<compile_context>
chip_gen: v7x
topology: tpu7x:2x2x1
jax: 0.10.0
libtpu: 0.0.40
codegen_flags: <defaults>
</compile_context>

<pallas_src>
import functools

import jax
import jax.numpy as jnp
import numpy as np
from jax.experimental import pallas as pl
from jax.experimental.pallas import tpu as pltpu  # noqa: F401  (TPU backend)


# ----------------------------------------------------------------------------
# Kernel 1: fused  out = relu(x @ w + b)   -- used by both convs via im2col.
# Grid-less call: whole operands resident in VMEM, single-buffered.
# ----------------------------------------------------------------------------
def _matmul_bias_relu_kernel(x_ref, w_ref, b_ref, o_ref):
    acc = jnp.dot(x_ref[...], w_ref[...], preferred_element_type=jnp.float32)
    o_ref[...] = jnp.maximum(acc + b_ref[...], 0.0).astype(o_ref.dtype)


def pallas_matmul_bias_relu(x, w, b_row):
    M, K = x.shape
    K2, N = w.shape
    assert K == K2, (K, K2)
    flops = 2 * M * K * N
    bytes_accessed = (x.size * x.dtype.itemsize + w.size * w.dtype.itemsize
                      + b_row.size * b_row.dtype.itemsize + M * N * 4)
    return pl.pallas_call(
        _matmul_bias_relu_kernel,
        out_shape=jax.ShapeDtypeStruct((M, N), jnp.float32),
        cost_estimate=pl.CostEstimate(flops=flops, transcendentals=0,
                                      bytes_accessed=bytes_accessed),
    )(x, w, b_row)


# ----------------------------------------------------------------------------
# Kernel 2: fused FC tail.
#   out = (relu(relu(x @ w1 + b1) @ w2 + b2)) @ w3 + b3
# w1/w2/w3 are bf16; accumulation is f32 on the MXU. w3/b3 are the merged
# (action || value) heads padded to 128 output lanes -> lane-dense store.
# ----------------------------------------------------------------------------
def _fc_tail_kernel(x_ref, w1_ref, b1_ref, w2_ref, b2_ref, w3_ref, b3_ref,
                    o_ref):
    h = jnp.dot(x_ref[...].astype(jnp.bfloat16), w1_ref[...],
                preferred_element_type=jnp.float32) + b1_ref[...]
    h = jnp.maximum(h, 0.0)
    h = jnp.dot(h.astype(jnp.bfloat16), w2_ref[...],
                preferred_element_type=jnp.float32) + b2_ref[...]
    h = jnp.maximum(h, 0.0)
    out = jnp.dot(h.astype(jnp.bfloat16), w3_ref[...],
                  preferred_element_type=jnp.float32) + b3_ref[...]
    o_ref[...] = out.astype(o_ref.dtype)


def pallas_fc_tail(x, w1, b1, w2, b2, w3, b3):
    B = x.shape[0]
    Nh = w3.shape[1]
    flops = 2 * B * (w1.shape[0] * w1.shape[1]
                     + w2.shape[0] * w2.shape[1]
                     + w3.shape[0] * w3.shape[1])
    bytes_accessed = (sum(a.size * a.dtype.itemsize
                          for a in (x, w1, b1, w2, b2, w3, b3)) + B * Nh * 4)
    return pl.pallas_call(
        _fc_tail_kernel,
        out_shape=jax.ShapeDtypeStruct((B, Nh), jnp.float32),
        cost_estimate=pl.CostEstimate(flops=flops, transcendentals=0,
                                      bytes_accessed=bytes_accessed),
    )(x, w1, b1, w2, b2, w3, b3)


# ----------------------------------------------------------------------------
# Conv2d(k=3, stride=2, pad=1) = im2col (JAX glue) + Pallas matmul kernel.
# Patch last-dim ordering is (kh, kw, cin), matching the weight repack below.
# ----------------------------------------------------------------------------
def _im2col(x_nhwc, ksize, stride, pad):
    N, H, W, C = x_nhwc.shape
    xp = jnp.pad(x_nhwc, ((0, 0), (pad, pad), (pad, pad), (0, 0)))
    Ho = (H + 2 * pad - ksize) // stride + 1
    Wo = (W + 2 * pad - ksize) // stride + 1
    cols = []
    for kh in range(ksize):
        for kw in range(ksize):
            cols.append(xp[:, kh:kh + stride * Ho:stride,
                           kw:kw + stride * Wo:stride, :])
    patches = jnp.stack(cols, axis=3)            # (N, Ho, Wo, k*k, C)
    return patches.reshape(N * Ho * Wo, ksize * ksize * C), Ho, Wo


def pallas_conv2d(x_nhwc, w_mat, b_row):
    N = x_nhwc.shape[0]
    cout = w_mat.shape[1]
    patches, Ho, Wo = _im2col(x_nhwc, 3, 2, 1)
    out = pallas_matmul_bias_relu(patches, w_mat, b_row)
    return out.reshape(N, Ho, Wo, cout)


# ----------------------------------------------------------------------------
# One-time parameter repack (done outside the hot path).
# ----------------------------------------------------------------------------
HEAD_PAD = 128  # lane-dense merged-head width


def prepare_params(params, *, conv2_hw=(15, 16)):
    def conv_mat(w_oihw):
        Cout, Cin, kh, kw = w_oihw.shape
        # (Cout, Cin, kh, kw) -> (kh, kw, Cin, Cout) -> (kh*kw*Cin, Cout)
        return jnp.transpose(w_oihw, (2, 3, 1, 0)).reshape(kh * kw * Cin, Cout)

    H2, W2 = conv2_hw
    C2 = params["conv2_w"].shape[0]
    D1, D2 = params["fc1_w"].shape
    assert D1 == C2 * H2 * W2

    # Fold torch's NCHW flatten order into fc1's rows so the kernel consumes
    # the NHWC-flattened conv2 output directly (no runtime transpose).
    fc1_w = params["fc1_w"].reshape(C2, H2, W2, D2)           # [c, h, w, o]
    fc1_w = jnp.transpose(fc1_w, (1, 2, 0, 3)).reshape(D1, D2)  # [h, w, c, o]

    # Merge action & value heads into one zero-padded lane-dense matmul.
    hid, n_act = params["act_w"].shape
    assert n_act + 1 <= HEAD_PAD
    head_w = jnp.zeros((hid, HEAD_PAD), jnp.float32)
    head_w = head_w.at[:, :n_act].set(params["act_w"])
    head_w = head_w.at[:, n_act:n_act + 1].set(params["val_w"])
    head_b = jnp.zeros((HEAD_PAD,), jnp.float32)
    head_b = head_b.at[:n_act].set(params["act_b"])
    head_b = head_b.at[n_act:n_act + 1].set(params["val_b"])

    return {
        "c1_w": conv_mat(params["conv1_w"]),
        "c1_b": params["conv1_b"].reshape(1, -1),
        "c2_w": conv_mat(params["conv2_w"]),
        "c2_b": params["conv2_b"].reshape(1, -1),
        "fc1_w": fc1_w.astype(jnp.bfloat16),
        "fc1_b": params["fc1_b"].reshape(1, -1),
        "fc2_w": params["fc2_w"].astype(jnp.bfloat16),
        "fc2_b": params["fc2_b"].reshape(1, -1),
        "head_w": head_w.astype(jnp.bfloat16),
        "head_b": head_b.reshape(1, -1),
    }


# ----------------------------------------------------------------------------
# Full PPOAgent forward: 3 pallas_calls total (conv1, conv2, fused FC tail).
# ----------------------------------------------------------------------------
def ppo_forward(prep, x_nchw, *, output_dim):
    B = x_nchw.shape[0]
    x = jnp.transpose(x_nchw, (0, 2, 3, 1))              # NCHW -> NHWC (input only)
    x = pallas_conv2d(x, prep["c1_w"], prep["c1_b"])
    x = pallas_conv2d(x, prep["c2_w"], prep["c2_b"])
    feat = x.reshape(B, -1)                              # NHWC flatten; fc1_w pre-permuted
    out = pallas_fc_tail(feat,
                         prep["fc1_w"], prep["fc1_b"],
                         prep["fc2_w"], prep["fc2_b"],
                         prep["head_w"], prep["head_b"])
    action_logits = out[:, :output_dim]
    value = out[:, output_dim:output_dim + 1]
    return action_logits, value


# ----------------------------------------------------------------------------
# Deterministic parameter init (PyTorch-style uniform(-1/sqrt(fan_in), ...)).
# Linear weights are stored transposed, i.e. (in_features, out_features).
# ----------------------------------------------------------------------------
def init_params(key, input_dim, output_dim):
    ks = jax.random.split(key, 12)

    def u(k, shape, fan_in):
        bound = 1.0 / np.sqrt(fan_in)
        return jax.random.uniform(k, shape, jnp.float32, -bound, bound)

    flat = 16 * 15 * 16  # 3840
    return {
        "conv1_w": u(ks[0], (16, input_dim, 3, 3), input_dim * 9),
        "conv1_b": u(ks[1], (16,), input_dim * 9),
        "conv2_w": u(ks[2], (16, 16, 3, 3), 16 * 9),
        "conv2_b": u(ks[3], (16,), 16 * 9),
        "fc1_w": u(ks[4], (flat, 512), flat),
        "fc1_b": u(ks[5], (512,), flat),
        "fc2_w": u(ks[6], (512, 128), 512),
        "fc2_b": u(ks[7], (128,), 512),
        "act_w": u(ks[8], (128, output_dim), 128),
        "act_b": u(ks[9], (output_dim,), 128),
        "val_w": u(ks[10], (128, 1), 128),
        "val_b": u(ks[11], (1,), 128),
    }


# Pure-JAX f32 reference (uses the ORIGINAL, un-repacked params).
def ref_forward(params, x_nchw):
    def conv(x, w, b):
        y = jax.lax.conv_general_dilated(
            x, w, window_strides=(2, 2), padding=((1, 1), (1, 1)),
            dimension_numbers=("NCHW", "OIHW", "NCHW"))
        return jax.nn.relu(y + b[None, :, None, None])

    x = conv(x_nchw, params["conv1_w"], params["conv1_b"])
    x = conv(x, params["conv2_w"], params["conv2_b"])
    x = x.reshape(x.shape[0], -1)
    x = jax.nn.relu(x @ params["fc1_w"] + params["fc1_b"])
    x = jax.nn.relu(x @ params["fc2_w"] + params["fc2_b"])
    return (x @ params["act_w"] + params["act_b"],
            x @ params["val_w"] + params["val_b"])


if __name__ == "__main__":
    INPUT_DIM = 4     # in-channels
    OUTPUT_DIM = 6    # number of actions
    B, H, W = 2, 60, 64   # 60x64 -> 30x32 -> 15x16, so 16*15*16 = 3840 = fc1 in

    key = jax.random.PRNGKey(0)
    pkey, xkey = jax.random.split(key)
    params = init_params(pkey, INPUT_DIM, OUTPUT_DIM)
    prep = prepare_params(params)     # one-time weight repack (bf16, permuted)
    x = jax.random.normal(xkey, (B, INPUT_DIM, H, W), jnp.float32)

    fwd = jax.jit(functools.partial(ppo_forward, output_dim=OUTPUT_DIM))
    logits, value = fwd(prep, x)
    jax.block_until_ready((logits, value))

    assert logits.shape == (B, OUTPUT_DIM) and value.shape == (B, 1)

    # Sanity check against a pure-JAX f32 reference (also validates the fc1
    # row permutation and the merged-head packing).
    ref_logits, ref_value = jax.jit(ref_forward)(params, x)
    np.testing.assert_allclose(np.asarray(logits), np.asarray(ref_logits),
                               rtol=2e-2, atol=2e-2)
    np.testing.assert_allclose(np.asarray(value), np.asarray(ref_value),
                               rtol=2e-2, atol=2e-2)

    print("KERNEL_OK")
</pallas_src>

<mosaic_0001>
module attributes {stable_mosaic.version = 11 : i64} {
  func.func @_matmul_bias_relu_kernel(%arg0: memref<1920x36xf32, #tpu.memory_space<vmem>>, %arg1: memref<36x16xf32, #tpu.memory_space<vmem>>, %arg2: memref<1x16xf32, #tpu.memory_space<vmem>>, %arg3: memref<1920x16xf32, #tpu.memory_space<vmem>>) attributes {dimension_semantics = [], scalar_prefetch = 0 : i64, scratch_operands = 0 : i64, tpu.core_type = #tpu.core_type<tc>} {
    %c0 = arith.constant 0 : index
    %c0_0 = arith.constant 0 : index
    %0 = vector.load %arg0[%c0, %c0_0] : memref<1920x36xf32, #tpu.memory_space<vmem>>, vector<1920x36xf32>
    %c0_1 = arith.constant 0 : index
    %c0_2 = arith.constant 0 : index
    %1 = vector.load %arg1[%c0_1, %c0_2] : memref<36x16xf32, #tpu.memory_space<vmem>>, vector<36x16xf32>
    %cst = arith.constant dense<0.000000e+00> : vector<1920x16xf32>
    %2 = tpu.matmul %0, %1, %cst {dimension_numbers = #tpu.dot_dimension_numbers<[1], [0], [0], [1], [0, 0, 1, 1], [], []>} : vector<1920x36xf32>, vector<36x16xf32>, vector<1920x16xf32> -> vector<1920x16xf32>
    %c0_3 = arith.constant 0 : index
    %c0_4 = arith.constant 0 : index
    %3 = vector.load %arg2[%c0_3, %c0_4] : memref<1x16xf32, #tpu.memory_space<vmem>>, vector<1x16xf32>
    %4 = vector.broadcast %3 : vector<1x16xf32> to vector<1920x16xf32>
    %5 = arith.addf %2, %4 : vector<1920x16xf32>
    %cst_5 = arith.constant 0.000000e+00 : f32
    %6 = vector.broadcast %cst_5 : f32 to vector<1920x16xf32>
    %7 = arith.maximumf %5, %6 : vector<1920x16xf32>
    %c0_6 = arith.constant 0 : index
    %c0_7 = arith.constant 0 : index
    %8 = vector.load %arg3[%c0_6, %c0_7] : memref<1920x16xf32, #tpu.memory_space<vmem>>, vector<1920x16xf32>
    tpu.vector_store %arg3[%c0_6, %c0_7], %7 {strides = array<i32>} : memref<1920x16xf32, #tpu.memory_space<vmem>>, vector<1920x16xf32>,
    return
  }
}

module attributes {stable_mosaic.version = 11 : i64} {
  func.func @_matmul_bias_relu_kernel(%arg0: memref<480x144xf32, #tpu.memory_space<vmem>>, %arg1: memref<144x16xf32, #tpu.memory_space<vmem>>, %arg2: memref<1x16xf32, #tpu.memory_space<vmem>>, %arg3: memref<480x16xf32, #tpu.memory_space<vmem>>) attributes {dimension_semantics = [], scalar_prefetch = 0 : i64, scratch_operands = 0 : i64, tpu.core_type = #tpu.core_type<tc>} {
    %c0 = arith.constant 0 : index
    %c0_0 = arith.constant 0 : index
    %0 = vector.load %arg0[%c0, %c0_0] : memref<480x144xf32, #tpu.memory_space<vmem>>, vector<480x144xf32>
    %c0_1 = arith.constant 0 : index
    %c0_2 = arith.constant 0 : index
    %1 = vector.load %arg1[%c0_1, %c0_2] : memref<144x16xf32, #tpu.memory_space<vmem>>, vector<144x16xf32>
    %cst = arith.constant dense<0.000000e+00> : vector<480x16xf32>
    %2 = tpu.matmul %0, %1, %cst {dimension_numbers = #tpu.dot_dimension_numbers<[1], [0], [0], [1], [0, 0, 1, 1], [], []>} : vector<480x144xf32>, vector<144x16xf32>, vector<480x16xf32> -> vector<480x16xf32>
    %c0_3 = arith.constant 0 : index
    %c0_4 = arith.constant 0 : index
    %3 = vector.load %arg2[%c0_3, %c0_4] : memref<1x16xf32, #tpu.memory_space<vmem>>, vector<1x16xf32>
    %4 = vector.broadcast %3 : vector<1x16xf32> to vector<480x16xf32>
    %5 = arith.addf %2, %4 : vector<480x16xf32>
    %cst_5 = arith.constant 0.000000e+00 : f32
    %6 = vector.broadcast %cst_5 : f32 to vector<480x16xf32>
    %7 = arith.maximumf %5, %6 : vector<480x16xf32>
    %c0_6 = arith.constant 0 : index
    %c0_7 = arith.constant 0 : index
    %8 = vector.load %arg3[%c0_6, %c0_7] : memref<480x16xf32, #tpu.memory_space<vmem>>, vector<480x16xf32>
    tpu.vector_store %arg3[%c0_6, %c0_7], %7 {strides = array<i32>} : memref<480x16xf32, #tpu.memory_space<vmem>>, vector<480x16xf32>,
    return
  }
}

module attributes {stable_mosaic.version = 11 : i64} {
  func.func @_fc_tail_kernel(%arg0: memref<2x3840xf32, #tpu.memory_space<vmem>>, %arg1: memref<3840x512xbf16, #tpu.memory_space<vmem>>, %arg2: memref<1x512xf32, #tpu.memory_space<vmem>>, %arg3: memref<512x128xbf16, #tpu.memory_space<vmem>>, %arg4: memref<1x128xf32, #tpu.memory_space<vmem>>, %arg5: memref<128x128xbf16, #tpu.memory_space<vmem>>, %arg6: memref<1x128xf32, #tpu.memory_space<vmem>>, %arg7: memref<2x128xf32, #tpu.memory_space<vmem>>) attributes {dimension_semantics = [], scalar_prefetch = 0 : i64, scratch_operands = 0 : i64, tpu.core_type = #tpu.core_type<tc>} {
    %c0 = arith.constant 0 : index
    %c0_0 = arith.constant 0 : index
    %0 = vector.load %arg0[%c0, %c0_0] : memref<2x3840xf32, #tpu.memory_space<vmem>>, vector<2x3840xf32>
    %1 = arith.truncf %0 : vector<2x3840xf32> to vector<2x3840xbf16>
    %c0_1 = arith.constant 0 : index
    %c0_2 = arith.constant 0 : index
    %2 = vector.load %arg1[%c0_1, %c0_2] : memref<3840x512xbf16, #tpu.memory_space<vmem>>, vector<3840x512xbf16>
    %cst = arith.constant dense<0.000000e+00> : vector<2x512xf32>
    %3 = tpu.matmul %1, %2, %cst {dimension_numbers = #tpu.dot_dimension_numbers<[1], [0], [0], [1], [0, 0, 1, 1], [], []>} : vector<2x3840xbf16>, vector<3840x512xbf16>, vector<2x512xf32> -> vector<2x512xf32>
    %c0_3 = arith.constant 0 : index
    %c0_4 = arith.constant 0 : index
    %4 = vector.load %arg2[%c0_3, %c0_4] : memref<1x512xf32, #tpu.memory_space<vmem>>, vector<1x512xf32>
    %5 = vector.broadcast %4 : vector<1x512xf32> to vector<2x512xf32>
    %6 = arith.addf %3, %5 : vector<2x512xf32>
    %cst_5 = arith.constant 0.000000e+00 : f32
    %7 = vector.broadcast %cst_5 : f32 to vector<2x512xf32>
    %8 = arith.maximumf %6, %7 : vector<2x512xf32>
    %9 = arith.truncf %8 : vector<2x512xf32> to vector<2x512xbf16>
    %c0_6 = arith.constant 0 : index
    %c0_7 = arith.constant 0 : index
    %10 = vector.load %arg3[%c0_6, %c0_7] : memref<512x128xbf16, #tpu.memory_space<vmem>>, vector<512x128xbf16>
    %cst_8 = arith.constant dense<0.000000e+00> : vector<2x128xf32>
    %11 = tpu.matmul %9, %10, %cst_8 {dimension_numbers = #tpu.dot_dimension_numbers<[1], [0], [0], [1], [0, 0, 1, 1], [], []>} : vector<2x512xbf16>, vector<512x128xbf16>, vector<2x128xf32> -> vector<2x128xf32>
    %c0_9 = arith.constant 0 : index
    %c0_10 = arith.constant 0 : index
    %12 = vector.load %arg4[%c0_9, %c0_10] : memref<1x128xf32, #tpu.memory_space<vmem>>, vector<1x128xf32>
    %13 = vector.broadcast %12 : vector<1x128xf32> to vector<2x128xf32>
    %14 = arith.addf %11, %13 : vector<2x128xf32>
    %cst_11 = arith.constant 0.000000e+00 : f32
    %15 = vector.broadcast %cst_11 : f32 to vector<2x128xf32>
    %16 = arith.maximumf %14, %15 : vector<2x128xf32>
    %17 = arith.truncf %16 : vector<2x128xf32> to vector<2x128xbf16>
    %c0_12 = arith.constant 0 : index
    %c0_13 = arith.constant 0 : index
    %18 = vector.load %arg5[%c0_12, %c0_13] : memref<128x128xbf16, #tpu.memory_space<vmem>>, vector<128x128xbf16>
    %cst_14 = arith.constant dense<0.000000e+00> : vector<2x128xf32>
    %19 = tpu.matmul %17, %18, %cst_14 {dimension_numbers = #tpu.dot_dimension_numbers<[1], [0], [0], [1], [0, 0, 1, 1], [], []>} : vector<2x128xbf16>, vector<128x128xbf16>, vector<2x128xf32> -> vector<2x128xf32>
    %c0_15 = arith.constant 0 : index
    %c0_16 = arith.constant 0 : index
    %20 = vector.load %arg6[%c0_15, %c0_16] : memref<1x128xf32, #tpu.memory_space<vmem>>, vector<1x128xf32>
    %21 = vector.broadcast %20 : vector<1x128xf32> to vector<2x128xf32>
    %22 = arith.addf %19, %21 : vector<2x128xf32>
    %c0_17 = arith.constant 0 : index
    %c0_18 = arith.constant 0 : index
    %23 = vector.load %arg7[%c0_17, %c0_18] : memref<2x128xf32, #tpu.memory_space<vmem>>, vector<2x128xf32>
    tpu.vector_store %arg7[%c0_17, %c0_18], %22 {strides = array<i32>} : memref<2x128xf32, #tpu.memory_space<vmem>>, vector<2x128xf32>,
    return
  }
}

</mosaic_0001>

<bundles_post_ra>
// kernel: ppo_forward.3
= control target key start
LH: loop header
LB: loop body
LE: loop exit
PB: predicated region body
PF: predicated region fallthrough
CT: control target
= control target key end

     0   :  { %vm266_vm0 = vcmask 293888   ;;  %vm987_vm1 = vcmask 1043456   ;;  %vm2496_vm2 = vcmask 130048   ;;  %s5818_s1 = inlined_call_operand.vmem [shape: f32[36,16], index: 1, kind: input, shape index: {}]   ;;  %s5819_s0 = inlined_call_operand.vmem [shape: f32[1920,36], index: 0, kind: input, shape index: {}]   ;;  %s5820_s2 = inlined_call_operand.vmem [shape: f32[1,16], index: 2, kind: input, shape index: {}]   ;;  %s5821_s3 = inlined_call_operand.vmem [shape: f32[1920,16], index: 3, kind: output, shape index: {}]  }
   0x1   :  { %v254_v0 = vld [vmem:[%s5818_s1] sm:$0xff]  ;;  %v255_v1 = vld [vmem:[%s5818_s1 + $0x8] sm:$0xff]  ;;  %v256_v2 = vld [vmem:[%s5818_s1 + $0x10] sm:$0xff] }
   0x2   :  { %v3598_v3 = vpack.c.bf16 %v255_v1, %v254_v0  ;;  %v257_v4 = vld [vmem:[%s5818_s1 + $0x18] sm:$0xff]  ;;  %v14_v5 = vld [vmem:[%s5819_s0] sm:$0xff]  ;;  %v15_v9 = vld [vmem:[%s5819_s0 + $0x8] sm:$0xff] }
   0x3   :  { %v3602_v6 = vpack.c.bf16 %v257_v4, %v256_v2  ;;  %3238 = vmatprep.mubr.msk.f32.mxu0 %vm266_vm0, %v14_v5  ;;  %v134_v7 = vld [vmem:[%s5819_s0 + $0x3c0] sm:$0xff]  ;;  %v135_v10 = vld [vmem:[%s5819_s0 + $0x3c8] sm:$0xff]  ;;  %v16_v11 = vld [vmem:[%s5819_s0 + $0x10] sm:$0xff] }
   0x4   :  { %3599 = vmatprep.subr.bf16.mxu0 %v3598_v3  ;;  %3606 = vmatprep.subr.bf16.mxu1 %v3598_v3  ;;  %v258_v8 = vld [vmem:[%s5818_s1 + $0x20] sm:$0xf]  ;;  %v136_v12 = vld [vmem:[%s5819_s0 + $0x3d0] sm:$0xff]  ;;  %v17_v13 = vld [vmem:[%s5819_s0 + $0x18] sm:$0xff] }
   0x5   :  { %3601 = vmatpush3.bf16.msra.mxu0 %v3598_v3  ;;  %3609 = vmatpush3.bf16.msra.mxu1 %v3598_v3  ;;  %v137_v14 = vld [vmem:[%s5819_s0 + $0x3d8] sm:$0xff]  ;;  %v18_v15 = vld [vmem:[%s5819_s0 + $0x20] sm:$0xff]  ;;  %v19_v17 = vld [vmem:[%s5819_s0 + $0x28] sm:$0xff] }
   0x6   :  { %3603 = vmatprep.subr.bf16.mxu0 %v3602_v6  ;;  %3607 = vmatprep.subr.bf16.mxu1 %v3602_v6  ;;  %v138_v16 = vld [vmem:[%s5819_s0 + $0x3e0] sm:$0xff]  ;;  %v139_v18 = vld [vmem:[%s5819_s0 + $0x3e8] sm:$0xff]  ;;  %v20_v19 = vld [vmem:[%s5819_s0 + $0x30] sm:$0xff] }
   0x7   :  { %3418 = vmatprep.mubr.msk.f32.mxu1 %vm266_vm0, %v134_v7  ;;  %v140_v20 = vld [vmem:[%s5819_s0 + $0x3f0] sm:$0xff]  ;;  %v21_v21 = vld [vmem:[%s5819_s0 + $0x38] sm:$0xff]  ;;  %v22_v23 = vld [vmem:[%s5819_s0 + $0x40] sm:$0xff] }
   0x8   :  { %v141_v22 = vld [vmem:[%s5819_s0 + $0x3f8] sm:$0xff]  ;;  %v142_v24 = vld [vmem:[%s5819_s0 + $0x400] sm:$0xff]  ;;  %v23_v25 = vld [vmem:[%s5819_s0 + $0x48] sm:$0xff] }
   0x9   :  { %3605 = vmatpush3.bf16.msra.mxu0 %v3602_v6  ;;  %3610 = vmatpush3.bf16.msra.mxu1 %v3602_v6  ;;  %v143_v26 = vld [vmem:[%s5819_s0 + $0x408] sm:$0xff]  ;;  %v24_v27 = vld [vmem:[%s5819_s0 + $0x50] sm:$0xff]  ;;  %v25_v29 = vld [vmem:[%s5819_s0 + $0x58] sm:$0xff] }
   0xa   :  { %3236 = vmatprep.subr.msk.mxu0 %vm987_vm1, %v258_v8  ;;  %3608 = vmatprep.subr.msk.mxu1 %vm987_vm1, %v258_v8  ;;  %v144_v28 = vld [vmem:[%s5819_s0 + $0x410] sm:$0xff]  ;;  %v145_v30 = vld [vmem:[%s5819_s0 + $0x418] sm:$0xff]  ;;  %v26_v31 = vld [vmem:[%s5819_s0 + $0x60] sm:$0xff] }
   0xb   :  { %v146_v32 = vld [vmem:[%s5819_s0 + $0x420] sm:$0xff]  ;;  %v27_v33 = vld [vmem:[%s5819_s0 + $0x68] sm:$0xff]  ;;  %v28_v35 = vld [vmem:[%s5819_s0 + $0x70] sm:$0xff] }
   0xc   :  { %v147_v34 = vld [vmem:[%s5819_s0 + $0x428] sm:$0xff]  ;;  %v148_v36 = vld [vmem:[%s5819_s0 + $0x430] sm:$0xff]  ;;  %v29_v37 = vld [vmem:[%s5819_s0 + $0x78] sm:$0xff] }
   0xd   :  { %3237 = vmatpush3.msk.msra.mxu0 %vm987_vm1, %v258_v8  ;;  %3611 = vmatpush3.msk.msra.mxu1 %vm987_vm1, %v258_v8  ;;  %v149_v38 = vld [vmem:[%s5819_s0 + $0x438] sm:$0xff]  ;;  %v30_v39 = vld [vmem:[%s5819_s0 + $0x80] sm:$0xff]  ;;  %v31_v41 = vld [vmem:[%s5819_s0 + $0x88] sm:$0xff] }
   0xe   :  { %3239 = vmatmul.mubr.msk.f32.vlgmr.msra.gmra.mrb[0].mxu0 %vm266_vm0, %v15_v9  ;;  %3419 = vmatmul.mubr.msk.f32.vlgmr.msra.gmra.mrb[0].mxu1 %vm266_vm0, %v135_v10  ;;  %v150_v40 = vld [vmem:[%s5819_s0 + $0x440] sm:$0xff]  ;;  %v151_v42 = vld [vmem:[%s5819_s0 + $0x448] sm:$0xff]  ;;  %v32_v43 = vld [vmem:[%s5819_s0 + $0x90] sm:$0xff] }
   0xf   :  { %3241 = vmatprep.mubr.msk.f32.mxu0 %vm266_vm0, %v16_v11  ;;  %3421 = vmatprep.mubr.msk.f32.mxu1 %vm266_vm0, %v136_v12  ;;  %v152_v44 = vld [vmem:[%s5819_s0 + $0x450] sm:$0xff]  ;;  %v33_v45 = vld [vmem:[%s5819_s0 + $0x98] sm:$0xff]  ;;  %v34_v47 = vld [vmem:[%s5819_s0 + $0xa0] sm:$0xff] }
  0x10   :  { %v153_v46 = vld [vmem:[%s5819_s0 + $0x458] sm:$0xff]  ;;  %v154_v48 = vld [vmem:[%s5819_s0 + $0x460] sm:$0xff]  ;;  %v35_v49 = vld [vmem:[%s5819_s0 + $0xa8] sm:$0xff] }
  0x11   :  { %v155_v50 = vld [vmem:[%s5819_s0 + $0x468] sm:$0xff]  ;;  %v36_v51 = vld [vmem:[%s5819_s0 + $0xb0] sm:$0xff]  ;;  %v37_v53 = vld [vmem:[%s5819_s0 + $0xb8] sm:$0xff] }
  0x12   :  { %3242 = vmatmul.mubr.msk.f32.gmra.mrb[2].mxu0 %vm266_vm0, %v17_v13  ;;  %3422 = vmatmul.mubr.msk.f32.gmra.mrb[2].mxu1 %vm266_vm0, %v137_v14  ;;  %v156_v52 = vld [vmem:[%s5819_s0 + $0x470] sm:$0xff]  ;;  %v157_v54 = vld [vmem:[%s5819_s0 + $0x478] sm:$0xff]  ;;  %v38_v55 = vld [vmem:[%s5819_s0 + $0xc0] sm:$0xff] }
  0x13   :  { %3244 = vmatprep.mubr.msk.f32.mxu0 %vm266_vm0, %v18_v15  ;;  %3424 = vmatprep.mubr.msk.f32.mxu1 %vm266_vm0, %v138_v16  ;;  %v158_v56 = vld [vmem:[%s5819_s0 + $0x480] sm:$0xff]  ;;  %v39_v57 = vld [vmem:[%s5819_s0 + $0xc8] sm:$0xff]  ;;  %v40_v59 = vld [vmem:[%s5819_s0 + $0xd0] sm:$0xff] }
  0x14   :  { %v159_v58 = vld [vmem:[%s5819_s0 + $0x488] sm:$0xff]  ;;  %v160_v60 = vld [vmem:[%s5819_s0 + $0x490] sm:$0xff]  ;;  %v41_v61 = vld [vmem:[%s5819_s0 + $0xd8] sm:$0xff] }
  0x15   :  { %v161_v62 = vld [vmem:[%s5819_s0 + $0x498] sm:$0xff]  ;;  %v42_v63 = vld [vmem:[%s5819_s0 + $0xe0] sm:$0xff]  ;;  %v43_v1 = vld [vmem:[%s5819_s0 + $0xe8] sm:$0xff] }
  0x16   :  { %3245 = vmatmul.mubr.msk.f32.gmra.mrb[4].mxu0 %vm266_vm0, %v19_v17  ;;  %3425 = vmatmul.mubr.msk.f32.gmra.mrb[4].mxu1 %vm266_vm0, %v139_v18  ;;  %v162_v0 = vld [vmem:[%s5819_s0 + $0x4a0] sm:$0xff]  ;;  %v163_v2 = vld [vmem:[%s5819_s0 + $0x4a8] sm:$0xff]  ;;  %v44_v3 = vld [vmem:[%s5819_s0 + $0xf0] sm:$0xff] }
  0x17   :  { %3247 = vmatprep.mubr.msk.f32.mxu0 %vm266_vm0, %v20_v19  ;;  %3427 = vmatprep.mubr.msk.f32.mxu1 %vm266_vm0, %v140_v20  ;;  %v164_v4 = vld [vmem:[%s5819_s0 + $0x4b0] sm:$0xff]  ;;  %v45_v5 = vld [vmem:[%s5819_s0 + $0xf8] sm:$0xff]  ;;  %v46_v7 = vld [vmem:[%s5819_s0 + $0x100] sm:$0xff] }
  0x18   :  { %v165_v6 = vld [vmem:[%s5819_s0 + $0x4b8] sm:$0xff]  ;;  %v166_v8 = vld [vmem:[%s5819_s0 + $0x4c0] sm:$0xff]  ;;  %v47_v9 = vld [vmem:[%s5819_s0 + $0x108] sm:$0xff] }
  0x19   :  { %v167_v10 = vld [vmem:[%s5819_s0 + $0x4c8] sm:$0xff]  ;;  %v48_v11 = vld [vmem:[%s5819_s0 + $0x110] sm:$0xff]  ;;  %v49_v13 = vld [vmem:[%s5819_s0 + $0x118] sm:$0xff] }
  0x1a   :  { %3248 = vmatmul.mubr.msk.f32.gmra.mrb[6].mxu0 %vm266_vm0, %v21_v21  ;;  %3428 = vmatmul.mubr.msk.f32.gmra.mrb[6].mxu1 %vm266_vm0, %v141_v22  ;;  %v168_v12 = vld [vmem:[%s5819_s0 + $0x4d0] sm:$0xff]  ;;  %v169_v14 = vld [vmem:[%s5819_s0 + $0x4d8] sm:$0xff]  ;;  %v50_v15 = vld [vmem:[%s5819_s0 + $0x120] sm:$0xff] }
  0x1b   :  { %3250 = vmatprep.mubr.msk.f32.mxu0 %vm266_vm0, %v22_v23  ;;  %3430 = vmatprep.mubr.msk.f32.mxu1 %vm266_vm0, %v142_v24  ;;  %v170_v16 = vld [vmem:[%s5819_s0 + $0x4e0] sm:$0xff]  ;;  %v51_v17 = vld [vmem:[%s5819_s0 + $0x128] sm:$0xff]  ;;  %v52_v19 = vld [vmem:[%s5819_s0 + $0x130] sm:$0xff] }
  0x1c   :  { %v171_v18 = vld [vmem:[%s5819_s0 + $0x4e8] sm:$0xff]  ;;  %v172_v20 = vld [vmem:[%s5819_s0 + $0x4f0] sm:$0xff]  ;;  %v53_v21 = vld [vmem:[%s5819_s0 + $0x138] sm:$0xff] }
  0x1d   :  { %v173_v22 = vld [vmem:[%s5819_s0 + $0x4f8] sm:$0xff]  ;;  %v54_v23 = vld [vmem:[%s5819_s0 + $0x140] sm:$0xff] }
  0x1e   :  { %3251 = vmatmul.mubr.msk.f32.gmra.mrb[8].mxu0 %vm266_vm0, %v23_v25  ;;  %3431 = vmatmul.mubr.msk.f32.gmra.mrb[8].mxu1 %vm266_vm0, %v143_v26  ;;  %v174_v24 = vld [vmem:[%s5819_s0 + $0x500] sm:$0xff]  ;;  %v55_v25 = vld [vmem:[%s5819_s0 + $0x148] sm:$0xff] }
  0x1f   :  { %3253 = vmatprep.mubr.msk.f32.mxu0 %vm266_vm0, %v24_v27  ;;  %3433 = vmatprep.mubr.msk.f32.mxu1 %vm266_vm0, %v144_v28  ;;  %v175_v26 = vld [vmem:[%s5819_s0 + $0x508] sm:$0xff]  ;;  %v56_v27 = vld [vmem:[%s5819_s0 + $0x150] sm:$0xff] }
  0x20   :  { %v176_v28 = vld [vmem:[%s5819_s0 + $0x510] sm:$0xff] }
  0x22   :  { %3254 = vmatmul.mubr.msk.f32.gmra.mrb[10].mxu0 %vm266_vm0, %v25_v29  ;;  %3434 = vmatmul.mubr.msk.f32.gmra.mrb[10].mxu1 %vm266_vm0, %v145_v30  ;;  %v57_v29 = vld [vmem:[%s5819_s0 + $0x158] sm:$0xff] }
  0x23   :  { %3256 = vmatprep.mubr.msk.f32.mxu0 %vm266_vm0, %v26_v31  ;;  %3436 = vmatprep.mubr.msk.f32.mxu1 %vm266_vm0, %v146_v32  ;;  %v177_v30 = vld [vmem:[%s5819_s0 + $0x518] sm:$0xff]  ;;  %v58_v31 = vld [vmem:[%s5819_s0 + $0x160] sm:$0xff] }
  0x24   :  { %v178_v32 = vld [vmem:[%s5819_s0 + $0x520] sm:$0xff] }
  0x26   :  { %3257 = vmatmul.mubr.msk.f32.gmra.mrb[12].mxu0 %vm266_vm0, %v27_v33  ;;  %3437 = vmatmul.mubr.msk.f32.gmra.mrb[12].mxu1 %vm266_vm0, %v147_v34  ;;  %v59_v33 = vld [vmem:[%s5819_s0 + $0x168] sm:$0xff] }
  0x27   :  { %3259 = vmatprep.mubr.msk.f32.mxu0 %vm266_vm0, %v28_v35  ;;  %3439 = vmatprep.mubr.msk.f32.mxu1 %vm266_vm0, %v148_v36  ;;  %v179_v34 = vld [vmem:[%s5819_s0 + $0x528] sm:$0xff]  ;;  %v60_v35 = vld [vmem:[%s5819_s0 + $0x170] sm:$0xff] }
  0x28   :  { %v180_v36 = vld [vmem:[%s5819_s0 + $0x530] sm:$0xff] }
  0x2a   :  { %3260 = vmatmul.mubr.msk.f32.gmra.mrb[14].mxu0 %vm266_vm0, %v29_v37  ;;  %3440 = vmatmul.mubr.msk.f32.gmra.mrb[14].mxu1 %vm266_vm0, %v149_v38  ;;  %v61_v37 = vld [vmem:[%s5819_s0 + $0x178] sm:$0xff] }
  0x2b   :  { %3262 = vmatprep.mubr.msk.f32.mxu0 %vm266_vm0, %v30_v39  ;;  %3442 = vmatprep.mubr.msk.f32.mxu1 %vm266_vm0, %v150_v40  ;;  %v181_v38 = vld [vmem:[%s5819_s0 + $0x538] sm:$0xff]  ;;  %v62_v39 = vld [vmem:[%s5819_s0 + $0x180] sm:$0xff] }
  0x2c   :  { %v182_v40 = vld [vmem:[%s5819_s0 + $0x540] sm:$0xff] }
  0x2e   :  { %3263 = vmatmul.mubr.msk.f32.gmra.mrb[16].mxu0 %vm266_vm0, %v31_v41  ;;  %3443 = vmatmul.mubr.msk.f32.gmra.mrb[16].mxu1 %vm266_vm0, %v151_v42  ;;  %v63_v41 = vld [vmem:[%s5819_s0 + $0x188] sm:$0xff] }
  0x2f   :  { %3265 = vmatprep.mubr.msk.f32.mxu0 %vm266_vm0, %v32_v43  ;;  %3445 = vmatprep.mubr.msk.f32.mxu1 %vm266_vm0, %v152_v44  ;;  %v183_v42 = vld [vmem:[%s5819_s0 + $0x548] sm:$0xff]  ;;  %v64_v43 = vld [vmem:[%s5819_s0 + $0x190] sm:$0xff] }
  0x30   :  { %v184_v44 = vld [vmem:[%s5819_s0 + $0x550] sm:$0xff] }
  0x32   :  { %3266 = vmatmul.mubr.msk.f32.gmra.mrb[18].mxu0 %vm266_vm0, %v33_v45  ;;  %3446 = vmatmul.mubr.msk.f32.gmra.mrb[18].mxu1 %vm266_vm0, %v153_v46  ;;  %v65_v45 = vld [vmem:[%s5819_s0 + $0x198] sm:$0xff] }
  0x33   :  { %3268 = vmatprep.mubr.msk.f32.mxu0 %vm266_vm0, %v34_v47  ;;  %3448 = vmatprep.mubr.msk.f32.mxu1 %vm266_vm0, %v154_v48  ;;  %v185_v46 = vld [vmem:[%s5819_s0 + $0x558] sm:$0xff]  ;;  %v66_v47 = vld [vmem:[%s5819_s0 + $0x1a0] sm:$0xff] }
  0x34   :  { %v186_v48 = vld [vmem:[%s5819_s0 + $0x560] sm:$0xff] }
  0x36   :  { %3269 = vmatmul.mubr.msk.f32.gmra.mrb[20].mxu0 %vm266_vm0, %v35_v49  ;;  %3449 = vmatmul.mubr.msk.f32.gmra.mrb[20].mxu1 %vm266_vm0, %v155_v50  ;;  %v67_v49 = vld [vmem:[%s5819_s0 + $0x1a8] sm:$0xff] }
  0x37   :  { %3271 = vmatprep.mubr.msk.f32.mxu0 %vm266_vm0, %v36_v51  ;;  %3451 = vmatprep.mubr.msk.f32.mxu1 %vm266_vm0, %v156_v52  ;;  %v187_v50 = vld [vmem:[%s5819_s0 + $0x568] sm:$0xff]  ;;  %v68_v51 = vld [vmem:[%s5819_s0 + $0x1b0] sm:$0xff] }
  0x38   :  { %v188_v52 = vld [vmem:[%s5819_s0 + $0x570] sm:$0xff] }
  0x3a   :  { %3272 = vmatmul.mubr.msk.f32.gmra.mrb[22].mxu0 %vm266_vm0, %v37_v53  ;;  %3452 = vmatmul.mubr.msk.f32.gmra.mrb[22].mxu1 %vm266_vm0, %v157_v54  ;;  %v69_v53 = vld [vmem:[%s5819_s0 + $0x1b8] sm:$0xff] }
  0x3b   :  { %3274 = vmatprep.mubr.msk.f32.mxu0 %vm266_vm0, %v38_v55  ;;  %3454 = vmatprep.mubr.msk.f32.mxu1 %vm266_vm0, %v158_v56  ;;  %v189_v54 = vld [vmem:[%s5819_s0 + $0x578] sm:$0xff]  ;;  %v70_v55 = vld [vmem:[%s5819_s0 + $0x1c0] sm:$0xff] }
  0x3c   :  { %v190_v56 = vld [vmem:[%s5819_s0 + $0x580] sm:$0xff] }
  0x3e   :  { %3275 = vmatmul.mubr.msk.f32.gmra.mrb[24].mxu0 %vm266_vm0, %v39_v57  ;;  %3455 = vmatmul.mubr.msk.f32.gmra.mrb[24].mxu1 %vm266_vm0, %v159_v58  ;;  %v71_v57 = vld [vmem:[%s5819_s0 + $0x1c8] sm:$0xff] }
  0x3f   :  { %3277 = vmatprep.mubr.msk.f32.mxu0 %vm266_vm0, %v40_v59  ;;  %3457 = vmatprep.mubr.msk.f32.mxu1 %vm266_vm0, %v160_v60  ;;  %v191_v58 = vld [vmem:[%s5819_s0 + $0x588] sm:$0xff]  ;;  %v72_v59 = vld [vmem:[%s5819_s0 + $0x1d0] sm:$0xff] }
  0x40   :  { %v192_v60 = vld [vmem:[%s5819_s0 + $0x590] sm:$0xff] }
  0x42   :  { %3278 = vmatmul.mubr.msk.f32.gmra.mrb[26].mxu0 %vm266_vm0, %v41_v61  ;;  %3458 = vmatmul.mubr.msk.f32.gmra.mrb[26].mxu1 %vm266_vm0, %v161_v62  ;;  %v73_v61 = vld [vmem:[%s5819_s0 + $0x1d8] sm:$0xff] }
  0x43   :  { %3280 = vmatprep.mubr.msk.f32.mxu0 %vm266_vm0, %v42_v63  ;;  %3460 = vmatprep.mubr.msk.f32.mxu1 %vm266_vm0, %v162_v0  ;;  %v193_v62 = vld [vmem:[%s5819_s0 + $0x598] sm:$0xff]  ;;  %v74_v63 = vld [vmem:[%s5819_s0 + $0x1e0] sm:$0xff] }
  0x44   :  { %v194_v0 = vld [vmem:[%s5819_s0 + $0x5a0] sm:$0xff] }
  0x46   :  { %3281 = vmatmul.mubr.msk.f32.gmra.mrb[28].mxu0 %vm266_vm0, %v43_v1  ;;  %3461 = vmatmul.mubr.msk.f32.gmra.mrb[28].mxu1 %vm266_vm0, %v163_v2  ;;  %v75_v1 = vld [vmem:[%s5819_s0 + $0x1e8] sm:$0xff] }
  0x47   :  { %3283 = vmatprep.mubr.msk.f32.mxu0 %vm266_vm0, %v44_v3  ;;  %3463 = vmatprep.mubr.msk.f32.mxu1 %vm266_vm0, %v164_v4  ;;  %v195_v2 = vld [vmem:[%s5819_s0 + $0x5a8] sm:$0xff]  ;;  %v76_v3 = vld [vmem:[%s5819_s0 + $0x1f0] sm:$0xff] }
  0x48   :  { %v196_v4 = vld [vmem:[%s5819_s0 + $0x5b0] sm:$0xff] }
  0x4a   :  { %3284 = vmatmul.mubr.msk.f32.gmra.mrb[30].mxu0 %vm266_vm0, %v45_v5  ;;  %3464 = vmatmul.mubr.msk.f32.gmra.mrb[30].mxu1 %vm266_vm0, %v165_v6  ;;  %v77_v5 = vld [vmem:[%s5819_s0 + $0x1f8] sm:$0xff] }
  0x4b   :  { %3286 = vmatprep.mubr.msk.f32.mxu0 %vm266_vm0, %v46_v7  ;;  %3466 = vmatprep.mubr.msk.f32.mxu1 %vm266_vm0, %v166_v8  ;;  %v197_v6 = vld [vmem:[%s5819_s0 + $0x5b8] sm:$0xff]  ;;  %v78_v7 = vld [vmem:[%s5819_s0 + $0x200] sm:$0xff] }
  0x4c   :  { %v198_v8 = vld [vmem:[%s5819_s0 + $0x5c0] sm:$0xff] }
  0x4e   :  { %3287 = vmatmul.mubr.msk.f32.gmra.mrb[32].mxu0 %vm266_vm0, %v47_v9  ;;  %3467 = vmatmul.mubr.msk.f32.gmra.mrb[32].mxu1 %vm266_vm0, %v167_v10  ;;  %v79_v9 = vld [vmem:[%s5819_s0 + $0x208] sm:$0xff] }
  0x4f   :  { %3289 = vmatprep.mubr.msk.f32.mxu0 %vm266_vm0, %v48_v11  ;;  %3469 = vmatprep.mubr.msk.f32.mxu1 %vm266_vm0, %v168_v12  ;;  %v199_v10 = vld [vmem:[%s5819_s0 + $0x5c8] sm:$0xff]  ;;  %v80_v11 = vld [vmem:[%s5819_s0 + $0x210] sm:$0xff] }
  0x50   :  { %v200_v12 = vld [vmem:[%s5819_s0 + $0x5d0] sm:$0xff] }
  0x52   :  { %3290 = vmatmul.mubr.msk.f32.gmra.mrb[34].mxu0 %vm266_vm0, %v49_v13  ;;  %3470 = vmatmul.mubr.msk.f32.gmra.mrb[34].mxu1 %vm266_vm0, %v169_v14  ;;  %v81_v13 = vld [vmem:[%s5819_s0 + $0x218] sm:$0xff] }
  0x53   :  { %3292 = vmatprep.mubr.msk.f32.mxu0 %vm266_vm0, %v50_v15  ;;  %3472 = vmatprep.mubr.msk.f32.mxu1 %vm266_vm0, %v170_v16  ;;  %v201_v14 = vld [vmem:[%s5819_s0 + $0x5d8] sm:$0xff]  ;;  %v82_v15 = vld [vmem:[%s5819_s0 + $0x220] sm:$0xff] }
  0x54   :  { %v202_v16 = vld [vmem:[%s5819_s0 + $0x5e0] sm:$0xff] }
  0x56   :  { %3293 = vmatmul.mubr.msk.f32.gmra.mrb[36].mxu0 %vm266_vm0, %v51_v17  ;;  %3473 = vmatmul.mubr.msk.f32.gmra.mrb[36].mxu1 %vm266_vm0, %v171_v18  ;;  %v83_v17 = vld [vmem:[%s5819_s0 + $0x228] sm:$0xff] }
  0x57   :  { %3295 = vmatprep.mubr.msk.f32.mxu0 %vm266_vm0, %v52_v19  ;;  %3475 = vmatprep.mubr.msk.f32.mxu1 %vm266_vm0, %v172_v20  ;;  %v203_v18 = vld [vmem:[%s5819_s0 + $0x5e8] sm:$0xff]  ;;  %v84_v19 = vld [vmem:[%s5819_s0 + $0x230] sm:$0xff] }
  0x58   :  { %v204_v20 = vld [vmem:[%s5819_s0 + $0x5f0] sm:$0xff] }
  0x5a   :  { %3296 = vmatmul.mubr.msk.f32.gmra.mrb[38].mxu0 %vm266_vm0, %v53_v21  ;;  %3476 = vmatmul.mubr.msk.f32.gmra.mrb[38].mxu1 %vm266_vm0, %v173_v22  ;;  %v85_v21 = vld [vmem:[%s5819_s0 + $0x238] sm:$0xff] }
  0x5b   :  { %3298 = vmatprep.mubr.msk.f32.mxu0 %vm266_vm0, %v54_v23  ;;  %3478 = vmatprep.mubr.msk.f32.mxu1 %vm266_vm0, %v174_v24  ;;  %v205_v22 = vld [vmem:[%s5819_s0 + $0x5f8] sm:$0xff]  ;;  %v86_v23 = vld [vmem:[%s5819_s0 + $0x240] sm:$0xff] }
  0x5c   :  { %v206_v24 = vld [vmem:[%s5819_s0 + $0x600] sm:$0xff] }
  0x5e   :  { %3299 = vmatmul.mubr.msk.f32.gmra.mrb[40].mxu0 %vm266_vm0, %v55_v25  ;;  %3479 = vmatmul.mubr.msk.f32.gmra.mrb[40].mxu1 %vm266_vm0, %v175_v26  ;;  %v87_v25 = vld [vmem:[%s5819_s0 + $0x248] sm:$0xff] }
  0x5f   :  { %3301 = vmatprep.mubr.msk.f32.mxu0 %vm266_vm0, %v56_v27  ;;  %3481 = vmatprep.mubr.msk.f32.mxu1 %vm266_vm0, %v176_v28  ;;  %v207_v26 = vld [vmem:[%s5819_s0 + $0x608] sm:$0xff]  ;;  %v88_v27 = vld [vmem:[%s5819_s0 + $0x250] sm:$0xff] }
  0x60   :  { %v208_v28 = vld [vmem:[%s5819_s0 + $0x610] sm:$0xff] }
  0x62   :  { %3302 = vmatmul.mubr.msk.f32.gmra.mrb[42].mxu0 %vm266_vm0, %v57_v29  ;;  %3482 = vmatmul.mubr.msk.f32.gmra.mrb[42].mxu1 %vm266_vm0, %v177_v30  ;;  %v89_v29 = vld [vmem:[%s5819_s0 + $0x258] sm:$0xff] }
  0x63   :  { %3304 = vmatprep.mubr.msk.f32.mxu0 %vm266_vm0, %v58_v31  ;;  %3484 = vmatprep.mubr.msk.f32.mxu1 %vm266_vm0, %v178_v32  ;;  %v209_v30 = vld [vmem:[%s5819_s0 + $0x618] sm:$0xff]  ;;  %v90_v31 = vld [vmem:[%s5819_s0 + $0x260] sm:$0xff] }
  0x64   :  { %v210_v32 = vld [vmem:[%s5819_s0 + $0x620] sm:$0xff] }
  0x66   :  { %3305 = vmatmul.mubr.msk.f32.gmra.mrb[44].mxu0 %vm266_vm0, %v59_v33  ;;  %3485 = vmatmul.mubr.msk.f32.gmra.mrb[44].mxu1 %vm266_vm0, %v179_v34  ;;  %v91_v33 = vld [vmem:[%s5819_s0 + $0x268] sm:$0xff] }
  0x67   :  { %3307 = vmatprep.mubr.msk.f32.mxu0 %vm266_vm0, %v60_v35  ;;  %3487 = vmatprep.mubr.msk.f32.mxu1 %vm266_vm0, %v180_v36  ;;  %v211_v34 = vld [vmem:[%s5819_s0 + $0x628] sm:$0xff]  ;;  %v92_v35 = vld [vmem:[%s5819_s0 + $0x270] sm:$0xff] }
  0x68   :  { %v212_v36 = vld [vmem:[%s5819_s0 + $0x630] sm:$0xff] }
  0x6a   :  { %3308 = vmatmul.mubr.msk.f32.gmra.mrb[46].mxu0 %vm266_vm0, %v61_v37  ;;  %3488 = vmatmul.mubr.msk.f32.gmra.mrb[46].mxu1 %vm266_vm0, %v181_v38  ;;  %v93_v37 = vld [vmem:[%s5819_s0 + $0x278] sm:$0xff] }
  0x6b   :  { %3310 = vmatprep.mubr.msk.f32.mxu0 %vm266_vm0, %v62_v39  ;;  %3490 = vmatprep.mubr.msk.f32.mxu1 %vm266_vm0, %v182_v40  ;;  %v213_v38 = vld [vmem:[%s5819_s0 + $0x638] sm:$0xff]  ;;  %v94_v39 = vld [vmem:[%s5819_s0 + $0x280] sm:$0xff] }
  0x6c   :  { %v214_v40 = vld [vmem:[%s5819_s0 + $0x640] sm:$0xff] }
  0x6e   :  { %3311 = vmatmul.mubr.msk.f32.gmra.mrb[48].mxu0 %vm266_vm0, %v63_v41  ;;  %3491 = vmatmul.mubr.msk.f32.gmra.mrb[48].mxu1 %vm266_vm0, %v183_v42  ;;  %v95_v41 = vld [vmem:[%s5819_s0 + $0x288] sm:$0xff] }
  0x6f   :  { %3313 = vmatprep.mubr.msk.f32.mxu0 %vm266_vm0, %v64_v43  ;;  %3493 = vmatprep.mubr.msk.f32.mxu1 %vm266_vm0, %v184_v44  ;;  %v215_v42 = vld [vmem:[%s5819_s0 + $0x648] sm:$0xff]  ;;  %v96_v43 = vld [vmem:[%s5819_s0 + $0x290] sm:$0xff] }
  0x70   :  { %v216_v44 = vld [vmem:[%s5819_s0 + $0x650] sm:$0xff] }
  0x72   :  { %3314 = vmatmul.mubr.msk.f32.gmra.mrb[50].mxu0 %vm266_vm0, %v65_v45  ;;  %3494 = vmatmul.mubr.msk.f32.gmra.mrb[50].mxu1 %vm266_vm0, %v185_v46  ;;  %v97_v45 = vld [vmem:[%s5819_s0 + $0x298] sm:$0xff] }
  0x73   :  { %3316 = vmatprep.mubr.msk.f32.mxu0 %vm266_vm0, %v66_v47  ;;  %3496 = vmatprep.mubr.msk.f32.mxu1 %vm266_vm0, %v186_v48  ;;  %v217_v46 = vld [vmem:[%s5819_s0 + $0x658] sm:$0xff]  ;;  %v98_v47 = vld [vmem:[%s5819_s0 + $0x2a0] sm:$0xff] }
  0x74   :  { %v218_v48 = vld [vmem:[%s5819_s0 + $0x660] sm:$0xff] }
  0x76   :  { %3317 = vmatmul.mubr.msk.f32.gmra.mrb[52].mxu0 %vm266_vm0, %v67_v49  ;;  %3497 = vmatmul.mubr.msk.f32.gmra.mrb[52].mxu1 %vm266_vm0, %v187_v50  ;;  %v99_v49 = vld [vmem:[%s5819_s0 + $0x2a8] sm:$0xff] }
  0x77   :  { %3319 = vmatprep.mubr.msk.f32.mxu0 %vm266_vm0, %v68_v51  ;;  %3499 = vmatprep.mubr.msk.f32.mxu1 %vm266_vm0, %v188_v52  ;;  %v219_v50 = vld [vmem:[%s5819_s0 + $0x668] sm:$0xff]  ;;  %v100_v51 = vld [vmem:[%s5819_s0 + $0x2b0] sm:$0xff] }
  0x78   :  { %v220_v52 = vld [vmem:[%s5819_s0 + $0x670] sm:$0xff] }
  0x7a   :  { %3320 = vmatmul.mubr.msk.f32.gmra.mrb[54].mxu0 %vm266_vm0, %v69_v53  ;;  %3500 = vmatmul.mubr.msk.f32.gmra.mrb[54].mxu1 %vm266_vm0, %v189_v54  ;;  %v101_v53 = vld [vmem:[%s5819_s0 + $0x2b8] sm:$0xff] }
  0x7b   :  { %3322 = vmatprep.mubr.msk.f32.mxu0 %vm266_vm0, %v70_v55  ;;  %3502 = vmatprep.mubr.msk.f32.mxu1 %vm266_vm0, %v190_v56  ;;  %v221_v54 = vld [vmem:[%s5819_s0 + $0x678] sm:$0xff]  ;;  %v102_v55 = vld [vmem:[%s5819_s0 + $0x2c0] sm:$0xff] }
  0x7c   :  { %v222_v56 = vld [vmem:[%s5819_s0 + $0x680] sm:$0xff] }
  0x7e   :  { %3323 = vmatmul.mubr.msk.f32.gmra.mrb[56].mxu0 %vm266_vm0, %v71_v57  ;;  %3503 = vmatmul.mubr.msk.f32.gmra.mrb[56].mxu1 %vm266_vm0, %v191_v58  ;;  %v103_v57 = vld [vmem:[%s5819_s0 + $0x2c8] sm:$0xff] }
  0x7f   :  { %3325 = vmatprep.mubr.msk.f32.mxu0 %vm266_vm0, %v72_v59  ;;  %3505 = vmatprep.mubr.msk.f32.mxu1 %vm266_vm0, %v192_v60  ;;  %v223_v58 = vld [vmem:[%s5819_s0 + $0x688] sm:$0xff]  ;;  %v104_v59 = vld [vmem:[%s5819_s0 + $0x2d0] sm:$0xff] }
  0x80   :  { %v224_v60 = vld [vmem:[%s5819_s0 + $0x690] sm:$0xff] }
  0x82   :  { %3326 = vmatmul.mubr.msk.f32.gmra.mrb[58].mxu0 %vm266_vm0, %v73_v61  ;;  %3506 = vmatmul.mubr.msk.f32.gmra.mrb[58].mxu1 %vm266_vm0, %v193_v62  ;;  %v105_v61 = vld [vmem:[%s5819_s0 + $0x2d8] sm:$0xff] }
  0x83   :  { %3328 = vmatprep.mubr.msk.f32.mxu0 %vm266_vm0, %v74_v63  ;;  %3508 = vmatprep.mubr.msk.f32.mxu1 %vm266_vm0, %v194_v0  ;;  %v225_v62 = vld [vmem:[%s5819_s0 + $0x698] sm:$0xff]  ;;  %v106_v63 = vld [vmem:[%s5819_s0 + $0x2e0] sm:$0xff] }
  0x84   :  { %v226_v0 = vld [vmem:[%s5819_s0 + $0x6a0] sm:$0xff] }
  0x86   :  { %3329 = vmatmul.mubr.msk.f32.gmra.mrb[60].mxu0 %vm266_vm0, %v75_v1  ;;  %3509 = vmatmul.mubr.msk.f32.gmra.mrb[60].mxu1 %vm266_vm0, %v195_v2  ;;  %v107_v1 = vld [vmem:[%s5819_s0 + $0x2e8] sm:$0xff] }
  0x87   :  { %3331 = vmatprep.mubr.msk.f32.mxu0 %vm266_vm0, %v76_v3  ;;  %3511 = vmatprep.mubr.msk.f32.mxu1 %vm266_vm0, %v196_v4  ;;  %v227_v2 = vld [vmem:[%s5819_s0 + $0x6a8] sm:$0xff]  ;;  %v108_v3 = vld [vmem:[%s5819_s0 + $0x2f0] sm:$0xff] }
  0x88   :  { %v228_v4 = vld [vmem:[%s5819_s0 + $0x6b0] sm:$0xff] }
  0x8a   :  { %3332 = vmatmul.mubr.msk.f32.gmra.mrb[62].mxu0 %vm266_vm0, %v77_v5  ;;  %3512 = vmatmul.mubr.msk.f32.gmra.mrb[62].mxu1 %vm266_vm0, %v197_v6  ;;  %v109_v5 = vld [vmem:[%s5819_s0 + $0x2f8] sm:$0xff] }
  0x8b   :  { %3334 = vmatprep.mubr.msk.f32.mxu0 %vm266_vm0, %v78_v7  ;;  %3514 = vmatprep.mubr.msk.f32.mxu1 %vm266_vm0, %v198_v8  ;;  %v229_v6 = vld [vmem:[%s5819_s0 + $0x6b8] sm:$0xff]  ;;  %v110_v7 = vld [vmem:[%s5819_s0 + $0x300] sm:$0xff] }
  0x8c   :  { %v230_v8 = vld [vmem:[%s5819_s0 + $0x6c0] sm:$0xff] }
  0x8e   :  { %3335 = vmatmul.mubr.msk.f32.gmra.mrb[64].mxu0 %vm266_vm0, %v79_v9  ;;  %3515 = vmatmul.mubr.msk.f32.gmra.mrb[64].mxu1 %vm266_vm0, %v199_v10  ;;  %v111_v9 = vld [vmem:[%s5819_s0 + $0x308] sm:$0xff] }
  0x8f   :  { %3337 = vmatprep.mubr.msk.f32.mxu0 %vm266_vm0, %v80_v11  ;;  %3517 = vmatprep.mubr.msk.f32.mxu1 %vm266_vm0, %v200_v12  ;;  %v231_v10 = vld [vmem:[%s5819_s0 + $0x6c8] sm:$0xff]  ;;  %v112_v11 = vld [vmem:[%s5819_s0 + $0x310] sm:$0xff] }
  0x90   :  { %v232_v12 = vld [vmem:[%s5819_s0 + $0x6d0] sm:$0xff] }
  0x92   :  { %3338 = vmatmul.mubr.msk.f32.gmra.mrb[66].mxu0 %vm266_vm0, %v81_v13  ;;  %3518 = vmatmul.mubr.msk.f32.gmra.mrb[66].mxu1 %vm266_vm0, %v201_v14  ;;  %v113_v13 = vld [vmem:[%s5819_s0 + $0x318] sm:$0xff] }
  0x93   :  { %3340 = vmatprep.mubr.msk.f32.mxu0 %vm266_vm0, %v82_v15  ;;  %3520 = vmatprep.mubr.msk.f32.mxu1 %vm266_vm0, %v202_v16  ;;  %v233_v14 = vld [vmem:[%s5819_s0 + $0x6d8] sm:$0xff]  ;;  %v114_v15 = vld [vmem:[%s5819_s0 + $0x320] sm:$0xff] }
  0x94   :  { %v234_v16 = vld [vmem:[%s5819_s0 + $0x6e0] sm:$0xff] }
  0x96   :  { %3341 = vmatmul.mubr.msk.f32.gmra.mrb[68].mxu0 %vm266_vm0, %v83_v17  ;;  %3521 = vmatmul.mubr.msk.f32.gmra.mrb[68].mxu1 %vm266_vm0, %v203_v18  ;;  %v115_v17 = vld [vmem:[%s5819_s0 + $0x328] sm:$0xff] }
  0x97   :  { %3343 = vmatprep.mubr.msk.f32.mxu0 %vm266_vm0, %v84_v19  ;;  %3523 = vmatprep.mubr.msk.f32.mxu1 %vm266_vm0, %v204_v20  ;;  %v235_v18 = vld [vmem:[%s5819_s0 + $0x6e8] sm:$0xff]  ;;  %v116_v19 = vld [vmem:[%s5819_s0 + $0x330] sm:$0xff] }
  0x98   :  { %v236_v20 = vld [vmem:[%s5819_s0 + $0x6f0] sm:$0xff] }
  0x9a   :  { %3344 = vmatmul.mubr.msk.f32.gmra.mrb[70].mxu0 %vm266_vm0, %v85_v21  ;;  %3524 = vmatmul.mubr.msk.f32.gmra.mrb[70].mxu1 %vm266_vm0, %v205_v22  ;;  %v117_v21 = vld [vmem:[%s5819_s0 + $0x338] sm:$0xff] }
  0x9b   :  { %3346 = vmatprep.mubr.msk.f32.mxu0 %vm266_vm0, %v86_v23  ;;  %3526 = vmatprep.mubr.msk.f32.mxu1 %vm266_vm0, %v206_v24  ;;  %v237_v22 = vld [vmem:[%s5819_s0 + $0x6f8] sm:$0xff]  ;;  %v118_v23 = vld [vmem:[%s5819_s0 + $0x340] sm:$0xff] }
  0x9c   :  { %v238_v24 = vld [vmem:[%s5819_s0 + $0x700] sm:$0xff] }
  0x9e   :  { %3347 = vmatmul.mubr.msk.f32.gmra.mrb[72].mxu0 %vm266_vm0, %v87_v25  ;;  %3527 = vmatmul.mubr.msk.f32.gmra.mrb[72].mxu1 %vm266_vm0, %v207_v26  ;;  %v119_v25 = vld [vmem:[%s5819_s0 + $0x348] sm:$0xff] }
  0x9f   :  { %3349 = vmatprep.mubr.msk.f32.mxu0 %vm266_vm0, %v88_v27  ;;  %3529 = vmatprep.mubr.msk.f32.mxu1 %vm266_vm0, %v208_v28  ;;  %v239_v26 = vld [vmem:[%s5819_s0 + $0x708] sm:$0xff]  ;;  %v120_v27 = vld [vmem:[%s5819_s0 + $0x350] sm:$0xff] }
  0xa0   :  { %v240_v28 = vld [vmem:[%s5819_s0 + $0x710] sm:$0xff] }
  0xa2   :  { %3350 = vmatmul.mubr.msk.f32.gmra.mrb[74].mxu0 %vm266_vm0, %v89_v29  ;;  %3530 = vmatmul.mubr.msk.f32.gmra.mrb[74].mxu1 %vm266_vm0, %v209_v30  ;;  %v4505_v29 = vld [vmem:[%s5820_s2] ss:$0 sm:$0xff]  ;;  %v121_v30 = vld [vmem:[%s5819_s0 + $0x358] sm:$0xff] }
  0xa3   :  { %3352 = vmatprep.mubr.msk.f32.mxu0 %vm266_vm0, %v90_v31  ;;  %3532 = vmatprep.mubr.msk.f32.mxu1 %vm266_vm0, %v210_v32  ;;  %v241_v31 = vld [vmem:[%s5819_s0 + $0x718] sm:$0xff]  ;;  %v122_v32 = vld [vmem:[%s5819_s0 + $0x360] sm:$0xff] }
  0xa6   :  { %3353 = vmatmul.mubr.msk.f32.gmra.mrb[76].mxu0 %vm266_vm0, %v91_v33  ;;  %3533 = vmatmul.mubr.msk.f32.gmra.mrb[76].mxu1 %vm266_vm0, %v211_v34  ;;  %v242_v33 = vld [vmem:[%s5819_s0 + $0x720] sm:$0xff] }
  0xa7   :  { %3355 = vmatprep.mubr.msk.f32.mxu0 %vm266_vm0, %v92_v35  ;;  %3535 = vmatprep.mubr.msk.f32.mxu1 %vm266_vm0, %v212_v36 }
  0xaa   :  { %3356 = vmatmul.mubr.msk.f32.gmra.mrb[78].mxu0 %vm266_vm0, %v93_v37  ;;  %3536 = vmatmul.mubr.msk.f32.gmra.mrb[78].mxu1 %vm266_vm0, %v213_v38 }
  0xab   :  { %3358 = vmatprep.mubr.msk.f32.mxu0 %vm266_vm0, %v94_v39  ;;  %3538 = vmatprep.mubr.msk.f32.mxu1 %vm266_vm0, %v214_v40 }
  0xae   :  { %3359 = vmatmul.mubr.msk.f32.gmra.mrb[80].mxu0 %vm266_vm0, %v95_v41  ;;  %3539 = vmatmul.mubr.msk.f32.gmra.mrb[80].mxu1 %vm266_vm0, %v215_v42  ;;  %v123_v42 = vld [vmem:[%s5819_s0 + $0x368] sm:$0xff] }
  0xaf   :  { %3361 = vmatprep.mubr.msk.f32.mxu0 %vm266_vm0, %v96_v43  ;;  %3541 = vmatprep.mubr.msk.f32.mxu1 %vm266_vm0, %v216_v44  ;;  %v243_v43 = vld [vmem:[%s5819_s0 + $0x728] sm:$0xff] }
  0xb2   :  { %3362 = vmatmul.mubr.msk.f32.gmra.mrb[82].mxu0 %vm266_vm0, %v97_v45  ;;  %3542 = vmatmul.mubr.msk.f32.gmra.mrb[82].mxu1 %vm266_vm0, %v217_v46  ;;  %v124_v46 = vld [vmem:[%s5819_s0 + $0x370] sm:$0xff] }
  0xb3   :  { %3364 = vmatprep.mubr.msk.f32.mxu0 %vm266_vm0, %v98_v47  ;;  %3544 = vmatprep.mubr.msk.f32.mxu1 %vm266_vm0, %v218_v48  ;;  %v244_v47 = vld [vmem:[%s5819_s0 + $0x730] sm:$0xff] }
  0xb6   :  { %3365 = vmatmul.mubr.msk.f32.gmra.mrb[84].mxu0 %vm266_vm0, %v99_v49  ;;  %3545 = vmatmul.mubr.msk.f32.gmra.mrb[84].mxu1 %vm266_vm0, %v219_v50 }
  0xb7   :  { %3367 = vmatprep.mubr.msk.f32.mxu0 %vm266_vm0, %v100_v51  ;;  %3547 = vmatprep.mubr.msk.f32.mxu1 %vm266_vm0, %v220_v52 }
  0xba   :  { %3368 = vmatmul.mubr.msk.f32.gmra.mrb[86].mxu0 %vm266_vm0, %v101_v53  ;;  %3548 = vmatmul.mubr.msk.f32.gmra.mrb[86].mxu1 %vm266_vm0, %v221_v54 }
  0xbb   :  { %3370 = vmatprep.mubr.msk.f32.mxu0 %vm266_vm0, %v102_v55  ;;  %3550 = vmatprep.mubr.msk.f32.mxu1 %vm266_vm0, %v222_v56 }
  0xbe   :  { %3371 = vmatmul.mubr.msk.f32.gmra.mrb[88].mxu0 %vm266_vm0, %v103_v57  ;;  %3551 = vmatmul.mubr.msk.f32.gmra.mrb[88].mxu1 %vm266_vm0, %v223_v58  ;;  %v125_v58 = vld [vmem:[%s5819_s0 + $0x378] sm:$0xff] }
  0xbf   :  { %3373 = vmatprep.mubr.msk.f32.mxu0 %vm266_vm0, %v104_v59  ;;  %3553 = vmatprep.mubr.msk.f32.mxu1 %vm266_vm0, %v224_v60  ;;  %v245_v59 = vld [vmem:[%s5819_s0 + $0x738] sm:$0xff] }
  0xc2   :  { %3374 = vmatmul.mubr.msk.f32.gmra.mrb[90].mxu0 %vm266_vm0, %v105_v61  ;;  %3554 = vmatmul.mubr.msk.f32.gmra.mrb[90].mxu1 %vm266_vm0, %v225_v62  ;;  %v126_v62 = vld [vmem:[%s5819_s0 + $0x380] sm:$0xff] }
  0xc3   :  { %3376 = vmatprep.mubr.msk.f32.mxu0 %vm266_vm0, %v106_v63  ;;  %3556 = vmatprep.mubr.msk.f32.mxu1 %vm266_vm0, %v226_v0  ;;  %v246_v63 = vld [vmem:[%s5819_s0 + $0x740] sm:$0xff] }
  0xc6   :  { %3377 = vmatmul.mubr.msk.f32.gmra.mrb[92].mxu0 %vm266_vm0, %v107_v1  ;;  %3557 = vmatmul.mubr.msk.f32.gmra.mrb[92].mxu1 %vm266_vm0, %v227_v2 }
  0xc7   :  { %3379 = vmatprep.mubr.msk.f32.mxu0 %vm266_vm0, %v108_v3  ;;  %3559 = vmatprep.mubr.msk.f32.mxu1 %vm266_vm0, %v228_v4 }
  0xca   :  { %3380 = vmatmul.mubr.msk.f32.gmra.mrb[94].mxu0 %vm266_vm0, %v109_v5  ;;  %3560 = vmatmul.mubr.msk.f32.gmra.mrb[94].mxu1 %vm266_vm0, %v229_v6 }
  0xcb   :  { %3382 = vmatprep.mubr.msk.f32.mxu0 %vm266_vm0, %v110_v7  ;;  %3562 = vmatprep.mubr.msk.f32.mxu1 %vm266_vm0, %v230_v8 }
  0xce   :  { %3383 = vmatmul.mubr.msk.f32.gmra.mrb[96].mxu0 %vm266_vm0, %v111_v9  ;;  %3563 = vmatmul.mubr.msk.f32.gmra.mrb[96].mxu1 %vm266_vm0, %v231_v10  ;;  %v127_v10 = vld [vmem:[%s5819_s0 + $0x388] sm:$0xff] }
  0xcf   :  { %3385 = vmatprep.mubr.msk.f32.mxu0 %vm266_vm0, %v112_v11  ;;  %3565 = vmatprep.mubr.msk.f32.mxu1 %vm266_vm0, %v232_v12  ;;  %v247_v11 = vld [vmem:[%s5819_s0 + $0x748] sm:$0xff] }
  0xd2   :  { %3386 = vmatmul.mubr.msk.f32.gmra.mrb[98].mxu0 %vm266_vm0, %v113_v13  ;;  %3566 = vmatmul.mubr.msk.f32.gmra.mrb[98].mxu1 %vm266_vm0, %v233_v14  ;;  %v128_v14 = vld [vmem:[%s5819_s0 + $0x390] sm:$0xff] }
  0xd3   :  { %3388 = vmatprep.mubr.msk.f32.mxu0 %vm266_vm0, %v114_v15  ;;  %3568 = vmatprep.mubr.msk.f32.mxu1 %vm266_vm0, %v234_v16  ;;  %v248_v15 = vld [vmem:[%s5819_s0 + $0x750] sm:$0xff] }
  0xd6   :  { %3389 = vmatmul.mubr.msk.f32.gmra.mrb[100].mxu0 %vm266_vm0, %v115_v17  ;;  %3569 = vmatmul.mubr.msk.f32.gmra.mrb[100].mxu1 %vm266_vm0, %v235_v18 }
  0xd7   :  { %3391 = vmatprep.mubr.msk.f32.mxu0 %vm266_vm0, %v116_v19  ;;  %3571 = vmatprep.mubr.msk.f32.mxu1 %vm266_vm0, %v236_v20 }
  0xda   :  { %3392 = vmatmul.mubr.msk.f32.gmra.mrb[102].mxu0 %vm266_vm0, %v117_v21  ;;  %3572 = vmatmul.mubr.msk.f32.gmra.mrb[102].mxu1 %vm266_vm0, %v237_v22 }
  0xdb   :  { %3394 = vmatprep.mubr.msk.f32.mxu0 %vm266_vm0, %v118_v23  ;;  %3574 = vmatprep.mubr.msk.f32.mxu1 %vm266_vm0, %v238_v24 }
  0xde   :  { %3395 = vmatmul.mubr.msk.f32.gmra.mrb[104].mxu0 %vm266_vm0, %v119_v25  ;;  %3575 = vmatmul.mubr.msk.f32.gmra.mrb[104].mxu1 %vm266_vm0, %v239_v26  ;;  %v129_v26 = vld [vmem:[%s5819_s0 + $0x398] sm:$0xff] }
  0xdf   :  { %3397 = vmatprep.mubr.msk.f32.mxu0 %vm266_vm0, %v120_v27  ;;  %3577 = vmatprep.mubr.msk.f32.mxu1 %vm266_vm0, %v240_v28  ;;  %v249_v27 = vld [vmem:[%s5819_s0 + $0x758] sm:$0xff] }
  0xe1   :  { %v3240_v34 = vpop.f32.mrb[0].mxu0  ;;  %v3420_v35 = vpop.f32.mrb[0].mxu1 }
  0xe2   :  { %v1063_v36 = vadd.f32 %v3240_v34, %v4505_v29  ;;  %v1663_v37 = vadd.f32 %v3420_v35, %v4505_v29  ;;  %v1057_v38 = vpop.f32.mrb[1].mxu0  ;;  %3398 = vmatmul.mubr.msk.f32.gmra.mrb[106].mxu0 %vm266_vm0, %v121_v30  ;;  %v1657_v39 = vpop.f32.mrb[1].mxu1  ;;  %3578 = vmatmul.mubr.msk.f32.gmra.mrb[106].mxu1 %vm266_vm0, %v241_v31  ;;  %v130_v31 = vld [vmem:[%s5819_s0 + $0x3a0] sm:$0xff] }
  0xe3   :  { %v1058_v40 = vadd.f32 %v4505_v29, %v1057_v38  ;;  %v1658_v41 = vadd.f32 %v4505_v29, %v1657_v39  ;;  %3400 = vmatprep.mubr.msk.f32.mxu0 %vm266_vm0, %v122_v32  ;;  %3580 = vmatprep.mubr.msk.f32.mxu1 %vm266_vm0, %v242_v33  ;;  %v250_v32 = vld [vmem:[%s5819_s0 + $0x760] sm:$0xff] }
  0xe4   :  { %v2257_v44 = vmax.f32 %v1063_v36, 0.0  ;;  %v2377_v45 = vmax.f32 %v1663_v37, 0.0 }
  0xe5   :  { %v2256_v48 = vmax.f32 %v1058_v40, 0.0  ;;  %v2376_v49 = vmax.f32 %v1658_v41, 0.0  ;;  %v3243_v50 = vpop.f32.mrb[2].mxu0  ;;  %v3423_v51 = vpop.f32.mrb[2].mxu1 }
  0xe6   :  { %2498 = vst.msk [vmem:[%s5821_s3 + $0x8] sm:$0xff] %vm2496_vm2, %v2257_v44  ;;  %2618 = vst.msk [vmem:[%s5821_s3 + $0x3c8] sm:$0xff] %vm2496_vm2, %v2377_v45  ;;  %v1073_v52 = vadd.f32 %v3243_v50, %v4505_v29  ;;  %v1673_v53 = vadd.f32 %v3423_v51, %v4505_v29  ;;  %v1067_v54 = vpop.f32.mrb[3].mxu0  ;;  %3401 = vmatmul.mubr.msk.f32.gmra.mrb[108].mxu0 %vm266_vm0, %v123_v42  ;;  %v1667_v55 = vpop.f32.mrb[3].mxu1  ;;  %3581 = vmatmul.mubr.msk.f32.gmra.mrb[108].mxu1 %vm266_vm0, %v243_v43  ;;  %v131_v43 = vld [vmem:[%s5819_s0 + $0x3a8] sm:$0xff] }
  0xe7   :  { %2497 = vst.msk [vmem:[%s5821_s3] sm:$0xff] %vm2496_vm2, %v2256_v48  ;;  %2617 = vst.msk [vmem:[%s5821_s3 + $0x3c0] sm:$0xff] %vm2496_vm2, %v2376_v49  ;;  %v1068_v56 = vadd.f32 %v4505_v29, %v1067_v54  ;;  %v1668_v57 = vadd.f32 %v4505_v29, %v1667_v55  ;;  %3403 = vmatprep.mubr.msk.f32.mxu0 %vm266_vm0, %v124_v46  ;;  %3583 = vmatprep.mubr.msk.f32.mxu1 %vm266_vm0, %v244_v47  ;;  %v251_v44 = vld [vmem:[%s5819_s0 + $0x768] sm:$0xff]  ;;  %v132_v47 = vld [vmem:[%s5819_s0 + $0x3b0] sm:$0xff] }
  0xe8   :  { %v2259_v60 = vmax.f32 %v1073_v52, 0.0  ;;  %v2379_v61 = vmax.f32 %v1673_v53, 0.0  ;;  %v252_v48 = vld [vmem:[%s5819_s0 + $0x770] sm:$0xff] }
  0xe9   :  { %v2258_v0 = vmax.f32 %v1068_v56, 0.0  ;;  %v2378_v1 = vmax.f32 %v1668_v57, 0.0  ;;  %v3246_v2 = vpop.f32.mrb[4].mxu0  ;;  %v3426_v3 = vpop.f32.mrb[4].mxu1 }
  0xea   :  { %2500 = vst.msk [vmem:[%s5821_s3 + $0x18] sm:$0xff] %vm2496_vm2, %v2259_v60  ;;  %2620 = vst.msk [vmem:[%s5821_s3 + $0x3d8] sm:$0xff] %vm2496_vm2, %v2379_v61  ;;  %v1083_v4 = vadd.f32 %v3246_v2, %v4505_v29  ;;  %v1683_v5 = vadd.f32 %v3426_v3, %v4505_v29  ;;  %v1077_v6 = vpop.f32.mrb[5].mxu0  ;;  %3404 = vmatmul.mubr.msk.f32.gmra.mrb[110].mxu0 %vm266_vm0, %v125_v58  ;;  %v1677_v7 = vpop.f32.mrb[5].mxu1  ;;  %3584 = vmatmul.mubr.msk.f32.gmra.mrb[110].mxu1 %vm266_vm0, %v245_v59  ;;  %v133_v59 = vld [vmem:[%s5819_s0 + $0x3b8] sm:$0xff] }
  0xeb   :  { %2499 = vst.msk [vmem:[%s5821_s3 + $0x10] sm:$0xff] %vm2496_vm2, %v2258_v0  ;;  %2619 = vst.msk [vmem:[%s5821_s3 + $0x3d0] sm:$0xff] %vm2496_vm2, %v2378_v1  ;;  %v1078_v8 = vadd.f32 %v4505_v29, %v1077_v6  ;;  %v1678_v9 = vadd.f32 %v4505_v29, %v1677_v7  ;;  %3406 = vmatprep.mubr.msk.f32.mxu0 %vm266_vm0, %v126_v62  ;;  %3586 = vmatprep.mubr.msk.f32.mxu1 %vm266_vm0, %v246_v63  ;;  %v253_v60 = vld [vmem:[%s5819_s0 + $0x778] sm:$0xff] }
  0xec   :  { %v2261_v12 = vmax.f32 %v1083_v4, 0.0  ;;  %v2381_v13 = vmax.f32 %v1683_v5, 0.0 }
  0xed   :  { %v2260_v16 = vmax.f32 %v1078_v8, 0.0  ;;  %v2380_v17 = vmax.f32 %v1678_v9, 0.0  ;;  %v3249_v18 = vpop.f32.mrb[6].mxu0  ;;  %v3429_v19 = vpop.f32.mrb[6].mxu1 }
  0xee   :  { %2502 = vst.msk [vmem:[%s5821_s3 + $0x28] sm:$0xff] %vm2496_vm2, %v2261_v12  ;;  %2622 = vst.msk [vmem:[%s5821_s3 + $0x3e8] sm:$0xff] %vm2496_vm2, %v2381_v13  ;;  %v1093_v20 = vadd.f32 %v3249_v18, %v4505_v29  ;;  %v1693_v21 = vadd.f32 %v3429_v19, %v4505_v29  ;;  %v1087_v22 = vpop.f32.mrb[7].mxu0  ;;  %3407 = vmatmul.mubr.msk.f32.gmra.mrb[112].mxu0 %vm266_vm0, %v127_v10  ;;  %v1687_v23 = vpop.f32.mrb[7].mxu1  ;;  %3587 = vmatmul.mubr.msk.f32.gmra.mrb[112].mxu1 %vm266_vm0, %v247_v11 }
  0xef   :  { %2501 = vst.msk [vmem:[%s5821_s3 + $0x20] sm:$0xff] %vm2496_vm2, %v2260_v16  ;;  %2621 = vst.msk [vmem:[%s5821_s3 + $0x3e0] sm:$0xff] %vm2496_vm2, %v2380_v17  ;;  %v1088_v24 = vadd.f32 %v4505_v29, %v1087_v22  ;;  %v1688_v25 = vadd.f32 %v4505_v29, %v1687_v23  ;;  %3409 = vmatprep.mubr.msk.f32.mxu0 %vm266_vm0, %v128_v14  ;;  %3589 = vmatprep.mubr.msk.f32.mxu1 %vm266_vm0, %v248_v15 }
  0xf0   :  { %v2263_v28 = vmax.f32 %v1093_v20, 0.0  ;;  %v2383_v30 = vmax.f32 %v1693_v21, 0.0 }
  0xf1   :  { %v2262_v33 = vmax.f32 %v1088_v24, 0.0  ;;  %v2382_v34 = vmax.f32 %v1688_v25, 0.0  ;;  %v3252_v35 = vpop.f32.mrb[8].mxu0  ;;  %v3432_v36 = vpop.f32.mrb[8].mxu1 }
  0xf2   :  { %2504 = vst.msk [vmem:[%s5821_s3 + $0x38] sm:$0xff] %vm2496_vm2, %v2263_v28  ;;  %2624 = vst.msk [vmem:[%s5821_s3 + $0x3f8] sm:$0xff] %vm2496_vm2, %v2383_v30  ;;  %v1103_v37 = vadd.f32 %v3252_v35, %v4505_v29  ;;  %v1703_v38 = vadd.f32 %v3432_v36, %v4505_v29  ;;  %v1097_v39 = vpop.f32.mrb[9].mxu0  ;;  %3410 = vmatmul.mubr.msk.f32.gmra.mrb[114].mxu0 %vm266_vm0, %v129_v26  ;;  %v1697_v40 = vpop.f32.mrb[9].mxu1  ;;  %3590 = vmatmul.mubr.msk.f32.gmra.mrb[114].mxu1 %vm266_vm0, %v249_v27 }
  0xf3   :  { %2503 = vst.msk [vmem:[%s5821_s3 + $0x30] sm:$0xff] %vm2496_vm2, %v2262_v33  ;;  %2623 = vst.msk [vmem:[%s5821_s3 + $0x3f0] sm:$0xff] %vm2496_vm2, %v2382_v34  ;;  %v1098_v41 = vadd.f32 %v4505_v29, %v1097_v39  ;;  %v1698_v42 = vadd.f32 %v4505_v29, %v1697_v40  ;;  %3412 = vmatprep.mubr.msk.f32.mxu0 %vm266_vm0, %v130_v31  ;;  %3592 = vmatprep.mubr.msk.f32.mxu1 %vm266_vm0, %v250_v32 }
  0xf4   :  { %v2265_v45 = vmax.f32 %v1103_v37, 0.0  ;;  %v2385_v46 = vmax.f32 %v1703_v38, 0.0 }
  0xf5   :  { %v2264_v49 = vmax.f32 %v1098_v41, 0.0  ;;  %v2384_v50 = vmax.f32 %v1698_v42, 0.0  ;;  %v3255_v51 = vpop.f32.mrb[10].mxu0  ;;  %v3435_v52 = vpop.f32.mrb[10].mxu1 }
  0xf6   :  { %2506 = vst.msk [vmem:[%s5821_s3 + $0x48] sm:$0xff] %vm2496_vm2, %v2265_v45  ;;  %2626 = vst.msk [vmem:[%s5821_s3 + $0x408] sm:$0xff] %vm2496_vm2, %v2385_v46  ;;  %v1113_v53 = vadd.f32 %v3255_v51, %v4505_v29  ;;  %v1713_v54 = vadd.f32 %v3435_v52, %v4505_v29  ;;  %v1107_v55 = vpop.f32.mrb[11].mxu0  ;;  %3413 = vmatmul.mubr.msk.f32.gmra.mrb[116].mxu0 %vm266_vm0, %v131_v43  ;;  %v1707_v56 = vpop.f32.mrb[11].mxu1  ;;  %3593 = vmatmul.mubr.msk.f32.gmra.mrb[116].mxu1 %vm266_vm0, %v251_v44 }
  0xf7   :  { %2505 = vst.msk [vmem:[%s5821_s3 + $0x40] sm:$0xff] %vm2496_vm2, %v2264_v49  ;;  %2625 = vst.msk [vmem:[%s5821_s3 + $0x400] sm:$0xff] %vm2496_vm2, %v2384_v50  ;;  %v1108_v57 = vadd.f32 %v4505_v29, %v1107_v55  ;;  %v1708_v58 = vadd.f32 %v4505_v29, %v1707_v56  ;;  %3415 = vmatprep.mubr.msk.f32.mxu0 %vm266_vm0, %v132_v47  ;;  %3595 = vmatprep.mubr.msk.f32.mxu1 %vm266_vm0, %v252_v48 }
  0xf8   :  { %v2267_v61 = vmax.f32 %v1113_v53, 0.0  ;;  %v2387_v62 = vmax.f32 %v1713_v54, 0.0 }
  0xf9   :  { %v2266_v63 = vmax.f32 %v1108_v57, 0.0  ;;  %v2386_v0 = vmax.f32 %v1708_v58, 0.0  ;;  %v3258_v1 = vpop.f32.mrb[12].mxu0  ;;  %v3438_v2 = vpop.f32.mrb[12].mxu1 }
  0xfa   :  { %2508 = vst.msk [vmem:[%s5821_s3 + $0x58] sm:$0xff] %vm2496_vm2, %v2267_v61  ;;  %2628 = vst.msk [vmem:[%s5821_s3 + $0x418] sm:$0xff] %vm2496_vm2, %v2387_v62  ;;  %v1123_v3 = vadd.f32 %v3258_v1, %v4505_v29  ;;  %v1723_v4 = vadd.f32 %v3438_v2, %v4505_v29  ;;  %v1117_v5 = vpop.f32.mrb[13].mxu0  ;;  %3416 = vmatmul.mubr.msk.f32.gmra.mrb[118].mxu0 %vm266_vm0, %v133_v59  ;;  %v1717_v6 = vpop.f32.mrb[13].mxu1  ;;  %3596 = vmatmul.mubr.msk.f32.gmra.mrb[118].mxu1 %vm266_vm0, %v253_v60 }
  0xfb   :  { %2507 = vst.msk [vmem:[%s5821_s3 + $0x50] sm:$0xff] %vm2496_vm2, %v2266_v63  ;;  %2627 = vst.msk [vmem:[%s5821_s3 + $0x410] sm:$0xff] %vm2496_vm2, %v2386_v0  ;;  %v1118_v7 = vadd.f32 %v4505_v29, %v1117_v5  ;;  %v1718_v8 = vadd.f32 %v4505_v29, %v1717_v6 }
  0xfc   :  { %v2269_v9 = vmax.f32 %v1123_v3, 0.0  ;;  %v2389_v10 = vmax.f32 %v1723_v4, 0.0 }
  0xfd   :  { %v2268_v11 = vmax.f32 %v1118_v7, 0.0  ;;  %v2388_v12 = vmax.f32 %v1718_v8, 0.0  ;;  %v3261_v13 = vpop.f32.mrb[14].mxu0  ;;  %v3441_v14 = vpop.f32.mrb[14].mxu1 }
  0xfe   :  { %2510 = vst.msk [vmem:[%s5821_s3 + $0x68] sm:$0xff] %vm2496_vm2, %v2269_v9  ;;  %2630 = vst.msk [vmem:[%s5821_s3 + $0x428] sm:$0xff] %vm2496_vm2, %v2389_v10  ;;  %v1133_v15 = vadd.f32 %v3261_v13, %v4505_v29  ;;  %v1733_v16 = vadd.f32 %v3441_v14, %v4505_v29  ;;  %v1127_v17 = vpop.f32.mrb[15].mxu0  ;;  %v1727_v18 = vpop.f32.mrb[15].mxu1 }
  0xff   :  { %2509 = vst.msk [vmem:[%s5821_s3 + $0x60] sm:$0xff] %vm2496_vm2, %v2268_v11  ;;  %2629 = vst.msk [vmem:[%s5821_s3 + $0x420] sm:$0xff] %vm2496_vm2, %v2388_v12  ;;  %v1128_v19 = vadd.f32 %v4505_v29, %v1127_v17  ;;  %v1728_v20 = vadd.f32 %v4505_v29, %v1727_v18 }
 0x100   :  { %v2271_v21 = vmax.f32 %v1133_v15, 0.0  ;;  %v2391_v22 = vmax.f32 %v1733_v16, 0.0 }
 0x101   :  { %v2270_v23 = vmax.f32 %v1128_v19, 0.0  ;;  %v2390_v24 = vmax.f32 %v1728_v20, 0.0  ;;  %v3264_v25 = vpop.f32.mrb[16].mxu0  ;;  %v3444_v26 = vpop.f32.mrb[16].mxu1 }
 0x102   :  { %2512 = vst.msk [vmem:[%s5821_s3 + $0x78] sm:$0xff] %vm2496_vm2, %v2271_v21  ;;  %2632 = vst.msk [vmem:[%s5821_s3 + $0x438] sm:$0xff] %vm2496_vm2, %v2391_v22  ;;  %v1143_v27 = vadd.f32 %v3264_v25, %v4505_v29  ;;  %v1743_v28 = vadd.f32 %v3444_v26, %v4505_v29  ;;  %v1137_v30 = vpop.f32.mrb[17].mxu0  ;;  %v1737_v31 = vpop.f32.mrb[17].mxu1 }
 0x103   :  { %2511 = vst.msk [vmem:[%s5821_s3 + $0x70] sm:$0xff] %vm2496_vm2, %v2270_v23  ;;  %2631 = vst.msk [vmem:[%s5821_s3 + $0x430] sm:$0xff] %vm2496_vm2, %v2390_v24  ;;  %v1138_v32 = vadd.f32 %v4505_v29, %v1137_v30  ;;  %v1738_v33 = vadd.f32 %v4505_v29, %v1737_v31 }
 0x104   :  { %v2273_v34 = vmax.f32 %v1143_v27, 0.0  ;;  %v2393_v35 = vmax.f32 %v1743_v28, 0.0 }
 0x105   :  { %v2272_v36 = vmax.f32 %v1138_v32, 0.0  ;;  %v2392_v37 = vmax.f32 %v1738_v33, 0.0  ;;  %v3267_v38 = vpop.f32.mrb[18].mxu0  ;;  %v3447_v39 = vpop.f32.mrb[18].mxu1 }
 0x106   :  { %2514 = vst.msk [vmem:[%s5821_s3 + $0x88] sm:$0xff] %vm2496_vm2, %v2273_v34  ;;  %2634 = vst.msk [vmem:[%s5821_s3 + $0x448] sm:$0xff] %vm2496_vm2, %v2393_v35  ;;  %v1153_v40 = vadd.f32 %v3267_v38, %v4505_v29  ;;  %v1753_v41 = vadd.f32 %v3447_v39, %v4505_v29  ;;  %v1147_v42 = vpop.f32.mrb[19].mxu0  ;;  %v1747_v43 = vpop.f32.mrb[19].mxu1 }
 0x107   :  { %2513 = vst.msk [vmem:[%s5821_s3 + $0x80] sm:$0xff] %vm2496_vm2, %v2272_v36  ;;  %2633 = vst.msk [vmem:[%s5821_s3 + $0x440] sm:$0xff] %vm2496_vm2, %v2392_v37  ;;  %v1148_v44 = vadd.f32 %v4505_v29, %v1147_v42  ;;  %v1748_v45 = vadd.f32 %v4505_v29, %v1747_v43 }
 0x108   :  { %v2275_v46 = vmax.f32 %v1153_v40, 0.0  ;;  %v2395_v47 = vmax.f32 %v1753_v41, 0.0 }
 0x109   :  { %v2274_v48 = vmax.f32 %v1148_v44, 0.0  ;;  %v2394_v49 = vmax.f32 %v1748_v45, 0.0  ;;  %v3270_v50 = vpop.f32.mrb[20].mxu0  ;;  %v3450_v51 = vpop.f32.mrb[20].mxu1 }
 0x10a   :  { %2516 = vst.msk [vmem:[%s5821_s3 + $0x98] sm:$0xff] %vm2496_vm2, %v2275_v46  ;;  %2636 = vst.msk [vmem:[%s5821_s3 + $0x458] sm:$0xff] %vm2496_vm2, %v2395_v47  ;;  %v1163_v52 = vadd.f32 %v3270_v50, %v4505_v29  ;;  %v1763_v53 = vadd.f32 %v3450_v51, %v4505_v29  ;;  %v1157_v54 = vpop.f32.mrb[21].mxu0  ;;  %v1757_v55 = vpop.f32.mrb[21].mxu1 }
 0x10b   :  { %2515 = vst.msk [vmem:[%s5821_s3 + $0x90] sm:$0xff] %vm2496_vm2, %v2274_v48  ;;  %2635 = vst.msk [vmem:[%s5821_s3 + $0x450] sm:$0xff] %vm2496_vm2, %v2394_v49  ;;  %v1158_v56 = vadd.f32 %v4505_v29, %v1157_v54  ;;  %v1758_v57 = vadd.f32 %v4505_v29, %v1757_v55 }
 0x10c   :  { %v2277_v58 = vmax.f32 %v1163_v52, 0.0  ;;  %v2397_v59 = vmax.f32 %v1763_v53, 0.0 }
 0x10d   :  { %v2276_v60 = vmax.f32 %v1158_v56, 0.0  ;;  %v2396_v61 = vmax.f32 %v1758_v57, 0.0  ;;  %v3273_v62 = vpop.f32.mrb[22].mxu0  ;;  %v3453_v63 = vpop.f32.mrb[22].mxu1 }
 0x10e   :  { %2518 = vst.msk [vmem:[%s5821_s3 + $0xa8] sm:$0xff] %vm2496_vm2, %v2277_v58  ;;  %2638 = vst.msk [vmem:[%s5821_s3 + $0x468] sm:$0xff] %vm2496_vm2, %v2397_v59  ;;  %v1173_v0 = vadd.f32 %v3273_v62, %v4505_v29  ;;  %v1773_v1 = vadd.f32 %v3453_v63, %v4505_v29  ;;  %v1167_v2 = vpop.f32.mrb[23].mxu0  ;;  %v1767_v3 = vpop.f32.mrb[23].mxu1 }
 0x10f   :  { %2517 = vst.msk [vmem:[%s5821_s3 + $0xa0] sm:$0xff] %vm2496_vm2, %v2276_v60  ;;  %2637 = vst.msk [vmem:[%s5821_s3 + $0x460] sm:$0xff] %vm2496_vm2, %v2396_v61  ;;  %v1168_v4 = vadd.f32 %v4505_v29, %v1167_v2  ;;  %v1768_v5 = vadd.f32 %v4505_v29, %v1767_v3 }
 0x110   :  { %v2279_v6 = vmax.f32 %v1173_v0, 0.0  ;;  %v2399_v7 = vmax.f32 %v1773_v1, 0.0 }
 0x111   :  { %v2278_v8 = vmax.f32 %v1168_v4, 0.0  ;;  %v2398_v9 = vmax.f32 %v1768_v5, 0.0  ;;  %v3276_v10 = vpop.f32.mrb[24].mxu0  ;;  %v3456_v11 = vpop.f32.mrb[24].mxu1 }
 0x112   :  { %2520 = vst.msk [vmem:[%s5821_s3 + $0xb8] sm:$0xff] %vm2496_vm2, %v2279_v6  ;;  %2640 = vst.msk [vmem:[%s5821_s3 + $0x478] sm:$0xff] %vm2496_vm2, %v2399_v7  ;;  %v1183_v12 = vadd.f32 %v3276_v10, %v4505_v29  ;;  %v1783_v13 = vadd.f32 %v3456_v11, %v4505_v29  ;;  %v1177_v14 = vpop.f32.mrb[25].mxu0  ;;  %v1777_v15 = vpop.f32.mrb[25].mxu1 }
 0x113   :  { %2519 = vst.msk [vmem:[%s5821_s3 + $0xb0] sm:$0xff] %vm2496_vm2, %v2278_v8  ;;  %2639 = vst.msk [vmem:[%s5821_s3 + $0x470] sm:$0xff] %vm2496_vm2, %v2398_v9  ;;  %v1178_v16 = vadd.f32 %v4505_v29, %v1177_v14  ;;  %v1778_v17 = vadd.f32 %v4505_v29, %v1777_v15 }
 0x114   :  { %v2281_v18 = vmax.f32 %v1183_v12, 0.0  ;;  %v2401_v19 = vmax.f32 %v1783_v13, 0.0 }
 0x115   :  { %v2280_v20 = vmax.f32 %v1178_v16, 0.0  ;;  %v2400_v21 = vmax.f32 %v1778_v17, 0.0  ;;  %v3279_v22 = vpop.f32.mrb[26].mxu0  ;;  %v3459_v23 = vpop.f32.mrb[26].mxu1 }
 0x116   :  { %2522 = vst.msk [vmem:[%s5821_s3 + $0xc8] sm:$0xff] %vm2496_vm2, %v2281_v18  ;;  %2642 = vst.msk [vmem:[%s5821_s3 + $0x488] sm:$0xff] %vm2496_vm2, %v2401_v19  ;;  %v1193_v24 = vadd.f32 %v3279_v22, %v4505_v29  ;;  %v1793_v25 = vadd.f32 %v3459_v23, %v4505_v29  ;;  %v1187_v26 = vpop.f32.mrb[27].mxu0  ;;  %v1787_v27 = vpop.f32.mrb[27].mxu1 }
 0x117   :  { %2521 = vst.msk [vmem:[%s5821_s3 + $0xc0] sm:$0xff] %vm2496_vm2, %v2280_v20  ;;  %2641 = vst.msk [vmem:[%s5821_s3 + $0x480] sm:$0xff] %vm2496_vm2, %v2400_v21  ;;  %v1188_v28 = vadd.f32 %v4505_v29, %v1187_v26  ;;  %v1788_v30 = vadd.f32 %v4505_v29, %v1787_v27 }
 0x118   :  { %v2283_v31 = vmax.f32 %v1193_v24, 0.0  ;;  %v2403_v32 = vmax.f32 %v1793_v25, 0.0 }
 0x119   :  { %v2282_v33 = vmax.f32 %v1188_v28, 0.0  ;;  %v2402_v34 = vmax.f32 %v1788_v30, 0.0  ;;  %v3282_v35 = vpop.f32.mrb[28].mxu0  ;;  %v3462_v36 = vpop.f32.mrb[28].mxu1 }
 0x11a   :  { %2524 = vst.msk [vmem:[%s5821_s3 + $0xd8] sm:$0xff] %vm2496_vm2, %v2283_v31  ;;  %2644 = vst.msk [vmem:[%s5821_s3 + $0x498] sm:$0xff] %vm2496_vm2, %v2403_v32  ;;  %v1203_v37 = vadd.f32 %v3282_v35, %v4505_v29  ;;  %v1803_v38 = vadd.f32 %v3462_v36, %v4505_v29  ;;  %v1197_v39 = vpop.f32.mrb[29].mxu0  ;;  %v1797_v40 = vpop.f32.mrb[29].mxu1 }
 0x11b   :  { %2523 = vst.msk [vmem:[%s5821_s3 + $0xd0] sm:$0xff] %vm2496_vm2, %v2282_v33  ;;  %2643 = vst.msk [vmem:[%s5821_s3 + $0x490] sm:$0xff] %vm2496_vm2, %v2402_v34  ;;  %v1198_v41 = vadd.f32 %v4505_v29, %v1197_v39  ;;  %v1798_v42 = vadd.f32 %v4505_v29, %v1797_v40 }
 0x11c   :  { %v2285_v43 = vmax.f32 %v1203_v37, 0.0  ;;  %v2405_v44 = vmax.f32 %v1803_v38, 0.0 }
 0x11d   :  { %v2284_v45 = vmax.f32 %v1198_v41, 0.0  ;;  %v2404_v46 = vmax.f32 %v1798_v42, 0.0  ;;  %v3285_v47 = vpop.f32.mrb[30].mxu0  ;;  %v3465_v48 = vpop.f32.mrb[30].mxu1 }
 0x11e   :  { %2526 = vst.msk [vmem:[%s5821_s3 + $0xe8] sm:$0xff] %vm2496_vm2, %v2285_v43  ;;  %2646 = vst.msk [vmem:[%s5821_s3 + $0x4a8] sm:$0xff] %vm2496_vm2, %v2405_v44  ;;  %v1213_v49 = vadd.f32 %v3285_v47, %v4505_v29  ;;  %v1813_v50 = vadd.f32 %v3465_v48, %v4505_v29  ;;  %v1207_v51 = vpop.f32.mrb[31].mxu0  ;;  %v1807_v52 = vpop.f32.mrb[31].mxu1 }
 0x11f   :  { %2525 = vst.msk [vmem:[%s5821_s3 + $0xe0] sm:$0xff] %vm2496_vm2, %v2284_v45  ;;  %2645 = vst.msk [vmem:[%s5821_s3 + $0x4a0] sm:$0xff] %vm2496_vm2, %v2404_v46  ;;  %v1208_v53 = vadd.f32 %v4505_v29, %v1207_v51  ;;  %v1808_v54 = vadd.f32 %v4505_v29, %v1807_v52 }
 0x120   :  { %v2287_v55 = vmax.f32 %v1213_v49, 0.0  ;;  %v2407_v56 = vmax.f32 %v1813_v50, 0.0 }
 0x121   :  { %v2286_v57 = vmax.f32 %v1208_v53, 0.0  ;;  %v2406_v58 = vmax.f32 %v1808_v54, 0.0  ;;  %v3288_v59 = vpop.f32.mrb[32].mxu0  ;;  %v3468_v60 = vpop.f32.mrb[32].mxu1 }
 0x122   :  { %2528 = vst.msk [vmem:[%s5821_s3 + $0xf8] sm:$0xff] %vm2496_vm2, %v2287_v55  ;;  %2648 = vst.msk [vmem:[%s5821_s3 + $0x4b8] sm:$0xff] %vm2496_vm2, %v2407_v56  ;;  %v1223_v61 = vadd.f32 %v3288_v59, %v4505_v29  ;;  %v1823_v62 = vadd.f32 %v3468_v60, %v4505_v29  ;;  %v1217_v63 = vpop.f32.mrb[33].mxu0  ;;  %v1817_v0 = vpop.f32.mrb[33].mxu1 }
 0x123   :  { %2527 = vst.msk [vmem:[%s5821_s3 + $0xf0] sm:$0xff] %vm2496_vm2, %v2286_v57  ;;  %2647 = vst.msk [vmem:[%s5821_s3 + $0x4b0] sm:$0xff] %vm2496_vm2, %v2406_v58  ;;  %v1218_v1 = vadd.f32 %v4505_v29, %v1217_v63  ;;  %v1818_v2 = vadd.f32 %v4505_v29, %v1817_v0 }
 0x124   :  { %v2289_v3 = vmax.f32 %v1223_v61, 0.0  ;;  %v2409_v4 = vmax.f32 %v1823_v62, 0.0 }
 0x125   :  { %v2288_v5 = vmax.f32 %v1218_v1, 0.0  ;;  %v2408_v6 = vmax.f32 %v1818_v2, 0.0  ;;  %v3291_v7 = vpop.f32.mrb[34].mxu0  ;;  %v3471_v8 = vpop.f32.mrb[34].mxu1 }
 0x126   :  { %2530 = vst.msk [vmem:[%s5821_s3 + $0x108] sm:$0xff] %vm2496_vm2, %v2289_v3  ;;  %2650 = vst.msk [vmem:[%s5821_s3 + $0x4c8] sm:$0xff] %vm2496_vm2, %v2409_v4  ;;  %v1233_v9 = vadd.f32 %v3291_v7, %v4505_v29  ;;  %v1833_v10 = vadd.f32 %v3471_v8, %v4505_v29  ;;  %v1227_v11 = vpop.f32.mrb[35].mxu0  ;;  %v1827_v12 = vpop.f32.mrb[35].mxu1 }
 0x127   :  { %2529 = vst.msk [vmem:[%s5821_s3 + $0x100] sm:$0xff] %vm2496_vm2, %v2288_v5  ;;  %2649 = vst.msk [vmem:[%s5821_s3 + $0x4c0] sm:$0xff] %vm2496_vm2, %v2408_v6  ;;  %v1228_v13 = vadd.f32 %v4505_v29, %v1227_v11  ;;  %v1828_v14 = vadd.f32 %v4505_v29, %v1827_v12 }
 0x128   :  { %v2291_v15 = vmax.f32 %v1233_v9, 0.0  ;;  %v2411_v16 = vmax.f32 %v1833_v10, 0.0 }
 0x129   :  { %v2290_v17 = vmax.f32 %v1228_v13, 0.0  ;;  %v2410_v18 = vmax.f32 %v1828_v14, 0.0  ;;  %v3294_v19 = vpop.f32.mrb[36].mxu0  ;;  %v3474_v20 = vpop.f32.mrb[36].mxu1 }
 0x12a   :  { %2532 = vst.msk [vmem:[%s5821_s3 + $0x118] sm:$0xff] %vm2496_vm2, %v2291_v15  ;;  %2652 = vst.msk [vmem:[%s5821_s3 + $0x4d8] sm:$0xff] %vm2496_vm2, %v2411_v16  ;;  %v1243_v21 = vadd.f32 %v3294_v19, %v4505_v29  ;;  %v1843_v22 = vadd.f32 %v3474_v20, %v4505_v29  ;;  %v1237_v23 = vpop.f32.mrb[37].mxu0  ;;  %v1837_v24 = vpop.f32.mrb[37].mxu1 }
 0x12b   :  { %2531 = vst.msk [vmem:[%s5821_s3 + $0x110] sm:$0xff] %vm2496_vm2, %v2290_v17  ;;  %2651 = vst.msk [vmem:[%s5821_s3 + $0x4d0] sm:$0xff] %vm2496_vm2, %v2410_v18  ;;  %v1238_v25 = vadd.f32 %v4505_v29, %v1237_v23  ;;  %v1838_v26 = vadd.f32 %v4505_v29, %v1837_v24 }
 0x12c   :  { %v2293_v27 = vmax.f32 %v1243_v21, 0.0  ;;  %v2413_v28 = vmax.f32 %v1843_v22, 0.0 }
 0x12d   :  { %v2292_v30 = vmax.f32 %v1238_v25, 0.0  ;;  %v2412_v31 = vmax.f32 %v1838_v26, 0.0  ;;  %v3297_v32 = vpop.f32.mrb[38].mxu0  ;;  %v3477_v33 = vpop.f32.mrb[38].mxu1 }
 0x12e   :  { %2534 = vst.msk [vmem:[%s5821_s3 + $0x128] sm:$0xff] %vm2496_vm2, %v2293_v27  ;;  %2654 = vst.msk [vmem:[%s5821_s3 + $0x4e8] sm:$0xff] %vm2496_vm2, %v2413_v28  ;;  %v1253_v34 = vadd.f32 %v3297_v32, %v4505_v29  ;;  %v1853_v35 = vadd.f32 %v3477_v33, %v4505_v29  ;;  %v1247_v36 = vpop.f32.mrb[39].mxu0  ;;  %v1847_v37 = vpop.f32.mrb[39].mxu1 }
 0x12f   :  { %2533 = vst.msk [vmem:[%s5821_s3 + $0x120] sm:$0xff] %vm2496_vm2, %v2292_v30  ;;  %2653 = vst.msk [vmem:[%s5821_s3 + $0x4e0] sm:$0xff] %vm2496_vm2, %v2412_v31  ;;  %v1248_v38 = vadd.f32 %v4505_v29, %v1247_v36  ;;  %v1848_v39 = vadd.f32 %v4505_v29, %v1847_v37 }
 0x130   :  { %v2295_v40 = vmax.f32 %v1253_v34, 0.0  ;;  %v2415_v41 = vmax.f32 %v1853_v35, 0.0 }
 0x131   :  { %v2294_v42 = vmax.f32 %v1248_v38, 0.0  ;;  %v2414_v43 = vmax.f32 %v1848_v39, 0.0  ;;  %v3300_v44 = vpop.f32.mrb[40].mxu0  ;;  %v3480_v45 = vpop.f32.mrb[40].mxu1 }
 0x132   :  { %2536 = vst.msk [vmem:[%s5821_s3 + $0x138] sm:$0xff] %vm2496_vm2, %v2295_v40  ;;  %2656 = vst.msk [vmem:[%s5821_s3 + $0x4f8] sm:$0xff] %vm2496_vm2, %v2415_v41  ;;  %v1263_v46 = vadd.f32 %v3300_v44, %v4505_v29  ;;  %v1863_v47 = vadd.f32 %v3480_v45, %v4505_v29  ;;  %v1257_v48 = vpop.f32.mrb[41].mxu0  ;;  %v1857_v49 = vpop.f32.mrb[41].mxu1 }
 0x133   :  { %2535 = vst.msk [vmem:[%s5821_s3 + $0x130] sm:$0xff] %vm2496_vm2, %v2294_v42  ;;  %2655 = vst.msk [vmem:[%s5821_s3 + $0x4f0] sm:$0xff] %vm2496_vm2, %v2414_v43  ;;  %v1258_v50 = vadd.f32 %v4505_v29, %v1257_v48  ;;  %v1858_v51 = vadd.f32 %v4505_v29, %v1857_v49 }
 0x134   :  { %v2297_v52 = vmax.f32 %v1263_v46, 0.0  ;;  %v2417_v53 = vmax.f32 %v1863_v47, 0.0 }
 0x135   :  { %v2296_v54 = vmax.f32 %v1258_v50, 0.0  ;;  %v2416_v55 = vmax.f32 %v1858_v51, 0.0  ;;  %v3303_v56 = vpop.f32.mrb[42].mxu0  ;;  %v3483_v57 = vpop.f32.mrb[42].mxu1 }
 0x136   :  { %2538 = vst.msk [vmem:[%s5821_s3 + $0x148] sm:$0xff] %vm2496_vm2, %v2297_v52  ;;  %2658 = vst.msk [vmem:[%s5821_s3 + $0x508] sm:$0xff] %vm2496_vm2, %v2417_v53  ;;  %v1273_v58 = vadd.f32 %v3303_v56, %v4505_v29  ;;  %v1873_v59 = vadd.f32 %v3483_v57, %v4505_v29  ;;  %v1267_v60 = vpop.f32.mrb[43].mxu0  ;;  %v1867_v61 = vpop.f32.mrb[43].mxu1 }
 0x137   :  { %2537 = vst.msk [vmem:[%s5821_s3 + $0x140] sm:$0xff] %vm2496_vm2, %v2296_v54  ;;  %2657 = vst.msk [vmem:[%s5821_s3 + $0x500] sm:$0xff] %vm2496_vm2, %v2416_v55  ;;  %v1268_v62 = vadd.f32 %v4505_v29, %v1267_v60  ;;  %v1868_v63 = vadd.f32 %v4505_v29, %v1867_v61 }
 0x138   :  { %v2299_v0 = vmax.f32 %v1273_v58, 0.0  ;;  %v2419_v1 = vmax.f32 %v1873_v59, 0.0 }
 0x139   :  { %v2298_v2 = vmax.f32 %v1268_v62, 0.0  ;;  %v2418_v3 = vmax.f32 %v1868_v63, 0.0  ;;  %v3306_v4 = vpop.f32.mrb[44].mxu0  ;;  %v3486_v5 = vpop.f32.mrb[44].mxu1 }
 0x13a   :  { %2540 = vst.msk [vmem:[%s5821_s3 + $0x158] sm:$0xff] %vm2496_vm2, %v2299_v0  ;;  %2660 = vst.msk [vmem:[%s5821_s3 + $0x518] sm:$0xff] %vm2496_vm2, %v2419_v1  ;;  %v1283_v6 = vadd.f32 %v3306_v4, %v4505_v29  ;;  %v1883_v7 = vadd.f32 %v3486_v5, %v4505_v29  ;;  %v1277_v8 = vpop.f32.mrb[45].mxu0  ;;  %v1877_v9 = vpop.f32.mrb[45].mxu1 }
 0x13b   :  { %2539 = vst.msk [vmem:[%s5821_s3 + $0x150] sm:$0xff] %vm2496_vm2, %v2298_v2  ;;  %2659 = vst.msk [vmem:[%s5821_s3 + $0x510] sm:$0xff] %vm2496_vm2, %v2418_v3  ;;  %v1278_v10 = vadd.f32 %v4505_v29, %v1277_v8  ;;  %v1878_v11 = vadd.f32 %v4505_v29, %v1877_v9 }
 0x13c   :  { %v2301_v12 = vmax.f32 %v1283_v6, 0.0  ;;  %v2421_v13 = vmax.f32 %v1883_v7, 0.0 }
 0x13d   :  { %v2300_v14 = vmax.f32 %v1278_v10, 0.0  ;;  %v2420_v15 = vmax.f32 %v1878_v11, 0.0  ;;  %v3309_v16 = vpop.f32.mrb[46].mxu0  ;;  %v3489_v17 = vpop.f32.mrb[46].mxu1 }
 0x13e   :  { %2542 = vst.msk [vmem:[%s5821_s3 + $0x168] sm:$0xff] %vm2496_vm2, %v2301_v12  ;;  %2662 = vst.msk [vmem:[%s5821_s3 + $0x528] sm:$0xff] %vm2496_vm2, %v2421_v13  ;;  %v1293_v18 = vadd.f32 %v3309_v16, %v4505_v29  ;;  %v1893_v19 = vadd.f32 %v3489_v17, %v4505_v29  ;;  %v1287_v20 = vpop.f32.mrb[47].mxu0  ;;  %v1887_v21 = vpop.f32.mrb[47].mxu1 }
 0x13f   :  { %2541 = vst.msk [vmem:[%s5821_s3 + $0x160] sm:$0xff] %vm2496_vm2, %v2300_v14  ;;  %2661 = vst.msk [vmem:[%s5821_s3 + $0x520] sm:$0xff] %vm2496_vm2, %v2420_v15  ;;  %v1288_v22 = vadd.f32 %v4505_v29, %v1287_v20  ;;  %v1888_v23 = vadd.f32 %v4505_v29, %v1887_v21  ;;  %v5179_v20 = vld [vmem:[%s5820_s2] ss:$0 sm:$0xff] }
 0x140   :  { %v2303_v24 = vmax.f32 %v1293_v18, 0.0  ;;  %v2423_v25 = vmax.f32 %v1893_v19, 0.0 }
 0x141   :  { %v2302_v26 = vmax.f32 %v1288_v22, 0.0  ;;  %v2422_v27 = vmax.f32 %v1888_v23, 0.0  ;;  %v3312_v28 = vpop.f32.mrb[48].mxu0  ;;  %v3492_v30 = vpop.f32.mrb[48].mxu1 }
 0x142   :  { %2544 = vst.msk [vmem:[%s5821_s3 + $0x178] sm:$0xff] %vm2496_vm2, %v2303_v24  ;;  %2664 = vst.msk [vmem:[%s5821_s3 + $0x538] sm:$0xff] %vm2496_vm2, %v2423_v25  ;;  %v1303_v31 = vadd.f32 %v3312_v28, %v4505_v29  ;;  %v1903_v32 = vadd.f32 %v3492_v30, %v4505_v29  ;;  %v1297_v33 = vpop.f32.mrb[49].mxu0  ;;  %v1897_v34 = vpop.f32.mrb[49].mxu1 }
 0x143   :  { %2543 = vst.msk [vmem:[%s5821_s3 + $0x170] sm:$0xff] %vm2496_vm2, %v2302_v26  ;;  %2663 = vst.msk [vmem:[%s5821_s3 + $0x530] sm:$0xff] %vm2496_vm2, %v2422_v27  ;;  %v1298_v35 = vadd.f32 %v4505_v29, %v1297_v33  ;;  %v1898_v36 = vadd.f32 %v4505_v29, %v1897_v34 }
 0x144   :  { %v2305_v37 = vmax.f32 %v1303_v31, 0.0  ;;  %v2425_v38 = vmax.f32 %v1903_v32, 0.0 }
 0x145   :  { %v2304_v39 = vmax.f32 %v1298_v35, 0.0  ;;  %v2424_v40 = vmax.f32 %v1898_v36, 0.0  ;;  %v3315_v41 = vpop.f32.mrb[50].mxu0  ;;  %v3495_v42 = vpop.f32.mrb[50].mxu1 }
 0x146   :  { %2546 = vst.msk [vmem:[%s5821_s3 + $0x188] sm:$0xff] %vm2496_vm2, %v2305_v37  ;;  %2666 = vst.msk [vmem:[%s5821_s3 + $0x548] sm:$0xff] %vm2496_vm2, %v2425_v38  ;;  %v1313_v43 = vadd.f32 %v3315_v41, %v4505_v29  ;;  %v1913_v44 = vadd.f32 %v3495_v42, %v4505_v29  ;;  %v1307_v45 = vpop.f32.mrb[51].mxu0  ;;  %v1907_v46 = vpop.f32.mrb[51].mxu1 }
 0x147   :  { %2545 = vst.msk [vmem:[%s5821_s3 + $0x180] sm:$0xff] %vm2496_vm2, %v2304_v39  ;;  %2665 = vst.msk [vmem:[%s5821_s3 + $0x540] sm:$0xff] %vm2496_vm2, %v2424_v40  ;;  %v1308_v47 = vadd.f32 %v4505_v29, %v1307_v45  ;;  %v1908_v48 = vadd.f32 %v4505_v29, %v1907_v46 }
 0x148   :  { %v2307_v49 = vmax.f32 %v1313_v43, 0.0  ;;  %v2427_v50 = vmax.f32 %v1913_v44, 0.0 }
 0x149   :  { %v2306_v51 = vmax.f32 %v1308_v47, 0.0  ;;  %v2426_v52 = vmax.f32 %v1908_v48, 0.0  ;;  %v3318_v53 = vpop.f32.mrb[52].mxu0  ;;  %v3498_v54 = vpop.f32.mrb[52].mxu1 }
 0x14a   :  { %2548 = vst.msk [vmem:[%s5821_s3 + $0x198] sm:$0xff] %vm2496_vm2, %v2307_v49  ;;  %2668 = vst.msk [vmem:[%s5821_s3 + $0x558] sm:$0xff] %vm2496_vm2, %v2427_v50  ;;  %v1323_v55 = vadd.f32 %v3318_v53, %v4505_v29  ;;  %v1923_v56 = vadd.f32 %v3498_v54, %v4505_v29  ;;  %v1317_v57 = vpop.f32.mrb[53].mxu0  ;;  %v1917_v58 = vpop.f32.mrb[53].mxu1 }
 0x14b   :  { %2547 = vst.msk [vmem:[%s5821_s3 + $0x190] sm:$0xff] %vm2496_vm2, %v2306_v51  ;;  %2667 = vst.msk [vmem:[%s5821_s3 + $0x550] sm:$0xff] %vm2496_vm2, %v2426_v52  ;;  %v1318_v59 = vadd.f32 %v4505_v29, %v1317_v57  ;;  %v1918_v60 = vadd.f32 %v4505_v29, %v1917_v58 }
 0x14c   :  { %v2309_v61 = vmax.f32 %v1323_v55, 0.0  ;;  %v2429_v62 = vmax.f32 %v1923_v56, 0.0 }
 0x14d   :  { %v2308_v63 = vmax.f32 %v1318_v59, 0.0  ;;  %v2428_v0 = vmax.f32 %v1918_v60, 0.0  ;;  %v3321_v1 = vpop.f32.mrb[54].mxu0  ;;  %v3501_v2 = vpop.f32.mrb[54].mxu1 }
 0x14e   :  { %2550 = vst.msk [vmem:[%s5821_s3 + $0x1a8] sm:$0xff] %vm2496_vm2, %v2309_v61  ;;  %2670 = vst.msk [vmem:[%s5821_s3 + $0x568] sm:$0xff] %vm2496_vm2, %v2429_v62  ;;  %v1333_v3 = vadd.f32 %v3321_v1, %v4505_v29  ;;  %v1933_v4 = vadd.f32 %v3501_v2, %v4505_v29  ;;  %v1327_v5 = vpop.f32.mrb[55].mxu0  ;;  %v1927_v6 = vpop.f32.mrb[55].mxu1 }
 0x14f   :  { %2549 = vst.msk [vmem:[%s5821_s3 + $0x1a0] sm:$0xff] %vm2496_vm2, %v2308_v63  ;;  %2669 = vst.msk [vmem:[%s5821_s3 + $0x560] sm:$0xff] %vm2496_vm2, %v2428_v0  ;;  %v1328_v7 = vadd.f32 %v4505_v29, %v1327_v5  ;;  %v1928_v8 = vadd.f32 %v4505_v29, %v1927_v6 }
 0x150   :  { %v2311_v9 = vmax.f32 %v1333_v3, 0.0  ;;  %v2431_v10 = vmax.f32 %v1933_v4, 0.0 }
 0x151   :  { %v2310_v11 = vmax.f32 %v1328_v7, 0.0  ;;  %v2430_v12 = vmax.f32 %v1928_v8, 0.0  ;;  %v3324_v13 = vpop.f32.mrb[56].mxu0  ;;  %v3504_v14 = vpop.f32.mrb[56].mxu1 }
 0x152   :  { %2552 = vst.msk [vmem:[%s5821_s3 + $0x1b8] sm:$0xff] %vm2496_vm2, %v2311_v9  ;;  %2672 = vst.msk [vmem:[%s5821_s3 + $0x578] sm:$0xff] %vm2496_vm2, %v2431_v10  ;;  %v1343_v15 = vadd.f32 %v3324_v13, %v4505_v29  ;;  %v1943_v16 = vadd.f32 %v3504_v14, %v4505_v29  ;;  %v1337_v17 = vpop.f32.mrb[57].mxu0  ;;  %v1937_v18 = vpop.f32.mrb[57].mxu1 }
 0x153   :  { %2551 = vst.msk [vmem:[%s5821_s3 + $0x1b0] sm:$0xff] %vm2496_vm2, %v2310_v11  ;;  %2671 = vst.msk [vmem:[%s5821_s3 + $0x570] sm:$0xff] %vm2496_vm2, %v2430_v12  ;;  %v1338_v19 = vadd.f32 %v4505_v29, %v1337_v17  ;;  %v1938_v21 = vadd.f32 %v5179_v20, %v1937_v18 }
 0x154   :  { %v2313_v22 = vmax.f32 %v1343_v15, 0.0  ;;  %v2433_v23 = vmax.f32 %v1943_v16, 0.0 }
 0x155   :  { %v2312_v24 = vmax.f32 %v1338_v19, 0.0  ;;  %v2432_v25 = vmax.f32 %v1938_v21, 0.0  ;;  %v3327_v26 = vpop.f32.mrb[58].mxu0  ;;  %v3507_v27 = vpop.f32.mrb[58].mxu1 }
 0x156   :  { %2554 = vst.msk [vmem:[%s5821_s3 + $0x1c8] sm:$0xff] %vm2496_vm2, %v2313_v22  ;;  %2674 = vst.msk [vmem:[%s5821_s3 + $0x588] sm:$0xff] %vm2496_vm2, %v2433_v23  ;;  %v1353_v29 = vadd.f32 %v5179_v20, %v3327_v26  ;;  %v1953_v28 = vadd.f32 %v5179_v20, %v3507_v27  ;;  %v1347_v30 = vpop.f32.mrb[59].mxu0  ;;  %v1947_v31 = vpop.f32.mrb[59].mxu1 }
 0x157   :  { %2553 = vst.msk [vmem:[%s5821_s3 + $0x1c0] sm:$0xff] %vm2496_vm2, %v2312_v24  ;;  %2673 = vst.msk [vmem:[%s5821_s3 + $0x580] sm:$0xff] %vm2496_vm2, %v2432_v25  ;;  %v1348_v32 = vadd.f32 %v5179_v20, %v1347_v30  ;;  %v1948_v33 = vadd.f32 %v5179_v20, %v1947_v31 }
 0x158   :  { %v2315_v34 = vmax.f32 %v1353_v29, 0.0  ;;  %v2435_v35 = vmax.f32 %v1953_v28, 0.0 }
 0x159   :  { %v2314_v36 = vmax.f32 %v1348_v32, 0.0  ;;  %v2434_v37 = vmax.f32 %v1948_v33, 0.0  ;;  %v3330_v38 = vpop.f32.mrb[60].mxu0  ;;  %v3510_v39 = vpop.f32.mrb[60].mxu1 }
 0x15a   :  { %2556 = vst.msk [vmem:[%s5821_s3 + $0x1d8] sm:$0xff] %vm2496_vm2, %v2315_v34  ;;  %2676 = vst.msk [vmem:[%s5821_s3 + $0x598] sm:$0xff] %vm2496_vm2, %v2435_v35  ;;  %v1363_v40 = vadd.f32 %v5179_v20, %v3330_v38  ;;  %v1963_v41 = vadd.f32 %v5179_v20, %v3510_v39  ;;  %v1357_v42 = vpop.f32.mrb[61].mxu0  ;;  %v1957_v43 = vpop.f32.mrb[61].mxu1 }
 0x15b   :  { %2555 = vst.msk [vmem:[%s5821_s3 + $0x1d0] sm:$0xff] %vm2496_vm2, %v2314_v36  ;;  %2675 = vst.msk [vmem:[%s5821_s3 + $0x590] sm:$0xff] %vm2496_vm2, %v2434_v37  ;;  %v1358_v44 = vadd.f32 %v5179_v20, %v1357_v42  ;;  %v1958_v45 = vadd.f32 %v5179_v20, %v1957_v43 }
 0x15c   :  { %v2317_v46 = vmax.f32 %v1363_v40, 0.0  ;;  %v2437_v47 = vmax.f32 %v1963_v41, 0.0 }
 0x15d   :  { %v2316_v48 = vmax.f32 %v1358_v44, 0.0  ;;  %v2436_v49 = vmax.f32 %v1958_v45, 0.0  ;;  %v3333_v50 = vpop.f32.mrb[62].mxu0  ;;  %v3513_v51 = vpop.f32.mrb[62].mxu1 }
 0x15e   :  { %2558 = vst.msk [vmem:[%s5821_s3 + $0x1e8] sm:$0xff] %vm2496_vm2, %v2317_v46  ;;  %2678 = vst.msk [vmem:[%s5821_s3 + $0x5a8] sm:$0xff] %vm2496_vm2, %v2437_v47  ;;  %v1373_v52 = vadd.f32 %v5179_v20, %v3333_v50  ;;  %v1973_v53 = vadd.f32 %v5179_v20, %v3513_v51  ;;  %v1367_v54 = vpop.f32.mrb[63].mxu0  ;;  %v1967_v55 = vpop.f32.mrb[63].mxu1 }
 0x15f   :  { %2557 = vst.msk [vmem:[%s5821_s3 + $0x1e0] sm:$0xff] %vm2496_vm2, %v2316_v48  ;;  %2677 = vst.msk [vmem:[%s5821_s3 + $0x5a0] sm:$0xff] %vm2496_vm2, %v2436_v49  ;;  %v1368_v56 = vadd.f32 %v5179_v20, %v1367_v54  ;;  %v1968_v57 = vadd.f32 %v5179_v20, %v1967_v55 }
 0x160   :  { %v2319_v58 = vmax.f32 %v1373_v52, 0.0  ;;  %v2439_v59 = vmax.f32 %v1973_v53, 0.0 }
 0x161   :  { %v2318_v60 = vmax.f32 %v1368_v56, 0.0  ;;  %v2438_v61 = vmax.f32 %v1968_v57, 0.0  ;;  %v3336_v62 = vpop.f32.mrb[64].mxu0  ;;  %v3516_v63 = vpop.f32.mrb[64].mxu1 }
 0x162   :  { %2560 = vst.msk [vmem:[%s5821_s3 + $0x1f8] sm:$0xff] %vm2496_vm2, %v2319_v58  ;;  %2680 = vst.msk [vmem:[%s5821_s3 + $0x5b8] sm:$0xff] %vm2496_vm2, %v2439_v59  ;;  %v1383_v0 = vadd.f32 %v5179_v20, %v3336_v62  ;;  %v1983_v1 = vadd.f32 %v5179_v20, %v3516_v63  ;;  %v1377_v2 = vpop.f32.mrb[65].mxu0  ;;  %v1977_v3 = vpop.f32.mrb[65].mxu1 }
 0x163   :  { %2559 = vst.msk [vmem:[%s5821_s3 + $0x1f0] sm:$0xff] %vm2496_vm2, %v2318_v60  ;;  %2679 = vst.msk [vmem:[%s5821_s3 + $0x5b0] sm:$0xff] %vm2496_vm2, %v2438_v61  ;;  %v1378_v4 = vadd.f32 %v5179_v20, %v1377_v2  ;;  %v1978_v5 = vadd.f32 %v5179_v20, %v1977_v3 }
 0x164   :  { %v2321_v6 = vmax.f32 %v1383_v0, 0.0  ;;  %v2441_v7 = vmax.f32 %v1983_v1, 0.0 }
 0x165   :  { %v2320_v8 = vmax.f32 %v1378_v4, 0.0  ;;  %v2440_v9 = vmax.f32 %v1978_v5, 0.0  ;;  %v3339_v10 = vpop.f32.mrb[66].mxu0  ;;  %v3519_v11 = vpop.f32.mrb[66].mxu1 }
 0x166   :  { %2562 = vst.msk [vmem:[%s5821_s3 + $0x208] sm:$0xff] %vm2496_vm2, %v2321_v6  ;;  %2682 = vst.msk [vmem:[%s5821_s3 + $0x5c8] sm:$0xff] %vm2496_vm2, %v2441_v7  ;;  %v1393_v12 = vadd.f32 %v5179_v20, %v3339_v10  ;;  %v1993_v13 = vadd.f32 %v5179_v20, %v3519_v11  ;;  %v1387_v14 = vpop.f32.mrb[67].mxu0  ;;  %v1987_v15 = vpop.f32.mrb[67].mxu1 }
 0x167   :  { %2561 = vst.msk [vmem:[%s5821_s3 + $0x200] sm:$0xff] %vm2496_vm2, %v2320_v8  ;;  %2681 = vst.msk [vmem:[%s5821_s3 + $0x5c0] sm:$0xff] %vm2496_vm2, %v2440_v9  ;;  %v1388_v16 = vadd.f32 %v5179_v20, %v1387_v14  ;;  %v1988_v17 = vadd.f32 %v5179_v20, %v1987_v15 }
 0x168   :  { %v2323_v18 = vmax.f32 %v1393_v12, 0.0  ;;  %v2443_v19 = vmax.f32 %v1993_v13, 0.0 }
 0x169   :  { %v2322_v21 = vmax.f32 %v1388_v16, 0.0  ;;  %v2442_v22 = vmax.f32 %v1988_v17, 0.0  ;;  %v3342_v23 = vpop.f32.mrb[68].mxu0  ;;  %v3522_v24 = vpop.f32.mrb[68].mxu1 }
 0x16a   :  { %2564 = vst.msk [vmem:[%s5821_s3 + $0x218] sm:$0xff] %vm2496_vm2, %v2323_v18  ;;  %2684 = vst.msk [vmem:[%s5821_s3 + $0x5d8] sm:$0xff] %vm2496_vm2, %v2443_v19  ;;  %v1403_v25 = vadd.f32 %v5179_v20, %v3342_v23  ;;  %v2003_v26 = vadd.f32 %v5179_v20, %v3522_v24  ;;  %v1397_v27 = vpop.f32.mrb[69].mxu0  ;;  %v1997_v29 = vpop.f32.mrb[69].mxu1 }
 0x16b   :  { %2563 = vst.msk [vmem:[%s5821_s3 + $0x210] sm:$0xff] %vm2496_vm2, %v2322_v21  ;;  %2683 = vst.msk [vmem:[%s5821_s3 + $0x5d0] sm:$0xff] %vm2496_vm2, %v2442_v22  ;;  %v1398_v28 = vadd.f32 %v5179_v20, %v1397_v27  ;;  %v1998_v30 = vadd.f32 %v5179_v20, %v1997_v29 }
 0x16c   :  { %v2325_v31 = vmax.f32 %v1403_v25, 0.0  ;;  %v2445_v32 = vmax.f32 %v2003_v26, 0.0 }
 0x16d   :  { %v2324_v33 = vmax.f32 %v1398_v28, 0.0  ;;  %v2444_v34 = vmax.f32 %v1998_v30, 0.0  ;;  %v3345_v35 = vpop.f32.mrb[70].mxu0  ;;  %v3525_v36 = vpop.f32.mrb[70].mxu1 }
 0x16e   :  { %2566 = vst.msk [vmem:[%s5821_s3 + $0x228] sm:$0xff] %vm2496_vm2, %v2325_v31  ;;  %2686 = vst.msk [vmem:[%s5821_s3 + $0x5e8] sm:$0xff] %vm2496_vm2, %v2445_v32  ;;  %v1413_v37 = vadd.f32 %v5179_v20, %v3345_v35  ;;  %v2013_v38 = vadd.f32 %v5179_v20, %v3525_v36  ;;  %v1407_v39 = vpop.f32.mrb[71].mxu0  ;;  %v2007_v40 = vpop.f32.mrb[71].mxu1 }
 0x16f   :  { %2565 = vst.msk [vmem:[%s5821_s3 + $0x220] sm:$0xff] %vm2496_vm2, %v2324_v33  ;;  %2685 = vst.msk [vmem:[%s5821_s3 + $0x5e0] sm:$0xff] %vm2496_vm2, %v2444_v34  ;;  %v1408_v41 = vadd.f32 %v5179_v20, %v1407_v39  ;;  %v2008_v42 = vadd.f32 %v5179_v20, %v2007_v40 }
 0x170   :  { %v2327_v43 = vmax.f32 %v1413_v37, 0.0  ;;  %v2447_v44 = vmax.f32 %v2013_v38, 0.0 }
 0x171   :  { %v2326_v45 = vmax.f32 %v1408_v41, 0.0  ;;  %v2446_v46 = vmax.f32 %v2008_v42, 0.0  ;;  %v3348_v47 = vpop.f32.mrb[72].mxu0  ;;  %v3528_v48 = vpop.f32.mrb[72].mxu1 }
 0x172   :  { %2568 = vst.msk [vmem:[%s5821_s3 + $0x238] sm:$0xff] %vm2496_vm2, %v2327_v43  ;;  %2688 = vst.msk [vmem:[%s5821_s3 + $0x5f8] sm:$0xff] %vm2496_vm2, %v2447_v44  ;;  %v1423_v49 = vadd.f32 %v5179_v20, %v3348_v47  ;;  %v2023_v50 = vadd.f32 %v5179_v20, %v3528_v48  ;;  %v1417_v51 = vpop.f32.mrb[73].mxu0  ;;  %v2017_v52 = vpop.f32.mrb[73].mxu1 }
 0x173   :  { %2567 = vst.msk [vmem:[%s5821_s3 + $0x230] sm:$0xff] %vm2496_vm2, %v2326_v45  ;;  %2687 = vst.msk [vmem:[%s5821_s3 + $0x5f0] sm:$0xff] %vm2496_vm2, %v2446_v46  ;;  %v1418_v53 = vadd.f32 %v5179_v20, %v1417_v51  ;;  %v2018_v54 = vadd.f32 %v5179_v20, %v2017_v52 }
 0x174   :  { %v2329_v55 = vmax.f32 %v1423_v49, 0.0  ;;  %v2449_v56 = vmax.f32 %v2023_v50, 0.0 }
 0x175   :  { %v2328_v57 = vmax.f32 %v1418_v53, 0.0  ;;  %v2448_v58 = vmax.f32 %v2018_v54, 0.0  ;;  %v3351_v59 = vpop.f32.mrb[74].mxu0  ;;  %v3531_v60 = vpop.f32.mrb[74].mxu1 }
 0x176   :  { %2570 = vst.msk [vmem:[%s5821_s3 + $0x248] sm:$0xff] %vm2496_vm2, %v2329_v55  ;;  %2690 = vst.msk [vmem:[%s5821_s3 + $0x608] sm:$0xff] %vm2496_vm2, %v2449_v56  ;;  %v1433_v61 = vadd.f32 %v5179_v20, %v3351_v59  ;;  %v2033_v62 = vadd.f32 %v5179_v20, %v3531_v60  ;;  %v1427_v63 = vpop.f32.mrb[75].mxu0  ;;  %v2027_v0 = vpop.f32.mrb[75].mxu1 }
 0x177   :  { %2569 = vst.msk [vmem:[%s5821_s3 + $0x240] sm:$0xff] %vm2496_vm2, %v2328_v57  ;;  %2689 = vst.msk [vmem:[%s5821_s3 + $0x600] sm:$0xff] %vm2496_vm2, %v2448_v58  ;;  %v1428_v1 = vadd.f32 %v5179_v20, %v1427_v63  ;;  %v2028_v2 = vadd.f32 %v5179_v20, %v2027_v0 }
 0x178   :  { %v2331_v3 = vmax.f32 %v1433_v61, 0.0  ;;  %v2451_v4 = vmax.f32 %v2033_v62, 0.0 }
 0x179   :  { %v2330_v5 = vmax.f32 %v1428_v1, 0.0  ;;  %v2450_v6 = vmax.f32 %v2028_v2, 0.0  ;;  %v3354_v7 = vpop.f32.mrb[76].mxu0  ;;  %v3534_v8 = vpop.f32.mrb[76].mxu1 }
 0x17a   :  { %2572 = vst.msk [vmem:[%s5821_s3 + $0x258] sm:$0xff] %vm2496_vm2, %v2331_v3  ;;  %2692 = vst.msk [vmem:[%s5821_s3 + $0x618] sm:$0xff] %vm2496_vm2, %v2451_v4  ;;  %v1443_v9 = vadd.f32 %v5179_v20, %v3354_v7  ;;  %v2043_v10 = vadd.f32 %v5179_v20, %v3534_v8  ;;  %v1437_v11 = vpop.f32.mrb[77].mxu0  ;;  %v2037_v12 = vpop.f32.mrb[77].mxu1 }
 0x17b   :  { %2571 = vst.msk [vmem:[%s5821_s3 + $0x250] sm:$0xff] %vm2496_vm2, %v2330_v5  ;;  %2691 = vst.msk [vmem:[%s5821_s3 + $0x610] sm:$0xff] %vm2496_vm2, %v2450_v6  ;;  %v1438_v13 = vadd.f32 %v5179_v20, %v1437_v11  ;;  %v2038_v14 = vadd.f32 %v5179_v20, %v2037_v12 }
 0x17c   :  { %v2333_v15 = vmax.f32 %v1443_v9, 0.0  ;;  %v2453_v16 = vmax.f32 %v2043_v10, 0.0 }
 0x17d   :  { %v2332_v17 = vmax.f32 %v1438_v13, 0.0  ;;  %v2452_v18 = vmax.f32 %v2038_v14, 0.0  ;;  %v3357_v19 = vpop.f32.mrb[78].mxu0  ;;  %v3537_v21 = vpop.f32.mrb[78].mxu1 }
 0x17e   :  { %2574 = vst.msk [vmem:[%s5821_s3 + $0x268] sm:$0xff] %vm2496_vm2, %v2333_v15  ;;  %2694 = vst.msk [vmem:[%s5821_s3 + $0x628] sm:$0xff] %vm2496_vm2, %v2453_v16  ;;  %v1453_v22 = vadd.f32 %v5179_v20, %v3357_v19  ;;  %v2053_v23 = vadd.f32 %v5179_v20, %v3537_v21  ;;  %v1447_v24 = vpop.f32.mrb[79].mxu0  ;;  %v2047_v25 = vpop.f32.mrb[79].mxu1 }
 0x17f   :  { %2573 = vst.msk [vmem:[%s5821_s3 + $0x260] sm:$0xff] %vm2496_vm2, %v2332_v17  ;;  %2693 = vst.msk [vmem:[%s5821_s3 + $0x620] sm:$0xff] %vm2496_vm2, %v2452_v18  ;;  %v1448_v26 = vadd.f32 %v5179_v20, %v1447_v24  ;;  %v2048_v27 = vadd.f32 %v5179_v20, %v2047_v25 }
 0x180   :  { %v2335_v29 = vmax.f32 %v1453_v22, 0.0  ;;  %v2455_v28 = vmax.f32 %v2053_v23, 0.0 }
 0x181   :  { %v2334_v30 = vmax.f32 %v1448_v26, 0.0  ;;  %v2454_v31 = vmax.f32 %v2048_v27, 0.0  ;;  %v3360_v32 = vpop.f32.mrb[80].mxu0  ;;  %v3540_v33 = vpop.f32.mrb[80].mxu1 }
 0x182   :  { %2576 = vst.msk [vmem:[%s5821_s3 + $0x278] sm:$0xff] %vm2496_vm2, %v2335_v29  ;;  %2696 = vst.msk [vmem:[%s5821_s3 + $0x638] sm:$0xff] %vm2496_vm2, %v2455_v28  ;;  %v1463_v34 = vadd.f32 %v5179_v20, %v3360_v32  ;;  %v2063_v35 = vadd.f32 %v5179_v20, %v3540_v33  ;;  %v1457_v36 = vpop.f32.mrb[81].mxu0  ;;  %v2057_v37 = vpop.f32.mrb[81].mxu1 }
 0x183   :  { %2575 = vst.msk [vmem:[%s5821_s3 + $0x270] sm:$0xff] %vm2496_vm2, %v2334_v30  ;;  %2695 = vst.msk [vmem:[%s5821_s3 + $0x630] sm:$0xff] %vm2496_vm2, %v2454_v31  ;;  %v1458_v38 = vadd.f32 %v5179_v20, %v1457_v36  ;;  %v2058_v39 = vadd.f32 %v5179_v20, %v2057_v37 }
 0x184   :  { %v2337_v40 = vmax.f32 %v1463_v34, 0.0  ;;  %v2457_v41 = vmax.f32 %v2063_v35, 0.0 }
 0x185   :  { %v2336_v42 = vmax.f32 %v1458_v38, 0.0  ;;  %v2456_v43 = vmax.f32 %v2058_v39, 0.0  ;;  %v3363_v44 = vpop.f32.mrb[82].mxu0  ;;  %v3543_v45 = vpop.f32.mrb[82].mxu1 }
 0x186   :  { %2578 = vst.msk [vmem:[%s5821_s3 + $0x288] sm:$0xff] %vm2496_vm2, %v2337_v40  ;;  %2698 = vst.msk [vmem:[%s5821_s3 + $0x648] sm:$0xff] %vm2496_vm2, %v2457_v41  ;;  %v1473_v46 = vadd.f32 %v5179_v20, %v3363_v44  ;;  %v2073_v47 = vadd.f32 %v5179_v20, %v3543_v45  ;;  %v1467_v48 = vpop.f32.mrb[83].mxu0  ;;  %v2067_v49 = vpop.f32.mrb[83].mxu1 }
 0x187   :  { %2577 = vst.msk [vmem:[%s5821_s3 + $0x280] sm:$0xff] %vm2496_vm2, %v2336_v42  ;;  %2697 = vst.msk [vmem:[%s5821_s3 + $0x640] sm:$0xff] %vm2496_vm2, %v2456_v43  ;;  %v1468_v50 = vadd.f32 %v5179_v20, %v1467_v48  ;;  %v2068_v51 = vadd.f32 %v5179_v20, %v2067_v49 }
 0x188   :  { %v2339_v52 = vmax.f32 %v1473_v46, 0.0  ;;  %v2459_v53 = vmax.f32 %v2073_v47, 0.0 }
 0x189   :  { %v2338_v54 = vmax.f32 %v1468_v50, 0.0  ;;  %v2458_v55 = vmax.f32 %v2068_v51, 0.0  ;;  %v3366_v56 = vpop.f32.mrb[84].mxu0  ;;  %v3546_v57 = vpop.f32.mrb[84].mxu1 }
 0x18a   :  { %2580 = vst.msk [vmem:[%s5821_s3 + $0x298] sm:$0xff] %vm2496_vm2, %v2339_v52  ;;  %2700 = vst.msk [vmem:[%s5821_s3 + $0x658] sm:$0xff] %vm2496_vm2, %v2459_v53  ;;  %v1483_v58 = vadd.f32 %v5179_v20, %v3366_v56  ;;  %v2083_v59 = vadd.f32 %v5179_v20, %v3546_v57  ;;  %v1477_v60 = vpop.f32.mrb[85].mxu0  ;;  %v2077_v61 = vpop.f32.mrb[85].mxu1 }
 0x18b   :  { %2579 = vst.msk [vmem:[%s5821_s3 + $0x290] sm:$0xff] %vm2496_vm2, %v2338_v54  ;;  %2699 = vst.msk [vmem:[%s5821_s3 + $0x650] sm:$0xff] %vm2496_vm2, %v2458_v55  ;;  %v1478_v62 = vadd.f32 %v5179_v20, %v1477_v60  ;;  %v2078_v63 = vadd.f32 %v5179_v20, %v2077_v61 }
 0x18c   :  { %v2341_v0 = vmax.f32 %v1483_v58, 0.0  ;;  %v2461_v1 = vmax.f32 %v2083_v59, 0.0 }
 0x18d   :  { %v2340_v2 = vmax.f32 %v1478_v62, 0.0  ;;  %v2460_v3 = vmax.f32 %v2078_v63, 0.0  ;;  %v3369_v4 = vpop.f32.mrb[86].mxu0  ;;  %v3549_v5 = vpop.f32.mrb[86].mxu1 }
 0x18e   :  { %2582 = vst.msk [vmem:[%s5821_s3 + $0x2a8] sm:$0xff] %vm2496_vm2, %v2341_v0  ;;  %2702 = vst.msk [vmem:[%s5821_s3 + $0x668] sm:$0xff] %vm2496_vm2, %v2461_v1  ;;  %v1493_v6 = vadd.f32 %v5179_v20, %v3369_v4  ;;  %v2093_v7 = vadd.f32 %v5179_v20, %v3549_v5  ;;  %v1487_v8 = vpop.f32.mrb[87].mxu0  ;;  %v2087_v9 = vpop.f32.mrb[87].mxu1 }
 0x18f   :  { %2581 = vst.msk [vmem:[%s5821_s3 + $0x2a0] sm:$0xff] %vm2496_vm2, %v2340_v2  ;;  %2701 = vst.msk [vmem:[%s5821_s3 + $0x660] sm:$0xff] %vm2496_vm2, %v2460_v3  ;;  %v1488_v10 = vadd.f32 %v5179_v20, %v1487_v8  ;;  %v2088_v11 = vadd.f32 %v5179_v20, %v2087_v9 }
 0x190   :  { %v2343_v12 = vmax.f32 %v1493_v6, 0.0  ;;  %v2463_v13 = vmax.f32 %v2093_v7, 0.0 }
 0x191   :  { %v2342_v14 = vmax.f32 %v1488_v10, 0.0  ;;  %v2462_v15 = vmax.f32 %v2088_v11, 0.0  ;;  %v3372_v16 = vpop.f32.mrb[88].mxu0  ;;  %v3552_v17 = vpop.f32.mrb[88].mxu1 }
 0x192   :  { %2584 = vst.msk [vmem:[%s5821_s3 + $0x2b8] sm:$0xff] %vm2496_vm2, %v2343_v12  ;;  %2704 = vst.msk [vmem:[%s5821_s3 + $0x678] sm:$0xff] %vm2496_vm2, %v2463_v13  ;;  %v1503_v18 = vadd.f32 %v5179_v20, %v3372_v16  ;;  %v2103_v19 = vadd.f32 %v5179_v20, %v3552_v17  ;;  %v1497_v21 = vpop.f32.mrb[89].mxu0  ;;  %v2097_v22 = vpop.f32.mrb[89].mxu1 }
 0x193   :  { %2583 = vst.msk [vmem:[%s5821_s3 + $0x2b0] sm:$0xff] %vm2496_vm2, %v2342_v14  ;;  %2703 = vst.msk [vmem:[%s5821_s3 + $0x670] sm:$0xff] %vm2496_vm2, %v2462_v15  ;;  %v1498_v23 = vadd.f32 %v5179_v20, %v1497_v21  ;;  %v2098_v24 = vadd.f32 %v5179_v20, %v2097_v22 }
 0x194   :  { %v2345_v25 = vmax.f32 %v1503_v18, 0.0  ;;  %v2465_v26 = vmax.f32 %v2103_v19, 0.0 }
 0x195   :  { %v2344_v27 = vmax.f32 %v1498_v23, 0.0  ;;  %v2464_v29 = vmax.f32 %v2098_v24, 0.0  ;;  %v3375_v28 = vpop.f32.mrb[90].mxu0  ;;  %v3555_v30 = vpop.f32.mrb[90].mxu1 }
 0x196   :  { %2586 = vst.msk [vmem:[%s5821_s3 + $0x2c8] sm:$0xff] %vm2496_vm2, %v2345_v25  ;;  %2706 = vst.msk [vmem:[%s5821_s3 + $0x688] sm:$0xff] %vm2496_vm2, %v2465_v26  ;;  %v1513_v31 = vadd.f32 %v5179_v20, %v3375_v28  ;;  %v2113_v32 = vadd.f32 %v5179_v20, %v3555_v30  ;;  %v1507_v33 = vpop.f32.mrb[91].mxu0  ;;  %v2107_v34 = vpop.f32.mrb[91].mxu1 }
 0x197   :  { %2585 = vst.msk [vmem:[%s5821_s3 + $0x2c0] sm:$0xff] %vm2496_vm2, %v2344_v27  ;;  %2705 = vst.msk [vmem:[%s5821_s3 + $0x680] sm:$0xff] %vm2496_vm2, %v2464_v29  ;;  %v1508_v35 = vadd.f32 %v5179_v20, %v1507_v33  ;;  %v2108_v36 = vadd.f32 %v5179_v20, %v2107_v34 }
 0x198   :  { %v2347_v37 = vmax.f32 %v1513_v31, 0.0  ;;  %v2467_v38 = vmax.f32 %v2113_v32, 0.0 }
 0x199   :  { %v2346_v39 = vmax.f32 %v1508_v35, 0.0  ;;  %v2466_v40 = vmax.f32 %v2108_v36, 0.0  ;;  %v3378_v41 = vpop.f32.mrb[92].mxu0  ;;  %v3558_v42 = vpop.f32.mrb[92].mxu1 }
 0x19a   :  { %2588 = vst.msk [vmem:[%s5821_s3 + $0x2d8] sm:$0xff] %vm2496_vm2, %v2347_v37  ;;  %2708 = vst.msk [vmem:[%s5821_s3 + $0x698] sm:$0xff] %vm2496_vm2, %v2467_v38  ;;  %v1523_v43 = vadd.f32 %v5179_v20, %v3378_v41  ;;  %v2123_v44 = vadd.f32 %v5179_v20, %v3558_v42  ;;  %v1517_v45 = vpop.f32.mrb[93].mxu0  ;;  %v2117_v46 = vpop.f32.mrb[93].mxu1 }
 0x19b   :  { %2587 = vst.msk [vmem:[%s5821_s3 + $0x2d0] sm:$0xff] %vm2496_vm2, %v2346_v39  ;;  %2707 = vst.msk [vmem:[%s5821_s3 + $0x690] sm:$0xff] %vm2496_vm2, %v2466_v40  ;;  %v1518_v47 = vadd.f32 %v5179_v20, %v1517_v45  ;;  %v2118_v48 = vadd.f32 %v5179_v20, %v2117_v46 }
 0x19c   :  { %v2349_v49 = vmax.f32 %v1523_v43, 0.0  ;;  %v2469_v50 = vmax.f32 %v2123_v44, 0.0 }
 0x19d   :  { %v2348_v51 = vmax.f32 %v1518_v47, 0.0  ;;  %v2468_v52 = vmax.f32 %v2118_v48, 0.0  ;;  %v3381_v53 = vpop.f32.mrb[94].mxu0  ;;  %v3561_v54 = vpop.f32.mrb[94].mxu1 }
 0x19e   :  { %2590 = vst.msk [vmem:[%s5821_s3 + $0x2e8] sm:$0xff] %vm2496_vm2, %v2349_v49  ;;  %2710 = vst.msk [vmem:[%s5821_s3 + $0x6a8] sm:$0xff] %vm2496_vm2, %v2469_v50  ;;  %v1533_v55 = vadd.f32 %v5179_v20, %v3381_v53  ;;  %v2133_v56 = vadd.f32 %v5179_v20, %v3561_v54  ;;  %v1527_v57 = vpop.f32.mrb[95].mxu0  ;;  %v2127_v58 = vpop.f32.mrb[95].mxu1 }
 0x19f   :  { %2589 = vst.msk [vmem:[%s5821_s3 + $0x2e0] sm:$0xff] %vm2496_vm2, %v2348_v51  ;;  %2709 = vst.msk [vmem:[%s5821_s3 + $0x6a0] sm:$0xff] %vm2496_vm2, %v2468_v52  ;;  %v1528_v59 = vadd.f32 %v5179_v20, %v1527_v57  ;;  %v2128_v60 = vadd.f32 %v5179_v20, %v2127_v58 }
 0x1a0   :  { %v2351_v61 = vmax.f32 %v1533_v55, 0.0  ;;  %v2471_v62 = vmax.f32 %v2133_v56, 0.0 }
 0x1a1   :  { %v2350_v63 = vmax.f32 %v1528_v59, 0.0  ;;  %v2470_v0 = vmax.f32 %v2128_v60, 0.0  ;;  %v3384_v1 = vpop.f32.mrb[96].mxu0  ;;  %v3564_v2 = vpop.f32.mrb[96].mxu1 }
 0x1a2   :  { %2592 = vst.msk [vmem:[%s5821_s3 + $0x2f8] sm:$0xff] %vm2496_vm2, %v2351_v61  ;;  %2712 = vst.msk [vmem:[%s5821_s3 + $0x6b8] sm:$0xff] %vm2496_vm2, %v2471_v62  ;;  %v1543_v3 = vadd.f32 %v5179_v20, %v3384_v1  ;;  %v2143_v4 = vadd.f32 %v5179_v20, %v3564_v2  ;;  %v1537_v5 = vpop.f32.mrb[97].mxu0  ;;  %v2137_v6 = vpop.f32.mrb[97].mxu1 }
 0x1a3   :  { %2591 = vst.msk [vmem:[%s5821_s3 + $0x2f0] sm:$0xff] %vm2496_vm2, %v2350_v63  ;;  %2711 = vst.msk [vmem:[%s5821_s3 + $0x6b0] sm:$0xff] %vm2496_vm2, %v2470_v0  ;;  %v1538_v7 = vadd.f32 %v5179_v20, %v1537_v5  ;;  %v2138_v8 = vadd.f32 %v5179_v20, %v2137_v6 }
 0x1a4   :  { %v2353_v9 = vmax.f32 %v1543_v3, 0.0  ;;  %v2473_v10 = vmax.f32 %v2143_v4, 0.0 }
 0x1a5   :  { %v2352_v11 = vmax.f32 %v1538_v7, 0.0  ;;  %v2472_v12 = vmax.f32 %v2138_v8, 0.0  ;;  %v3387_v13 = vpop.f32.mrb[98].mxu0  ;;  %v3567_v14 = vpop.f32.mrb[98].mxu1 }
 0x1a6   :  { %2594 = vst.msk [vmem:[%s5821_s3 + $0x308] sm:$0xff] %vm2496_vm2, %v2353_v9  ;;  %2714 = vst.msk [vmem:[%s5821_s3 + $0x6c8] sm:$0xff] %vm2496_vm2, %v2473_v10  ;;  %v1553_v15 = vadd.f32 %v5179_v20, %v3387_v13  ;;  %v2153_v16 = vadd.f32 %v5179_v20, %v3567_v14  ;;  %v1547_v17 = vpop.f32.mrb[99].mxu0  ;;  %v2147_v18 = vpop.f32.mrb[99].mxu1 }
 0x1a7   :  { %2593 = vst.msk [vmem:[%s5821_s3 + $0x300] sm:$0xff] %vm2496_vm2, %v2352_v11  ;;  %2713 = vst.msk [vmem:[%s5821_s3 + $0x6c0] sm:$0xff] %vm2496_vm2, %v2472_v12  ;;  %v1548_v19 = vadd.f32 %v5179_v20, %v1547_v17  ;;  %v2148_v21 = vadd.f32 %v5179_v20, %v2147_v18 }
 0x1a8   :  { %v2355_v22 = vmax.f32 %v1553_v15, 0.0  ;;  %v2475_v23 = vmax.f32 %v2153_v16, 0.0 }
 0x1a9   :  { %v2354_v24 = vmax.f32 %v1548_v19, 0.0  ;;  %v2474_v25 = vmax.f32 %v2148_v21, 0.0  ;;  %v3390_v26 = vpop.f32.mrb[100].mxu0  ;;  %v3570_v27 = vpop.f32.mrb[100].mxu1 }
 0x1aa   :  { %2596 = vst.msk [vmem:[%s5821_s3 + $0x318] sm:$0xff] %vm2496_vm2, %v2355_v22  ;;  %2716 = vst.msk [vmem:[%s5821_s3 + $0x6d8] sm:$0xff] %vm2496_vm2, %v2475_v23  ;;  %v1563_v29 = vadd.f32 %v5179_v20, %v3390_v26  ;;  %v2163_v28 = vadd.f32 %v5179_v20, %v3570_v27  ;;  %v1557_v30 = vpop.f32.mrb[101].mxu0  ;;  %v2157_v31 = vpop.f32.mrb[101].mxu1 }
 0x1ab   :  { %2595 = vst.msk [vmem:[%s5821_s3 + $0x310] sm:$0xff] %vm2496_vm2, %v2354_v24  ;;  %2715 = vst.msk [vmem:[%s5821_s3 + $0x6d0] sm:$0xff] %vm2496_vm2, %v2474_v25  ;;  %v1558_v32 = vadd.f32 %v5179_v20, %v1557_v30  ;;  %v2158_v33 = vadd.f32 %v5179_v20, %v2157_v31 }
 0x1ac   :  { %v2357_v34 = vmax.f32 %v1563_v29, 0.0  ;;  %v2477_v35 = vmax.f32 %v2163_v28, 0.0 }
 0x1ad   :  { %v2356_v36 = vmax.f32 %v1558_v32, 0.0  ;;  %v2476_v37 = vmax.f32 %v2158_v33, 0.0  ;;  %v3393_v38 = vpop.f32.mrb[102].mxu0  ;;  %v3573_v39 = vpop.f32.mrb[102].mxu1 }
 0x1ae   :  { %2598 = vst.msk [vmem:[%s5821_s3 + $0x328] sm:$0xff] %vm2496_vm2, %v2357_v34  ;;  %2718 = vst.msk [vmem:[%s5821_s3 + $0x6e8] sm:$0xff] %vm2496_vm2, %v2477_v35  ;;  %v1573_v40 = vadd.f32 %v5179_v20, %v3393_v38  ;;  %v2173_v41 = vadd.f32 %v5179_v20, %v3573_v39  ;;  %v1567_v42 = vpop.f32.mrb[103].mxu0  ;;  %v2167_v43 = vpop.f32.mrb[103].mxu1 }
 0x1af   :  { %2597 = vst.msk [vmem:[%s5821_s3 + $0x320] sm:$0xff] %vm2496_vm2, %v2356_v36  ;;  %2717 = vst.msk [vmem:[%s5821_s3 + $0x6e0] sm:$0xff] %vm2496_vm2, %v2476_v37  ;;  %v1568_v44 = vadd.f32 %v5179_v20, %v1567_v42  ;;  %v2168_v45 = vadd.f32 %v5179_v20, %v2167_v43 }
 0x1b0   :  { %v2359_v46 = vmax.f32 %v1573_v40, 0.0  ;;  %v2479_v47 = vmax.f32 %v2173_v41, 0.0 }
 0x1b1   :  { %v2358_v48 = vmax.f32 %v1568_v44, 0.0  ;;  %v2478_v49 = vmax.f32 %v2168_v45, 0.0  ;;  %v3396_v50 = vpop.f32.mrb[104].mxu0  ;;  %v3576_v51 = vpop.f32.mrb[104].mxu1 }
 0x1b2   :  { %2600 = vst.msk [vmem:[%s5821_s3 + $0x338] sm:$0xff] %vm2496_vm2, %v2359_v46  ;;  %2720 = vst.msk [vmem:[%s5821_s3 + $0x6f8] sm:$0xff] %vm2496_vm2, %v2479_v47  ;;  %v1583_v52 = vadd.f32 %v5179_v20, %v3396_v50  ;;  %v2183_v53 = vadd.f32 %v5179_v20, %v3576_v51  ;;  %v1577_v54 = vpop.f32.mrb[105].mxu0  ;;  %v2177_v55 = vpop.f32.mrb[105].mxu1 }
 0x1b3   :  { %2599 = vst.msk [vmem:[%s5821_s3 + $0x330] sm:$0xff] %vm2496_vm2, %v2358_v48  ;;  %2719 = vst.msk [vmem:[%s5821_s3 + $0x6f0] sm:$0xff] %vm2496_vm2, %v2478_v49  ;;  %v1578_v56 = vadd.f32 %v5179_v20, %v1577_v54  ;;  %v2178_v57 = vadd.f32 %v5179_v20, %v2177_v55 }
 0x1b4   :  { %v2361_v58 = vmax.f32 %v1583_v52, 0.0  ;;  %v2481_v59 = vmax.f32 %v2183_v53, 0.0 }
 0x1b5   :  { %v2360_v60 = vmax.f32 %v1578_v56, 0.0  ;;  %v2480_v61 = vmax.f32 %v2178_v57, 0.0  ;;  %v3399_v62 = vpop.f32.mrb[106].mxu0  ;;  %v3579_v63 = vpop.f32.mrb[106].mxu1 }
 0x1b6   :  { %2602 = vst.msk [vmem:[%s5821_s3 + $0x348] sm:$0xff] %vm2496_vm2, %v2361_v58  ;;  %2722 = vst.msk [vmem:[%s5821_s3 + $0x708] sm:$0xff] %vm2496_vm2, %v2481_v59  ;;  %v1593_v0 = vadd.f32 %v5179_v20, %v3399_v62  ;;  %v2193_v1 = vadd.f32 %v5179_v20, %v3579_v63  ;;  %v1587_v2 = vpop.f32.mrb[107].mxu0  ;;  %v2187_v3 = vpop.f32.mrb[107].mxu1 }
 0x1b7   :  { %2601 = vst.msk [vmem:[%s5821_s3 + $0x340] sm:$0xff] %vm2496_vm2, %v2360_v60  ;;  %2721 = vst.msk [vmem:[%s5821_s3 + $0x700] sm:$0xff] %vm2496_vm2, %v2480_v61  ;;  %v1588_v4 = vadd.f32 %v5179_v20, %v1587_v2  ;;  %v2188_v5 = vadd.f32 %v5179_v20, %v2187_v3 }
 0x1b8   :  { %v2363_v6 = vmax.f32 %v1593_v0, 0.0  ;;  %v2483_v7 = vmax.f32 %v2193_v1, 0.0 }
 0x1b9   :  { %v2362_v8 = vmax.f32 %v1588_v4, 0.0  ;;  %v2482_v9 = vmax.f32 %v2188_v5, 0.0  ;;  %v3402_v10 = vpop.f32.mrb[108].mxu0  ;;  %v3582_v11 = vpop.f32.mrb[108].mxu1 }
 0x1ba   :  { %2604 = vst.msk [vmem:[%s5821_s3 + $0x358] sm:$0xff] %vm2496_vm2, %v2363_v6  ;;  %2724 = vst.msk [vmem:[%s5821_s3 + $0x718] sm:$0xff] %vm2496_vm2, %v2483_v7  ;;  %v1603_v12 = vadd.f32 %v5179_v20, %v3402_v10  ;;  %v2203_v13 = vadd.f32 %v5179_v20, %v3582_v11  ;;  %v1597_v14 = vpop.f32.mrb[109].mxu0  ;;  %v2197_v15 = vpop.f32.mrb[109].mxu1 }
 0x1bb   :  { %2603 = vst.msk [vmem:[%s5821_s3 + $0x350] sm:$0xff] %vm2496_vm2, %v2362_v8  ;;  %2723 = vst.msk [vmem:[%s5821_s3 + $0x710] sm:$0xff] %vm2496_vm2, %v2482_v9  ;;  %v1598_v16 = vadd.f32 %v5179_v20, %v1597_v14  ;;  %v2198_v17 = vadd.f32 %v5179_v20, %v2197_v15 }
 0x1bc   :  { %v2365_v18 = vmax.f32 %v1603_v12, 0.0  ;;  %v2485_v19 = vmax.f32 %v2203_v13, 0.0 }
 0x1bd   :  { %v2364_v21 = vmax.f32 %v1598_v16, 0.0  ;;  %v2484_v22 = vmax.f32 %v2198_v17, 0.0  ;;  %v3405_v23 = vpop.f32.mrb[110].mxu0  ;;  %v3585_v24 = vpop.f32.mrb[110].mxu1 }
 0x1be   :  { %2606 = vst.msk [vmem:[%s5821_s3 + $0x368] sm:$0xff] %vm2496_vm2, %v2365_v18  ;;  %2726 = vst.msk [vmem:[%s5821_s3 + $0x728] sm:$0xff] %vm2496_vm2, %v2485_v19  ;;  %v1613_v25 = vadd.f32 %v5179_v20, %v3405_v23  ;;  %v2213_v26 = vadd.f32 %v5179_v20, %v3585_v24  ;;  %v1607_v27 = vpop.f32.mrb[111].mxu0  ;;  %v2207_v29 = vpop.f32.mrb[111].mxu1 }
 0x1bf   :  { %2605 = vst.msk [vmem:[%s5821_s3 + $0x360] sm:$0xff] %vm2496_vm2, %v2364_v21  ;;  %2725 = vst.msk [vmem:[%s5821_s3 + $0x720] sm:$0xff] %vm2496_vm2, %v2484_v22  ;;  %v1608_v28 = vadd.f32 %v5179_v20, %v1607_v27  ;;  %v2208_v30 = vadd.f32 %v5179_v20, %v2207_v29 }
 0x1c0   :  { %v2367_v31 = vmax.f32 %v1613_v25, 0.0  ;;  %v2487_v32 = vmax.f32 %v2213_v26, 0.0 }
 0x1c1   :  { %v2366_v33 = vmax.f32 %v1608_v28, 0.0  ;;  %v2486_v34 = vmax.f32 %v2208_v30, 0.0  ;;  %v3408_v35 = vpop.f32.mrb[112].mxu0  ;;  %v3588_v36 = vpop.f32.mrb[112].mxu1 }
 0x1c2   :  { %2608 = vst.msk [vmem:[%s5821_s3 + $0x378] sm:$0xff] %vm2496_vm2, %v2367_v31  ;;  %2728 = vst.msk [vmem:[%s5821_s3 + $0x738] sm:$0xff] %vm2496_vm2, %v2487_v32  ;;  %v1623_v37 = vadd.f32 %v5179_v20, %v3408_v35  ;;  %v2223_v38 = vadd.f32 %v5179_v20, %v3588_v36  ;;  %v1617_v39 = vpop.f32.mrb[113].mxu0  ;;  %v2217_v40 = vpop.f32.mrb[113].mxu1 }
 0x1c3   :  { %2607 = vst.msk [vmem:[%s5821_s3 + $0x370] sm:$0xff] %vm2496_vm2, %v2366_v33  ;;  %2727 = vst.msk [vmem:[%s5821_s3 + $0x730] sm:$0xff] %vm2496_vm2, %v2486_v34  ;;  %v1618_v41 = vadd.f32 %v5179_v20, %v1617_v39  ;;  %v2218_v42 = vadd.f32 %v5179_v20, %v2217_v40 }
 0x1c4   :  { %v2369_v43 = vmax.f32 %v1623_v37, 0.0  ;;  %v2489_v44 = vmax.f32 %v2223_v38, 0.0 }
 0x1c5   :  { %v2368_v45 = vmax.f32 %v1618_v41, 0.0  ;;  %v2488_v46 = vmax.f32 %v2218_v42, 0.0  ;;  %v3411_v47 = vpop.f32.mrb[114].mxu0  ;;  %v3591_v48 = vpop.f32.mrb[114].mxu1 }
 0x1c6   :  { %2610 = vst.msk [vmem:[%s5821_s3 + $0x388] sm:$0xff] %vm2496_vm2, %v2369_v43  ;;  %2730 = vst.msk [vmem:[%s5821_s3 + $0x748] sm:$0xff] %vm2496_vm2, %v2489_v44  ;;  %v1633_v49 = vadd.f32 %v5179_v20, %v3411_v47  ;;  %v2233_v50 = vadd.f32 %v5179_v20, %v3591_v48  ;;  %v1627_v51 = vpop.f32.mrb[115].mxu0  ;;  %v2227_v52 = vpop.f32.mrb[115].mxu1 }
 0x1c7   :  { %2609 = vst.msk [vmem:[%s5821_s3 + $0x380] sm:$0xff] %vm2496_vm2, %v2368_v45  ;;  %2729 = vst.msk [vmem:[%s5821_s3 + $0x740] sm:$0xff] %vm2496_vm2, %v2488_v46  ;;  %v1628_v53 = vadd.f32 %v5179_v20, %v1627_v51  ;;  %v2228_v54 = vadd.f32 %v5179_v20, %v2227_v52 }
 0x1c8   :  { %v2371_v55 = vmax.f32 %v1633_v49, 0.0  ;;  %v2491_v56 = vmax.f32 %v2233_v50, 0.0 }
 0x1c9   :  { %v2370_v57 = vmax.f32 %v1628_v53, 0.0  ;;  %v2490_v58 = vmax.f32 %v2228_v54, 0.0  ;;  %v3414_v59 = vpop.f32.mrb[116].mxu0  ;;  %v3594_v60 = vpop.f32.mrb[116].mxu1 }
 0x1ca   :  { %2612 = vst.msk [vmem:[%s5821_s3 + $0x398] sm:$0xff] %vm2496_vm2, %v2371_v55  ;;  %2732 = vst.msk [vmem:[%s5821_s3 + $0x758] sm:$0xff] %vm2496_vm2, %v2491_v56  ;;  %v1643_v61 = vadd.f32 %v5179_v20, %v3414_v59  ;;  %v2243_v62 = vadd.f32 %v5179_v20, %v3594_v60  ;;  %v1637_v63 = vpop.f32.mrb[117].mxu0  ;;  %v2237_v0 = vpop.f32.mrb[117].mxu1 }
 0x1cb   :  { %2611 = vst.msk [vmem:[%s5821_s3 + $0x390] sm:$0xff] %vm2496_vm2, %v2370_v57  ;;  %2731 = vst.msk [vmem:[%s5821_s3 + $0x750] sm:$0xff] %vm2496_vm2, %v2490_v58  ;;  %v1638_v1 = vadd.f32 %v5179_v20, %v1637_v63  ;;  %v2238_v2 = vadd.f32 %v5179_v20, %v2237_v0 }
 0x1cc   :  { %v2373_v3 = vmax.f32 %v1643_v61, 0.0  ;;  %v2493_v4 = vmax.f32 %v2243_v62, 0.0 }
 0x1cd   :  { %v2372_v5 = vmax.f32 %v1638_v1, 0.0  ;;  %v2492_v6 = vmax.f32 %v2238_v2, 0.0  ;;  %v3417_v7 = vpop.f32.mrb[118].mxu0  ;;  %v3597_v8 = vpop.f32.mrb[118].mxu1 }
 0x1ce   :  { %2614 = vst.msk [vmem:[%s5821_s3 + $0x3a8] sm:$0xff] %vm2496_vm2, %v2373_v3  ;;  %2734 = vst.msk [vmem:[%s5821_s3 + $0x768] sm:$0xff] %vm2496_vm2, %v2493_v4  ;;  %v1653_v9 = vadd.f32 %v5179_v20, %v3417_v7  ;;  %v2253_v10 = vadd.f32 %v5179_v20, %v3597_v8  ;;  %v1647_v11 = vpop.f32.mrb[119].mxu0  ;;  %v2247_v12 = vpop.f32.mrb[119].mxu1 }
 0x1cf   :  { %2613 = vst.msk [vmem:[%s5821_s3 + $0x3a0] sm:$0xff] %vm2496_vm2, %v2372_v5  ;;  %2733 = vst.msk [vmem:[%s5821_s3 + $0x760] sm:$0xff] %vm2496_vm2, %v2492_v6  ;;  %v1648_v13 = vadd.f32 %v5179_v20, %v1647_v11  ;;  %v2248_v14 = vadd.f32 %v5179_v20, %v2247_v12 }
 0x1d0   :  { %v2375_v15 = vmax.f32 %v1653_v9, 0.0  ;;  %v2495_v16 = vmax.f32 %v2253_v10, 0.0 }
 0x1d1   :  { %v2374_v17 = vmax.f32 %v1648_v13, 0.0  ;;  %v2494_v18 = vmax.f32 %v2248_v14, 0.0 }
 0x1d2   :  { %2616 = vst.msk [vmem:[%s5821_s3 + $0x3b8] sm:$0xff] %vm2496_vm2, %v2375_v15  ;;  %2736 = vst.msk [vmem:[%s5821_s3 + $0x778] sm:$0xff] %vm2496_vm2, %v2495_v16 }
 0x1d3   :  { %2615 = vst.msk [vmem:[%s5821_s3 + $0x3b0] sm:$0xff] %vm2496_vm2, %v2374_v17  ;;  %2735 = vst.msk [vmem:[%s5821_s3 + $0x770] sm:$0xff] %vm2496_vm2, %v2494_v18 }

// kernel: ppo_forward.4
= control target key start
LH: loop header
LB: loop body
LE: loop exit
PB: predicated region body
PF: predicated region fallthrough
CT: control target
= control target key end

     0   :  { %v936_v0 = vmov 0.0|0.0   ;;  %vm159_vm0 = vcmask 130048   ;;  %s1754_s1 = inlined_call_operand.vmem [shape: f32[144,16], index: 1, kind: input, shape index: {}]   ;;  %s1755_s0 = inlined_call_operand.vmem [shape: f32[480,144], index: 0, kind: input, shape index: {}]   ;;  %s1756_s2 = inlined_call_operand.vmem [shape: f32[1,16], index: 2, kind: input, shape index: {}]   ;;  %s1757_s3 = inlined_call_operand.vmem [shape: f32[480,16], index: 3, kind: output, shape index: {}]  }
   0x1   :  { %890 = vmatprep.subr.bf16.mxu0 %v936_v0  ;;  %917 = vmatprep.subr.bf16.mxu1 %v936_v0  ;;  %v134_v1 = vld [vmem:[%s1754_s1] sm:$0xff]  ;;  %v135_v2 = vld [vmem:[%s1754_s1 + $0x8] sm:$0xff]  ;;  %v136_v3 = vld [vmem:[%s1754_s1 + $0x10] sm:$0xff] }
   0x2   :  { %v891_v4 = vpack.c.bf16 %v135_v2, %v134_v1  ;;  %v137_v5 = vld [vmem:[%s1754_s1 + $0x18] sm:$0xff]  ;;  %v138_v7 = vld [vmem:[%s1754_s1 + $0x20] sm:$0xff]  ;;  %v139_v8 = vld [vmem:[%s1754_s1 + $0x28] sm:$0xff] }
   0x3   :  { %v894_v6 = vpack.c.bf16 %v137_v5, %v136_v3  ;;  %v15_v9 = vld [vmem:[%s1755_s0 + $0x8] sm:$0xff]  ;;  %v897_v11 = vpack.c.bf16 %v139_v8, %v138_v7  ;;  %v140_v12 = vld [vmem:[%s1754_s1 + $0x30] sm:$0xff]  ;;  %v141_v13 = vld [vmem:[%s1754_s1 + $0x38] sm:$0xff] }
   0x4   :  { %892 = vmatpush1.bf16.msra.mxu0 %v891_v4  ;;  %926 = vmatpush1.bf16.msra.mxu1 %v891_v4  ;;  %v75_v10 = vld [vmem:[%s1755_s0 + $0x1e8] sm:$0xff]  ;;  %v900_v14 = vpack.c.bf16 %v141_v13, %v140_v12  ;;  %v142_v15 = vld [vmem:[%s1754_s1 + $0x40] sm:$0xff]  ;;  %v144_v18 = vld [vmem:[%s1754_s1 + $0x50] sm:$0xff] }
   0x5   :  { %893 = vmatprep.subr.bf16.mxu0 %v936_v0  ;;  %918 = vmatprep.subr.bf16.mxu1 %v936_v0  ;;  %v143_v16 = vld [vmem:[%s1754_s1 + $0x48] sm:$0xff]  ;;  %v145_v19 = vld [vmem:[%s1754_s1 + $0x58] sm:$0xff]  ;;  %v146_v21 = vld [vmem:[%s1754_s1 + $0x60] sm:$0xff] }
   0x6   :  { %830 = vmatprep.mubr.msk.f32.mxu0 %vm159_vm0, %v15_v9  ;;  %860 = vmatprep.mubr.msk.f32.mxu1 %vm159_vm0, %v75_v10  ;;  %v903_v17 = vpack.c.bf16 %v143_v16, %v142_v15  ;;  %v906_v20 = vpack.c.bf16 %v145_v19, %v144_v18  ;;  %v147_v22 = vld [vmem:[%s1754_s1 + $0x68] sm:$0xff]  ;;  %v148_v24 = vld [vmem:[%s1754_s1 + $0x70] sm:$0xff]  ;;  %v149_v25 = vld [vmem:[%s1754_s1 + $0x78] sm:$0xff] }
   0x7   :  { %v909_v23 = vpack.c.bf16 %v147_v22, %v146_v21  ;;  %v912_v26 = vpack.c.bf16 %v149_v25, %v148_v24  ;;  %v150_v27 = vld [vmem:[%s1754_s1 + $0x80] sm:$0xff]  ;;  %v151_v28 = vld [vmem:[%s1754_s1 + $0x88] sm:$0xff]  ;;  %v17_v32 = vld [vmem:[%s1755_s0 + $0x18] sm:$0xff] }
   0x8   :  { %895 = vmatpush1.bf16.msra.mxu0 %v894_v6  ;;  %927 = vmatpush1.bf16.msra.mxu1 %v894_v6  ;;  %v915_v29 = vpack.c.bf16 %v151_v28, %v150_v27  ;;  %v14_v30 = vld [vmem:[%s1755_s0] sm:$0xff]  ;;  %v77_v33 = vld [vmem:[%s1755_s0 + $0x1f8] sm:$0xff]  ;;  %v16_v34 = vld [vmem:[%s1755_s0 + $0x10] sm:$0xff] }
   0x9   :  { %896 = vmatprep.subr.bf16.mxu0 %v936_v0  ;;  %919 = vmatprep.subr.bf16.mxu1 %v936_v0  ;;  %v74_v31 = vld [vmem:[%s1755_s0 + $0x1e0] sm:$0xff]  ;;  %v76_v35 = vld [vmem:[%s1755_s0 + $0x1f0] sm:$0xff]  ;;  %v19_v36 = vld [vmem:[%s1755_s0 + $0x28] sm:$0xff] }
   0xa   :  { %v79_v37 = vld [vmem:[%s1755_s0 + $0x208] sm:$0xff]  ;;  %v18_v38 = vld [vmem:[%s1755_s0 + $0x20] sm:$0xff]  ;;  %v21_v40 = vld [vmem:[%s1755_s0 + $0x38] sm:$0xff] }
   0xb   :  { %v78_v39 = vld [vmem:[%s1755_s0 + $0x200] sm:$0xff]  ;;  %v81_v41 = vld [vmem:[%s1755_s0 + $0x218] sm:$0xff]  ;;  %v20_v42 = vld [vmem:[%s1755_s0 + $0x30] sm:$0xff] }
   0xc   :  { %898 = vmatpush1.bf16.msra.mxu0 %v897_v11  ;;  %928 = vmatpush1.bf16.msra.mxu1 %v897_v11  ;;  %v80_v43 = vld [vmem:[%s1755_s0 + $0x210] sm:$0xff]  ;;  %v23_v44 = vld [vmem:[%s1755_s0 + $0x48] sm:$0xff]  ;;  %v22_v46 = vld [vmem:[%s1755_s0 + $0x40] sm:$0xff] }
   0xd   :  { %899 = vmatprep.subr.bf16.mxu0 %v936_v0  ;;  %920 = vmatprep.subr.bf16.mxu1 %v936_v0  ;;  %v83_v45 = vld [vmem:[%s1755_s0 + $0x228] sm:$0xff]  ;;  %v82_v47 = vld [vmem:[%s1755_s0 + $0x220] sm:$0xff]  ;;  %v25_v48 = vld [vmem:[%s1755_s0 + $0x58] sm:$0xff] }
   0xe   :  { %v85_v49 = vld [vmem:[%s1755_s0 + $0x238] sm:$0xff]  ;;  %v24_v50 = vld [vmem:[%s1755_s0 + $0x50] sm:$0xff]  ;;  %v27_v52 = vld [vmem:[%s1755_s0 + $0x68] sm:$0xff] }
   0xf   :  { %v84_v51 = vld [vmem:[%s1755_s0 + $0x230] sm:$0xff]  ;;  %v87_v53 = vld [vmem:[%s1755_s0 + $0x248] sm:$0xff]  ;;  %v26_v54 = vld [vmem:[%s1755_s0 + $0x60] sm:$0xff] }
  0x10   :  { %901 = vmatpush1.bf16.msra.mxu0 %v900_v14  ;;  %929 = vmatpush1.bf16.msra.mxu1 %v900_v14  ;;  %v86_v55 = vld [vmem:[%s1755_s0 + $0x240] sm:$0xff]  ;;  %v29_v56 = vld [vmem:[%s1755_s0 + $0x78] sm:$0xff]  ;;  %v28_v58 = vld [vmem:[%s1755_s0 + $0x70] sm:$0xff] }
  0x11   :  { %902 = vmatprep.subr.bf16.mxu0 %v936_v0  ;;  %921 = vmatprep.subr.bf16.mxu1 %v936_v0  ;;  %v89_v57 = vld [vmem:[%s1755_s0 + $0x258] sm:$0xff]  ;;  %v88_v59 = vld [vmem:[%s1755_s0 + $0x250] sm:$0xff]  ;;  %v31_v60 = vld [vmem:[%s1755_s0 + $0x88] sm:$0xff] }
  0x12   :  { %v91_v61 = vld [vmem:[%s1755_s0 + $0x268] sm:$0xff]  ;;  %v30_v62 = vld [vmem:[%s1755_s0 + $0x80] sm:$0xff]  ;;  %v93_v1 = vld [vmem:[%s1755_s0 + $0x278] sm:$0xff] }
  0x13   :  { %v90_v63 = vld [vmem:[%s1755_s0 + $0x260] sm:$0xff]  ;;  %v32_v2 = vld [vmem:[%s1755_s0 + $0x90] sm:$0xff]  ;;  %v35_v4 = vld [vmem:[%s1755_s0 + $0xa8] sm:$0xff] }
  0x14   :  { %904 = vmatpush1.bf16.msra.mxu0 %v903_v17  ;;  %930 = vmatpush1.bf16.msra.mxu1 %v903_v17  ;;  %v92_v3 = vld [vmem:[%s1755_s0 + $0x270] sm:$0xff]  ;;  %v95_v5 = vld [vmem:[%s1755_s0 + $0x288] sm:$0xff]  ;;  %v34_v6 = vld [vmem:[%s1755_s0 + $0xa0] sm:$0xff] }
  0x15   :  { %905 = vmatprep.subr.bf16.mxu0 %v936_v0  ;;  %922 = vmatprep.subr.bf16.mxu1 %v936_v0  ;;  %v94_v7 = vld [vmem:[%s1755_s0 + $0x280] sm:$0xff]  ;;  %v37_v8 = vld [vmem:[%s1755_s0 + $0xb8] sm:$0xff]  ;;  %v36_v10 = vld [vmem:[%s1755_s0 + $0xb0] sm:$0xff] }
  0x16   :  { %v97_v9 = vld [vmem:[%s1755_s0 + $0x298] sm:$0xff]  ;;  %v96_v11 = vld [vmem:[%s1755_s0 + $0x290] sm:$0xff]  ;;  %v39_v12 = vld [vmem:[%s1755_s0 + $0xc8] sm:$0xff] }
  0x17   :  { %v99_v13 = vld [vmem:[%s1755_s0 + $0x2a8] sm:$0xff]  ;;  %v38_v14 = vld [vmem:[%s1755_s0 + $0xc0] sm:$0xff]  ;;  %v41_v16 = vld [vmem:[%s1755_s0 + $0xd8] sm:$0xff] }
  0x18   :  { %907 = vmatpush1.bf16.msra.mxu0 %v906_v20  ;;  %931 = vmatpush1.bf16.msra.mxu1 %v906_v20  ;;  %v98_v15 = vld [vmem:[%s1755_s0 + $0x2a0] sm:$0xff]  ;;  %v101_v17 = vld [vmem:[%s1755_s0 + $0x2b8] sm:$0xff]  ;;  %v40_v18 = vld [vmem:[%s1755_s0 + $0xd0] sm:$0xff] }
  0x19   :  { %908 = vmatprep.subr.bf16.mxu0 %v936_v0  ;;  %923 = vmatprep.subr.bf16.mxu1 %v936_v0  ;;  %v100_v19 = vld [vmem:[%s1755_s0 + $0x2b0] sm:$0xff]  ;;  %v43_v20 = vld [vmem:[%s1755_s0 + $0xe8] sm:$0xff]  ;;  %v42_v22 = vld [vmem:[%s1755_s0 + $0xe0] sm:$0xff] }
  0x1a   :  { %v103_v21 = vld [vmem:[%s1755_s0 + $0x2c8] sm:$0xff]  ;;  %v45_v24 = vld [vmem:[%s1755_s0 + $0xf8] sm:$0xff]  ;;  %v104_v27 = vld [vmem:[%s1755_s0 + $0x2d0] sm:$0xff] }
  0x1b   :  { %v105_v25 = vld [vmem:[%s1755_s0 + $0x2d8] sm:$0xff]  ;;  %v47_v28 = vld [vmem:[%s1755_s0 + $0x108] sm:$0xff] }
  0x1c   :  { %910 = vmatpush1.bf16.msra.mxu0 %v909_v23  ;;  %932 = vmatpush1.bf16.msra.mxu1 %v909_v23  ;;  %v102_v23 = vld [vmem:[%s1755_s0 + $0x2c0] sm:$0xff] }
  0x1d   :  { %911 = vmatprep.subr.bf16.mxu0 %v936_v0  ;;  %924 = vmatprep.subr.bf16.mxu1 %v936_v0 }
  0x20   :  { %913 = vmatpush1.bf16.msra.mxu0 %v912_v26  ;;  %933 = vmatpush1.bf16.msra.mxu1 %v912_v26  ;;  %v44_v26 = vld [vmem:[%s1755_s0 + $0xf0] sm:$0xff] }
  0x21   :  { %914 = vmatprep.subr.bf16.mxu0 %v936_v0  ;;  %925 = vmatprep.subr.bf16.mxu1 %v936_v0  ;;  %v33_v0 = vld [vmem:[%s1755_s0 + $0x98] sm:$0xff] }
  0x24   :  { %916 = vmatpush1.bf16.msra.mxu0 %v915_v29  ;;  %934 = vmatpush1.bf16.msra.mxu1 %v915_v29  ;;  %v107_v29 = vld [vmem:[%s1755_s0 + $0x2e8] sm:$0xff] }
  0x27   :  { %405 = vmatmul.mubr.f32.vlgmr.msra.gmra.mrb[0].mxu0 %v14_v30  ;;  %555 = vmatmul.mubr.f32.vlgmr.msra.gmra.mrb[0].mxu1 %v74_v31  ;;  %v46_v30 = vld [vmem:[%s1755_s0 + $0x100] sm:$0xff] }
  0x28   :  { %831 = vmatprep.mubr.msk.f32.mxu0 %vm159_vm0, %v17_v32  ;;  %861 = vmatprep.mubr.msk.f32.mxu1 %vm159_vm0, %v77_v33  ;;  %v106_v31 = vld [vmem:[%s1755_s0 + $0x2e0] sm:$0xff]  ;;  %v49_v32 = vld [vmem:[%s1755_s0 + $0x118] sm:$0xff] }
  0x29   :  { %v109_v33 = vld [vmem:[%s1755_s0 + $0x2f8] sm:$0xff] }
  0x2b   :  { %410 = vmatmul.mubr.f32.gmra.mrb[2].mxu0 %v16_v34  ;;  %560 = vmatmul.mubr.f32.gmra.mrb[2].mxu1 %v76_v35  ;;  %v48_v34 = vld [vmem:[%s1755_s0 + $0x110] sm:$0xff] }
  0x2c   :  { %832 = vmatprep.mubr.msk.f32.mxu0 %vm159_vm0, %v19_v36  ;;  %862 = vmatprep.mubr.msk.f32.mxu1 %vm159_vm0, %v79_v37  ;;  %v108_v35 = vld [vmem:[%s1755_s0 + $0x2f0] sm:$0xff]  ;;  %v51_v36 = vld [vmem:[%s1755_s0 + $0x128] sm:$0xff] }
  0x2d   :  { %v111_v37 = vld [vmem:[%s1755_s0 + $0x308] sm:$0xff] }
  0x2f   :  { %415 = vmatmul.mubr.f32.gmra.mrb[4].mxu0 %v18_v38  ;;  %565 = vmatmul.mubr.f32.gmra.mrb[4].mxu1 %v78_v39  ;;  %v50_v38 = vld [vmem:[%s1755_s0 + $0x120] sm:$0xff] }
  0x30   :  { %833 = vmatprep.mubr.msk.f32.mxu0 %vm159_vm0, %v21_v40  ;;  %863 = vmatprep.mubr.msk.f32.mxu1 %vm159_vm0, %v81_v41  ;;  %v110_v39 = vld [vmem:[%s1755_s0 + $0x300] sm:$0xff]  ;;  %v53_v40 = vld [vmem:[%s1755_s0 + $0x138] sm:$0xff] }
  0x31   :  { %v113_v41 = vld [vmem:[%s1755_s0 + $0x318] sm:$0xff] }
  0x33   :  { %420 = vmatmul.mubr.f32.gmra.mrb[6].mxu0 %v20_v42  ;;  %570 = vmatmul.mubr.f32.gmra.mrb[6].mxu1 %v80_v43  ;;  %v52_v42 = vld [vmem:[%s1755_s0 + $0x130] sm:$0xff] }
  0x34   :  { %834 = vmatprep.mubr.msk.f32.mxu0 %vm159_vm0, %v23_v44  ;;  %864 = vmatprep.mubr.msk.f32.mxu1 %vm159_vm0, %v83_v45  ;;  %v112_v43 = vld [vmem:[%s1755_s0 + $0x310] sm:$0xff]  ;;  %v55_v44 = vld [vmem:[%s1755_s0 + $0x148] sm:$0xff] }
  0x35   :  { %v115_v45 = vld [vmem:[%s1755_s0 + $0x328] sm:$0xff] }
  0x37   :  { %425 = vmatmul.mubr.f32.gmra.mrb[8].mxu0 %v22_v46  ;;  %575 = vmatmul.mubr.f32.gmra.mrb[8].mxu1 %v82_v47  ;;  %v54_v46 = vld [vmem:[%s1755_s0 + $0x140] sm:$0xff] }
  0x38   :  { %835 = vmatprep.mubr.msk.f32.mxu0 %vm159_vm0, %v25_v48  ;;  %865 = vmatprep.mubr.msk.f32.mxu1 %vm159_vm0, %v85_v49  ;;  %v114_v47 = vld [vmem:[%s1755_s0 + $0x320] sm:$0xff]  ;;  %v57_v48 = vld [vmem:[%s1755_s0 + $0x158] sm:$0xff] }
  0x39   :  { %v117_v49 = vld [vmem:[%s1755_s0 + $0x338] sm:$0xff] }
  0x3b   :  { %430 = vmatmul.mubr.f32.gmra.mrb[10].mxu0 %v24_v50  ;;  %580 = vmatmul.mubr.f32.gmra.mrb[10].mxu1 %v84_v51  ;;  %v56_v50 = vld [vmem:[%s1755_s0 + $0x150] sm:$0xff] }
  0x3c   :  { %836 = vmatprep.mubr.msk.f32.mxu0 %vm159_vm0, %v27_v52  ;;  %866 = vmatprep.mubr.msk.f32.mxu1 %vm159_vm0, %v87_v53  ;;  %v116_v51 = vld [vmem:[%s1755_s0 + $0x330] sm:$0xff]  ;;  %v59_v52 = vld [vmem:[%s1755_s0 + $0x168] sm:$0xff] }
  0x3d   :  { %v119_v53 = vld [vmem:[%s1755_s0 + $0x348] sm:$0xff] }
  0x3f   :  { %435 = vmatmul.mubr.f32.gmra.mrb[12].mxu0 %v26_v54  ;;  %585 = vmatmul.mubr.f32.gmra.mrb[12].mxu1 %v86_v55  ;;  %v58_v54 = vld [vmem:[%s1755_s0 + $0x160] sm:$0xff] }
  0x40   :  { %837 = vmatprep.mubr.msk.f32.mxu0 %vm159_vm0, %v29_v56  ;;  %867 = vmatprep.mubr.msk.f32.mxu1 %vm159_vm0, %v89_v57  ;;  %v118_v55 = vld [vmem:[%s1755_s0 + $0x340] sm:$0xff]  ;;  %v61_v56 = vld [vmem:[%s1755_s0 + $0x178] sm:$0xff] }
  0x41   :  { %v121_v57 = vld [vmem:[%s1755_s0 + $0x358] sm:$0xff] }
  0x43   :  { %440 = vmatmul.mubr.f32.gmra.mrb[14].mxu0 %v28_v58  ;;  %590 = vmatmul.mubr.f32.gmra.mrb[14].mxu1 %v88_v59  ;;  %v60_v58 = vld [vmem:[%s1755_s0 + $0x170] sm:$0xff] }
  0x44   :  { %838 = vmatprep.mubr.msk.f32.mxu0 %vm159_vm0, %v31_v60  ;;  %868 = vmatprep.mubr.msk.f32.mxu1 %vm159_vm0, %v91_v61  ;;  %v120_v59 = vld [vmem:[%s1755_s0 + $0x350] sm:$0xff]  ;;  %v63_v60 = vld [vmem:[%s1755_s0 + $0x188] sm:$0xff] }
  0x45   :  { %v123_v61 = vld [vmem:[%s1755_s0 + $0x368] sm:$0xff] }
  0x47   :  { %445 = vmatmul.mubr.f32.gmra.mrb[16].mxu0 %v30_v62  ;;  %595 = vmatmul.mubr.f32.gmra.mrb[16].mxu1 %v90_v63  ;;  %v62_v62 = vld [vmem:[%s1755_s0 + $0x180] sm:$0xff] }
  0x48   :  { %839 = vmatprep.mubr.msk.f32.mxu0 %vm159_vm0, %v33_v0  ;;  %869 = vmatprep.mubr.msk.f32.mxu1 %vm159_vm0, %v93_v1  ;;  %v122_v63 = vld [vmem:[%s1755_s0 + $0x360] sm:$0xff]  ;;  %v65_v0 = vld [vmem:[%s1755_s0 + $0x198] sm:$0xff] }
  0x49   :  { %v125_v1 = vld [vmem:[%s1755_s0 + $0x378] sm:$0xff] }
  0x4b   :  { %450 = vmatmul.mubr.f32.gmra.mrb[18].mxu0 %v32_v2  ;;  %600 = vmatmul.mubr.f32.gmra.mrb[18].mxu1 %v92_v3  ;;  %v64_v2 = vld [vmem:[%s1755_s0 + $0x190] sm:$0xff] }
  0x4c   :  { %840 = vmatprep.mubr.msk.f32.mxu0 %vm159_vm0, %v35_v4  ;;  %870 = vmatprep.mubr.msk.f32.mxu1 %vm159_vm0, %v95_v5  ;;  %v124_v3 = vld [vmem:[%s1755_s0 + $0x370] sm:$0xff]  ;;  %v67_v4 = vld [vmem:[%s1755_s0 + $0x1a8] sm:$0xff] }
  0x4d   :  { %v127_v5 = vld [vmem:[%s1755_s0 + $0x388] sm:$0xff] }
  0x4f   :  { %455 = vmatmul.mubr.f32.gmra.mrb[20].mxu0 %v34_v6  ;;  %605 = vmatmul.mubr.f32.gmra.mrb[20].mxu1 %v94_v7  ;;  %v66_v6 = vld [vmem:[%s1755_s0 + $0x1a0] sm:$0xff] }
  0x50   :  { %841 = vmatprep.mubr.msk.f32.mxu0 %vm159_vm0, %v37_v8  ;;  %871 = vmatprep.mubr.msk.f32.mxu1 %vm159_vm0, %v97_v9  ;;  %v126_v7 = vld [vmem:[%s1755_s0 + $0x380] sm:$0xff]  ;;  %v69_v8 = vld [vmem:[%s1755_s0 + $0x1b8] sm:$0xff] }
  0x51   :  { %v129_v9 = vld [vmem:[%s1755_s0 + $0x398] sm:$0xff] }
  0x53   :  { %460 = vmatmul.mubr.f32.gmra.mrb[22].mxu0 %v36_v10  ;;  %610 = vmatmul.mubr.f32.gmra.mrb[22].mxu1 %v96_v11  ;;  %v68_v10 = vld [vmem:[%s1755_s0 + $0x1b0] sm:$0xff] }
  0x54   :  { %842 = vmatprep.mubr.msk.f32.mxu0 %vm159_vm0, %v39_v12  ;;  %872 = vmatprep.mubr.msk.f32.mxu1 %vm159_vm0, %v99_v13  ;;  %v128_v11 = vld [vmem:[%s1755_s0 + $0x390] sm:$0xff]  ;;  %v71_v12 = vld [vmem:[%s1755_s0 + $0x1c8] sm:$0xff] }
  0x55   :  { %v131_v13 = vld [vmem:[%s1755_s0 + $0x3a8] sm:$0xff] }
  0x57   :  { %465 = vmatmul.mubr.f32.gmra.mrb[24].mxu0 %v38_v14  ;;  %615 = vmatmul.mubr.f32.gmra.mrb[24].mxu1 %v98_v15  ;;  %v70_v14 = vld [vmem:[%s1755_s0 + $0x1c0] sm:$0xff] }
  0x58   :  { %843 = vmatprep.mubr.msk.f32.mxu0 %vm159_vm0, %v41_v16  ;;  %873 = vmatprep.mubr.msk.f32.mxu1 %vm159_vm0, %v101_v17  ;;  %v130_v15 = vld [vmem:[%s1755_s0 + $0x3a0] sm:$0xff]  ;;  %v73_v16 = vld [vmem:[%s1755_s0 + $0x1d8] sm:$0xff] }
  0x59   :  { %v133_v17 = vld [vmem:[%s1755_s0 + $0x3b8] sm:$0xff] }
  0x5b   :  { %470 = vmatmul.mubr.f32.gmra.mrb[26].mxu0 %v40_v18  ;;  %620 = vmatmul.mubr.f32.gmra.mrb[26].mxu1 %v100_v19  ;;  %v72_v18 = vld [vmem:[%s1755_s0 + $0x1d0] sm:$0xff] }
  0x5c   :  { %844 = vmatprep.mubr.msk.f32.mxu0 %vm159_vm0, %v43_v20  ;;  %874 = vmatprep.mubr.msk.f32.mxu1 %vm159_vm0, %v103_v21  ;;  %v132_v19 = vld [vmem:[%s1755_s0 + $0x3b0] sm:$0xff]  ;;  %v1452_v20 = vld [vmem:[%s1756_s2] ss:$0 sm:$0xff] }
  0x5f   :  { %475 = vmatmul.mubr.f32.gmra.mrb[28].mxu0 %v42_v22  ;;  %625 = vmatmul.mubr.f32.gmra.mrb[28].mxu1 %v102_v23 }
  0x60   :  { %845 = vmatprep.mubr.msk.f32.mxu0 %vm159_vm0, %v45_v24  ;;  %875 = vmatprep.mubr.msk.f32.mxu1 %vm159_vm0, %v105_v25 }
  0x63   :  { %480 = vmatmul.mubr.f32.gmra.mrb[30].mxu0 %v44_v26  ;;  %630 = vmatmul.mubr.f32.gmra.mrb[30].mxu1 %v104_v27 }
  0x64   :  { %846 = vmatprep.mubr.msk.f32.mxu0 %vm159_vm0, %v47_v28  ;;  %876 = vmatprep.mubr.msk.f32.mxu1 %vm159_vm0, %v107_v29 }
  0x67   :  { %485 = vmatmul.mubr.f32.gmra.mrb[32].mxu0 %v46_v30  ;;  %635 = vmatmul.mubr.f32.gmra.mrb[32].mxu1 %v106_v31 }
  0x68   :  { %847 = vmatprep.mubr.msk.f32.mxu0 %vm159_vm0, %v49_v32  ;;  %877 = vmatprep.mubr.msk.f32.mxu1 %vm159_vm0, %v109_v33 }
  0x6b   :  { %490 = vmatmul.mubr.f32.gmra.mrb[34].mxu0 %v48_v34  ;;  %640 = vmatmul.mubr.f32.gmra.mrb[34].mxu1 %v108_v35 }
  0x6c   :  { %848 = vmatprep.mubr.msk.f32.mxu0 %vm159_vm0, %v51_v36  ;;  %878 = vmatprep.mubr.msk.f32.mxu1 %vm159_vm0, %v111_v37 }
  0x6f   :  { %495 = vmatmul.mubr.f32.gmra.mrb[36].mxu0 %v50_v38  ;;  %645 = vmatmul.mubr.f32.gmra.mrb[36].mxu1 %v110_v39 }
  0x70   :  { %849 = vmatprep.mubr.msk.f32.mxu0 %vm159_vm0, %v53_v40  ;;  %879 = vmatprep.mubr.msk.f32.mxu1 %vm159_vm0, %v113_v41 }
  0x73   :  { %500 = vmatmul.mubr.f32.gmra.mrb[38].mxu0 %v52_v42  ;;  %650 = vmatmul.mubr.f32.gmra.mrb[38].mxu1 %v112_v43 }
  0x74   :  { %850 = vmatprep.mubr.msk.f32.mxu0 %vm159_vm0, %v55_v44  ;;  %880 = vmatprep.mubr.msk.f32.mxu1 %vm159_vm0, %v115_v45 }
  0x77   :  { %505 = vmatmul.mubr.f32.gmra.mrb[40].mxu0 %v54_v46  ;;  %655 = vmatmul.mubr.f32.gmra.mrb[40].mxu1 %v114_v47 }
  0x78   :  { %851 = vmatprep.mubr.msk.f32.mxu0 %vm159_vm0, %v57_v48  ;;  %881 = vmatprep.mubr.msk.f32.mxu1 %vm159_vm0, %v117_v49 }
  0x7b   :  { %510 = vmatmul.mubr.f32.gmra.mrb[42].mxu0 %v56_v50  ;;  %660 = vmatmul.mubr.f32.gmra.mrb[42].mxu1 %v116_v51 }
  0x7c   :  { %852 = vmatprep.mubr.msk.f32.mxu0 %vm159_vm0, %v59_v52  ;;  %882 = vmatprep.mubr.msk.f32.mxu1 %vm159_vm0, %v119_v53 }
  0x7f   :  { %515 = vmatmul.mubr.f32.gmra.mrb[44].mxu0 %v58_v54  ;;  %665 = vmatmul.mubr.f32.gmra.mrb[44].mxu1 %v118_v55 }
  0x80   :  { %853 = vmatprep.mubr.msk.f32.mxu0 %vm159_vm0, %v61_v56  ;;  %883 = vmatprep.mubr.msk.f32.mxu1 %vm159_vm0, %v121_v57 }
  0x83   :  { %520 = vmatmul.mubr.f32.gmra.mrb[46].mxu0 %v60_v58  ;;  %670 = vmatmul.mubr.f32.gmra.mrb[46].mxu1 %v120_v59 }
  0x84   :  { %854 = vmatprep.mubr.msk.f32.mxu0 %vm159_vm0, %v63_v60  ;;  %884 = vmatprep.mubr.msk.f32.mxu1 %vm159_vm0, %v123_v61 }
  0x87   :  { %525 = vmatmul.mubr.f32.gmra.mrb[48].mxu0 %v62_v62  ;;  %675 = vmatmul.mubr.f32.gmra.mrb[48].mxu1 %v122_v63 }
  0x88   :  { %855 = vmatprep.mubr.msk.f32.mxu0 %vm159_vm0, %v65_v0  ;;  %885 = vmatprep.mubr.msk.f32.mxu1 %vm159_vm0, %v125_v1 }
  0x8b   :  { %530 = vmatmul.mubr.f32.gmra.mrb[50].mxu0 %v64_v2  ;;  %680 = vmatmul.mubr.f32.gmra.mrb[50].mxu1 %v124_v3 }
  0x8c   :  { %856 = vmatprep.mubr.msk.f32.mxu0 %vm159_vm0, %v67_v4  ;;  %886 = vmatprep.mubr.msk.f32.mxu1 %vm159_vm0, %v127_v5 }
  0x8f   :  { %535 = vmatmul.mubr.f32.gmra.mrb[52].mxu0 %v66_v6  ;;  %685 = vmatmul.mubr.f32.gmra.mrb[52].mxu1 %v126_v7 }
  0x90   :  { %857 = vmatprep.mubr.msk.f32.mxu0 %vm159_vm0, %v69_v8  ;;  %887 = vmatprep.mubr.msk.f32.mxu1 %vm159_vm0, %v129_v9 }
  0x93   :  { %540 = vmatmul.mubr.f32.gmra.mrb[54].mxu0 %v68_v10  ;;  %690 = vmatmul.mubr.f32.gmra.mrb[54].mxu1 %v128_v11 }
  0x94   :  { %858 = vmatprep.mubr.msk.f32.mxu0 %vm159_vm0, %v71_v12  ;;  %888 = vmatprep.mubr.msk.f32.mxu1 %vm159_vm0, %v131_v13 }
  0x97   :  { %545 = vmatmul.mubr.f32.gmra.mrb[56].mxu0 %v70_v14  ;;  %695 = vmatmul.mubr.f32.gmra.mrb[56].mxu1 %v130_v15 }
  0x98   :  { %859 = vmatprep.mubr.msk.f32.mxu0 %vm159_vm0, %v73_v16  ;;  %889 = vmatprep.mubr.msk.f32.mxu1 %vm159_vm0, %v133_v17 }
  0x9b   :  { %550 = vmatmul.mubr.f32.gmra.mrb[58].mxu0 %v72_v18  ;;  %700 = vmatmul.mubr.f32.gmra.mrb[58].mxu1 %v132_v19 }
  0xfa   :  { %v406_v21 = vpop.f32.mrb[0].mxu0  ;;  %v556_v22 = vpop.f32.mrb[0].mxu1 }
  0xfb   :  { %v407_v23 = vadd.f32 %v1452_v20, %v406_v21  ;;  %v557_v24 = vadd.f32 %v1452_v20, %v556_v22  ;;  %v408_v25 = vpop.f32.mrb[1].mxu0  ;;  %v558_v26 = vpop.f32.mrb[1].mxu1 }
  0xfd   :  { %v705_v27 = vmax.f32 %v407_v23, 0.0  ;;  %v735_v28 = vmax.f32 %v557_v24, 0.0 }
  0xfe   :  { %v411_v29 = vpop.f32.mrb[2].mxu0  ;;  %v561_v30 = vpop.f32.mrb[2].mxu1 }
  0xff   :  { %765 = vst.msk [vmem:[%s1757_s3] sm:$0xff] %vm159_vm0, %v705_v27  ;;  %795 = vst.msk [vmem:[%s1757_s3 + $0xf0] sm:$0xff] %vm159_vm0, %v735_v28  ;;  %v412_v31 = vadd.f32 %v1452_v20, %v411_v29  ;;  %v562_v32 = vadd.f32 %v1452_v20, %v561_v30  ;;  %v413_v33 = vpop.f32.mrb[3].mxu0  ;;  %v563_v34 = vpop.f32.mrb[3].mxu1 }
 0x101   :  { %v706_v35 = vmax.f32 %v412_v31, 0.0  ;;  %v736_v36 = vmax.f32 %v562_v32, 0.0 }
 0x102   :  { %v416_v37 = vpop.f32.mrb[4].mxu0  ;;  %v566_v38 = vpop.f32.mrb[4].mxu1 }
 0x103   :  { %766 = vst.msk [vmem:[%s1757_s3 + $0x8] sm:$0xff] %vm159_vm0, %v706_v35  ;;  %796 = vst.msk [vmem:[%s1757_s3 + $0xf8] sm:$0xff] %vm159_vm0, %v736_v36  ;;  %v417_v39 = vadd.f32 %v1452_v20, %v416_v37  ;;  %v567_v40 = vadd.f32 %v1452_v20, %v566_v38  ;;  %v418_v41 = vpop.f32.mrb[5].mxu0  ;;  %v568_v42 = vpop.f32.mrb[5].mxu1 }
 0x105   :  { %v707_v43 = vmax.f32 %v417_v39, 0.0  ;;  %v737_v44 = vmax.f32 %v567_v40, 0.0 }
 0x106   :  { %v421_v45 = vpop.f32.mrb[6].mxu0  ;;  %v571_v46 = vpop.f32.mrb[6].mxu1 }
 0x107   :  { %767 = vst.msk [vmem:[%s1757_s3 + $0x10] sm:$0xff] %vm159_vm0, %v707_v43  ;;  %797 = vst.msk [vmem:[%s1757_s3 + $0x100] sm:$0xff] %vm159_vm0, %v737_v44  ;;  %v422_v47 = vadd.f32 %v1452_v20, %v421_v45  ;;  %v572_v48 = vadd.f32 %v1452_v20, %v571_v46  ;;  %v423_v49 = vpop.f32.mrb[7].mxu0  ;;  %v573_v50 = vpop.f32.mrb[7].mxu1 }
 0x109   :  { %v708_v51 = vmax.f32 %v422_v47, 0.0  ;;  %v738_v52 = vmax.f32 %v572_v48, 0.0 }
 0x10a   :  { %v426_v53 = vpop.f32.mrb[8].mxu0  ;;  %v576_v54 = vpop.f32.mrb[8].mxu1 }
 0x10b   :  { %768 = vst.msk [vmem:[%s1757_s3 + $0x18] sm:$0xff] %vm159_vm0, %v708_v51  ;;  %798 = vst.msk [vmem:[%s1757_s3 + $0x108] sm:$0xff] %vm159_vm0, %v738_v52  ;;  %v427_v55 = vadd.f32 %v1452_v20, %v426_v53  ;;  %v577_v56 = vadd.f32 %v1452_v20, %v576_v54  ;;  %v428_v57 = vpop.f32.mrb[9].mxu0  ;;  %v578_v58 = vpop.f32.mrb[9].mxu1 }
 0x10d   :  { %v709_v59 = vmax.f32 %v427_v55, 0.0  ;;  %v739_v60 = vmax.f32 %v577_v56, 0.0 }
 0x10e   :  { %v431_v61 = vpop.f32.mrb[10].mxu0  ;;  %v581_v62 = vpop.f32.mrb[10].mxu1 }
 0x10f   :  { %769 = vst.msk [vmem:[%s1757_s3 + $0x20] sm:$0xff] %vm159_vm0, %v709_v59  ;;  %799 = vst.msk [vmem:[%s1757_s3 + $0x110] sm:$0xff] %vm159_vm0, %v739_v60  ;;  %v432_v63 = vadd.f32 %v1452_v20, %v431_v61  ;;  %v582_v0 = vadd.f32 %v1452_v20, %v581_v62  ;;  %v433_v1 = vpop.f32.mrb[11].mxu0  ;;  %v583_v2 = vpop.f32.mrb[11].mxu1 }
 0x111   :  { %v710_v3 = vmax.f32 %v432_v63, 0.0  ;;  %v740_v4 = vmax.f32 %v582_v0, 0.0 }
 0x112   :  { %v436_v5 = vpop.f32.mrb[12].mxu0  ;;  %v586_v6 = vpop.f32.mrb[12].mxu1 }
 0x113   :  { %770 = vst.msk [vmem:[%s1757_s3 + $0x28] sm:$0xff] %vm159_vm0, %v710_v3  ;;  %800 = vst.msk [vmem:[%s1757_s3 + $0x118] sm:$0xff] %vm159_vm0, %v740_v4  ;;  %v437_v7 = vadd.f32 %v1452_v20, %v436_v5  ;;  %v587_v8 = vadd.f32 %v1452_v20, %v586_v6  ;;  %v438_v9 = vpop.f32.mrb[13].mxu0  ;;  %v588_v10 = vpop.f32.mrb[13].mxu1 }
 0x115   :  { %v711_v11 = vmax.f32 %v437_v7, 0.0  ;;  %v741_v12 = vmax.f32 %v587_v8, 0.0 }
 0x116   :  { %v441_v13 = vpop.f32.mrb[14].mxu0  ;;  %v591_v14 = vpop.f32.mrb[14].mxu1 }
 0x117   :  { %771 = vst.msk [vmem:[%s1757_s3 + $0x30] sm:$0xff] %vm159_vm0, %v711_v11  ;;  %801 = vst.msk [vmem:[%s1757_s3 + $0x120] sm:$0xff] %vm159_vm0, %v741_v12  ;;  %v442_v15 = vadd.f32 %v1452_v20, %v441_v13  ;;  %v592_v16 = vadd.f32 %v1452_v20, %v591_v14  ;;  %v443_v17 = vpop.f32.mrb[15].mxu0  ;;  %v593_v18 = vpop.f32.mrb[15].mxu1 }
 0x119   :  { %v712_v19 = vmax.f32 %v442_v15, 0.0  ;;  %v742_v21 = vmax.f32 %v592_v16, 0.0 }
 0x11a   :  { %v446_v22 = vpop.f32.mrb[16].mxu0  ;;  %v596_v23 = vpop.f32.mrb[16].mxu1 }
 0x11b   :  { %772 = vst.msk [vmem:[%s1757_s3 + $0x38] sm:$0xff] %vm159_vm0, %v712_v19  ;;  %802 = vst.msk [vmem:[%s1757_s3 + $0x128] sm:$0xff] %vm159_vm0, %v742_v21  ;;  %v447_v24 = vadd.f32 %v1452_v20, %v446_v22  ;;  %v597_v25 = vadd.f32 %v1452_v20, %v596_v23  ;;  %v448_v26 = vpop.f32.mrb[17].mxu0  ;;  %v598_v27 = vpop.f32.mrb[17].mxu1 }
 0x11d   :  { %v713_v28 = vmax.f32 %v447_v24, 0.0  ;;  %v743_v29 = vmax.f32 %v597_v25, 0.0 }
 0x11e   :  { %v451_v30 = vpop.f32.mrb[18].mxu0  ;;  %v601_v31 = vpop.f32.mrb[18].mxu1 }
 0x11f   :  { %773 = vst.msk [vmem:[%s1757_s3 + $0x40] sm:$0xff] %vm159_vm0, %v713_v28  ;;  %803 = vst.msk [vmem:[%s1757_s3 + $0x130] sm:$0xff] %vm159_vm0, %v743_v29  ;;  %v452_v32 = vadd.f32 %v1452_v20, %v451_v30  ;;  %v602_v33 = vadd.f32 %v1452_v20, %v601_v31  ;;  %v453_v34 = vpop.f32.mrb[19].mxu0  ;;  %v603_v35 = vpop.f32.mrb[19].mxu1 }
 0x121   :  { %v714_v36 = vmax.f32 %v452_v32, 0.0  ;;  %v744_v37 = vmax.f32 %v602_v33, 0.0 }
 0x122   :  { %v456_v38 = vpop.f32.mrb[20].mxu0  ;;  %v606_v39 = vpop.f32.mrb[20].mxu1 }
 0x123   :  { %774 = vst.msk [vmem:[%s1757_s3 + $0x48] sm:$0xff] %vm159_vm0, %v714_v36  ;;  %804 = vst.msk [vmem:[%s1757_s3 + $0x138] sm:$0xff] %vm159_vm0, %v744_v37  ;;  %v457_v40 = vadd.f32 %v1452_v20, %v456_v38  ;;  %v607_v41 = vadd.f32 %v1452_v20, %v606_v39  ;;  %v458_v42 = vpop.f32.mrb[21].mxu0  ;;  %v608_v43 = vpop.f32.mrb[21].mxu1 }
 0x125   :  { %v715_v44 = vmax.f32 %v457_v40, 0.0  ;;  %v745_v45 = vmax.f32 %v607_v41, 0.0 }
 0x126   :  { %v461_v46 = vpop.f32.mrb[22].mxu0  ;;  %v611_v47 = vpop.f32.mrb[22].mxu1 }
 0x127   :  { %775 = vst.msk [vmem:[%s1757_s3 + $0x50] sm:$0xff] %vm159_vm0, %v715_v44  ;;  %805 = vst.msk [vmem:[%s1757_s3 + $0x140] sm:$0xff] %vm159_vm0, %v745_v45  ;;  %v462_v48 = vadd.f32 %v1452_v20, %v461_v46  ;;  %v612_v49 = vadd.f32 %v1452_v20, %v611_v47  ;;  %v463_v50 = vpop.f32.mrb[23].mxu0  ;;  %v613_v51 = vpop.f32.mrb[23].mxu1 }
 0x129   :  { %v716_v52 = vmax.f32 %v462_v48, 0.0  ;;  %v746_v53 = vmax.f32 %v612_v49, 0.0 }
 0x12a   :  { %v466_v54 = vpop.f32.mrb[24].mxu0  ;;  %v616_v55 = vpop.f32.mrb[24].mxu1 }
 0x12b   :  { %776 = vst.msk [vmem:[%s1757_s3 + $0x58] sm:$0xff] %vm159_vm0, %v716_v52  ;;  %806 = vst.msk [vmem:[%s1757_s3 + $0x148] sm:$0xff] %vm159_vm0, %v746_v53  ;;  %v467_v56 = vadd.f32 %v1452_v20, %v466_v54  ;;  %v617_v57 = vadd.f32 %v1452_v20, %v616_v55  ;;  %v468_v58 = vpop.f32.mrb[25].mxu0  ;;  %v618_v59 = vpop.f32.mrb[25].mxu1 }
 0x12d   :  { %v717_v60 = vmax.f32 %v467_v56, 0.0  ;;  %v747_v61 = vmax.f32 %v617_v57, 0.0 }
 0x12e   :  { %v471_v62 = vpop.f32.mrb[26].mxu0  ;;  %v621_v63 = vpop.f32.mrb[26].mxu1 }
 0x12f   :  { %777 = vst.msk [vmem:[%s1757_s3 + $0x60] sm:$0xff] %vm159_vm0, %v717_v60  ;;  %807 = vst.msk [vmem:[%s1757_s3 + $0x150] sm:$0xff] %vm159_vm0, %v747_v61  ;;  %v472_v0 = vadd.f32 %v1452_v20, %v471_v62  ;;  %v622_v1 = vadd.f32 %v1452_v20, %v621_v63  ;;  %v473_v2 = vpop.f32.mrb[27].mxu0  ;;  %v623_v3 = vpop.f32.mrb[27].mxu1 }
 0x131   :  { %v718_v4 = vmax.f32 %v472_v0, 0.0  ;;  %v748_v5 = vmax.f32 %v622_v1, 0.0 }
 0x132   :  { %v476_v6 = vpop.f32.mrb[28].mxu0  ;;  %v626_v7 = vpop.f32.mrb[28].mxu1 }
 0x133   :  { %778 = vst.msk [vmem:[%s1757_s3 + $0x68] sm:$0xff] %vm159_vm0, %v718_v4  ;;  %808 = vst.msk [vmem:[%s1757_s3 + $0x158] sm:$0xff] %vm159_vm0, %v748_v5  ;;  %v477_v8 = vadd.f32 %v1452_v20, %v476_v6  ;;  %v627_v9 = vadd.f32 %v1452_v20, %v626_v7  ;;  %v478_v10 = vpop.f32.mrb[29].mxu0  ;;  %v628_v11 = vpop.f32.mrb[29].mxu1 }
 0x135   :  { %v719_v12 = vmax.f32 %v477_v8, 0.0  ;;  %v749_v13 = vmax.f32 %v627_v9, 0.0 }
 0x136   :  { %v481_v14 = vpop.f32.mrb[30].mxu0  ;;  %v631_v15 = vpop.f32.mrb[30].mxu1 }
 0x137   :  { %779 = vst.msk [vmem:[%s1757_s3 + $0x70] sm:$0xff] %vm159_vm0, %v719_v12  ;;  %809 = vst.msk [vmem:[%s1757_s3 + $0x160] sm:$0xff] %vm159_vm0, %v749_v13  ;;  %v482_v16 = vadd.f32 %v1452_v20, %v481_v14  ;;  %v632_v17 = vadd.f32 %v1452_v20, %v631_v15  ;;  %v483_v18 = vpop.f32.mrb[31].mxu0  ;;  %v633_v19 = vpop.f32.mrb[31].mxu1 }
 0x139   :  { %v720_v21 = vmax.f32 %v482_v16, 0.0  ;;  %v750_v22 = vmax.f32 %v632_v17, 0.0 }
 0x13a   :  { %v486_v23 = vpop.f32.mrb[32].mxu0  ;;  %v636_v24 = vpop.f32.mrb[32].mxu1 }
 0x13b   :  { %780 = vst.msk [vmem:[%s1757_s3 + $0x78] sm:$0xff] %vm159_vm0, %v720_v21  ;;  %810 = vst.msk [vmem:[%s1757_s3 + $0x168] sm:$0xff] %vm159_vm0, %v750_v22  ;;  %v487_v25 = vadd.f32 %v1452_v20, %v486_v23  ;;  %v637_v26 = vadd.f32 %v1452_v20, %v636_v24  ;;  %v488_v27 = vpop.f32.mrb[33].mxu0  ;;  %v638_v28 = vpop.f32.mrb[33].mxu1 }
 0x13d   :  { %v721_v29 = vmax.f32 %v487_v25, 0.0  ;;  %v751_v30 = vmax.f32 %v637_v26, 0.0 }
 0x13e   :  { %v491_v31 = vpop.f32.mrb[34].mxu0  ;;  %v641_v32 = vpop.f32.mrb[34].mxu1 }
 0x13f   :  { %781 = vst.msk [vmem:[%s1757_s3 + $0x80] sm:$0xff] %vm159_vm0, %v721_v29  ;;  %811 = vst.msk [vmem:[%s1757_s3 + $0x170] sm:$0xff] %vm159_vm0, %v751_v30  ;;  %v492_v33 = vadd.f32 %v1452_v20, %v491_v31  ;;  %v642_v34 = vadd.f32 %v1452_v20, %v641_v32  ;;  %v493_v35 = vpop.f32.mrb[35].mxu0  ;;  %v643_v36 = vpop.f32.mrb[35].mxu1 }
 0x141   :  { %v722_v37 = vmax.f32 %v492_v33, 0.0  ;;  %v752_v38 = vmax.f32 %v642_v34, 0.0 }
 0x142   :  { %v496_v39 = vpop.f32.mrb[36].mxu0  ;;  %v646_v40 = vpop.f32.mrb[36].mxu1 }
 0x143   :  { %782 = vst.msk [vmem:[%s1757_s3 + $0x88] sm:$0xff] %vm159_vm0, %v722_v37  ;;  %812 = vst.msk [vmem:[%s1757_s3 + $0x178] sm:$0xff] %vm159_vm0, %v752_v38  ;;  %v497_v41 = vadd.f32 %v1452_v20, %v496_v39  ;;  %v647_v42 = vadd.f32 %v1452_v20, %v646_v40  ;;  %v498_v43 = vpop.f32.mrb[37].mxu0  ;;  %v648_v44 = vpop.f32.mrb[37].mxu1 }
 0x145   :  { %v723_v45 = vmax.f32 %v497_v41, 0.0  ;;  %v753_v46 = vmax.f32 %v647_v42, 0.0 }
 0x146   :  { %v501_v47 = vpop.f32.mrb[38].mxu0  ;;  %v651_v48 = vpop.f32.mrb[38].mxu1 }
 0x147   :  { %783 = vst.msk [vmem:[%s1757_s3 + $0x90] sm:$0xff] %vm159_vm0, %v723_v45  ;;  %813 = vst.msk [vmem:[%s1757_s3 + $0x180] sm:$0xff] %vm159_vm0, %v753_v46  ;;  %v502_v49 = vadd.f32 %v1452_v20, %v501_v47  ;;  %v652_v50 = vadd.f32 %v1452_v20, %v651_v48  ;;  %v503_v51 = vpop.f32.mrb[39].mxu0  ;;  %v653_v52 = vpop.f32.mrb[39].mxu1 }
 0x149   :  { %v724_v53 = vmax.f32 %v502_v49, 0.0  ;;  %v754_v54 = vmax.f32 %v652_v50, 0.0 }
 0x14a   :  { %v506_v55 = vpop.f32.mrb[40].mxu0  ;;  %v656_v56 = vpop.f32.mrb[40].mxu1 }
 0x14b   :  { %784 = vst.msk [vmem:[%s1757_s3 + $0x98] sm:$0xff] %vm159_vm0, %v724_v53  ;;  %814 = vst.msk [vmem:[%s1757_s3 + $0x188] sm:$0xff] %vm159_vm0, %v754_v54  ;;  %v507_v57 = vadd.f32 %v1452_v20, %v506_v55  ;;  %v657_v58 = vadd.f32 %v1452_v20, %v656_v56  ;;  %v508_v59 = vpop.f32.mrb[41].mxu0  ;;  %v658_v60 = vpop.f32.mrb[41].mxu1 }
 0x14d   :  { %v725_v61 = vmax.f32 %v507_v57, 0.0  ;;  %v755_v62 = vmax.f32 %v657_v58, 0.0 }
 0x14e   :  { %v511_v63 = vpop.f32.mrb[42].mxu0  ;;  %v661_v0 = vpop.f32.mrb[42].mxu1 }
 0x14f   :  { %785 = vst.msk [vmem:[%s1757_s3 + $0xa0] sm:$0xff] %vm159_vm0, %v725_v61  ;;  %815 = vst.msk [vmem:[%s1757_s3 + $0x190] sm:$0xff] %vm159_vm0, %v755_v62  ;;  %v512_v1 = vadd.f32 %v1452_v20, %v511_v63  ;;  %v662_v2 = vadd.f32 %v1452_v20, %v661_v0  ;;  %v513_v3 = vpop.f32.mrb[43].mxu0  ;;  %v663_v4 = vpop.f32.mrb[43].mxu1 }
 0x151   :  { %v726_v5 = vmax.f32 %v512_v1, 0.0  ;;  %v756_v6 = vmax.f32 %v662_v2, 0.0 }
 0x152   :  { %v516_v7 = vpop.f32.mrb[44].mxu0  ;;  %v666_v8 = vpop.f32.mrb[44].mxu1 }
 0x153   :  { %786 = vst.msk [vmem:[%s1757_s3 + $0xa8] sm:$0xff] %vm159_vm0, %v726_v5  ;;  %816 = vst.msk [vmem:[%s1757_s3 + $0x198] sm:$0xff] %vm159_vm0, %v756_v6  ;;  %v517_v9 = vadd.f32 %v1452_v20, %v516_v7  ;;  %v667_v10 = vadd.f32 %v1452_v20, %v666_v8  ;;  %v518_v11 = vpop.f32.mrb[45].mxu0  ;;  %v668_v12 = vpop.f32.mrb[45].mxu1 }
 0x155   :  { %v727_v13 = vmax.f32 %v517_v9, 0.0  ;;  %v757_v14 = vmax.f32 %v667_v10, 0.0 }
 0x156   :  { %v521_v15 = vpop.f32.mrb[46].mxu0  ;;  %v671_v16 = vpop.f32.mrb[46].mxu1 }
 0x157   :  { %787 = vst.msk [vmem:[%s1757_s3 + $0xb0] sm:$0xff] %vm159_vm0, %v727_v13  ;;  %817 = vst.msk [vmem:[%s1757_s3 + $0x1a0] sm:$0xff] %vm159_vm0, %v757_v14  ;;  %v522_v17 = vadd.f32 %v1452_v20, %v521_v15  ;;  %v672_v18 = vadd.f32 %v1452_v20, %v671_v16  ;;  %v523_v19 = vpop.f32.mrb[47].mxu0  ;;  %v673_v21 = vpop.f32.mrb[47].mxu1 }
 0x159   :  { %v728_v22 = vmax.f32 %v522_v17, 0.0  ;;  %v758_v23 = vmax.f32 %v672_v18, 0.0 }
 0x15a   :  { %v526_v24 = vpop.f32.mrb[48].mxu0  ;;  %v676_v25 = vpop.f32.mrb[48].mxu1 }
 0x15b   :  { %788 = vst.msk [vmem:[%s1757_s3 + $0xb8] sm:$0xff] %vm159_vm0, %v728_v22  ;;  %818 = vst.msk [vmem:[%s1757_s3 + $0x1a8] sm:$0xff] %vm159_vm0, %v758_v23  ;;  %v527_v26 = vadd.f32 %v1452_v20, %v526_v24  ;;  %v677_v27 = vadd.f32 %v1452_v20, %v676_v25  ;;  %v528_v28 = vpop.f32.mrb[49].mxu0  ;;  %v678_v29 = vpop.f32.mrb[49].mxu1 }
 0x15d   :  { %v729_v30 = vmax.f32 %v527_v26, 0.0  ;;  %v759_v31 = vmax.f32 %v677_v27, 0.0 }
 0x15e   :  { %v531_v32 = vpop.f32.mrb[50].mxu0  ;;  %v681_v33 = vpop.f32.mrb[50].mxu1 }
 0x15f   :  { %789 = vst.msk [vmem:[%s1757_s3 + $0xc0] sm:$0xff] %vm159_vm0, %v729_v30  ;;  %819 = vst.msk [vmem:[%s1757_s3 + $0x1b0] sm:$0xff] %vm159_vm0, %v759_v31  ;;  %v532_v34 = vadd.f32 %v1452_v20, %v531_v32  ;;  %v682_v35 = vadd.f32 %v1452_v20, %v681_v33  ;;  %v533_v36 = vpop.f32.mrb[51].mxu0  ;;  %v683_v37 = vpop.f32.mrb[51].mxu1 }
 0x161   :  { %v730_v38 = vmax.f32 %v532_v34, 0.0  ;;  %v760_v39 = vmax.f32 %v682_v35, 0.0 }
 0x162   :  { %v536_v40 = vpop.f32.mrb[52].mxu0  ;;  %v686_v41 = vpop.f32.mrb[52].mxu1 }
 0x163   :  { %790 = vst.msk [vmem:[%s1757_s3 + $0xc8] sm:$0xff] %vm159_vm0, %v730_v38  ;;  %820 = vst.msk [vmem:[%s1757_s3 + $0x1b8] sm:$0xff] %vm159_vm0, %v760_v39  ;;  %v537_v42 = vadd.f32 %v1452_v20, %v536_v40  ;;  %v687_v43 = vadd.f32 %v1452_v20, %v686_v41  ;;  %v538_v44 = vpop.f32.mrb[53].mxu0  ;;  %v688_v45 = vpop.f32.mrb[53].mxu1 }
 0x165   :  { %v731_v46 = vmax.f32 %v537_v42, 0.0  ;;  %v761_v47 = vmax.f32 %v687_v43, 0.0 }
 0x166   :  { %v541_v48 = vpop.f32.mrb[54].mxu0  ;;  %v691_v49 = vpop.f32.mrb[54].mxu1 }
 0x167   :  { %791 = vst.msk [vmem:[%s1757_s3 + $0xd0] sm:$0xff] %vm159_vm0, %v731_v46  ;;  %821 = vst.msk [vmem:[%s1757_s3 + $0x1c0] sm:$0xff] %vm159_vm0, %v761_v47  ;;  %v542_v50 = vadd.f32 %v1452_v20, %v541_v48  ;;  %v692_v51 = vadd.f32 %v1452_v20, %v691_v49  ;;  %v543_v52 = vpop.f32.mrb[55].mxu0  ;;  %v693_v53 = vpop.f32.mrb[55].mxu1 }
 0x169   :  { %v732_v54 = vmax.f32 %v542_v50, 0.0  ;;  %v762_v55 = vmax.f32 %v692_v51, 0.0 }
 0x16a   :  { %v546_v56 = vpop.f32.mrb[56].mxu0  ;;  %v696_v57 = vpop.f32.mrb[56].mxu1 }
 0x16b   :  { %792 = vst.msk [vmem:[%s1757_s3 + $0xd8] sm:$0xff] %vm159_vm0, %v732_v54  ;;  %822 = vst.msk [vmem:[%s1757_s3 + $0x1c8] sm:$0xff] %vm159_vm0, %v762_v55  ;;  %v547_v58 = vadd.f32 %v1452_v20, %v546_v56  ;;  %v697_v59 = vadd.f32 %v1452_v20, %v696_v57  ;;  %v548_v60 = vpop.f32.mrb[57].mxu0  ;;  %v698_v61 = vpop.f32.mrb[57].mxu1 }
 0x16d   :  { %v733_v62 = vmax.f32 %v547_v58, 0.0  ;;  %v763_v63 = vmax.f32 %v697_v59, 0.0 }
 0x16e   :  { %v551_v0 = vpop.f32.mrb[58].mxu0  ;;  %v701_v1 = vpop.f32.mrb[58].mxu1 }
 0x16f   :  { %793 = vst.msk [vmem:[%s1757_s3 + $0xe0] sm:$0xff] %vm159_vm0, %v733_v62  ;;  %823 = vst.msk [vmem:[%s1757_s3 + $0x1d0] sm:$0xff] %vm159_vm0, %v763_v63  ;;  %v552_v2 = vadd.f32 %v1452_v20, %v551_v0  ;;  %v702_v3 = vadd.f32 %v1452_v20, %v701_v1  ;;  %v553_v4 = vpop.f32.mrb[59].mxu0  ;;  %v703_v5 = vpop.f32.mrb[59].mxu1 }
 0x171   :  { %v734_v6 = vmax.f32 %v552_v2, 0.0  ;;  %v764_v7 = vmax.f32 %v702_v3, 0.0 }
 0x173   :  { %794 = vst.msk [vmem:[%s1757_s3 + $0xe8] sm:$0xff] %vm159_vm0, %v734_v6  ;;  %824 = vst.msk [vmem:[%s1757_s3 + $0x1d8] sm:$0xff] %vm159_vm0, %v764_v7 }

// kernel: ppo_forward.5
= control target key start
LH: loop header
LB: loop body
LE: loop exit
PB: predicated region body
PF: predicated region fallthrough
CT: control target
= control target key end

     0   :  { %v10393_v36 = vmov 1983009808   ;;  %v47_v38 = vlaneseq  ;;  %vm10395_vm0 = vmmov 0   ;;  %s13609_s1 = inlined_call_operand.vmem [shape: bf16[3840,512], index: 1, kind: input, shape index: {}]   ;;  %s13610_s0 = inlined_call_operand.vmem [shape: f32[2,3840], index: 0, kind: input, shape index: {}]   ;;  %s13611_s3 = inlined_call_operand.vmem [shape: bf16[512,128], index: 3, kind: input, shape index: {}]   ;;  %s13612_s5 = inlined_call_operand.vmem [shape: bf16[128,128], index: 5, kind: input, shape index: {}]   ;;  %s13613_s2 = inlined_call_operand.vmem [shape: f32[1,512], index: 2, kind: input, shape index: {}]   ;;  %s13614_s4 = inlined_call_operand.vmem [shape: f32[1,128], index: 4, kind: input, shape index: {}]   ;;  %s13615_s6 = inlined_call_operand.vmem [shape: f32[1,128], index: 6, kind: input, shape index: {}]   ;;  %s13616_s7 = inlined_call_operand.vmem [shape: f32[2,128], index: 7, kind: output, shape index: {}]  }
   0x1   :  { %v8906_v0 = vld [vmem:[%s13609_s1 + $0x4] ss:$16 sps:$4 sm:$0xff]   ;;  %v8908_v1 = vld [vmem:[%s13609_s1 + $0xc] ss:$16 sps:$4 sm:$0xff]   ;;  %v8910_v2 = vld [vmem:[%s13609_s1] ss:$16 sps:$4 sm:$0xff]   ;;  %v45_v37 = vunpack.c.l.s4 %v10393_v36 }
   0x2   :  { %6012 = vmatprep.subr.bf16.mxu0 %v8906_v0  ;;  %v8911_v3 = vld [vmem:[%s13609_s1 + $0x8] ss:$16 sps:$4 sm:$0xff]   ;;  %6627 = vmatprep.subr.bf16.mxu1 %v8908_v1  ;;  %v8912_v4 = vld [vmem:[%s13609_s1 + $0x24] ss:$16 sps:$4 sm:$0xff]   ;;  %v8914_v5 = vld [vmem:[%s13609_s1 + $0x2c] ss:$16 sps:$4 sm:$0xff]  }
   0x3   :  { %6013 = vmatpush1.bf16.msra.mxu0 %v8910_v2  ;;  %6628 = vmatpush1.bf16.msra.mxu1 %v8911_v3  ;;  %v8916_v6 = vld [vmem:[%s13609_s1 + $0x20] ss:$16 sps:$4 sm:$0xff]   ;;  %v8917_v7 = vld [vmem:[%s13609_s1 + $0x28] ss:$16 sps:$4 sm:$0xff]   ;;  %v8918_v8 = vld [vmem:[%s13609_s1 + $0x44] ss:$16 sps:$4 sm:$0xff]   ;;  %v46_v42 = vunpack.c.0.s8 %v45_v37 }
   0x4   :  { %6014 = vmatprep.subr.bf16.mxu0 %v8912_v4  ;;  %6629 = vmatprep.subr.bf16.mxu1 %v8914_v5  ;;  %v8920_v9 = vld [vmem:[%s13609_s1 + $0x4c] ss:$16 sps:$4 sm:$0xff]   ;;  %v8922_v10 = vld [vmem:[%s13609_s1 + $0x40] ss:$16 sps:$4 sm:$0xff]   ;;  %v8923_v11 = vld [vmem:[%s13609_s1 + $0x48] ss:$16 sps:$4 sm:$0xff]  }
   0x5   :  { %v8924_v12 = vld [vmem:[%s13609_s1 + $0x64] ss:$16 sps:$4 sm:$0xff]   ;;  %v8926_v13 = vld [vmem:[%s13609_s1 + $0x6c] ss:$16 sps:$4 sm:$0xff]   ;;  %v8928_v14 = vld [vmem:[%s13609_s1 + $0x60] ss:$16 sps:$4 sm:$0xff]  }
   0x6   :  { %v8929_v15 = vld [vmem:[%s13609_s1 + $0x68] ss:$16 sps:$4 sm:$0xff]   ;;  %v8930_v16 = vld [vmem:[%s13609_s1 + $0x84] ss:$16 sps:$4 sm:$0xff]   ;;  %v8932_v17 = vld [vmem:[%s13609_s1 + $0x8c] ss:$16 sps:$4 sm:$0xff]  }
   0x7   :  { %6015 = vmatpush1.bf16.msra.mxu0 %v8916_v6  ;;  %6630 = vmatpush1.bf16.msra.mxu1 %v8917_v7  ;;  %v8934_v18 = vld [vmem:[%s13609_s1 + $0x80] ss:$16 sps:$4 sm:$0xff]   ;;  %v8935_v19 = vld [vmem:[%s13609_s1 + $0x88] ss:$16 sps:$4 sm:$0xff]   ;;  %v8936_v20 = vld [vmem:[%s13609_s1 + $0xa4] ss:$16 sps:$4 sm:$0xff]  }
   0x8   :  { %6016 = vmatprep.subr.bf16.mxu0 %v8918_v8  ;;  %6631 = vmatprep.subr.bf16.mxu1 %v8920_v9  ;;  %v8938_v21 = vld [vmem:[%s13609_s1 + $0xac] ss:$16 sps:$4 sm:$0xff]   ;;  %v8940_v22 = vld [vmem:[%s13609_s1 + $0xa0] ss:$16 sps:$4 sm:$0xff]   ;;  %v8941_v23 = vld [vmem:[%s13609_s1 + $0xa8] ss:$16 sps:$4 sm:$0xff]  }
   0x9   :  { %v8942_v24 = vld [vmem:[%s13609_s1 + $0xc4] ss:$16 sps:$4 sm:$0xff]   ;;  %v8944_v25 = vld [vmem:[%s13609_s1 + $0xcc] ss:$16 sps:$4 sm:$0xff]   ;;  %v8946_v26 = vld [vmem:[%s13609_s1 + $0xc0] ss:$16 sps:$4 sm:$0xff]  }
   0xa   :  { %v8947_v27 = vld [vmem:[%s13609_s1 + $0xc8] ss:$16 sps:$4 sm:$0xff]   ;;  %v8948_v28 = vld [vmem:[%s13609_s1 + $0xe4] ss:$16 sps:$4 sm:$0xff]   ;;  %v8950_v29 = vld [vmem:[%s13609_s1 + $0xec] ss:$16 sps:$4 sm:$0xff]  }
   0xb   :  { %6017 = vmatpush1.bf16.msra.mxu0 %v8922_v10  ;;  %6632 = vmatpush1.bf16.msra.mxu1 %v8923_v11  ;;  %v8952_v30 = vld [vmem:[%s13609_s1 + $0xe0] ss:$16 sps:$4 sm:$0xff]   ;;  %v8953_v31 = vld [vmem:[%s13609_s1 + $0xe8] ss:$16 sps:$4 sm:$0xff]   ;;  %v8954_v32 = vld [vmem:[%s13609_s1 + $0x104] ss:$16 sps:$4 sm:$0xff]  }
   0xc   :  { %6018 = vmatprep.subr.bf16.mxu0 %v8924_v12  ;;  %6633 = vmatprep.subr.bf16.mxu1 %v8926_v13  ;;  %v8956_v33 = vld [vmem:[%s13609_s1 + $0x10c] ss:$16 sps:$4 sm:$0xff]   ;;  %v8958_v34 = vld [vmem:[%s13609_s1 + $0x100] ss:$16 sps:$4 sm:$0xff]   ;;  %v8959_v35 = vld [vmem:[%s13609_s1 + $0x108] ss:$16 sps:$4 sm:$0xff]  }
   0xd   :  { %v8960_v39 = vld [vmem:[%s13609_s1 + $0x124] ss:$16 sps:$4 sm:$0xff]   ;;  %v8962_v40 = vld [vmem:[%s13609_s1 + $0x12c] ss:$16 sps:$4 sm:$0xff]   ;;  %v8964_v41 = vld [vmem:[%s13609_s1 + $0x120] ss:$16 sps:$4 sm:$0xff]  }
   0xe   :  { %v10553_v43 = vshrl.u32 %v47_v38, 7  ;;  %v8965_v44 = vld [vmem:[%s13609_s1 + $0x128] ss:$16 sps:$4 sm:$0xff]   ;;  %v8966_v45 = vld [vmem:[%s13609_s1 + $0x144] ss:$16 sps:$4 sm:$0xff]  }
   0xf   :  { %6019 = vmatpush1.bf16.msra.mxu0 %v8928_v14  ;;  %6634 = vmatpush1.bf16.msra.mxu1 %v8929_v15  ;;  %v8968_v46 = vld [vmem:[%s13609_s1 + $0x14c] ss:$16 sps:$4 sm:$0xff]   ;;  %v8970_v47 = vld [vmem:[%s13609_s1 + $0x140] ss:$16 sps:$4 sm:$0xff]   ;;  %v8971_v48 = vld [vmem:[%s13609_s1 + $0x148] ss:$16 sps:$4 sm:$0xff]  }
  0x10   :  { %6020 = vmatprep.subr.bf16.mxu0 %v8930_v16  ;;  %6635 = vmatprep.subr.bf16.mxu1 %v8932_v17  ;;  %v10571_v49 = vsub.s32 %v46_v42, %v10553_v43  ;;  %v8972_v50 = vld [vmem:[%s13609_s1 + $0x164] ss:$16 sps:$4 sm:$0xff]   ;;  %v8974_v51 = vld [vmem:[%s13609_s1 + $0x16c] ss:$16 sps:$4 sm:$0xff]   ;;  %v8976_v53 = vld [vmem:[%s13609_s1 + $0x160] ss:$16 sps:$4 sm:$0xff]  }
  0x11   :  { %v27_v52 = vld [vmem:[%s13610_s0] sm:$0xff]  ;;  %v8977_v55 = vld [vmem:[%s13609_s1 + $0x168] ss:$16 sps:$4 sm:$0xff]   ;;  %v8980_v57 = vld [vmem:[%s13609_s1 + $0x18c] ss:$16 sps:$4 sm:$0xff]  }
  0x12   :  { %v50_v54 = vrot.slane %v27_v52, %v10571_v49  ;;  %v8978_v56 = vld [vmem:[%s13609_s1 + $0x184] ss:$16 sps:$4 sm:$0xff]   ;;  %v8982_v59 = vld [vmem:[%s13609_s1 + $0x180] ss:$16 sps:$4 sm:$0xff]   ;;  %v8983_v61 = vld [vmem:[%s13609_s1 + $0x188] ss:$16 sps:$4 sm:$0xff]   ;;  %v43_v4 = vcombine.high %v27_v52, %v27_v52 }
  0x13   :  { %6021 = vmatpush1.bf16.msra.mxu0 %v8934_v18  ;;  %6636 = vmatpush1.bf16.msra.mxu1 %v8935_v19  ;;  %v8984_v62 = vld [vmem:[%s13609_s1 + $0x1a4] ss:$16 sps:$4 sm:$0xff]   ;;  %v8986_v63 = vld [vmem:[%s13609_s1 + $0x1ac] ss:$16 sps:$4 sm:$0xff]   ;;  %v8988_v0 = vld [vmem:[%s13609_s1 + $0x1a0] ss:$16 sps:$4 sm:$0xff]  }
  0x14   :  { %6022 = vmatprep.subr.bf16.mxu0 %v8936_v20  ;;  %6637 = vmatprep.subr.bf16.mxu1 %v8938_v21  ;;  %v58_v58 = vcombine.high %v50_v54, %v50_v54  ;;  %v8989_v1 = vld [vmem:[%s13609_s1 + $0x1a8] ss:$16 sps:$4 sm:$0xff]   ;;  %v8990_v2 = vld [vmem:[%s13609_s1 + $0x1c4] ss:$16 sps:$4 sm:$0xff]   ;;  %v8992_v3 = vld [vmem:[%s13609_s1 + $0x1cc] ss:$16 sps:$4 sm:$0xff]   ;;  %v10632_v9 = vrot.slane %v43_v4, %v10571_v49  ;;  %v200_v16 = vpack.c.bf16 %v50_v54, %v50_v54 }
  0x15   :  { %v8994_v5 = vld [vmem:[%s13609_s1 + $0x1c0] ss:$16 sps:$4 sm:$0xff]   ;;  %v8995_v6 = vld [vmem:[%s13609_s1 + $0x1c8] ss:$16 sps:$4 sm:$0xff]   ;;  %v8996_v7 = vld [vmem:[%s13609_s1 + $0x1e4] ss:$16 sps:$4 sm:$0xff]  }
  0x16   :  { %v201_v60 = vpack.c.bf16 %v58_v58, %v58_v58  ;;  %v8998_v8 = vld [vmem:[%s13609_s1 + $0x1ec] ss:$16 sps:$4 sm:$0xff]   ;;  %v9000_v10 = vld [vmem:[%s13609_s1 + $0x1e0] ss:$16 sps:$4 sm:$0xff]   ;;  %v9001_v11 = vld [vmem:[%s13609_s1 + $0x1e8] ss:$16 sps:$4 sm:$0xff]   ;;  %v59_v14 = vcombine.high %v10632_v9, %v10632_v9 }
  0x17   :  { %6023 = vmatpush1.bf16.msra.mxu0 %v8940_v22  ;;  %6638 = vmatpush1.bf16.msra.mxu1 %v8941_v23  ;;  %v9005_v12 = vld [vmem:[%s13609_s1 + $0x204] ss:$16 sps:$4 sm:$0xff]   ;;  %v9008_v13 = vld [vmem:[%s13609_s1 + $0x20c] ss:$16 sps:$4 sm:$0xff]   ;;  %v9003_v15 = vld [vmem:[%s13609_s1 + $0x200] ss:$16 sps:$4 sm:$0xff]  }
  0x18   :  { %6024 = vmatprep.subr.bf16.mxu0 %v8942_v24  ;;  %6639 = vmatprep.subr.bf16.mxu1 %v8944_v25  ;;  %v9006_v17 = vld [vmem:[%s13609_s1 + $0x208] ss:$16 sps:$4 sm:$0xff]   ;;  %v9011_v18 = vld [vmem:[%s13609_s1 + $0x224] ss:$16 sps:$4 sm:$0xff]   ;;  %v9014_v19 = vld [vmem:[%s13609_s1 + $0x22c] ss:$16 sps:$4 sm:$0xff]   ;;  %v203_v20 = vpack.c.bf16 %v59_v14, %v59_v14 }
  0x19   :  { %6044 = vmatprep.mubr.bf16.mxu0 %v201_v60  ;;  %6659 = vmatprep.mubr.bf16.mxu1 %v201_v60  ;;  %v9009_v21 = vld [vmem:[%s13609_s1 + $0x220] ss:$16 sps:$4 sm:$0xff]   ;;  %v9012_v22 = vld [vmem:[%s13609_s1 + $0x228] ss:$16 sps:$4 sm:$0xff]   ;;  %v9017_v23 = vld [vmem:[%s13609_s1 + $0x244] ss:$16 sps:$4 sm:$0xff]  }
  0x1a   :  { %v9020_v24 = vld [vmem:[%s13609_s1 + $0x24c] ss:$16 sps:$4 sm:$0xff]   ;;  %v9015_v25 = vld [vmem:[%s13609_s1 + $0x240] ss:$16 sps:$4 sm:$0xff]   ;;  %v9036_v38 = vld [vmem:[%s13609_s1 + $0x2a8] ss:$16 sps:$4 sm:$0xff]  }
  0x1b   :  { %6025 = vmatpush1.bf16.msra.mxu0 %v8946_v26  ;;  %6640 = vmatpush1.bf16.msra.mxu1 %v8947_v27  ;;  %v9018_v26 = vld [vmem:[%s13609_s1 + $0x248] ss:$16 sps:$4 sm:$0xff]   ;;  %v9023_v27 = vld [vmem:[%s13609_s1 + $0x264] ss:$16 sps:$4 sm:$0xff]   ;;  %v9038_v36 = vld [vmem:[%s13609_s1 + $0x2ac] ss:$16 sps:$4 sm:$0xff]  }
  0x1c   :  { %6026 = vmatprep.subr.bf16.mxu0 %v8948_v28  ;;  %6641 = vmatprep.subr.bf16.mxu1 %v8950_v29  ;;  %v9026_v28 = vld [vmem:[%s13609_s1 + $0x26c] ss:$16 sps:$4 sm:$0xff]   ;;  %v9021_v29 = vld [vmem:[%s13609_s1 + $0x260] ss:$16 sps:$4 sm:$0xff]   ;;  %v9042_v42 = vld [vmem:[%s13609_s1 + $0x2c8] ss:$16 sps:$4 sm:$0xff]  }
  0x1d   :  { %v9033_v37 = vld [vmem:[%s13609_s1 + $0x2a0] ss:$16 sps:$4 sm:$0xff]   ;;  %v9054_v52 = vld [vmem:[%s13609_s1 + $0x308] ss:$16 sps:$4 sm:$0xff]   ;;  %v9062_v54 = vld [vmem:[%s13609_s1 + $0x32c] ss:$16 sps:$4 sm:$0xff]  }
  0x1e   :  { %v9068_v58 = vld [vmem:[%s13609_s1 + $0x34c] ss:$16 sps:$4 sm:$0xff]   ;;  %v9066_v60 = vld [vmem:[%s13609_s1 + $0x348] ss:$16 sps:$4 sm:$0xff]   ;;  %v9095_v14 = vld [vmem:[%s13609_s1 + $0x3e4] ss:$16 sps:$4 sm:$0xff]  }
  0x1f   :  { %6027 = vmatpush1.bf16.msra.mxu0 %v8952_v30  ;;  %6642 = vmatpush1.bf16.msra.mxu1 %v8953_v31  ;;  %v9024_v30 = vld [vmem:[%s13609_s1 + $0x268] ss:$16 sps:$4 sm:$0xff]   ;;  %v9029_v31 = vld [vmem:[%s13609_s1 + $0x284] ss:$16 sps:$4 sm:$0xff]  }
  0x20   :  { %6028 = vmatprep.subr.bf16.mxu0 %v8954_v32  ;;  %6643 = vmatprep.subr.bf16.mxu1 %v8956_v33  ;;  %v9032_v32 = vld [vmem:[%s13609_s1 + $0x28c] ss:$16 sps:$4 sm:$0xff]   ;;  %v9027_v33 = vld [vmem:[%s13609_s1 + $0x280] ss:$16 sps:$4 sm:$0xff]   ;;  %v9078_v4 = vld [vmem:[%s13609_s1 + $0x388] ss:$16 sps:$4 sm:$0xff]  }
  0x23   :  { %6029 = vmatpush1.bf16.msra.mxu0 %v8958_v34  ;;  %6644 = vmatpush1.bf16.msra.mxu1 %v8959_v35  ;;  %v9030_v34 = vld [vmem:[%s13609_s1 + $0x288] ss:$16 sps:$4 sm:$0xff]   ;;  %v9035_v35 = vld [vmem:[%s13609_s1 + $0x2a4] ss:$16 sps:$4 sm:$0xff]  }
  0x24   :  { %6030 = vmatprep.subr.bf16.mxu0 %v8960_v39  ;;  %6645 = vmatprep.subr.bf16.mxu1 %v8962_v40  ;;  %v9041_v39 = vld [vmem:[%s13609_s1 + $0x2c4] ss:$16 sps:$4 sm:$0xff]   ;;  %v9044_v40 = vld [vmem:[%s13609_s1 + $0x2cc] ss:$16 sps:$4 sm:$0xff]  }
  0x27   :  { %6031 = vmatpush1.bf16.msra.mxu0 %v8964_v41  ;;  %6646 = vmatpush1.bf16.msra.mxu1 %v8965_v44  ;;  %v9039_v41 = vld [vmem:[%s13609_s1 + $0x2c0] ss:$16 sps:$4 sm:$0xff]   ;;  %v9047_v44 = vld [vmem:[%s13609_s1 + $0x2e4] ss:$16 sps:$4 sm:$0xff]  }
  0x28   :  { %6032 = vmatprep.subr.bf16.mxu0 %v8966_v45  ;;  %6647 = vmatprep.subr.bf16.mxu1 %v8968_v46  ;;  %v9050_v45 = vld [vmem:[%s13609_s1 + $0x2ec] ss:$16 sps:$4 sm:$0xff]   ;;  %v9045_v46 = vld [vmem:[%s13609_s1 + $0x2e0] ss:$16 sps:$4 sm:$0xff]  }
  0x2b   :  { %6033 = vmatpush1.bf16.msra.mxu0 %v8970_v47  ;;  %6648 = vmatpush1.bf16.msra.mxu1 %v8971_v48  ;;  %v9048_v47 = vld [vmem:[%s13609_s1 + $0x2e8] ss:$16 sps:$4 sm:$0xff]   ;;  %v9053_v48 = vld [vmem:[%s13609_s1 + $0x304] ss:$16 sps:$4 sm:$0xff]  }
  0x2c   :  { %6034 = vmatprep.subr.bf16.mxu0 %v8972_v50  ;;  %6649 = vmatprep.subr.bf16.mxu1 %v8974_v51  ;;  %v9056_v50 = vld [vmem:[%s13609_s1 + $0x30c] ss:$16 sps:$4 sm:$0xff]   ;;  %v9051_v51 = vld [vmem:[%s13609_s1 + $0x300] ss:$16 sps:$4 sm:$0xff]  }
  0x2f   :  { %6035 = vmatpush1.bf16.msra.mxu0 %v8976_v53  ;;  %6650 = vmatpush1.bf16.msra.mxu1 %v8977_v55  ;;  %v9059_v53 = vld [vmem:[%s13609_s1 + $0x324] ss:$16 sps:$4 sm:$0xff]   ;;  %v9057_v55 = vld [vmem:[%s13609_s1 + $0x320] ss:$16 sps:$4 sm:$0xff]  }
  0x30   :  { %6036 = vmatprep.subr.bf16.mxu0 %v8978_v56  ;;  %6651 = vmatprep.subr.bf16.mxu1 %v8980_v57  ;;  %v9060_v56 = vld [vmem:[%s13609_s1 + $0x328] ss:$16 sps:$4 sm:$0xff]   ;;  %v9065_v57 = vld [vmem:[%s13609_s1 + $0x344] ss:$16 sps:$4 sm:$0xff]  }
  0x33   :  { %6037 = vmatpush1.bf16.msra.mxu0 %v8982_v59  ;;  %6652 = vmatpush1.bf16.msra.mxu1 %v8983_v61  ;;  %v9063_v59 = vld [vmem:[%s13609_s1 + $0x340] ss:$16 sps:$4 sm:$0xff]   ;;  %v9071_v61 = vld [vmem:[%s13609_s1 + $0x364] ss:$16 sps:$4 sm:$0xff]  }
  0x34   :  { %6038 = vmatprep.subr.bf16.mxu0 %v8984_v62  ;;  %6653 = vmatprep.subr.bf16.mxu1 %v8986_v63  ;;  %v9074_v62 = vld [vmem:[%s13609_s1 + $0x36c] ss:$16 sps:$4 sm:$0xff]   ;;  %v9069_v63 = vld [vmem:[%s13609_s1 + $0x360] ss:$16 sps:$4 sm:$0xff]  }
  0x37   :  { %6039 = vmatpush1.bf16.msra.mxu0 %v8988_v0  ;;  %6654 = vmatpush1.bf16.msra.mxu1 %v8989_v1  ;;  %v9072_v0 = vld [vmem:[%s13609_s1 + $0x368] ss:$16 sps:$4 sm:$0xff]   ;;  %v9077_v1 = vld [vmem:[%s13609_s1 + $0x384] ss:$16 sps:$4 sm:$0xff]  }
  0x38   :  { %6040 = vmatprep.subr.bf16.mxu0 %v8990_v2  ;;  %6655 = vmatprep.subr.bf16.mxu1 %v8992_v3  ;;  %v9080_v2 = vld [vmem:[%s13609_s1 + $0x38c] ss:$16 sps:$4 sm:$0xff]   ;;  %v9075_v3 = vld [vmem:[%s13609_s1 + $0x380] ss:$16 sps:$4 sm:$0xff]  }
  0x3b   :  { %6041 = vmatpush1.bf16.msra.mxu0 %v8994_v5  ;;  %6656 = vmatpush1.bf16.msra.mxu1 %v8995_v6  ;;  %v9083_v5 = vld [vmem:[%s13609_s1 + $0x3a4] ss:$16 sps:$4 sm:$0xff]   ;;  %v9086_v6 = vld [vmem:[%s13609_s1 + $0x3ac] ss:$16 sps:$4 sm:$0xff]  }
  0x3c   :  { %6042 = vmatprep.subr.bf16.mxu0 %v8996_v7  ;;  %6657 = vmatprep.subr.bf16.mxu1 %v8998_v8  ;;  %v9081_v7 = vld [vmem:[%s13609_s1 + $0x3a0] ss:$16 sps:$4 sm:$0xff]   ;;  %v9084_v8 = vld [vmem:[%s13609_s1 + $0x3a8] ss:$16 sps:$4 sm:$0xff]  }
  0x3f   :  { %6043 = vmatpush1.bf16.msra.mxu0 %v9000_v10  ;;  %6658 = vmatpush1.bf16.msra.mxu1 %v9001_v11  ;;  %v9089_v10 = vld [vmem:[%s13609_s1 + $0x3c4] ss:$16 sps:$4 sm:$0xff]   ;;  %v9092_v11 = vld [vmem:[%s13609_s1 + $0x3cc] ss:$16 sps:$4 sm:$0xff]  }
  0x40   :  { %6053 = vmatprep.subr.bf16.mxu0 %v9005_v12  ;;  %6668 = vmatprep.subr.bf16.mxu1 %v9008_v13  ;;  %v9087_v12 = vld [vmem:[%s13609_s1 + $0x3c0] ss:$16 sps:$4 sm:$0xff]   ;;  %v9090_v13 = vld [vmem:[%s13609_s1 + $0x3c8] ss:$16 sps:$4 sm:$0xff]  }
  0x42   :  { %6045 = vmatmul.mubr.bf16.vlgmr.msra.gmra.mrb[0].mxu0 %v200_v16  ;;  %6660 = vmatmul.mubr.bf16.vlgmr.msra.gmra.mrb[0].mxu1 %v200_v16  ;;  %v9093_v16 = vld [vmem:[%s13609_s1 + $0x3e0] ss:$16 sps:$4 sm:$0xff]  }
  0x43   :  { %6054 = vmatpush1.bf16.msra.mxu0 %v9003_v15  ;;  %6669 = vmatpush1.bf16.msra.mxu1 %v9006_v17  ;;  %v9098_v15 = vld [vmem:[%s13609_s1 + $0x3ec] ss:$16 sps:$4 sm:$0xff]   ;;  %v9096_v17 = vld [vmem:[%s13609_s1 + $0x3e8] ss:$16 sps:$4 sm:$0xff]  }
  0x44   :  { %6055 = vmatprep.subr.bf16.mxu0 %v9011_v18  ;;  %6670 = vmatprep.subr.bf16.mxu1 %v9014_v19  ;;  %v9101_v18 = vld [vmem:[%s13609_s1 + $0x404] ss:$16 sps:$4 sm:$0xff]   ;;  %v9104_v19 = vld [vmem:[%s13609_s1 + $0x40c] ss:$16 sps:$4 sm:$0xff]  }
  0x45   :  { %6085 = vmatprep.mubr.bf16.mxu0 %v203_v20  ;;  %6700 = vmatprep.mubr.bf16.mxu1 %v203_v20  ;;  %v9099_v20 = vld [vmem:[%s13609_s1 + $0x400] ss:$16 sps:$4 sm:$0xff]  }
  0x47   :  { %6056 = vmatpush1.bf16.msra.mxu0 %v9009_v21  ;;  %6671 = vmatpush1.bf16.msra.mxu1 %v9012_v22  ;;  %v202_v21 = vpack.c.bf16 %v10632_v9, %v10632_v9  ;;  %v9102_v22 = vld [vmem:[%s13609_s1 + $0x408] ss:$16 sps:$4 sm:$0xff]   ;;  %v9110_v9 = vld [vmem:[%s13609_s1 + $0x42c] ss:$16 sps:$4 sm:$0xff]  }
  0x48   :  { %6057 = vmatprep.subr.bf16.mxu0 %v9017_v23  ;;  %6672 = vmatprep.subr.bf16.mxu1 %v9020_v24  ;;  %v10851_v23 = vld [vmem:[%s13610_s0 + $0x8] sm:$0xff]  ;;  %v9107_v24 = vld [vmem:[%s13609_s1 + $0x424] ss:$16 sps:$4 sm:$0xff]  }
  0x4b   :  { %6058 = vmatpush1.bf16.msra.mxu0 %v9015_v25  ;;  %6673 = vmatpush1.bf16.msra.mxu1 %v9018_v26  ;;  %v10861_v25 = vrot.slane %v10851_v23, %v10571_v49 }
  0x4c   :  { %6059 = vmatprep.subr.bf16.mxu0 %v9023_v27  ;;  %6674 = vmatprep.subr.bf16.mxu1 %v9026_v28  ;;  %v9105_v27 = vld [vmem:[%s13609_s1 + $0x420] ss:$16 sps:$4 sm:$0xff]   ;;  %v9108_v28 = vld [vmem:[%s13609_s1 + $0x428] ss:$16 sps:$4 sm:$0xff]  }
  0x4d   :  { %v75_v26 = vcombine.high %v10861_v25, %v10861_v25 }
  0x4f   :  { %6060 = vmatpush1.bf16.msra.mxu0 %v9021_v29  ;;  %6675 = vmatpush1.bf16.msra.mxu1 %v9024_v30  ;;  %v9113_v29 = vld [vmem:[%s13609_s1 + $0x444] ss:$16 sps:$4 sm:$0xff]   ;;  %v9116_v30 = vld [vmem:[%s13609_s1 + $0x44c] ss:$16 sps:$4 sm:$0xff]  }
  0x50   :  { %6061 = vmatprep.subr.bf16.mxu0 %v9029_v31  ;;  %6676 = vmatprep.subr.bf16.mxu1 %v9032_v32  ;;  %v205_v31 = vpack.c.bf16 %v75_v26, %v75_v26  ;;  %v9111_v32 = vld [vmem:[%s13609_s1 + $0x440] ss:$16 sps:$4 sm:$0xff]   ;;  %v9192_v26 = vld [vmem:[%s13609_s1 + $0x5e8] ss:$16 sps:$4 sm:$0xff]  }
  0x53   :  { %6062 = vmatpush1.bf16.msra.mxu0 %v9027_v33  ;;  %6677 = vmatpush1.bf16.msra.mxu1 %v9030_v34  ;;  %v9114_v33 = vld [vmem:[%s13609_s1 + $0x448] ss:$16 sps:$4 sm:$0xff]   ;;  %v9119_v34 = vld [vmem:[%s13609_s1 + $0x464] ss:$16 sps:$4 sm:$0xff]  }
  0x54   :  { %6063 = vmatprep.subr.bf16.mxu0 %v9035_v35  ;;  %6678 = vmatprep.subr.bf16.mxu1 %v9038_v36  ;;  %v9122_v35 = vld [vmem:[%s13609_s1 + $0x46c] ss:$16 sps:$4 sm:$0xff]   ;;  %v9117_v36 = vld [vmem:[%s13609_s1 + $0x460] ss:$16 sps:$4 sm:$0xff]  }
  0x57   :  { %6064 = vmatpush1.bf16.msra.mxu0 %v9033_v37  ;;  %6679 = vmatpush1.bf16.msra.mxu1 %v9036_v38  ;;  %v9120_v37 = vld [vmem:[%s13609_s1 + $0x468] ss:$16 sps:$4 sm:$0xff]   ;;  %v9125_v38 = vld [vmem:[%s13609_s1 + $0x484] ss:$16 sps:$4 sm:$0xff]  }
  0x58   :  { %6065 = vmatprep.subr.bf16.mxu0 %v9041_v39  ;;  %6680 = vmatprep.subr.bf16.mxu1 %v9044_v40  ;;  %v9128_v39 = vld [vmem:[%s13609_s1 + $0x48c] ss:$16 sps:$4 sm:$0xff]   ;;  %v9123_v40 = vld [vmem:[%s13609_s1 + $0x480] ss:$16 sps:$4 sm:$0xff]  }
  0x5b   :  { %6066 = vmatpush1.bf16.msra.mxu0 %v9039_v41  ;;  %6681 = vmatpush1.bf16.msra.mxu1 %v9042_v42  ;;  %v9126_v41 = vld [vmem:[%s13609_s1 + $0x488] ss:$16 sps:$4 sm:$0xff]   ;;  %v9131_v42 = vld [vmem:[%s13609_s1 + $0x4a4] ss:$16 sps:$4 sm:$0xff]  }
  0x5c   :  { %6067 = vmatprep.subr.bf16.mxu0 %v9047_v44  ;;  %6682 = vmatprep.subr.bf16.mxu1 %v9050_v45  ;;  %v9134_v44 = vld [vmem:[%s13609_s1 + $0x4ac] ss:$16 sps:$4 sm:$0xff]   ;;  %v9129_v45 = vld [vmem:[%s13609_s1 + $0x4a0] ss:$16 sps:$4 sm:$0xff]  }
  0x5f   :  { %6068 = vmatpush1.bf16.msra.mxu0 %v9045_v46  ;;  %6683 = vmatpush1.bf16.msra.mxu1 %v9048_v47  ;;  %v9132_v46 = vld [vmem:[%s13609_s1 + $0x4a8] ss:$16 sps:$4 sm:$0xff]   ;;  %v9137_v47 = vld [vmem:[%s13609_s1 + $0x4c4] ss:$16 sps:$4 sm:$0xff]  }
  0x60   :  { %6069 = vmatprep.subr.bf16.mxu0 %v9053_v48  ;;  %6684 = vmatprep.subr.bf16.mxu1 %v9056_v50  ;;  %v9140_v48 = vld [vmem:[%s13609_s1 + $0x4cc] ss:$16 sps:$4 sm:$0xff]   ;;  %v9135_v50 = vld [vmem:[%s13609_s1 + $0x4c0] ss:$16 sps:$4 sm:$0xff]  }
  0x63   :  { %6070 = vmatpush1.bf16.msra.mxu0 %v9051_v51  ;;  %6685 = vmatpush1.bf16.msra.mxu1 %v9054_v52  ;;  %v9138_v51 = vld [vmem:[%s13609_s1 + $0x4c8] ss:$16 sps:$4 sm:$0xff]   ;;  %v9143_v52 = vld [vmem:[%s13609_s1 + $0x4e4] ss:$16 sps:$4 sm:$0xff]  }
  0x64   :  { %6071 = vmatprep.subr.bf16.mxu0 %v9059_v53  ;;  %6686 = vmatprep.subr.bf16.mxu1 %v9062_v54  ;;  %v9146_v53 = vld [vmem:[%s13609_s1 + $0x4ec] ss:$16 sps:$4 sm:$0xff]   ;;  %v9141_v54 = vld [vmem:[%s13609_s1 + $0x4e0] ss:$16 sps:$4 sm:$0xff]  }
  0x67   :  { %6072 = vmatpush1.bf16.msra.mxu0 %v9057_v55  ;;  %6687 = vmatpush1.bf16.msra.mxu1 %v9060_v56  ;;  %v9144_v55 = vld [vmem:[%s13609_s1 + $0x4e8] ss:$16 sps:$4 sm:$0xff]   ;;  %v9149_v56 = vld [vmem:[%s13609_s1 + $0x504] ss:$16 sps:$4 sm:$0xff]  }
  0x68   :  { %6073 = vmatprep.subr.bf16.mxu0 %v9065_v57  ;;  %6688 = vmatprep.subr.bf16.mxu1 %v9068_v58  ;;  %v9152_v57 = vld [vmem:[%s13609_s1 + $0x50c] ss:$16 sps:$4 sm:$0xff]   ;;  %v9147_v58 = vld [vmem:[%s13609_s1 + $0x500] ss:$16 sps:$4 sm:$0xff]  }
  0x6b   :  { %6074 = vmatpush1.bf16.msra.mxu0 %v9063_v59  ;;  %6689 = vmatpush1.bf16.msra.mxu1 %v9066_v60  ;;  %v9150_v59 = vld [vmem:[%s13609_s1 + $0x508] ss:$16 sps:$4 sm:$0xff]   ;;  %v9155_v60 = vld [vmem:[%s13609_s1 + $0x524] ss:$16 sps:$4 sm:$0xff]  }
  0x6c   :  { %6075 = vmatprep.subr.bf16.mxu0 %v9071_v61  ;;  %6690 = vmatprep.subr.bf16.mxu1 %v9074_v62  ;;  %v9158_v61 = vld [vmem:[%s13609_s1 + $0x52c] ss:$16 sps:$4 sm:$0xff]   ;;  %v9153_v62 = vld [vmem:[%s13609_s1 + $0x520] ss:$16 sps:$4 sm:$0xff]  }
  0x6f   :  { %6076 = vmatpush1.bf16.msra.mxu0 %v9069_v63  ;;  %6691 = vmatpush1.bf16.msra.mxu1 %v9072_v0  ;;  %v9156_v63 = vld [vmem:[%s13609_s1 + $0x528] ss:$16 sps:$4 sm:$0xff]   ;;  %v9161_v0 = vld [vmem:[%s13609_s1 + $0x544] ss:$16 sps:$4 sm:$0xff]  }
  0x70   :  { %6077 = vmatprep.subr.bf16.mxu0 %v9077_v1  ;;  %6692 = vmatprep.subr.bf16.mxu1 %v9080_v2  ;;  %v9164_v1 = vld [vmem:[%s13609_s1 + $0x54c] ss:$16 sps:$4 sm:$0xff]   ;;  %v9159_v2 = vld [vmem:[%s13609_s1 + $0x540] ss:$16 sps:$4 sm:$0xff]  }
  0x73   :  { %6078 = vmatpush1.bf16.msra.mxu0 %v9075_v3  ;;  %6693 = vmatpush1.bf16.msra.mxu1 %v9078_v4  ;;  %v9162_v3 = vld [vmem:[%s13609_s1 + $0x548] ss:$16 sps:$4 sm:$0xff]   ;;  %v9167_v4 = vld [vmem:[%s13609_s1 + $0x564] ss:$16 sps:$4 sm:$0xff]  }
  0x74   :  { %6079 = vmatprep.subr.bf16.mxu0 %v9083_v5  ;;  %6694 = vmatprep.subr.bf16.mxu1 %v9086_v6  ;;  %v9170_v5 = vld [vmem:[%s13609_s1 + $0x56c] ss:$16 sps:$4 sm:$0xff]   ;;  %v9165_v6 = vld [vmem:[%s13609_s1 + $0x560] ss:$16 sps:$4 sm:$0xff]  }
  0x77   :  { %6080 = vmatpush1.bf16.msra.mxu0 %v9081_v7  ;;  %6695 = vmatpush1.bf16.msra.mxu1 %v9084_v8  ;;  %v9168_v7 = vld [vmem:[%s13609_s1 + $0x568] ss:$16 sps:$4 sm:$0xff]   ;;  %v9173_v8 = vld [vmem:[%s13609_s1 + $0x584] ss:$16 sps:$4 sm:$0xff]  }
  0x78   :  { %6081 = vmatprep.subr.bf16.mxu0 %v9089_v10  ;;  %6696 = vmatprep.subr.bf16.mxu1 %v9092_v11  ;;  %v9176_v10 = vld [vmem:[%s13609_s1 + $0x58c] ss:$16 sps:$4 sm:$0xff]   ;;  %v9171_v11 = vld [vmem:[%s13609_s1 + $0x580] ss:$16 sps:$4 sm:$0xff]  }
  0x7b   :  { %6082 = vmatpush1.bf16.msra.mxu0 %v9087_v12  ;;  %6697 = vmatpush1.bf16.msra.mxu1 %v9090_v13  ;;  %v9174_v12 = vld [vmem:[%s13609_s1 + $0x588] ss:$16 sps:$4 sm:$0xff]   ;;  %v9179_v13 = vld [vmem:[%s13609_s1 + $0x5a4] ss:$16 sps:$4 sm:$0xff]  }
  0x7c   :  { %6083 = vmatprep.subr.bf16.mxu0 %v9095_v14  ;;  %6698 = vmatprep.subr.bf16.mxu1 %v9098_v15  ;;  %v9182_v14 = vld [vmem:[%s13609_s1 + $0x5ac] ss:$16 sps:$4 sm:$0xff]   ;;  %v9177_v15 = vld [vmem:[%s13609_s1 + $0x5a0] ss:$16 sps:$4 sm:$0xff]  }
  0x7f   :  { %6084 = vmatpush1.bf16.msra.mxu0 %v9093_v16  ;;  %6699 = vmatpush1.bf16.msra.mxu1 %v9096_v17  ;;  %v9180_v16 = vld [vmem:[%s13609_s1 + $0x5a8] ss:$16 sps:$4 sm:$0xff]   ;;  %v9185_v17 = vld [vmem:[%s13609_s1 + $0x5c4] ss:$16 sps:$4 sm:$0xff]  }
  0x80   :  { %6094 = vmatprep.subr.bf16.mxu0 %v9101_v18  ;;  %6709 = vmatprep.subr.bf16.mxu1 %v9104_v19  ;;  %v9188_v18 = vld [vmem:[%s13609_s1 + $0x5cc] ss:$16 sps:$4 sm:$0xff]   ;;  %v60_v19 = vcombine.high %v10851_v23, %v10851_v23 }
  0x81   :  { %v9194_v23 = vld [vmem:[%s13609_s1 + $0x5ec] ss:$16 sps:$4 sm:$0xff]  }
  0x82   :  { %6086 = vmatmul.mubr.bf16.vlgmr.msra.gmra.mrb[0].mxu0 %v202_v21  ;;  %6701 = vmatmul.mubr.bf16.vlgmr.msra.gmra.mrb[0].mxu1 %v202_v21  ;;  %v9186_v21 = vld [vmem:[%s13609_s1 + $0x5c8] ss:$16 sps:$4 sm:$0xff]  }
  0x83   :  { %6095 = vmatpush1.bf16.msra.mxu0 %v9099_v20  ;;  %6710 = vmatpush1.bf16.msra.mxu1 %v9102_v22  ;;  %v9183_v20 = vld [vmem:[%s13609_s1 + $0x5c0] ss:$16 sps:$4 sm:$0xff]   ;;  %v9191_v22 = vld [vmem:[%s13609_s1 + $0x5e4] ss:$16 sps:$4 sm:$0xff]  }
  0x84   :  { %6096 = vmatprep.subr.bf16.mxu0 %v9107_v24  ;;  %6711 = vmatprep.subr.bf16.mxu1 %v9110_v9  ;;  %v11036_v24 = vrot.slane %v60_v19, %v10571_v49  ;;  %v9189_v9 = vld [vmem:[%s13609_s1 + $0x5e0] ss:$16 sps:$4 sm:$0xff]   ;;  %v9270_v19 = vld [vmem:[%s13609_s1 + $0x788] ss:$16 sps:$4 sm:$0xff]  }
  0x85   :  { %6126 = vmatprep.mubr.bf16.mxu0 %v205_v31  ;;  %6741 = vmatprep.mubr.bf16.mxu1 %v205_v31  ;;  %v9195_v31 = vld [vmem:[%s13609_s1 + $0x600] ss:$16 sps:$4 sm:$0xff]  }
  0x87   :  { %6097 = vmatpush1.bf16.msra.mxu0 %v9105_v27  ;;  %6712 = vmatpush1.bf16.msra.mxu1 %v9108_v28  ;;  %v9197_v27 = vld [vmem:[%s13609_s1 + $0x604] ss:$16 sps:$4 sm:$0xff]   ;;  %v9200_v28 = vld [vmem:[%s13609_s1 + $0x60c] ss:$16 sps:$4 sm:$0xff]  }
  0x88   :  { %6098 = vmatprep.subr.bf16.mxu0 %v9113_v29  ;;  %6713 = vmatprep.subr.bf16.mxu1 %v9116_v30  ;;  %v76_v29 = vcombine.high %v11036_v24, %v11036_v24  ;;  %v204_v30 = vpack.c.bf16 %v10861_v25, %v10861_v25  ;;  %v9206_v25 = vld [vmem:[%s13609_s1 + $0x62c] ss:$16 sps:$4 sm:$0xff]  }
  0x8b   :  { %6099 = vmatpush1.bf16.msra.mxu0 %v9111_v32  ;;  %6714 = vmatpush1.bf16.msra.mxu1 %v9114_v33  ;;  %v9198_v32 = vld [vmem:[%s13609_s1 + $0x608] ss:$16 sps:$4 sm:$0xff]   ;;  %v9203_v33 = vld [vmem:[%s13609_s1 + $0x624] ss:$16 sps:$4 sm:$0xff]  }
  0x8c   :  { %6100 = vmatprep.subr.bf16.mxu0 %v9119_v34  ;;  %6715 = vmatprep.subr.bf16.mxu1 %v9122_v35  ;;  %v207_v34 = vpack.c.bf16 %v76_v29, %v76_v29  ;;  %v9201_v35 = vld [vmem:[%s13609_s1 + $0x620] ss:$16 sps:$4 sm:$0xff]   ;;  %v9282_v29 = vld [vmem:[%s13609_s1 + $0x7c8] ss:$16 sps:$4 sm:$0xff]  }
  0x8f   :  { %6101 = vmatpush1.bf16.msra.mxu0 %v9117_v36  ;;  %6716 = vmatpush1.bf16.msra.mxu1 %v9120_v37  ;;  %v9204_v36 = vld [vmem:[%s13609_s1 + $0x628] ss:$16 sps:$4 sm:$0xff]   ;;  %v9209_v37 = vld [vmem:[%s13609_s1 + $0x644] ss:$16 sps:$4 sm:$0xff]  }
  0x90   :  { %6102 = vmatprep.subr.bf16.mxu0 %v9125_v38  ;;  %6717 = vmatprep.subr.bf16.mxu1 %v9128_v39  ;;  %v9212_v38 = vld [vmem:[%s13609_s1 + $0x64c] ss:$16 sps:$4 sm:$0xff]   ;;  %v9207_v39 = vld [vmem:[%s13609_s1 + $0x640] ss:$16 sps:$4 sm:$0xff]  }
  0x93   :  { %6103 = vmatpush1.bf16.msra.mxu0 %v9123_v40  ;;  %6718 = vmatpush1.bf16.msra.mxu1 %v9126_v41  ;;  %v9210_v40 = vld [vmem:[%s13609_s1 + $0x648] ss:$16 sps:$4 sm:$0xff]   ;;  %v9215_v41 = vld [vmem:[%s13609_s1 + $0x664] ss:$16 sps:$4 sm:$0xff]  }
  0x94   :  { %6104 = vmatprep.subr.bf16.mxu0 %v9131_v42  ;;  %6719 = vmatprep.subr.bf16.mxu1 %v9134_v44  ;;  %v9218_v42 = vld [vmem:[%s13609_s1 + $0x66c] ss:$16 sps:$4 sm:$0xff]   ;;  %v9213_v44 = vld [vmem:[%s13609_s1 + $0x660] ss:$16 sps:$4 sm:$0xff]  }
  0x97   :  { %6105 = vmatpush1.bf16.msra.mxu0 %v9129_v45  ;;  %6720 = vmatpush1.bf16.msra.mxu1 %v9132_v46  ;;  %v9216_v45 = vld [vmem:[%s13609_s1 + $0x668] ss:$16 sps:$4 sm:$0xff]   ;;  %v9221_v46 = vld [vmem:[%s13609_s1 + $0x684] ss:$16 sps:$4 sm:$0xff]  }
  0x98   :  { %6106 = vmatprep.subr.bf16.mxu0 %v9137_v47  ;;  %6721 = vmatprep.subr.bf16.mxu1 %v9140_v48  ;;  %v9224_v47 = vld [vmem:[%s13609_s1 + $0x68c] ss:$16 sps:$4 sm:$0xff]   ;;  %v9219_v48 = vld [vmem:[%s13609_s1 + $0x680] ss:$16 sps:$4 sm:$0xff]  }
  0x9b   :  { %6107 = vmatpush1.bf16.msra.mxu0 %v9135_v50  ;;  %6722 = vmatpush1.bf16.msra.mxu1 %v9138_v51  ;;  %v9222_v50 = vld [vmem:[%s13609_s1 + $0x688] ss:$16 sps:$4 sm:$0xff]   ;;  %v9227_v51 = vld [vmem:[%s13609_s1 + $0x6a4] ss:$16 sps:$4 sm:$0xff]  }
  0x9c   :  { %6108 = vmatprep.subr.bf16.mxu0 %v9143_v52  ;;  %6723 = vmatprep.subr.bf16.mxu1 %v9146_v53  ;;  %v9230_v52 = vld [vmem:[%s13609_s1 + $0x6ac] ss:$16 sps:$4 sm:$0xff]   ;;  %v9225_v53 = vld [vmem:[%s13609_s1 + $0x6a0] ss:$16 sps:$4 sm:$0xff]  }
  0x9f   :  { %6109 = vmatpush1.bf16.msra.mxu0 %v9141_v54  ;;  %6724 = vmatpush1.bf16.msra.mxu1 %v9144_v55  ;;  %v9228_v54 = vld [vmem:[%s13609_s1 + $0x6a8] ss:$16 sps:$4 sm:$0xff]   ;;  %v9233_v55 = vld [vmem:[%s13609_s1 + $0x6c4] ss:$16 sps:$4 sm:$0xff]  }
  0xa0   :  { %6110 = vmatprep.subr.bf16.mxu0 %v9149_v56  ;;  %6725 = vmatprep.subr.bf16.mxu1 %v9152_v57  ;;  %v9236_v56 = vld [vmem:[%s13609_s1 + $0x6cc] ss:$16 sps:$4 sm:$0xff]   ;;  %v9231_v57 = vld [vmem:[%s13609_s1 + $0x6c0] ss:$16 sps:$4 sm:$0xff]  }
  0xa3   :  { %6111 = vmatpush1.bf16.msra.mxu0 %v9147_v58  ;;  %6726 = vmatpush1.bf16.msra.mxu1 %v9150_v59  ;;  %v9234_v58 = vld [vmem:[%s13609_s1 + $0x6c8] ss:$16 sps:$4 sm:$0xff]   ;;  %v9239_v59 = vld [vmem:[%s13609_s1 + $0x6e4] ss:$16 sps:$4 sm:$0xff]  }
  0xa4   :  { %6112 = vmatprep.subr.bf16.mxu0 %v9155_v60  ;;  %6727 = vmatprep.subr.bf16.mxu1 %v9158_v61  ;;  %v9242_v60 = vld [vmem:[%s13609_s1 + $0x6ec] ss:$16 sps:$4 sm:$0xff]   ;;  %v9237_v61 = vld [vmem:[%s13609_s1 + $0x6e0] ss:$16 sps:$4 sm:$0xff]  }
  0xa7   :  { %6113 = vmatpush1.bf16.msra.mxu0 %v9153_v62  ;;  %6728 = vmatpush1.bf16.msra.mxu1 %v9156_v63  ;;  %v9240_v62 = vld [vmem:[%s13609_s1 + $0x6e8] ss:$16 sps:$4 sm:$0xff]   ;;  %v9245_v63 = vld [vmem:[%s13609_s1 + $0x704] ss:$16 sps:$4 sm:$0xff]  }
  0xa8   :  { %6114 = vmatprep.subr.bf16.mxu0 %v9161_v0  ;;  %6729 = vmatprep.subr.bf16.mxu1 %v9164_v1  ;;  %v9248_v0 = vld [vmem:[%s13609_s1 + $0x70c] ss:$16 sps:$4 sm:$0xff]   ;;  %v9243_v1 = vld [vmem:[%s13609_s1 + $0x700] ss:$16 sps:$4 sm:$0xff]  }
  0xab   :  { %6115 = vmatpush1.bf16.msra.mxu0 %v9159_v2  ;;  %6730 = vmatpush1.bf16.msra.mxu1 %v9162_v3  ;;  %v9246_v2 = vld [vmem:[%s13609_s1 + $0x708] ss:$16 sps:$4 sm:$0xff]   ;;  %v9251_v3 = vld [vmem:[%s13609_s1 + $0x724] ss:$16 sps:$4 sm:$0xff]  }
  0xac   :  { %6116 = vmatprep.subr.bf16.mxu0 %v9167_v4  ;;  %6731 = vmatprep.subr.bf16.mxu1 %v9170_v5  ;;  %v9254_v4 = vld [vmem:[%s13609_s1 + $0x72c] ss:$16 sps:$4 sm:$0xff]   ;;  %v9249_v5 = vld [vmem:[%s13609_s1 + $0x720] ss:$16 sps:$4 sm:$0xff]  }
  0xaf   :  { %6117 = vmatpush1.bf16.msra.mxu0 %v9165_v6  ;;  %6732 = vmatpush1.bf16.msra.mxu1 %v9168_v7  ;;  %v9252_v6 = vld [vmem:[%s13609_s1 + $0x728] ss:$16 sps:$4 sm:$0xff]   ;;  %v9257_v7 = vld [vmem:[%s13609_s1 + $0x744] ss:$16 sps:$4 sm:$0xff]  }
  0xb0   :  { %6118 = vmatprep.subr.bf16.mxu0 %v9173_v8  ;;  %6733 = vmatprep.subr.bf16.mxu1 %v9176_v10  ;;  %v9260_v8 = vld [vmem:[%s13609_s1 + $0x74c] ss:$16 sps:$4 sm:$0xff]   ;;  %v9255_v10 = vld [vmem:[%s13609_s1 + $0x740] ss:$16 sps:$4 sm:$0xff]  }
  0xb3   :  { %6119 = vmatpush1.bf16.msra.mxu0 %v9171_v11  ;;  %6734 = vmatpush1.bf16.msra.mxu1 %v9174_v12  ;;  %v9258_v11 = vld [vmem:[%s13609_s1 + $0x748] ss:$16 sps:$4 sm:$0xff]   ;;  %v9263_v12 = vld [vmem:[%s13609_s1 + $0x764] ss:$16 sps:$4 sm:$0xff]  }
  0xb4   :  { %6120 = vmatprep.subr.bf16.mxu0 %v9179_v13  ;;  %6735 = vmatprep.subr.bf16.mxu1 %v9182_v14  ;;  %v9266_v13 = vld [vmem:[%s13609_s1 + $0x76c] ss:$16 sps:$4 sm:$0xff]   ;;  %v9261_v14 = vld [vmem:[%s13609_s1 + $0x760] ss:$16 sps:$4 sm:$0xff]  }
  0xb7   :  { %6121 = vmatpush1.bf16.msra.mxu0 %v9177_v15  ;;  %6736 = vmatpush1.bf16.msra.mxu1 %v9180_v16  ;;  %v9264_v15 = vld [vmem:[%s13609_s1 + $0x768] ss:$16 sps:$4 sm:$0xff]   ;;  %v9269_v16 = vld [vmem:[%s13609_s1 + $0x784] ss:$16 sps:$4 sm:$0xff]  }
  0xb8   :  { %6122 = vmatprep.subr.bf16.mxu0 %v9185_v17  ;;  %6737 = vmatprep.subr.bf16.mxu1 %v9188_v18  ;;  %v9272_v17 = vld [vmem:[%s13609_s1 + $0x78c] ss:$16 sps:$4 sm:$0xff]   ;;  %v9267_v18 = vld [vmem:[%s13609_s1 + $0x780] ss:$16 sps:$4 sm:$0xff]  }
  0xbb   :  { %6123 = vmatpush1.bf16.msra.mxu0 %v9183_v20  ;;  %6738 = vmatpush1.bf16.msra.mxu1 %v9186_v21  ;;  %v9275_v20 = vld [vmem:[%s13609_s1 + $0x7a4] ss:$16 sps:$4 sm:$0xff]   ;;  %v9278_v21 = vld [vmem:[%s13609_s1 + $0x7ac] ss:$16 sps:$4 sm:$0xff]  }
  0xbc   :  { %6124 = vmatprep.subr.bf16.mxu0 %v9191_v22  ;;  %6739 = vmatprep.subr.bf16.mxu1 %v9194_v23  ;;  %v9273_v22 = vld [vmem:[%s13609_s1 + $0x7a0] ss:$16 sps:$4 sm:$0xff]   ;;  %v9276_v23 = vld [vmem:[%s13609_s1 + $0x7a8] ss:$16 sps:$4 sm:$0xff]  }
  0xbf   :  { %6125 = vmatpush1.bf16.msra.mxu0 %v9189_v9  ;;  %6740 = vmatpush1.bf16.msra.mxu1 %v9192_v26  ;;  %v9281_v9 = vld [vmem:[%s13609_s1 + $0x7c4] ss:$16 sps:$4 sm:$0xff]   ;;  %v9284_v26 = vld [vmem:[%s13609_s1 + $0x7cc] ss:$16 sps:$4 sm:$0xff]  }
  0xc0   :  { %6135 = vmatprep.subr.bf16.mxu0 %v9197_v27  ;;  %6750 = vmatprep.subr.bf16.mxu1 %v9200_v28  ;;  %v9279_v27 = vld [vmem:[%s13609_s1 + $0x7c0] ss:$16 sps:$4 sm:$0xff]  }
  0xc1   :  { %v11228_v28 = vld [vmem:[%s13610_s0 + $0x10] sm:$0xff] }
  0xc2   :  { %6127 = vmatmul.mubr.bf16.vlgmr.msra.gmra.mrb[0].mxu0 %v204_v30  ;;  %6742 = vmatmul.mubr.bf16.vlgmr.msra.gmra.mrb[0].mxu1 %v204_v30  ;;  %v9287_v30 = vld [vmem:[%s13609_s1 + $0x7e4] ss:$16 sps:$4 sm:$0xff]  }
  0xc3   :  { %6136 = vmatpush1.bf16.msra.mxu0 %v9195_v31  ;;  %6751 = vmatpush1.bf16.msra.mxu1 %v9198_v32  ;;  %v9290_v31 = vld [vmem:[%s13609_s1 + $0x7ec] ss:$16 sps:$4 sm:$0xff]   ;;  %v11241_v32 = vrot.slane %v11228_v28, %v10571_v49 }
  0xc4   :  { %6137 = vmatprep.subr.bf16.mxu0 %v9203_v33  ;;  %6752 = vmatprep.subr.bf16.mxu1 %v9206_v25  ;;  %v9285_v33 = vld [vmem:[%s13609_s1 + $0x7e0] ss:$16 sps:$4 sm:$0xff]   ;;  %v9288_v25 = vld [vmem:[%s13609_s1 + $0x7e8] ss:$16 sps:$4 sm:$0xff]  }
  0xc5   :  { %6167 = vmatprep.mubr.bf16.mxu0 %v207_v34  ;;  %6782 = vmatprep.mubr.bf16.mxu1 %v207_v34  ;;  %v9294_v34 = vld [vmem:[%s13609_s1 + $0x804] ss:$16 sps:$4 sm:$0xff]  }
  0xc7   :  { %6138 = vmatpush1.bf16.msra.mxu0 %v9201_v35  ;;  %6753 = vmatpush1.bf16.msra.mxu1 %v9204_v36  ;;  %v9297_v35 = vld [vmem:[%s13609_s1 + $0x80c] ss:$16 sps:$4 sm:$0xff]   ;;  %v92_v36 = vcombine.high %v11241_v32, %v11241_v32 }
  0xc8   :  { %6139 = vmatprep.subr.bf16.mxu0 %v9209_v37  ;;  %6754 = vmatprep.subr.bf16.mxu1 %v9212_v38  ;;  %v9292_v37 = vld [vmem:[%s13609_s1 + $0x800] ss:$16 sps:$4 sm:$0xff]   ;;  %v206_v38 = vpack.c.bf16 %v11036_v24, %v11036_v24 }
  0xc9   :  { %v9298_v24 = vld [vmem:[%s13609_s1 + $0x820] ss:$16 sps:$4 sm:$0xff]  }
  0xcb   :  { %6140 = vmatpush1.bf16.msra.mxu0 %v9207_v39  ;;  %6755 = vmatpush1.bf16.msra.mxu1 %v9210_v40  ;;  %v9295_v39 = vld [vmem:[%s13609_s1 + $0x808] ss:$16 sps:$4 sm:$0xff]   ;;  %v9300_v40 = vld [vmem:[%s13609_s1 + $0x824] ss:$16 sps:$4 sm:$0xff]  }
  0xcc   :  { %6141 = vmatprep.subr.bf16.mxu0 %v9215_v41  ;;  %6756 = vmatprep.subr.bf16.mxu1 %v9218_v42  ;;  %v9303_v41 = vld [vmem:[%s13609_s1 + $0x82c] ss:$16 sps:$4 sm:$0xff]   ;;  %v209_v42 = vpack.c.bf16 %v92_v36, %v92_v36  ;;  %v9376_v36 = vld [vmem:[%s13609_s1 + $0x9c0] ss:$16 sps:$4 sm:$0xff]  }
  0xcf   :  { %6142 = vmatpush1.bf16.msra.mxu0 %v9213_v44  ;;  %6757 = vmatpush1.bf16.msra.mxu1 %v9216_v45  ;;  %v9301_v44 = vld [vmem:[%s13609_s1 + $0x828] ss:$16 sps:$4 sm:$0xff]   ;;  %v9306_v45 = vld [vmem:[%s13609_s1 + $0x844] ss:$16 sps:$4 sm:$0xff]  }
  0xd0   :  { %6143 = vmatprep.subr.bf16.mxu0 %v9221_v46  ;;  %6758 = vmatprep.subr.bf16.mxu1 %v9224_v47  ;;  %v9309_v46 = vld [vmem:[%s13609_s1 + $0x84c] ss:$16 sps:$4 sm:$0xff]   ;;  %v9304_v47 = vld [vmem:[%s13609_s1 + $0x840] ss:$16 sps:$4 sm:$0xff]  }
  0xd3   :  { %6144 = vmatpush1.bf16.msra.mxu0 %v9219_v48  ;;  %6759 = vmatpush1.bf16.msra.mxu1 %v9222_v50  ;;  %v9307_v48 = vld [vmem:[%s13609_s1 + $0x848] ss:$16 sps:$4 sm:$0xff]   ;;  %v9312_v50 = vld [vmem:[%s13609_s1 + $0x864] ss:$16 sps:$4 sm:$0xff]  }
  0xd4   :  { %6145 = vmatprep.subr.bf16.mxu0 %v9227_v51  ;;  %6760 = vmatprep.subr.bf16.mxu1 %v9230_v52  ;;  %v9315_v51 = vld [vmem:[%s13609_s1 + $0x86c] ss:$16 sps:$4 sm:$0xff]   ;;  %v9310_v52 = vld [vmem:[%s13609_s1 + $0x860] ss:$16 sps:$4 sm:$0xff]  }
  0xd7   :  { %6146 = vmatpush1.bf16.msra.mxu0 %v9225_v53  ;;  %6761 = vmatpush1.bf16.msra.mxu1 %v9228_v54  ;;  %v9313_v53 = vld [vmem:[%s13609_s1 + $0x868] ss:$16 sps:$4 sm:$0xff]   ;;  %v9318_v54 = vld [vmem:[%s13609_s1 + $0x884] ss:$16 sps:$4 sm:$0xff]  }
  0xd8   :  { %6147 = vmatprep.subr.bf16.mxu0 %v9233_v55  ;;  %6762 = vmatprep.subr.bf16.mxu1 %v9236_v56  ;;  %v9321_v55 = vld [vmem:[%s13609_s1 + $0x88c] ss:$16 sps:$4 sm:$0xff]   ;;  %v9316_v56 = vld [vmem:[%s13609_s1 + $0x880] ss:$16 sps:$4 sm:$0xff]  }
  0xdb   :  { %6148 = vmatpush1.bf16.msra.mxu0 %v9231_v57  ;;  %6763 = vmatpush1.bf16.msra.mxu1 %v9234_v58  ;;  %v9319_v57 = vld [vmem:[%s13609_s1 + $0x888] ss:$16 sps:$4 sm:$0xff]   ;;  %v9324_v58 = vld [vmem:[%s13609_s1 + $0x8a4] ss:$16 sps:$4 sm:$0xff]  }
  0xdc   :  { %6149 = vmatprep.subr.bf16.mxu0 %v9239_v59  ;;  %6764 = vmatprep.subr.bf16.mxu1 %v9242_v60  ;;  %v9327_v59 = vld [vmem:[%s13609_s1 + $0x8ac] ss:$16 sps:$4 sm:$0xff]   ;;  %v9322_v60 = vld [vmem:[%s13609_s1 + $0x8a0] ss:$16 sps:$4 sm:$0xff]  }
  0xdf   :  { %6150 = vmatpush1.bf16.msra.mxu0 %v9237_v61  ;;  %6765 = vmatpush1.bf16.msra.mxu1 %v9240_v62  ;;  %v9325_v61 = vld [vmem:[%s13609_s1 + $0x8a8] ss:$16 sps:$4 sm:$0xff]   ;;  %v9330_v62 = vld [vmem:[%s13609_s1 + $0x8c4] ss:$16 sps:$4 sm:$0xff]  }
  0xe0   :  { %6151 = vmatprep.subr.bf16.mxu0 %v9245_v63  ;;  %6766 = vmatprep.subr.bf16.mxu1 %v9248_v0  ;;  %v9333_v63 = vld [vmem:[%s13609_s1 + $0x8cc] ss:$16 sps:$4 sm:$0xff]   ;;  %v9328_v0 = vld [vmem:[%s13609_s1 + $0x8c0] ss:$16 sps:$4 sm:$0xff]  }
  0xe3   :  { %6152 = vmatpush1.bf16.msra.mxu0 %v9243_v1  ;;  %6767 = vmatpush1.bf16.msra.mxu1 %v9246_v2  ;;  %v9331_v1 = vld [vmem:[%s13609_s1 + $0x8c8] ss:$16 sps:$4 sm:$0xff]   ;;  %v9336_v2 = vld [vmem:[%s13609_s1 + $0x8e4] ss:$16 sps:$4 sm:$0xff]  }
  0xe4   :  { %6153 = vmatprep.subr.bf16.mxu0 %v9251_v3  ;;  %6768 = vmatprep.subr.bf16.mxu1 %v9254_v4  ;;  %v9339_v3 = vld [vmem:[%s13609_s1 + $0x8ec] ss:$16 sps:$4 sm:$0xff]   ;;  %v9334_v4 = vld [vmem:[%s13609_s1 + $0x8e0] ss:$16 sps:$4 sm:$0xff]  }
  0xe7   :  { %6154 = vmatpush1.bf16.msra.mxu0 %v9249_v5  ;;  %6769 = vmatpush1.bf16.msra.mxu1 %v9252_v6  ;;  %v9337_v5 = vld [vmem:[%s13609_s1 + $0x8e8] ss:$16 sps:$4 sm:$0xff]   ;;  %v9342_v6 = vld [vmem:[%s13609_s1 + $0x904] ss:$16 sps:$4 sm:$0xff]  }
  0xe8   :  { %6155 = vmatprep.subr.bf16.mxu0 %v9257_v7  ;;  %6770 = vmatprep.subr.bf16.mxu1 %v9260_v8  ;;  %v9345_v7 = vld [vmem:[%s13609_s1 + $0x90c] ss:$16 sps:$4 sm:$0xff]   ;;  %v9340_v8 = vld [vmem:[%s13609_s1 + $0x900] ss:$16 sps:$4 sm:$0xff]  }
  0xeb   :  { %6156 = vmatpush1.bf16.msra.mxu0 %v9255_v10  ;;  %6771 = vmatpush1.bf16.msra.mxu1 %v9258_v11  ;;  %v9343_v10 = vld [vmem:[%s13609_s1 + $0x908] ss:$16 sps:$4 sm:$0xff]   ;;  %v9348_v11 = vld [vmem:[%s13609_s1 + $0x924] ss:$16 sps:$4 sm:$0xff]  }
  0xec   :  { %6157 = vmatprep.subr.bf16.mxu0 %v9263_v12  ;;  %6772 = vmatprep.subr.bf16.mxu1 %v9266_v13  ;;  %v9351_v12 = vld [vmem:[%s13609_s1 + $0x92c] ss:$16 sps:$4 sm:$0xff]   ;;  %v9346_v13 = vld [vmem:[%s13609_s1 + $0x920] ss:$16 sps:$4 sm:$0xff]  }
  0xef   :  { %6158 = vmatpush1.bf16.msra.mxu0 %v9261_v14  ;;  %6773 = vmatpush1.bf16.msra.mxu1 %v9264_v15  ;;  %v9349_v14 = vld [vmem:[%s13609_s1 + $0x928] ss:$16 sps:$4 sm:$0xff]   ;;  %v9354_v15 = vld [vmem:[%s13609_s1 + $0x944] ss:$16 sps:$4 sm:$0xff]  }
  0xf0   :  { %6159 = vmatprep.subr.bf16.mxu0 %v9269_v16  ;;  %6774 = vmatprep.subr.bf16.mxu1 %v9272_v17  ;;  %v9357_v16 = vld [vmem:[%s13609_s1 + $0x94c] ss:$16 sps:$4 sm:$0xff]   ;;  %v9352_v17 = vld [vmem:[%s13609_s1 + $0x940] ss:$16 sps:$4 sm:$0xff]  }
  0xf3   :  { %6160 = vmatpush1.bf16.msra.mxu0 %v9267_v18  ;;  %6775 = vmatpush1.bf16.msra.mxu1 %v9270_v19  ;;  %v9355_v18 = vld [vmem:[%s13609_s1 + $0x948] ss:$16 sps:$4 sm:$0xff]   ;;  %v9360_v19 = vld [vmem:[%s13609_s1 + $0x964] ss:$16 sps:$4 sm:$0xff]  }
  0xf4   :  { %6161 = vmatprep.subr.bf16.mxu0 %v9275_v20  ;;  %6776 = vmatprep.subr.bf16.mxu1 %v9278_v21  ;;  %v9363_v20 = vld [vmem:[%s13609_s1 + $0x96c] ss:$16 sps:$4 sm:$0xff]   ;;  %v9358_v21 = vld [vmem:[%s13609_s1 + $0x960] ss:$16 sps:$4 sm:$0xff]  }
  0xf7   :  { %6162 = vmatpush1.bf16.msra.mxu0 %v9273_v22  ;;  %6777 = vmatpush1.bf16.msra.mxu1 %v9276_v23  ;;  %v9361_v22 = vld [vmem:[%s13609_s1 + $0x968] ss:$16 sps:$4 sm:$0xff]   ;;  %v9366_v23 = vld [vmem:[%s13609_s1 + $0x984] ss:$16 sps:$4 sm:$0xff]  }
  0xf8   :  { %6163 = vmatprep.subr.bf16.mxu0 %v9281_v9  ;;  %6778 = vmatprep.subr.bf16.mxu1 %v9284_v26  ;;  %v9369_v9 = vld [vmem:[%s13609_s1 + $0x98c] ss:$16 sps:$4 sm:$0xff]   ;;  %v9364_v26 = vld [vmem:[%s13609_s1 + $0x980] ss:$16 sps:$4 sm:$0xff]  }
  0xfb   :  { %6164 = vmatpush1.bf16.msra.mxu0 %v9279_v27  ;;  %6779 = vmatpush1.bf16.msra.mxu1 %v9282_v29  ;;  %v9367_v27 = vld [vmem:[%s13609_s1 + $0x988] ss:$16 sps:$4 sm:$0xff]   ;;  %v9372_v29 = vld [vmem:[%s13609_s1 + $0x9a4] ss:$16 sps:$4 sm:$0xff]  }
  0xfc   :  { %6165 = vmatprep.subr.bf16.mxu0 %v9287_v30  ;;  %6780 = vmatprep.subr.bf16.mxu1 %v9290_v31  ;;  %v9375_v30 = vld [vmem:[%s13609_s1 + $0x9ac] ss:$16 sps:$4 sm:$0xff]   ;;  %v9370_v31 = vld [vmem:[%s13609_s1 + $0x9a0] ss:$16 sps:$4 sm:$0xff]  }
  0xff   :  { %6166 = vmatpush1.bf16.msra.mxu0 %v9285_v33  ;;  %6781 = vmatpush1.bf16.msra.mxu1 %v9288_v25  ;;  %v9373_v33 = vld [vmem:[%s13609_s1 + $0x9a8] ss:$16 sps:$4 sm:$0xff]   ;;  %v9378_v25 = vld [vmem:[%s13609_s1 + $0x9c4] ss:$16 sps:$4 sm:$0xff]  }
 0x100   :  { %6176 = vmatprep.subr.bf16.mxu0 %v9294_v34  ;;  %6791 = vmatprep.subr.bf16.mxu1 %v9297_v35  ;;  %v9381_v34 = vld [vmem:[%s13609_s1 + $0x9cc] ss:$16 sps:$4 sm:$0xff]   ;;  %v77_v35 = vcombine.high %v11228_v28, %v11228_v28 }
 0x101   :  { %v9387_v28 = vld [vmem:[%s13609_s1 + $0x9ec] ss:$16 sps:$4 sm:$0xff]  }
 0x102   :  { %6168 = vmatmul.mubr.bf16.vlgmr.msra.gmra.mrb[0].mxu0 %v206_v38  ;;  %6783 = vmatmul.mubr.bf16.vlgmr.msra.gmra.mrb[0].mxu1 %v206_v38  ;;  %v9384_v38 = vld [vmem:[%s13609_s1 + $0x9e4] ss:$16 sps:$4 sm:$0xff]  }
 0x103   :  { %6177 = vmatpush1.bf16.msra.mxu0 %v9292_v37  ;;  %6792 = vmatpush1.bf16.msra.mxu1 %v9295_v39  ;;  %v9379_v37 = vld [vmem:[%s13609_s1 + $0x9c8] ss:$16 sps:$4 sm:$0xff]   ;;  %v11442_v39 = vrot.slane %v77_v35, %v10571_v49 }
 0x104   :  { %6178 = vmatprep.subr.bf16.mxu0 %v9300_v40  ;;  %6793 = vmatprep.subr.bf16.mxu1 %v9303_v41  ;;  %v9382_v40 = vld [vmem:[%s13609_s1 + $0x9e0] ss:$16 sps:$4 sm:$0xff]   ;;  %v9385_v41 = vld [vmem:[%s13609_s1 + $0x9e8] ss:$16 sps:$4 sm:$0xff]  }
 0x105   :  { %6208 = vmatprep.mubr.bf16.mxu0 %v209_v42  ;;  %6823 = vmatprep.mubr.bf16.mxu1 %v209_v42  ;;  %v9390_v42 = vld [vmem:[%s13609_s1 + $0xa04] ss:$16 sps:$4 sm:$0xff]   ;;  %v9463_v35 = vld [vmem:[%s13609_s1 + $0xb88] ss:$16 sps:$4 sm:$0xff]  }
 0x107   :  { %6179 = vmatpush1.bf16.msra.mxu0 %v9298_v24  ;;  %6794 = vmatpush1.bf16.msra.mxu1 %v9301_v44  ;;  %v9393_v24 = vld [vmem:[%s13609_s1 + $0xa0c] ss:$16 sps:$4 sm:$0xff]   ;;  %v93_v44 = vcombine.high %v11442_v39, %v11442_v39 }
 0x108   :  { %6180 = vmatprep.subr.bf16.mxu0 %v9306_v45  ;;  %6795 = vmatprep.subr.bf16.mxu1 %v9309_v46  ;;  %v208_v45 = vpack.c.bf16 %v11241_v32, %v11241_v32  ;;  %v9388_v46 = vld [vmem:[%s13609_s1 + $0xa00] ss:$16 sps:$4 sm:$0xff]   ;;  %v9399_v32 = vld [vmem:[%s13609_s1 + $0xa2c] ss:$16 sps:$4 sm:$0xff]  }
 0x10b   :  { %6181 = vmatpush1.bf16.msra.mxu0 %v9304_v47  ;;  %6796 = vmatpush1.bf16.msra.mxu1 %v9307_v48  ;;  %v9391_v47 = vld [vmem:[%s13609_s1 + $0xa08] ss:$16 sps:$4 sm:$0xff]   ;;  %v9396_v48 = vld [vmem:[%s13609_s1 + $0xa24] ss:$16 sps:$4 sm:$0xff]  }
 0x10c   :  { %6182 = vmatprep.subr.bf16.mxu0 %v9312_v50  ;;  %6797 = vmatprep.subr.bf16.mxu1 %v9315_v51  ;;  %v211_v50 = vpack.c.bf16 %v93_v44, %v93_v44  ;;  %v9394_v51 = vld [vmem:[%s13609_s1 + $0xa20] ss:$16 sps:$4 sm:$0xff]   ;;  %v9475_v44 = vld [vmem:[%s13609_s1 + $0xbc8] ss:$16 sps:$4 sm:$0xff]  }
 0x10f   :  { %6183 = vmatpush1.bf16.msra.mxu0 %v9310_v52  ;;  %6798 = vmatpush1.bf16.msra.mxu1 %v9313_v53  ;;  %v9397_v52 = vld [vmem:[%s13609_s1 + $0xa28] ss:$16 sps:$4 sm:$0xff]   ;;  %v9402_v53 = vld [vmem:[%s13609_s1 + $0xa44] ss:$16 sps:$4 sm:$0xff]  }
 0x110   :  { %6184 = vmatprep.subr.bf16.mxu0 %v9318_v54  ;;  %6799 = vmatprep.subr.bf16.mxu1 %v9321_v55  ;;  %v9405_v54 = vld [vmem:[%s13609_s1 + $0xa4c] ss:$16 sps:$4 sm:$0xff]   ;;  %v9400_v55 = vld [vmem:[%s13609_s1 + $0xa40] ss:$16 sps:$4 sm:$0xff]  }
 0x113   :  { %6185 = vmatpush1.bf16.msra.mxu0 %v9316_v56  ;;  %6800 = vmatpush1.bf16.msra.mxu1 %v9319_v57  ;;  %v9403_v56 = vld [vmem:[%s13609_s1 + $0xa48] ss:$16 sps:$4 sm:$0xff]   ;;  %v9408_v57 = vld [vmem:[%s13609_s1 + $0xa64] ss:$16 sps:$4 sm:$0xff]  }
 0x114   :  { %6186 = vmatprep.subr.bf16.mxu0 %v9324_v58  ;;  %6801 = vmatprep.subr.bf16.mxu1 %v9327_v59  ;;  %v9411_v58 = vld [vmem:[%s13609_s1 + $0xa6c] ss:$16 sps:$4 sm:$0xff]   ;;  %v9406_v59 = vld [vmem:[%s13609_s1 + $0xa60] ss:$16 sps:$4 sm:$0xff]  }
 0x117   :  { %6187 = vmatpush1.bf16.msra.mxu0 %v9322_v60  ;;  %6802 = vmatpush1.bf16.msra.mxu1 %v9325_v61  ;;  %v9409_v60 = vld [vmem:[%s13609_s1 + $0xa68] ss:$16 sps:$4 sm:$0xff]   ;;  %v9414_v61 = vld [vmem:[%s13609_s1 + $0xa84] ss:$16 sps:$4 sm:$0xff]  }
 0x118   :  { %6188 = vmatprep.subr.bf16.mxu0 %v9330_v62  ;;  %6803 = vmatprep.subr.bf16.mxu1 %v9333_v63  ;;  %v9417_v62 = vld [vmem:[%s13609_s1 + $0xa8c] ss:$16 sps:$4 sm:$0xff]   ;;  %v9412_v63 = vld [vmem:[%s13609_s1 + $0xa80] ss:$16 sps:$4 sm:$0xff]  }
 0x11b   :  { %6189 = vmatpush1.bf16.msra.mxu0 %v9328_v0  ;;  %6804 = vmatpush1.bf16.msra.mxu1 %v9331_v1  ;;  %v9415_v0 = vld [vmem:[%s13609_s1 + $0xa88] ss:$16 sps:$4 sm:$0xff]   ;;  %v9420_v1 = vld [vmem:[%s13609_s1 + $0xaa4] ss:$16 sps:$4 sm:$0xff]  }
 0x11c   :  { %6190 = vmatprep.subr.bf16.mxu0 %v9336_v2  ;;  %6805 = vmatprep.subr.bf16.mxu1 %v9339_v3  ;;  %v9423_v2 = vld [vmem:[%s13609_s1 + $0xaac] ss:$16 sps:$4 sm:$0xff]   ;;  %v9418_v3 = vld [vmem:[%s13609_s1 + $0xaa0] ss:$16 sps:$4 sm:$0xff]  }
 0x11f   :  { %6191 = vmatpush1.bf16.msra.mxu0 %v9334_v4  ;;  %6806 = vmatpush1.bf16.msra.mxu1 %v9337_v5  ;;  %v9421_v4 = vld [vmem:[%s13609_s1 + $0xaa8] ss:$16 sps:$4 sm:$0xff]   ;;  %v9426_v5 = vld [vmem:[%s13609_s1 + $0xac4] ss:$16 sps:$4 sm:$0xff]  }
 0x120   :  { %6192 = vmatprep.subr.bf16.mxu0 %v9342_v6  ;;  %6807 = vmatprep.subr.bf16.mxu1 %v9345_v7  ;;  %v9429_v6 = vld [vmem:[%s13609_s1 + $0xacc] ss:$16 sps:$4 sm:$0xff]   ;;  %v9424_v7 = vld [vmem:[%s13609_s1 + $0xac0] ss:$16 sps:$4 sm:$0xff]  }
 0x123   :  { %6193 = vmatpush1.bf16.msra.mxu0 %v9340_v8  ;;  %6808 = vmatpush1.bf16.msra.mxu1 %v9343_v10  ;;  %v9427_v8 = vld [vmem:[%s13609_s1 + $0xac8] ss:$16 sps:$4 sm:$0xff]   ;;  %v9432_v10 = vld [vmem:[%s13609_s1 + $0xae4] ss:$16 sps:$4 sm:$0xff]  }
 0x124   :  { %6194 = vmatprep.subr.bf16.mxu0 %v9348_v11  ;;  %6809 = vmatprep.subr.bf16.mxu1 %v9351_v12  ;;  %v9435_v11 = vld [vmem:[%s13609_s1 + $0xaec] ss:$16 sps:$4 sm:$0xff]   ;;  %v9430_v12 = vld [vmem:[%s13609_s1 + $0xae0] ss:$16 sps:$4 sm:$0xff]  }
 0x127   :  { %6195 = vmatpush1.bf16.msra.mxu0 %v9346_v13  ;;  %6810 = vmatpush1.bf16.msra.mxu1 %v9349_v14  ;;  %v9433_v13 = vld [vmem:[%s13609_s1 + $0xae8] ss:$16 sps:$4 sm:$0xff]   ;;  %v9438_v14 = vld [vmem:[%s13609_s1 + $0xb04] ss:$16 sps:$4 sm:$0xff]  }
 0x128   :  { %6196 = vmatprep.subr.bf16.mxu0 %v9354_v15  ;;  %6811 = vmatprep.subr.bf16.mxu1 %v9357_v16  ;;  %v9441_v15 = vld [vmem:[%s13609_s1 + $0xb0c] ss:$16 sps:$4 sm:$0xff]   ;;  %v9436_v16 = vld [vmem:[%s13609_s1 + $0xb00] ss:$16 sps:$4 sm:$0xff]  }
 0x12b   :  { %6197 = vmatpush1.bf16.msra.mxu0 %v9352_v17  ;;  %6812 = vmatpush1.bf16.msra.mxu1 %v9355_v18  ;;  %v9439_v17 = vld [vmem:[%s13609_s1 + $0xb08] ss:$16 sps:$4 sm:$0xff]   ;;  %v9444_v18 = vld [vmem:[%s13609_s1 + $0xb24] ss:$16 sps:$4 sm:$0xff]  }
 0x12c   :  { %6198 = vmatprep.subr.bf16.mxu0 %v9360_v19  ;;  %6813 = vmatprep.subr.bf16.mxu1 %v9363_v20  ;;  %v9447_v19 = vld [vmem:[%s13609_s1 + $0xb2c] ss:$16 sps:$4 sm:$0xff]   ;;  %v9442_v20 = vld [vmem:[%s13609_s1 + $0xb20] ss:$16 sps:$4 sm:$0xff]  }
 0x12f   :  { %6199 = vmatpush1.bf16.msra.mxu0 %v9358_v21  ;;  %6814 = vmatpush1.bf16.msra.mxu1 %v9361_v22  ;;  %v9445_v21 = vld [vmem:[%s13609_s1 + $0xb28] ss:$16 sps:$4 sm:$0xff]   ;;  %v9450_v22 = vld [vmem:[%s13609_s1 + $0xb44] ss:$16 sps:$4 sm:$0xff]  }
 0x130   :  { %6200 = vmatprep.subr.bf16.mxu0 %v9366_v23  ;;  %6815 = vmatprep.subr.bf16.mxu1 %v9369_v9  ;;  %v9453_v23 = vld [vmem:[%s13609_s1 + $0xb4c] ss:$16 sps:$4 sm:$0xff]   ;;  %v9448_v9 = vld [vmem:[%s13609_s1 + $0xb40] ss:$16 sps:$4 sm:$0xff]  }
 0x133   :  { %6201 = vmatpush1.bf16.msra.mxu0 %v9364_v26  ;;  %6816 = vmatpush1.bf16.msra.mxu1 %v9367_v27  ;;  %v9451_v26 = vld [vmem:[%s13609_s1 + $0xb48] ss:$16 sps:$4 sm:$0xff]   ;;  %v9456_v27 = vld [vmem:[%s13609_s1 + $0xb64] ss:$16 sps:$4 sm:$0xff]  }
 0x134   :  { %6202 = vmatprep.subr.bf16.mxu0 %v9372_v29  ;;  %6817 = vmatprep.subr.bf16.mxu1 %v9375_v30  ;;  %v9459_v29 = vld [vmem:[%s13609_s1 + $0xb6c] ss:$16 sps:$4 sm:$0xff]   ;;  %v9454_v30 = vld [vmem:[%s13609_s1 + $0xb60] ss:$16 sps:$4 sm:$0xff]  }
 0x137   :  { %6203 = vmatpush1.bf16.msra.mxu0 %v9370_v31  ;;  %6818 = vmatpush1.bf16.msra.mxu1 %v9373_v33  ;;  %v9457_v31 = vld [vmem:[%s13609_s1 + $0xb68] ss:$16 sps:$4 sm:$0xff]   ;;  %v9462_v33 = vld [vmem:[%s13609_s1 + $0xb84] ss:$16 sps:$4 sm:$0xff]  }
 0x138   :  { %6204 = vmatprep.subr.bf16.mxu0 %v9378_v25  ;;  %6819 = vmatprep.subr.bf16.mxu1 %v9381_v34  ;;  %v9465_v25 = vld [vmem:[%s13609_s1 + $0xb8c] ss:$16 sps:$4 sm:$0xff]   ;;  %v9460_v34 = vld [vmem:[%s13609_s1 + $0xb80] ss:$16 sps:$4 sm:$0xff]  }
 0x13b   :  { %6205 = vmatpush1.bf16.msra.mxu0 %v9376_v36  ;;  %6820 = vmatpush1.bf16.msra.mxu1 %v9379_v37  ;;  %v9468_v36 = vld [vmem:[%s13609_s1 + $0xba4] ss:$16 sps:$4 sm:$0xff]   ;;  %v9471_v37 = vld [vmem:[%s13609_s1 + $0xbac] ss:$16 sps:$4 sm:$0xff]  }
 0x13c   :  { %6206 = vmatprep.subr.bf16.mxu0 %v9384_v38  ;;  %6821 = vmatprep.subr.bf16.mxu1 %v9387_v28  ;;  %v9466_v38 = vld [vmem:[%s13609_s1 + $0xba0] ss:$16 sps:$4 sm:$0xff]   ;;  %v9469_v28 = vld [vmem:[%s13609_s1 + $0xba8] ss:$16 sps:$4 sm:$0xff]  }
 0x13f   :  { %6207 = vmatpush1.bf16.msra.mxu0 %v9382_v40  ;;  %6822 = vmatpush1.bf16.msra.mxu1 %v9385_v41  ;;  %v9474_v40 = vld [vmem:[%s13609_s1 + $0xbc4] ss:$16 sps:$4 sm:$0xff]   ;;  %v9477_v41 = vld [vmem:[%s13609_s1 + $0xbcc] ss:$16 sps:$4 sm:$0xff]  }
 0x140   :  { %6217 = vmatprep.subr.bf16.mxu0 %v9390_v42  ;;  %6832 = vmatprep.subr.bf16.mxu1 %v9393_v24  ;;  %v11631_v42 = vld [vmem:[%s13610_s0 + $0x18] sm:$0xff]  ;;  %v9472_v24 = vld [vmem:[%s13609_s1 + $0xbc0] ss:$16 sps:$4 sm:$0xff]  }
 0x142   :  { %6209 = vmatmul.mubr.bf16.vlgmr.msra.gmra.mrb[0].mxu0 %v208_v45  ;;  %6824 = vmatmul.mubr.bf16.vlgmr.msra.gmra.mrb[0].mxu1 %v208_v45  ;;  %v9480_v45 = vld [vmem:[%s13609_s1 + $0xbe4] ss:$16 sps:$4 sm:$0xff]  }
 0x143   :  { %6218 = vmatpush1.bf16.msra.mxu0 %v9388_v46  ;;  %6833 = vmatpush1.bf16.msra.mxu1 %v9391_v47  ;;  %v9483_v46 = vld [vmem:[%s13609_s1 + $0xbec] ss:$16 sps:$4 sm:$0xff]   ;;  %v11647_v47 = vrot.slane %v11631_v42, %v10571_v49 }
 0x144   :  { %6219 = vmatprep.subr.bf16.mxu0 %v9396_v48  ;;  %6834 = vmatprep.subr.bf16.mxu1 %v9399_v32  ;;  %v9478_v48 = vld [vmem:[%s13609_s1 + $0xbe0] ss:$16 sps:$4 sm:$0xff]   ;;  %v9481_v32 = vld [vmem:[%s13609_s1 + $0xbe8] ss:$16 sps:$4 sm:$0xff]  }
 0x145   :  { %6249 = vmatprep.mubr.bf16.mxu0 %v211_v50  ;;  %6864 = vmatprep.mubr.bf16.mxu1 %v211_v50  ;;  %v9487_v50 = vld [vmem:[%s13609_s1 + $0xc04] ss:$16 sps:$4 sm:$0xff]  }
 0x147   :  { %6220 = vmatpush1.bf16.msra.mxu0 %v9394_v51  ;;  %6835 = vmatpush1.bf16.msra.mxu1 %v9397_v52  ;;  %v9490_v51 = vld [vmem:[%s13609_s1 + $0xc0c] ss:$16 sps:$4 sm:$0xff]   ;;  %v109_v52 = vcombine.high %v11647_v47, %v11647_v47 }
 0x148   :  { %6221 = vmatprep.subr.bf16.mxu0 %v9402_v53  ;;  %6836 = vmatprep.subr.bf16.mxu1 %v9405_v54  ;;  %v210_v53 = vpack.c.bf16 %v11442_v39, %v11442_v39  ;;  %v9485_v54 = vld [vmem:[%s13609_s1 + $0xc00] ss:$16 sps:$4 sm:$0xff]   ;;  %v9496_v39 = vld [vmem:[%s13609_s1 + $0xc2c] ss:$16 sps:$4 sm:$0xff]  }
 0x14b   :  { %6222 = vmatpush1.bf16.msra.mxu0 %v9400_v55  ;;  %6837 = vmatpush1.bf16.msra.mxu1 %v9403_v56  ;;  %v9488_v55 = vld [vmem:[%s13609_s1 + $0xc08] ss:$16 sps:$4 sm:$0xff]   ;;  %v9493_v56 = vld [vmem:[%s13609_s1 + $0xc24] ss:$16 sps:$4 sm:$0xff]  }
 0x14c   :  { %6223 = vmatprep.subr.bf16.mxu0 %v9408_v57  ;;  %6838 = vmatprep.subr.bf16.mxu1 %v9411_v58  ;;  %v213_v57 = vpack.c.bf16 %v109_v52, %v109_v52  ;;  %v9491_v58 = vld [vmem:[%s13609_s1 + $0xc20] ss:$16 sps:$4 sm:$0xff]  }
 0x14d   :  { %v9569_v52 = vld [vmem:[%s13609_s1 + $0xdc0] ss:$16 sps:$4 sm:$0xff]  }
 0x14f   :  { %6224 = vmatpush1.bf16.msra.mxu0 %v9406_v59  ;;  %6839 = vmatpush1.bf16.msra.mxu1 %v9409_v60  ;;  %v9494_v59 = vld [vmem:[%s13609_s1 + $0xc28] ss:$16 sps:$4 sm:$0xff]   ;;  %v9499_v60 = vld [vmem:[%s13609_s1 + $0xc44] ss:$16 sps:$4 sm:$0xff]  }
 0x150   :  { %6225 = vmatprep.subr.bf16.mxu0 %v9414_v61  ;;  %6840 = vmatprep.subr.bf16.mxu1 %v9417_v62  ;;  %v9502_v61 = vld [vmem:[%s13609_s1 + $0xc4c] ss:$16 sps:$4 sm:$0xff]   ;;  %v9497_v62 = vld [vmem:[%s13609_s1 + $0xc40] ss:$16 sps:$4 sm:$0xff]  }
 0x153   :  { %6226 = vmatpush1.bf16.msra.mxu0 %v9412_v63  ;;  %6841 = vmatpush1.bf16.msra.mxu1 %v9415_v0  ;;  %v9500_v63 = vld [vmem:[%s13609_s1 + $0xc48] ss:$16 sps:$4 sm:$0xff]   ;;  %v9505_v0 = vld [vmem:[%s13609_s1 + $0xc64] ss:$16 sps:$4 sm:$0xff]  }
 0x154   :  { %6227 = vmatprep.subr.bf16.mxu0 %v9420_v1  ;;  %6842 = vmatprep.subr.bf16.mxu1 %v9423_v2  ;;  %v9508_v1 = vld [vmem:[%s13609_s1 + $0xc6c] ss:$16 sps:$4 sm:$0xff]   ;;  %v9503_v2 = vld [vmem:[%s13609_s1 + $0xc60] ss:$16 sps:$4 sm:$0xff]  }
 0x157   :  { %6228 = vmatpush1.bf16.msra.mxu0 %v9418_v3  ;;  %6843 = vmatpush1.bf16.msra.mxu1 %v9421_v4  ;;  %v9506_v3 = vld [vmem:[%s13609_s1 + $0xc68] ss:$16 sps:$4 sm:$0xff]   ;;  %v9511_v4 = vld [vmem:[%s13609_s1 + $0xc84] ss:$16 sps:$4 sm:$0xff]  }
 0x158   :  { %6229 = vmatprep.subr.bf16.mxu0 %v9426_v5  ;;  %6844 = vmatprep.subr.bf16.mxu1 %v9429_v6  ;;  %v9514_v5 = vld [vmem:[%s13609_s1 + $0xc8c] ss:$16 sps:$4 sm:$0xff]   ;;  %v9509_v6 = vld [vmem:[%s13609_s1 + $0xc80] ss:$16 sps:$4 sm:$0xff]  }
 0x15b   :  { %6230 = vmatpush1.bf16.msra.mxu0 %v9424_v7  ;;  %6845 = vmatpush1.bf16.msra.mxu1 %v9427_v8  ;;  %v9512_v7 = vld [vmem:[%s13609_s1 + $0xc88] ss:$16 sps:$4 sm:$0xff]   ;;  %v9517_v8 = vld [vmem:[%s13609_s1 + $0xca4] ss:$16 sps:$4 sm:$0xff]  }
 0x15c   :  { %6231 = vmatprep.subr.bf16.mxu0 %v9432_v10  ;;  %6846 = vmatprep.subr.bf16.mxu1 %v9435_v11  ;;  %v9520_v10 = vld [vmem:[%s13609_s1 + $0xcac] ss:$16 sps:$4 sm:$0xff]   ;;  %v9515_v11 = vld [vmem:[%s13609_s1 + $0xca0] ss:$16 sps:$4 sm:$0xff]  }
 0x15f   :  { %6232 = vmatpush1.bf16.msra.mxu0 %v9430_v12  ;;  %6847 = vmatpush1.bf16.msra.mxu1 %v9433_v13  ;;  %v9518_v12 = vld [vmem:[%s13609_s1 + $0xca8] ss:$16 sps:$4 sm:$0xff]   ;;  %v9523_v13 = vld [vmem:[%s13609_s1 + $0xcc4] ss:$16 sps:$4 sm:$0xff]  }
 0x160   :  { %6233 = vmatprep.subr.bf16.mxu0 %v9438_v14  ;;  %6848 = vmatprep.subr.bf16.mxu1 %v9441_v15  ;;  %v9526_v14 = vld [vmem:[%s13609_s1 + $0xccc] ss:$16 sps:$4 sm:$0xff]   ;;  %v9521_v15 = vld [vmem:[%s13609_s1 + $0xcc0] ss:$16 sps:$4 sm:$0xff]  }
 0x163   :  { %6234 = vmatpush1.bf16.msra.mxu0 %v9436_v16  ;;  %6849 = vmatpush1.bf16.msra.mxu1 %v9439_v17  ;;  %v9524_v16 = vld [vmem:[%s13609_s1 + $0xcc8] ss:$16 sps:$4 sm:$0xff]   ;;  %v9529_v17 = vld [vmem:[%s13609_s1 + $0xce4] ss:$16 sps:$4 sm:$0xff]  }
 0x164   :  { %6235 = vmatprep.subr.bf16.mxu0 %v9444_v18  ;;  %6850 = vmatprep.subr.bf16.mxu1 %v9447_v19  ;;  %v9532_v18 = vld [vmem:[%s13609_s1 + $0xcec] ss:$16 sps:$4 sm:$0xff]   ;;  %v9527_v19 = vld [vmem:[%s13609_s1 + $0xce0] ss:$16 sps:$4 sm:$0xff]  }
 0x167   :  { %6236 = vmatpush1.bf16.msra.mxu0 %v9442_v20  ;;  %6851 = vmatpush1.bf16.msra.mxu1 %v9445_v21  ;;  %v9530_v20 = vld [vmem:[%s13609_s1 + $0xce8] ss:$16 sps:$4 sm:$0xff]   ;;  %v9535_v21 = vld [vmem:[%s13609_s1 + $0xd04] ss:$16 sps:$4 sm:$0xff]  }
 0x168   :  { %6237 = vmatprep.subr.bf16.mxu0 %v9450_v22  ;;  %6852 = vmatprep.subr.bf16.mxu1 %v9453_v23  ;;  %v9538_v22 = vld [vmem:[%s13609_s1 + $0xd0c] ss:$16 sps:$4 sm:$0xff]   ;;  %v9533_v23 = vld [vmem:[%s13609_s1 + $0xd00] ss:$16 sps:$4 sm:$0xff]  }
 0x16b   :  { %6238 = vmatpush1.bf16.msra.mxu0 %v9448_v9  ;;  %6853 = vmatpush1.bf16.msra.mxu1 %v9451_v26  ;;  %v9536_v9 = vld [vmem:[%s13609_s1 + $0xd08] ss:$16 sps:$4 sm:$0xff]   ;;  %v9541_v26 = vld [vmem:[%s13609_s1 + $0xd24] ss:$16 sps:$4 sm:$0xff]  }
 0x16c   :  { %6239 = vmatprep.subr.bf16.mxu0 %v9456_v27  ;;  %6854 = vmatprep.subr.bf16.mxu1 %v9459_v29  ;;  %v9544_v27 = vld [vmem:[%s13609_s1 + $0xd2c] ss:$16 sps:$4 sm:$0xff]   ;;  %v9539_v29 = vld [vmem:[%s13609_s1 + $0xd20] ss:$16 sps:$4 sm:$0xff]  }
 0x16f   :  { %6240 = vmatpush1.bf16.msra.mxu0 %v9454_v30  ;;  %6855 = vmatpush1.bf16.msra.mxu1 %v9457_v31  ;;  %v9542_v30 = vld [vmem:[%s13609_s1 + $0xd28] ss:$16 sps:$4 sm:$0xff]   ;;  %v9547_v31 = vld [vmem:[%s13609_s1 + $0xd44] ss:$16 sps:$4 sm:$0xff]  }
 0x170   :  { %6241 = vmatprep.subr.bf16.mxu0 %v9462_v33  ;;  %6856 = vmatprep.subr.bf16.mxu1 %v9465_v25  ;;  %v9550_v33 = vld [vmem:[%s13609_s1 + $0xd4c] ss:$16 sps:$4 sm:$0xff]   ;;  %v9545_v25 = vld [vmem:[%s13609_s1 + $0xd40] ss:$16 sps:$4 sm:$0xff]  }
 0x173   :  { %6242 = vmatpush1.bf16.msra.mxu0 %v9460_v34  ;;  %6857 = vmatpush1.bf16.msra.mxu1 %v9463_v35  ;;  %v9548_v34 = vld [vmem:[%s13609_s1 + $0xd48] ss:$16 sps:$4 sm:$0xff]   ;;  %v9553_v35 = vld [vmem:[%s13609_s1 + $0xd64] ss:$16 sps:$4 sm:$0xff]  }
 0x174   :  { %6243 = vmatprep.subr.bf16.mxu0 %v9468_v36  ;;  %6858 = vmatprep.subr.bf16.mxu1 %v9471_v37  ;;  %v9556_v36 = vld [vmem:[%s13609_s1 + $0xd6c] ss:$16 sps:$4 sm:$0xff]   ;;  %v9551_v37 = vld [vmem:[%s13609_s1 + $0xd60] ss:$16 sps:$4 sm:$0xff]  }
 0x177   :  { %6244 = vmatpush1.bf16.msra.mxu0 %v9466_v38  ;;  %6859 = vmatpush1.bf16.msra.mxu1 %v9469_v28  ;;  %v9554_v38 = vld [vmem:[%s13609_s1 + $0xd68] ss:$16 sps:$4 sm:$0xff]   ;;  %v9559_v28 = vld [vmem:[%s13609_s1 + $0xd84] ss:$16 sps:$4 sm:$0xff]  }
 0x178   :  { %6245 = vmatprep.subr.bf16.mxu0 %v9474_v40  ;;  %6860 = vmatprep.subr.bf16.mxu1 %v9477_v41  ;;  %v9562_v40 = vld [vmem:[%s13609_s1 + $0xd8c] ss:$16 sps:$4 sm:$0xff]   ;;  %v9557_v41 = vld [vmem:[%s13609_s1 + $0xd80] ss:$16 sps:$4 sm:$0xff]  }
 0x17b   :  { %6246 = vmatpush1.bf16.msra.mxu0 %v9472_v24  ;;  %6861 = vmatpush1.bf16.msra.mxu1 %v9475_v44  ;;  %v9560_v24 = vld [vmem:[%s13609_s1 + $0xd88] ss:$16 sps:$4 sm:$0xff]   ;;  %v9565_v44 = vld [vmem:[%s13609_s1 + $0xda4] ss:$16 sps:$4 sm:$0xff]  }
 0x17c   :  { %6247 = vmatprep.subr.bf16.mxu0 %v9480_v45  ;;  %6862 = vmatprep.subr.bf16.mxu1 %v9483_v46  ;;  %v9568_v45 = vld [vmem:[%s13609_s1 + $0xdac] ss:$16 sps:$4 sm:$0xff]   ;;  %v9563_v46 = vld [vmem:[%s13609_s1 + $0xda0] ss:$16 sps:$4 sm:$0xff]  }
 0x17f   :  { %6248 = vmatpush1.bf16.msra.mxu0 %v9478_v48  ;;  %6863 = vmatpush1.bf16.msra.mxu1 %v9481_v32  ;;  %v9566_v48 = vld [vmem:[%s13609_s1 + $0xda8] ss:$16 sps:$4 sm:$0xff]   ;;  %v9571_v32 = vld [vmem:[%s13609_s1 + $0xdc4] ss:$16 sps:$4 sm:$0xff]  }
 0x180   :  { %6258 = vmatprep.subr.bf16.mxu0 %v9487_v50  ;;  %6873 = vmatprep.subr.bf16.mxu1 %v9490_v51  ;;  %v9574_v50 = vld [vmem:[%s13609_s1 + $0xdcc] ss:$16 sps:$4 sm:$0xff]   ;;  %v94_v51 = vcombine.high %v11631_v42, %v11631_v42 }
 0x181   :  { %v9580_v42 = vld [vmem:[%s13609_s1 + $0xdec] ss:$16 sps:$4 sm:$0xff]  }
 0x182   :  { %6250 = vmatmul.mubr.bf16.vlgmr.msra.gmra.mrb[0].mxu0 %v210_v53  ;;  %6865 = vmatmul.mubr.bf16.vlgmr.msra.gmra.mrb[0].mxu1 %v210_v53  ;;  %v9572_v53 = vld [vmem:[%s13609_s1 + $0xdc8] ss:$16 sps:$4 sm:$0xff]  }
 0x183   :  { %6259 = vmatpush1.bf16.msra.mxu0 %v9485_v54  ;;  %6874 = vmatpush1.bf16.msra.mxu1 %v9488_v55  ;;  %v9577_v54 = vld [vmem:[%s13609_s1 + $0xde4] ss:$16 sps:$4 sm:$0xff]   ;;  %v11848_v55 = vrot.slane %v94_v51, %v10571_v49  ;;  %v9656_v51 = vld [vmem:[%s13609_s1 + $0xf88] ss:$16 sps:$4 sm:$0xff]  }
 0x184   :  { %6260 = vmatprep.subr.bf16.mxu0 %v9493_v56  ;;  %6875 = vmatprep.subr.bf16.mxu1 %v9496_v39  ;;  %v9575_v56 = vld [vmem:[%s13609_s1 + $0xde0] ss:$16 sps:$4 sm:$0xff]   ;;  %v9578_v39 = vld [vmem:[%s13609_s1 + $0xde8] ss:$16 sps:$4 sm:$0xff]  }
 0x185   :  { %6290 = vmatprep.mubr.bf16.mxu0 %v213_v57  ;;  %6905 = vmatprep.mubr.bf16.mxu1 %v213_v57  ;;  %v9583_v57 = vld [vmem:[%s13609_s1 + $0xe04] ss:$16 sps:$4 sm:$0xff]  }
 0x187   :  { %6261 = vmatpush1.bf16.msra.mxu0 %v9491_v58  ;;  %6876 = vmatpush1.bf16.msra.mxu1 %v9494_v59  ;;  %v9586_v58 = vld [vmem:[%s13609_s1 + $0xe0c] ss:$16 sps:$4 sm:$0xff]   ;;  %v110_v59 = vcombine.high %v11848_v55, %v11848_v55 }
 0x188   :  { %6262 = vmatprep.subr.bf16.mxu0 %v9499_v60  ;;  %6877 = vmatprep.subr.bf16.mxu1 %v9502_v61  ;;  %v212_v60 = vpack.c.bf16 %v11647_v47, %v11647_v47  ;;  %v9581_v61 = vld [vmem:[%s13609_s1 + $0xe00] ss:$16 sps:$4 sm:$0xff]   ;;  %v9592_v47 = vld [vmem:[%s13609_s1 + $0xe2c] ss:$16 sps:$4 sm:$0xff]  }
 0x18b   :  { %6263 = vmatpush1.bf16.msra.mxu0 %v9497_v62  ;;  %6878 = vmatpush1.bf16.msra.mxu1 %v9500_v63  ;;  %v9584_v62 = vld [vmem:[%s13609_s1 + $0xe08] ss:$16 sps:$4 sm:$0xff]   ;;  %v9589_v63 = vld [vmem:[%s13609_s1 + $0xe24] ss:$16 sps:$4 sm:$0xff]  }
 0x18c   :  { %6264 = vmatprep.subr.bf16.mxu0 %v9505_v0  ;;  %6879 = vmatprep.subr.bf16.mxu1 %v9508_v1  ;;  %v215_v0 = vpack.c.bf16 %v110_v59, %v110_v59  ;;  %v9587_v1 = vld [vmem:[%s13609_s1 + $0xe20] ss:$16 sps:$4 sm:$0xff]   ;;  %v9668_v59 = vld [vmem:[%s13609_s1 + $0xfc8] ss:$16 sps:$4 sm:$0xff]  }
 0x18f   :  { %6265 = vmatpush1.bf16.msra.mxu0 %v9503_v2  ;;  %6880 = vmatpush1.bf16.msra.mxu1 %v9506_v3  ;;  %v9590_v2 = vld [vmem:[%s13609_s1 + $0xe28] ss:$16 sps:$4 sm:$0xff]   ;;  %v9595_v3 = vld [vmem:[%s13609_s1 + $0xe44] ss:$16 sps:$4 sm:$0xff]  }
 0x190   :  { %6266 = vmatprep.subr.bf16.mxu0 %v9511_v4  ;;  %6881 = vmatprep.subr.bf16.mxu1 %v9514_v5  ;;  %v9598_v4 = vld [vmem:[%s13609_s1 + $0xe4c] ss:$16 sps:$4 sm:$0xff]   ;;  %v9593_v5 = vld [vmem:[%s13609_s1 + $0xe40] ss:$16 sps:$4 sm:$0xff]  }
 0x193   :  { %6267 = vmatpush1.bf16.msra.mxu0 %v9509_v6  ;;  %6882 = vmatpush1.bf16.msra.mxu1 %v9512_v7  ;;  %v9596_v6 = vld [vmem:[%s13609_s1 + $0xe48] ss:$16 sps:$4 sm:$0xff]   ;;  %v9601_v7 = vld [vmem:[%s13609_s1 + $0xe64] ss:$16 sps:$4 sm:$0xff]  }
 0x194   :  { %6268 = vmatprep.subr.bf16.mxu0 %v9517_v8  ;;  %6883 = vmatprep.subr.bf16.mxu1 %v9520_v10  ;;  %v9604_v8 = vld [vmem:[%s13609_s1 + $0xe6c] ss:$16 sps:$4 sm:$0xff]   ;;  %v9599_v10 = vld [vmem:[%s13609_s1 + $0xe60] ss:$16 sps:$4 sm:$0xff]  }
 0x197   :  { %6269 = vmatpush1.bf16.msra.mxu0 %v9515_v11  ;;  %6884 = vmatpush1.bf16.msra.mxu1 %v9518_v12  ;;  %v9602_v11 = vld [vmem:[%s13609_s1 + $0xe68] ss:$16 sps:$4 sm:$0xff]   ;;  %v9607_v12 = vld [vmem:[%s13609_s1 + $0xe84] ss:$16 sps:$4 sm:$0xff]  }
 0x198   :  { %6270 = vmatprep.subr.bf16.mxu0 %v9523_v13  ;;  %6885 = vmatprep.subr.bf16.mxu1 %v9526_v14  ;;  %v9610_v13 = vld [vmem:[%s13609_s1 + $0xe8c] ss:$16 sps:$4 sm:$0xff]   ;;  %v9605_v14 = vld [vmem:[%s13609_s1 + $0xe80] ss:$16 sps:$4 sm:$0xff]  }
 0x19b   :  { %6271 = vmatpush1.bf16.msra.mxu0 %v9521_v15  ;;  %6886 = vmatpush1.bf16.msra.mxu1 %v9524_v16  ;;  %v9608_v15 = vld [vmem:[%s13609_s1 + $0xe88] ss:$16 sps:$4 sm:$0xff]   ;;  %v9613_v16 = vld [vmem:[%s13609_s1 + $0xea4] ss:$16 sps:$4 sm:$0xff]  }
 0x19c   :  { %6272 = vmatprep.subr.bf16.mxu0 %v9529_v17  ;;  %6887 = vmatprep.subr.bf16.mxu1 %v9532_v18  ;;  %v9616_v17 = vld [vmem:[%s13609_s1 + $0xeac] ss:$16 sps:$4 sm:$0xff]   ;;  %v9611_v18 = vld [vmem:[%s13609_s1 + $0xea0] ss:$16 sps:$4 sm:$0xff]  }
 0x19f   :  { %6273 = vmatpush1.bf16.msra.mxu0 %v9527_v19  ;;  %6888 = vmatpush1.bf16.msra.mxu1 %v9530_v20  ;;  %v9614_v19 = vld [vmem:[%s13609_s1 + $0xea8] ss:$16 sps:$4 sm:$0xff]   ;;  %v9619_v20 = vld [vmem:[%s13609_s1 + $0xec4] ss:$16 sps:$4 sm:$0xff]  }
 0x1a0   :  { %6274 = vmatprep.subr.bf16.mxu0 %v9535_v21  ;;  %6889 = vmatprep.subr.bf16.mxu1 %v9538_v22  ;;  %v9622_v21 = vld [vmem:[%s13609_s1 + $0xecc] ss:$16 sps:$4 sm:$0xff]   ;;  %v9617_v22 = vld [vmem:[%s13609_s1 + $0xec0] ss:$16 sps:$4 sm:$0xff]  }
 0x1a3   :  { %6275 = vmatpush1.bf16.msra.mxu0 %v9533_v23  ;;  %6890 = vmatpush1.bf16.msra.mxu1 %v9536_v9  ;;  %v9620_v23 = vld [vmem:[%s13609_s1 + $0xec8] ss:$16 sps:$4 sm:$0xff]   ;;  %v9625_v9 = vld [vmem:[%s13609_s1 + $0xee4] ss:$16 sps:$4 sm:$0xff]  }
 0x1a4   :  { %6276 = vmatprep.subr.bf16.mxu0 %v9541_v26  ;;  %6891 = vmatprep.subr.bf16.mxu1 %v9544_v27  ;;  %v9628_v26 = vld [vmem:[%s13609_s1 + $0xeec] ss:$16 sps:$4 sm:$0xff]   ;;  %v9623_v27 = vld [vmem:[%s13609_s1 + $0xee0] ss:$16 sps:$4 sm:$0xff]  }
 0x1a7   :  { %6277 = vmatpush1.bf16.msra.mxu0 %v9539_v29  ;;  %6892 = vmatpush1.bf16.msra.mxu1 %v9542_v30  ;;  %v9626_v29 = vld [vmem:[%s13609_s1 + $0xee8] ss:$16 sps:$4 sm:$0xff]   ;;  %v9631_v30 = vld [vmem:[%s13609_s1 + $0xf04] ss:$16 sps:$4 sm:$0xff]  }
 0x1a8   :  { %6278 = vmatprep.subr.bf16.mxu0 %v9547_v31  ;;  %6893 = vmatprep.subr.bf16.mxu1 %v9550_v33  ;;  %v9634_v31 = vld [vmem:[%s13609_s1 + $0xf0c] ss:$16 sps:$4 sm:$0xff]   ;;  %v9629_v33 = vld [vmem:[%s13609_s1 + $0xf00] ss:$16 sps:$4 sm:$0xff]  }
 0x1ab   :  { %6279 = vmatpush1.bf16.msra.mxu0 %v9545_v25  ;;  %6894 = vmatpush1.bf16.msra.mxu1 %v9548_v34  ;;  %v9632_v25 = vld [vmem:[%s13609_s1 + $0xf08] ss:$16 sps:$4 sm:$0xff]   ;;  %v9637_v34 = vld [vmem:[%s13609_s1 + $0xf24] ss:$16 sps:$4 sm:$0xff]  }
 0x1ac   :  { %6280 = vmatprep.subr.bf16.mxu0 %v9553_v35  ;;  %6895 = vmatprep.subr.bf16.mxu1 %v9556_v36  ;;  %v9640_v35 = vld [vmem:[%s13609_s1 + $0xf2c] ss:$16 sps:$4 sm:$0xff]   ;;  %v9635_v36 = vld [vmem:[%s13609_s1 + $0xf20] ss:$16 sps:$4 sm:$0xff]  }
 0x1af   :  { %6281 = vmatpush1.bf16.msra.mxu0 %v9551_v37  ;;  %6896 = vmatpush1.bf16.msra.mxu1 %v9554_v38  ;;  %v9638_v37 = vld [vmem:[%s13609_s1 + $0xf28] ss:$16 sps:$4 sm:$0xff]   ;;  %v9643_v38 = vld [vmem:[%s13609_s1 + $0xf44] ss:$16 sps:$4 sm:$0xff]  }
 0x1b0   :  { %6282 = vmatprep.subr.bf16.mxu0 %v9559_v28  ;;  %6897 = vmatprep.subr.bf16.mxu1 %v9562_v40  ;;  %v9646_v28 = vld [vmem:[%s13609_s1 + $0xf4c] ss:$16 sps:$4 sm:$0xff]   ;;  %v9641_v40 = vld [vmem:[%s13609_s1 + $0xf40] ss:$16 sps:$4 sm:$0xff]  }
 0x1b3   :  { %6283 = vmatpush1.bf16.msra.mxu0 %v9557_v41  ;;  %6898 = vmatpush1.bf16.msra.mxu1 %v9560_v24  ;;  %v9644_v41 = vld [vmem:[%s13609_s1 + $0xf48] ss:$16 sps:$4 sm:$0xff]   ;;  %v9649_v24 = vld [vmem:[%s13609_s1 + $0xf64] ss:$16 sps:$4 sm:$0xff]  }
 0x1b4   :  { %6284 = vmatprep.subr.bf16.mxu0 %v9565_v44  ;;  %6899 = vmatprep.subr.bf16.mxu1 %v9568_v45  ;;  %v9652_v44 = vld [vmem:[%s13609_s1 + $0xf6c] ss:$16 sps:$4 sm:$0xff]   ;;  %v9647_v45 = vld [vmem:[%s13609_s1 + $0xf60] ss:$16 sps:$4 sm:$0xff]  }
 0x1b7   :  { %6285 = vmatpush1.bf16.msra.mxu0 %v9563_v46  ;;  %6900 = vmatpush1.bf16.msra.mxu1 %v9566_v48  ;;  %v9650_v46 = vld [vmem:[%s13609_s1 + $0xf68] ss:$16 sps:$4 sm:$0xff]   ;;  %v9655_v48 = vld [vmem:[%s13609_s1 + $0xf84] ss:$16 sps:$4 sm:$0xff]  }
 0x1b8   :  { %6286 = vmatprep.subr.bf16.mxu0 %v9571_v32  ;;  %6901 = vmatprep.subr.bf16.mxu1 %v9574_v50  ;;  %v9658_v32 = vld [vmem:[%s13609_s1 + $0xf8c] ss:$16 sps:$4 sm:$0xff]   ;;  %v9653_v50 = vld [vmem:[%s13609_s1 + $0xf80] ss:$16 sps:$4 sm:$0xff]  }
 0x1bb   :  { %6287 = vmatpush1.bf16.msra.mxu0 %v9569_v52  ;;  %6902 = vmatpush1.bf16.msra.mxu1 %v9572_v53  ;;  %v9661_v52 = vld [vmem:[%s13609_s1 + $0xfa4] ss:$16 sps:$4 sm:$0xff]   ;;  %v9664_v53 = vld [vmem:[%s13609_s1 + $0xfac] ss:$16 sps:$4 sm:$0xff]  }
 0x1bc   :  { %6288 = vmatprep.subr.bf16.mxu0 %v9577_v54  ;;  %6903 = vmatprep.subr.bf16.mxu1 %v9580_v42  ;;  %v9659_v54 = vld [vmem:[%s13609_s1 + $0xfa0] ss:$16 sps:$4 sm:$0xff]   ;;  %v9662_v42 = vld [vmem:[%s13609_s1 + $0xfa8] ss:$16 sps:$4 sm:$0xff]  }
 0x1bf   :  { %6289 = vmatpush1.bf16.msra.mxu0 %v9575_v56  ;;  %6904 = vmatpush1.bf16.msra.mxu1 %v9578_v39  ;;  %v9667_v56 = vld [vmem:[%s13609_s1 + $0xfc4] ss:$16 sps:$4 sm:$0xff]   ;;  %v9670_v39 = vld [vmem:[%s13609_s1 + $0xfcc] ss:$16 sps:$4 sm:$0xff]  }
 0x1c0   :  { %6299 = vmatprep.subr.bf16.mxu0 %v9583_v57  ;;  %6914 = vmatprep.subr.bf16.mxu1 %v9586_v58  ;;  %v12037_v57 = vld [vmem:[%s13610_s0 + $0x20] sm:$0xff] }
 0x1c1   :  { %v9665_v58 = vld [vmem:[%s13609_s1 + $0xfc0] ss:$16 sps:$4 sm:$0xff]  }
 0x1c2   :  { %6291 = vmatmul.mubr.bf16.vlgmr.msra.gmra.mrb[0].mxu0 %v212_v60  ;;  %6906 = vmatmul.mubr.bf16.vlgmr.msra.gmra.mrb[0].mxu1 %v212_v60  ;;  %v9673_v60 = vld [vmem:[%s13609_s1 + $0xfe4] ss:$16 sps:$4 sm:$0xff]  }
 0x1c3   :  { %6300 = vmatpush1.bf16.msra.mxu0 %v9581_v61  ;;  %6915 = vmatpush1.bf16.msra.mxu1 %v9584_v62  ;;  %v9676_v61 = vld [vmem:[%s13609_s1 + $0xfec] ss:$16 sps:$4 sm:$0xff]   ;;  %v12053_v62 = vrot.slane %v12037_v57, %v10571_v49 }
 0x1c4   :  { %6301 = vmatprep.subr.bf16.mxu0 %v9589_v63  ;;  %6916 = vmatprep.subr.bf16.mxu1 %v9592_v47  ;;  %v9671_v63 = vld [vmem:[%s13609_s1 + $0xfe0] ss:$16 sps:$4 sm:$0xff]   ;;  %v9674_v47 = vld [vmem:[%s13609_s1 + $0xfe8] ss:$16 sps:$4 sm:$0xff]  }
 0x1c5   :  { %6331 = vmatprep.mubr.bf16.mxu0 %v215_v0  ;;  %6946 = vmatprep.mubr.bf16.mxu1 %v215_v0  ;;  %v9680_v0 = vld [vmem:[%s13609_s1 + $0x1004] ss:$16 sps:$4 sm:$0xff]  }
 0x1c7   :  { %6302 = vmatpush1.bf16.msra.mxu0 %v9587_v1  ;;  %6917 = vmatpush1.bf16.msra.mxu1 %v9590_v2  ;;  %v9683_v1 = vld [vmem:[%s13609_s1 + $0x100c] ss:$16 sps:$4 sm:$0xff]   ;;  %v126_v2 = vcombine.high %v12053_v62, %v12053_v62 }
 0x1c8   :  { %6303 = vmatprep.subr.bf16.mxu0 %v9595_v3  ;;  %6918 = vmatprep.subr.bf16.mxu1 %v9598_v4  ;;  %v214_v3 = vpack.c.bf16 %v11848_v55, %v11848_v55  ;;  %v9678_v4 = vld [vmem:[%s13609_s1 + $0x1000] ss:$16 sps:$4 sm:$0xff]   ;;  %v9689_v55 = vld [vmem:[%s13609_s1 + $0x102c] ss:$16 sps:$4 sm:$0xff]  }
 0x1cb   :  { %6304 = vmatpush1.bf16.msra.mxu0 %v9593_v5  ;;  %6919 = vmatpush1.bf16.msra.mxu1 %v9596_v6  ;;  %v9681_v5 = vld [vmem:[%s13609_s1 + $0x1008] ss:$16 sps:$4 sm:$0xff]   ;;  %v9686_v6 = vld [vmem:[%s13609_s1 + $0x1024] ss:$16 sps:$4 sm:$0xff]  }
 0x1cc   :  { %6305 = vmatprep.subr.bf16.mxu0 %v9601_v7  ;;  %6920 = vmatprep.subr.bf16.mxu1 %v9604_v8  ;;  %v217_v7 = vpack.c.bf16 %v126_v2, %v126_v2  ;;  %v9684_v8 = vld [vmem:[%s13609_s1 + $0x1020] ss:$16 sps:$4 sm:$0xff]  }
 0x1cd   :  { %v9762_v2 = vld [vmem:[%s13609_s1 + $0x11c0] ss:$16 sps:$4 sm:$0xff]  }
 0x1cf   :  { %6306 = vmatpush1.bf16.msra.mxu0 %v9599_v10  ;;  %6921 = vmatpush1.bf16.msra.mxu1 %v9602_v11  ;;  %v9687_v10 = vld [vmem:[%s13609_s1 + $0x1028] ss:$16 sps:$4 sm:$0xff]   ;;  %v9692_v11 = vld [vmem:[%s13609_s1 + $0x1044] ss:$16 sps:$4 sm:$0xff]  }
 0x1d0   :  { %6307 = vmatprep.subr.bf16.mxu0 %v9607_v12  ;;  %6922 = vmatprep.subr.bf16.mxu1 %v9610_v13  ;;  %v9695_v12 = vld [vmem:[%s13609_s1 + $0x104c] ss:$16 sps:$4 sm:$0xff]   ;;  %v9690_v13 = vld [vmem:[%s13609_s1 + $0x1040] ss:$16 sps:$4 sm:$0xff]  }
 0x1d3   :  { %6308 = vmatpush1.bf16.msra.mxu0 %v9605_v14  ;;  %6923 = vmatpush1.bf16.msra.mxu1 %v9608_v15  ;;  %v9693_v14 = vld [vmem:[%s13609_s1 + $0x1048] ss:$16 sps:$4 sm:$0xff]   ;;  %v9698_v15 = vld [vmem:[%s13609_s1 + $0x1064] ss:$16 sps:$4 sm:$0xff]  }
 0x1d4   :  { %6309 = vmatprep.subr.bf16.mxu0 %v9613_v16  ;;  %6924 = vmatprep.subr.bf16.mxu1 %v9616_v17  ;;  %v9701_v16 = vld [vmem:[%s13609_s1 + $0x106c] ss:$16 sps:$4 sm:$0xff]   ;;  %v9696_v17 = vld [vmem:[%s13609_s1 + $0x1060] ss:$16 sps:$4 sm:$0xff]  }
 0x1d7   :  { %6310 = vmatpush1.bf16.msra.mxu0 %v9611_v18  ;;  %6925 = vmatpush1.bf16.msra.mxu1 %v9614_v19  ;;  %v9699_v18 = vld [vmem:[%s13609_s1 + $0x1068] ss:$16 sps:$4 sm:$0xff]   ;;  %v9704_v19 = vld [vmem:[%s13609_s1 + $0x1084] ss:$16 sps:$4 sm:$0xff]  }
 0x1d8   :  { %6311 = vmatprep.subr.bf16.mxu0 %v9619_v20  ;;  %6926 = vmatprep.subr.bf16.mxu1 %v9622_v21  ;;  %v9707_v20 = vld [vmem:[%s13609_s1 + $0x108c] ss:$16 sps:$4 sm:$0xff]   ;;  %v9702_v21 = vld [vmem:[%s13609_s1 + $0x1080] ss:$16 sps:$4 sm:$0xff]  }
 0x1db   :  { %6312 = vmatpush1.bf16.msra.mxu0 %v9617_v22  ;;  %6927 = vmatpush1.bf16.msra.mxu1 %v9620_v23  ;;  %v9705_v22 = vld [vmem:[%s13609_s1 + $0x1088] ss:$16 sps:$4 sm:$0xff]   ;;  %v9710_v23 = vld [vmem:[%s13609_s1 + $0x10a4] ss:$16 sps:$4 sm:$0xff]  }
 0x1dc   :  { %6313 = vmatprep.subr.bf16.mxu0 %v9625_v9  ;;  %6928 = vmatprep.subr.bf16.mxu1 %v9628_v26  ;;  %v9713_v9 = vld [vmem:[%s13609_s1 + $0x10ac] ss:$16 sps:$4 sm:$0xff]   ;;  %v9708_v26 = vld [vmem:[%s13609_s1 + $0x10a0] ss:$16 sps:$4 sm:$0xff]  }
 0x1df   :  { %6314 = vmatpush1.bf16.msra.mxu0 %v9623_v27  ;;  %6929 = vmatpush1.bf16.msra.mxu1 %v9626_v29  ;;  %v9711_v27 = vld [vmem:[%s13609_s1 + $0x10a8] ss:$16 sps:$4 sm:$0xff]   ;;  %v9716_v29 = vld [vmem:[%s13609_s1 + $0x10c4] ss:$16 sps:$4 sm:$0xff]  }
 0x1e0   :  { %6315 = vmatprep.subr.bf16.mxu0 %v9631_v30  ;;  %6930 = vmatprep.subr.bf16.mxu1 %v9634_v31  ;;  %v9719_v30 = vld [vmem:[%s13609_s1 + $0x10cc] ss:$16 sps:$4 sm:$0xff]   ;;  %v9714_v31 = vld [vmem:[%s13609_s1 + $0x10c0] ss:$16 sps:$4 sm:$0xff]  }
 0x1e3   :  { %6316 = vmatpush1.bf16.msra.mxu0 %v9629_v33  ;;  %6931 = vmatpush1.bf16.msra.mxu1 %v9632_v25  ;;  %v9717_v33 = vld [vmem:[%s13609_s1 + $0x10c8] ss:$16 sps:$4 sm:$0xff]   ;;  %v9722_v25 = vld [vmem:[%s13609_s1 + $0x10e4] ss:$16 sps:$4 sm:$0xff]  }
 0x1e4   :  { %6317 = vmatprep.subr.bf16.mxu0 %v9637_v34  ;;  %6932 = vmatprep.subr.bf16.mxu1 %v9640_v35  ;;  %v9725_v34 = vld [vmem:[%s13609_s1 + $0x10ec] ss:$16 sps:$4 sm:$0xff]   ;;  %v9720_v35 = vld [vmem:[%s13609_s1 + $0x10e0] ss:$16 sps:$4 sm:$0xff]  }
 0x1e7   :  { %6318 = vmatpush1.bf16.msra.mxu0 %v9635_v36  ;;  %6933 = vmatpush1.bf16.msra.mxu1 %v9638_v37  ;;  %v9723_v36 = vld [vmem:[%s13609_s1 + $0x10e8] ss:$16 sps:$4 sm:$0xff]   ;;  %v9728_v37 = vld [vmem:[%s13609_s1 + $0x1104] ss:$16 sps:$4 sm:$0xff]  }
 0x1e8   :  { %6319 = vmatprep.subr.bf16.mxu0 %v9643_v38  ;;  %6934 = vmatprep.subr.bf16.mxu1 %v9646_v28  ;;  %v9731_v38 = vld [vmem:[%s13609_s1 + $0x110c] ss:$16 sps:$4 sm:$0xff]   ;;  %v9726_v28 = vld [vmem:[%s13609_s1 + $0x1100] ss:$16 sps:$4 sm:$0xff]  }
 0x1eb   :  { %6320 = vmatpush1.bf16.msra.mxu0 %v9641_v40  ;;  %6935 = vmatpush1.bf16.msra.mxu1 %v9644_v41  ;;  %v9729_v40 = vld [vmem:[%s13609_s1 + $0x1108] ss:$16 sps:$4 sm:$0xff]   ;;  %v9734_v41 = vld [vmem:[%s13609_s1 + $0x1124] ss:$16 sps:$4 sm:$0xff]  }
 0x1ec   :  { %6321 = vmatprep.subr.bf16.mxu0 %v9649_v24  ;;  %6936 = vmatprep.subr.bf16.mxu1 %v9652_v44  ;;  %v9737_v24 = vld [vmem:[%s13609_s1 + $0x112c] ss:$16 sps:$4 sm:$0xff]   ;;  %v9732_v44 = vld [vmem:[%s13609_s1 + $0x1120] ss:$16 sps:$4 sm:$0xff]  }
 0x1ef   :  { %6322 = vmatpush1.bf16.msra.mxu0 %v9647_v45  ;;  %6937 = vmatpush1.bf16.msra.mxu1 %v9650_v46  ;;  %v9735_v45 = vld [vmem:[%s13609_s1 + $0x1128] ss:$16 sps:$4 sm:$0xff]   ;;  %v9740_v46 = vld [vmem:[%s13609_s1 + $0x1144] ss:$16 sps:$4 sm:$0xff]  }
 0x1f0   :  { %6323 = vmatprep.subr.bf16.mxu0 %v9655_v48  ;;  %6938 = vmatprep.subr.bf16.mxu1 %v9658_v32  ;;  %v9743_v48 = vld [vmem:[%s13609_s1 + $0x114c] ss:$16 sps:$4 sm:$0xff]   ;;  %v9738_v32 = vld [vmem:[%s13609_s1 + $0x1140] ss:$16 sps:$4 sm:$0xff]  }
 0x1f3   :  { %6324 = vmatpush1.bf16.msra.mxu0 %v9653_v50  ;;  %6939 = vmatpush1.bf16.msra.mxu1 %v9656_v51  ;;  %v9741_v50 = vld [vmem:[%s13609_s1 + $0x1148] ss:$16 sps:$4 sm:$0xff]   ;;  %v9746_v51 = vld [vmem:[%s13609_s1 + $0x1164] ss:$16 sps:$4 sm:$0xff]  }
 0x1f4   :  { %6325 = vmatprep.subr.bf16.mxu0 %v9661_v52  ;;  %6940 = vmatprep.subr.bf16.mxu1 %v9664_v53  ;;  %v9749_v52 = vld [vmem:[%s13609_s1 + $0x116c] ss:$16 sps:$4 sm:$0xff]   ;;  %v9744_v53 = vld [vmem:[%s13609_s1 + $0x1160] ss:$16 sps:$4 sm:$0xff]  }
 0x1f7   :  { %6326 = vmatpush1.bf16.msra.mxu0 %v9659_v54  ;;  %6941 = vmatpush1.bf16.msra.mxu1 %v9662_v42  ;;  %v9747_v54 = vld [vmem:[%s13609_s1 + $0x1168] ss:$16 sps:$4 sm:$0xff]   ;;  %v9752_v42 = vld [vmem:[%s13609_s1 + $0x1184] ss:$16 sps:$4 sm:$0xff]  }
 0x1f8   :  { %6327 = vmatprep.subr.bf16.mxu0 %v9667_v56  ;;  %6942 = vmatprep.subr.bf16.mxu1 %v9670_v39  ;;  %v9755_v56 = vld [vmem:[%s13609_s1 + $0x118c] ss:$16 sps:$4 sm:$0xff]   ;;  %v9750_v39 = vld [vmem:[%s13609_s1 + $0x1180] ss:$16 sps:$4 sm:$0xff]  }
 0x1fb   :  { %6328 = vmatpush1.bf16.msra.mxu0 %v9665_v58  ;;  %6943 = vmatpush1.bf16.msra.mxu1 %v9668_v59  ;;  %v9753_v58 = vld [vmem:[%s13609_s1 + $0x1188] ss:$16 sps:$4 sm:$0xff]   ;;  %v9758_v59 = vld [vmem:[%s13609_s1 + $0x11a4] ss:$16 sps:$4 sm:$0xff]  }
 0x1fc   :  { %6329 = vmatprep.subr.bf16.mxu0 %v9673_v60  ;;  %6944 = vmatprep.subr.bf16.mxu1 %v9676_v61  ;;  %v9761_v60 = vld [vmem:[%s13609_s1 + $0x11ac] ss:$16 sps:$4 sm:$0xff]   ;;  %v9756_v61 = vld [vmem:[%s13609_s1 + $0x11a0] ss:$16 sps:$4 sm:$0xff]  }
 0x1ff   :  { %6330 = vmatpush1.bf16.msra.mxu0 %v9671_v63  ;;  %6945 = vmatpush1.bf16.msra.mxu1 %v9674_v47  ;;  %v9759_v63 = vld [vmem:[%s13609_s1 + $0x11a8] ss:$16 sps:$4 sm:$0xff]   ;;  %v9764_v47 = vld [vmem:[%s13609_s1 + $0x11c4] ss:$16 sps:$4 sm:$0xff]  }
 0x200   :  { %6340 = vmatprep.subr.bf16.mxu0 %v9680_v0  ;;  %6955 = vmatprep.subr.bf16.mxu1 %v9683_v1  ;;  %v9767_v0 = vld [vmem:[%s13609_s1 + $0x11cc] ss:$16 sps:$4 sm:$0xff]   ;;  %v111_v1 = vcombine.high %v12037_v57, %v12037_v57 }
 0x201   :  { %v9773_v57 = vld [vmem:[%s13609_s1 + $0x11ec] ss:$16 sps:$4 sm:$0xff]  }
 0x202   :  { %6332 = vmatmul.mubr.bf16.vlgmr.msra.gmra.mrb[0].mxu0 %v214_v3  ;;  %6947 = vmatmul.mubr.bf16.vlgmr.msra.gmra.mrb[0].mxu1 %v214_v3  ;;  %v9765_v3 = vld [vmem:[%s13609_s1 + $0x11c8] ss:$16 sps:$4 sm:$0xff]  }
 0x203   :  { %6341 = vmatpush1.bf16.msra.mxu0 %v9678_v4  ;;  %6956 = vmatpush1.bf16.msra.mxu1 %v9681_v5  ;;  %v9770_v4 = vld [vmem:[%s13609_s1 + $0x11e4] ss:$16 sps:$4 sm:$0xff]   ;;  %v12254_v5 = vrot.slane %v111_v1, %v10571_v49  ;;  %v9849_v1 = vld [vmem:[%s13609_s1 + $0x1388] ss:$16 sps:$4 sm:$0xff]  }
 0x204   :  { %6342 = vmatprep.subr.bf16.mxu0 %v9686_v6  ;;  %6957 = vmatprep.subr.bf16.mxu1 %v9689_v55  ;;  %v9768_v6 = vld [vmem:[%s13609_s1 + $0x11e0] ss:$16 sps:$4 sm:$0xff]   ;;  %v9771_v55 = vld [vmem:[%s13609_s1 + $0x11e8] ss:$16 sps:$4 sm:$0xff]  }
 0x205   :  { %6372 = vmatprep.mubr.bf16.mxu0 %v217_v7  ;;  %6987 = vmatprep.mubr.bf16.mxu1 %v217_v7  ;;  %v9776_v7 = vld [vmem:[%s13609_s1 + $0x1204] ss:$16 sps:$4 sm:$0xff]  }
 0x207   :  { %6343 = vmatpush1.bf16.msra.mxu0 %v9684_v8  ;;  %6958 = vmatpush1.bf16.msra.mxu1 %v9687_v10  ;;  %v9779_v8 = vld [vmem:[%s13609_s1 + $0x120c] ss:$16 sps:$4 sm:$0xff]   ;;  %v127_v10 = vcombine.high %v12254_v5, %v12254_v5 }
 0x208   :  { %6344 = vmatprep.subr.bf16.mxu0 %v9692_v11  ;;  %6959 = vmatprep.subr.bf16.mxu1 %v9695_v12  ;;  %v216_v11 = vpack.c.bf16 %v12053_v62, %v12053_v62  ;;  %v9774_v12 = vld [vmem:[%s13609_s1 + $0x1200] ss:$16 sps:$4 sm:$0xff]   ;;  %v9785_v62 = vld [vmem:[%s13609_s1 + $0x122c] ss:$16 sps:$4 sm:$0xff]  }
 0x20b   :  { %6345 = vmatpush1.bf16.msra.mxu0 %v9690_v13  ;;  %6960 = vmatpush1.bf16.msra.mxu1 %v9693_v14  ;;  %v9777_v13 = vld [vmem:[%s13609_s1 + $0x1208] ss:$16 sps:$4 sm:$0xff]   ;;  %v9782_v14 = vld [vmem:[%s13609_s1 + $0x1224] ss:$16 sps:$4 sm:$0xff]  }
 0x20c   :  { %6346 = vmatprep.subr.bf16.mxu0 %v9698_v15  ;;  %6961 = vmatprep.subr.bf16.mxu1 %v9701_v16  ;;  %v219_v15 = vpack.c.bf16 %v127_v10, %v127_v10  ;;  %v9780_v16 = vld [vmem:[%s13609_s1 + $0x1220] ss:$16 sps:$4 sm:$0xff]   ;;  %v9861_v10 = vld [vmem:[%s13609_s1 + $0x13c8] ss:$16 sps:$4 sm:$0xff]  }
 0x20f   :  { %6347 = vmatpush1.bf16.msra.mxu0 %v9696_v17  ;;  %6962 = vmatpush1.bf16.msra.mxu1 %v9699_v18  ;;  %v9783_v17 = vld [vmem:[%s13609_s1 + $0x1228] ss:$16 sps:$4 sm:$0xff]   ;;  %v9788_v18 = vld [vmem:[%s13609_s1 + $0x1244] ss:$16 sps:$4 sm:$0xff]  }
 0x210   :  { %6348 = vmatprep.subr.bf16.mxu0 %v9704_v19  ;;  %6963 = vmatprep.subr.bf16.mxu1 %v9707_v20  ;;  %v9791_v19 = vld [vmem:[%s13609_s1 + $0x124c] ss:$16 sps:$4 sm:$0xff]   ;;  %v9786_v20 = vld [vmem:[%s13609_s1 + $0x1240] ss:$16 sps:$4 sm:$0xff]  }
 0x213   :  { %6349 = vmatpush1.bf16.msra.mxu0 %v9702_v21  ;;  %6964 = vmatpush1.bf16.msra.mxu1 %v9705_v22  ;;  %v9789_v21 = vld [vmem:[%s13609_s1 + $0x1248] ss:$16 sps:$4 sm:$0xff]   ;;  %v9794_v22 = vld [vmem:[%s13609_s1 + $0x1264] ss:$16 sps:$4 sm:$0xff]  }
 0x214   :  { %6350 = vmatprep.subr.bf16.mxu0 %v9710_v23  ;;  %6965 = vmatprep.subr.bf16.mxu1 %v9713_v9  ;;  %v9797_v23 = vld [vmem:[%s13609_s1 + $0x126c] ss:$16 sps:$4 sm:$0xff]   ;;  %v9792_v9 = vld [vmem:[%s13609_s1 + $0x1260] ss:$16 sps:$4 sm:$0xff]  }
 0x217   :  { %6351 = vmatpush1.bf16.msra.mxu0 %v9708_v26  ;;  %6966 = vmatpush1.bf16.msra.mxu1 %v9711_v27  ;;  %v9795_v26 = vld [vmem:[%s13609_s1 + $0x1268] ss:$16 sps:$4 sm:$0xff]   ;;  %v9800_v27 = vld [vmem:[%s13609_s1 + $0x1284] ss:$16 sps:$4 sm:$0xff]  }
 0x218   :  { %6352 = vmatprep.subr.bf16.mxu0 %v9716_v29  ;;  %6967 = vmatprep.subr.bf16.mxu1 %v9719_v30  ;;  %v9803_v29 = vld [vmem:[%s13609_s1 + $0x128c] ss:$16 sps:$4 sm:$0xff]   ;;  %v9798_v30 = vld [vmem:[%s13609_s1 + $0x1280] ss:$16 sps:$4 sm:$0xff]  }
 0x21b   :  { %6353 = vmatpush1.bf16.msra.mxu0 %v9714_v31  ;;  %6968 = vmatpush1.bf16.msra.mxu1 %v9717_v33  ;;  %v9801_v31 = vld [vmem:[%s13609_s1 + $0x1288] ss:$16 sps:$4 sm:$0xff]   ;;  %v9806_v33 = vld [vmem:[%s13609_s1 + $0x12a4] ss:$16 sps:$4 sm:$0xff]  }
 0x21c   :  { %6354 = vmatprep.subr.bf16.mxu0 %v9722_v25  ;;  %6969 = vmatprep.subr.bf16.mxu1 %v9725_v34  ;;  %v9809_v25 = vld [vmem:[%s13609_s1 + $0x12ac] ss:$16 sps:$4 sm:$0xff]   ;;  %v9804_v34 = vld [vmem:[%s13609_s1 + $0x12a0] ss:$16 sps:$4 sm:$0xff]  }
 0x21f   :  { %6355 = vmatpush1.bf16.msra.mxu0 %v9720_v35  ;;  %6970 = vmatpush1.bf16.msra.mxu1 %v9723_v36  ;;  %v9807_v35 = vld [vmem:[%s13609_s1 + $0x12a8] ss:$16 sps:$4 sm:$0xff]   ;;  %v9812_v36 = vld [vmem:[%s13609_s1 + $0x12c4] ss:$16 sps:$4 sm:$0xff]  }
 0x220   :  { %6356 = vmatprep.subr.bf16.mxu0 %v9728_v37  ;;  %6971 = vmatprep.subr.bf16.mxu1 %v9731_v38  ;;  %v9815_v37 = vld [vmem:[%s13609_s1 + $0x12cc] ss:$16 sps:$4 sm:$0xff]   ;;  %v9810_v38 = vld [vmem:[%s13609_s1 + $0x12c0] ss:$16 sps:$4 sm:$0xff]  }
 0x223   :  { %6357 = vmatpush1.bf16.msra.mxu0 %v9726_v28  ;;  %6972 = vmatpush1.bf16.msra.mxu1 %v9729_v40  ;;  %v9813_v28 = vld [vmem:[%s13609_s1 + $0x12c8] ss:$16 sps:$4 sm:$0xff]   ;;  %v9818_v40 = vld [vmem:[%s13609_s1 + $0x12e4] ss:$16 sps:$4 sm:$0xff]  }
 0x224   :  { %6358 = vmatprep.subr.bf16.mxu0 %v9734_v41  ;;  %6973 = vmatprep.subr.bf16.mxu1 %v9737_v24  ;;  %v9821_v41 = vld [vmem:[%s13609_s1 + $0x12ec] ss:$16 sps:$4 sm:$0xff]   ;;  %v9816_v24 = vld [vmem:[%s13609_s1 + $0x12e0] ss:$16 sps:$4 sm:$0xff]  }
 0x227   :  { %6359 = vmatpush1.bf16.msra.mxu0 %v9732_v44  ;;  %6974 = vmatpush1.bf16.msra.mxu1 %v9735_v45  ;;  %v9819_v44 = vld [vmem:[%s13609_s1 + $0x12e8] ss:$16 sps:$4 sm:$0xff]   ;;  %v9824_v45 = vld [vmem:[%s13609_s1 + $0x1304] ss:$16 sps:$4 sm:$0xff]  }
 0x228   :  { %6360 = vmatprep.subr.bf16.mxu0 %v9740_v46  ;;  %6975 = vmatprep.subr.bf16.mxu1 %v9743_v48  ;;  %v9827_v46 = vld [vmem:[%s13609_s1 + $0x130c] ss:$16 sps:$4 sm:$0xff]   ;;  %v9822_v48 = vld [vmem:[%s13609_s1 + $0x1300] ss:$16 sps:$4 sm:$0xff]  }
 0x22b   :  { %6361 = vmatpush1.bf16.msra.mxu0 %v9738_v32  ;;  %6976 = vmatpush1.bf16.msra.mxu1 %v9741_v50  ;;  %v9825_v32 = vld [vmem:[%s13609_s1 + $0x1308] ss:$16 sps:$4 sm:$0xff]   ;;  %v9830_v50 = vld [vmem:[%s13609_s1 + $0x1324] ss:$16 sps:$4 sm:$0xff]  }
 0x22c   :  { %6362 = vmatprep.subr.bf16.mxu0 %v9746_v51  ;;  %6977 = vmatprep.subr.bf16.mxu1 %v9749_v52  ;;  %v9833_v51 = vld [vmem:[%s13609_s1 + $0x132c] ss:$16 sps:$4 sm:$0xff]   ;;  %v9828_v52 = vld [vmem:[%s13609_s1 + $0x1320] ss:$16 sps:$4 sm:$0xff]  }
 0x22f   :  { %6363 = vmatpush1.bf16.msra.mxu0 %v9744_v53  ;;  %6978 = vmatpush1.bf16.msra.mxu1 %v9747_v54  ;;  %v9831_v53 = vld [vmem:[%s13609_s1 + $0x1328] ss:$16 sps:$4 sm:$0xff]   ;;  %v9836_v54 = vld [vmem:[%s13609_s1 + $0x1344] ss:$16 sps:$4 sm:$0xff]  }
 0x230   :  { %6364 = vmatprep.subr.bf16.mxu0 %v9752_v42  ;;  %6979 = vmatprep.subr.bf16.mxu1 %v9755_v56  ;;  %v9839_v42 = vld [vmem:[%s13609_s1 + $0x134c] ss:$16 sps:$4 sm:$0xff]   ;;  %v9834_v56 = vld [vmem:[%s13609_s1 + $0x1340] ss:$16 sps:$4 sm:$0xff]  }
 0x233   :  { %6365 = vmatpush1.bf16.msra.mxu0 %v9750_v39  ;;  %6980 = vmatpush1.bf16.msra.mxu1 %v9753_v58  ;;  %v9837_v39 = vld [vmem:[%s13609_s1 + $0x1348] ss:$16 sps:$4 sm:$0xff]   ;;  %v9842_v58 = vld [vmem:[%s13609_s1 + $0x1364] ss:$16 sps:$4 sm:$0xff]  }
 0x234   :  { %6366 = vmatprep.subr.bf16.mxu0 %v9758_v59  ;;  %6981 = vmatprep.subr.bf16.mxu1 %v9761_v60  ;;  %v9845_v59 = vld [vmem:[%s13609_s1 + $0x136c] ss:$16 sps:$4 sm:$0xff]   ;;  %v9840_v60 = vld [vmem:[%s13609_s1 + $0x1360] ss:$16 sps:$4 sm:$0xff]  }
 0x237   :  { %6367 = vmatpush1.bf16.msra.mxu0 %v9756_v61  ;;  %6982 = vmatpush1.bf16.msra.mxu1 %v9759_v63  ;;  %v9843_v61 = vld [vmem:[%s13609_s1 + $0x1368] ss:$16 sps:$4 sm:$0xff]   ;;  %v9848_v63 = vld [vmem:[%s13609_s1 + $0x1384] ss:$16 sps:$4 sm:$0xff]  }
 0x238   :  { %6368 = vmatprep.subr.bf16.mxu0 %v9764_v47  ;;  %6983 = vmatprep.subr.bf16.mxu1 %v9767_v0  ;;  %v9851_v47 = vld [vmem:[%s13609_s1 + $0x138c] ss:$16 sps:$4 sm:$0xff]   ;;  %v9846_v0 = vld [vmem:[%s13609_s1 + $0x1380] ss:$16 sps:$4 sm:$0xff]  }
 0x23b   :  { %6369 = vmatpush1.bf16.msra.mxu0 %v9762_v2  ;;  %6984 = vmatpush1.bf16.msra.mxu1 %v9765_v3  ;;  %v9854_v2 = vld [vmem:[%s13609_s1 + $0x13a4] ss:$16 sps:$4 sm:$0xff]   ;;  %v9857_v3 = vld [vmem:[%s13609_s1 + $0x13ac] ss:$16 sps:$4 sm:$0xff]  }
 0x23c   :  { %6370 = vmatprep.subr.bf16.mxu0 %v9770_v4  ;;  %6985 = vmatprep.subr.bf16.mxu1 %v9773_v57  ;;  %v9852_v4 = vld [vmem:[%s13609_s1 + $0x13a0] ss:$16 sps:$4 sm:$0xff]   ;;  %v9855_v57 = vld [vmem:[%s13609_s1 + $0x13a8] ss:$16 sps:$4 sm:$0xff]  }
 0x23f   :  { %6371 = vmatpush1.bf16.msra.mxu0 %v9768_v6  ;;  %6986 = vmatpush1.bf16.msra.mxu1 %v9771_v55  ;;  %v9860_v6 = vld [vmem:[%s13609_s1 + $0x13c4] ss:$16 sps:$4 sm:$0xff]   ;;  %v9863_v55 = vld [vmem:[%s13609_s1 + $0x13cc] ss:$16 sps:$4 sm:$0xff]  }
 0x240   :  { %6381 = vmatprep.subr.bf16.mxu0 %v9776_v7  ;;  %6996 = vmatprep.subr.bf16.mxu1 %v9779_v8  ;;  %v12443_v7 = vld [vmem:[%s13610_s0 + $0x28] sm:$0xff]  ;;  %v9858_v8 = vld [vmem:[%s13609_s1 + $0x13c0] ss:$16 sps:$4 sm:$0xff]  }
 0x242   :  { %6373 = vmatmul.mubr.bf16.vlgmr.msra.gmra.mrb[0].mxu0 %v216_v11  ;;  %6988 = vmatmul.mubr.bf16.vlgmr.msra.gmra.mrb[0].mxu1 %v216_v11  ;;  %v9866_v11 = vld [vmem:[%s13609_s1 + $0x13e4] ss:$16 sps:$4 sm:$0xff]  }
 0x243   :  { %6382 = vmatpush1.bf16.msra.mxu0 %v9774_v12  ;;  %6997 = vmatpush1.bf16.msra.mxu1 %v9777_v13  ;;  %v9869_v12 = vld [vmem:[%s13609_s1 + $0x13ec] ss:$16 sps:$4 sm:$0xff]   ;;  %v12459_v13 = vrot.slane %v12443_v7, %v10571_v49 }
 0x244   :  { %6383 = vmatprep.subr.bf16.mxu0 %v9782_v14  ;;  %6998 = vmatprep.subr.bf16.mxu1 %v9785_v62  ;;  %v9864_v14 = vld [vmem:[%s13609_s1 + $0x13e0] ss:$16 sps:$4 sm:$0xff]   ;;  %v9867_v62 = vld [vmem:[%s13609_s1 + $0x13e8] ss:$16 sps:$4 sm:$0xff]  }
 0x245   :  { %6413 = vmatprep.mubr.bf16.mxu0 %v219_v15  ;;  %7028 = vmatprep.mubr.bf16.mxu1 %v219_v15  ;;  %v9873_v15 = vld [vmem:[%s13609_s1 + $0x1404] ss:$16 sps:$4 sm:$0xff]  }
 0x247   :  { %6384 = vmatpush1.bf16.msra.mxu0 %v9780_v16  ;;  %6999 = vmatpush1.bf16.msra.mxu1 %v9783_v17  ;;  %v9876_v16 = vld [vmem:[%s13609_s1 + $0x140c] ss:$16 sps:$4 sm:$0xff]   ;;  %v143_v17 = vcombine.high %v12459_v13, %v12459_v13 }
 0x248   :  { %6385 = vmatprep.subr.bf16.mxu0 %v9788_v18  ;;  %7000 = vmatprep.subr.bf16.mxu1 %v9791_v19  ;;  %v218_v18 = vpack.c.bf16 %v12254_v5, %v12254_v5  ;;  %v9871_v19 = vld [vmem:[%s13609_s1 + $0x1400] ss:$16 sps:$4 sm:$0xff]   ;;  %v9882_v5 = vld [vmem:[%s13609_s1 + $0x142c] ss:$16 sps:$4 sm:$0xff]  }
 0x24b   :  { %6386 = vmatpush1.bf16.msra.mxu0 %v9786_v20  ;;  %7001 = vmatpush1.bf16.msra.mxu1 %v9789_v21  ;;  %v9874_v20 = vld [vmem:[%s13609_s1 + $0x1408] ss:$16 sps:$4 sm:$0xff]   ;;  %v9879_v21 = vld [vmem:[%s13609_s1 + $0x1424] ss:$16 sps:$4 sm:$0xff]  }
 0x24c   :  { %6387 = vmatprep.subr.bf16.mxu0 %v9794_v22  ;;  %7002 = vmatprep.subr.bf16.mxu1 %v9797_v23  ;;  %v221_v22 = vpack.c.bf16 %v143_v17, %v143_v17  ;;  %v9877_v23 = vld [vmem:[%s13609_s1 + $0x1420] ss:$16 sps:$4 sm:$0xff]  }
 0x24d   :  { %v9955_v17 = vld [vmem:[%s13609_s1 + $0x15c0] ss:$16 sps:$4 sm:$0xff]  }
 0x24f   :  { %6388 = vmatpush1.bf16.msra.mxu0 %v9792_v9  ;;  %7003 = vmatpush1.bf16.msra.mxu1 %v9795_v26  ;;  %v9880_v9 = vld [vmem:[%s13609_s1 + $0x1428] ss:$16 sps:$4 sm:$0xff]   ;;  %v9885_v26 = vld [vmem:[%s13609_s1 + $0x1444] ss:$16 sps:$4 sm:$0xff]  }
 0x250   :  { %6389 = vmatprep.subr.bf16.mxu0 %v9800_v27  ;;  %7004 = vmatprep.subr.bf16.mxu1 %v9803_v29  ;;  %v9888_v27 = vld [vmem:[%s13609_s1 + $0x144c] ss:$16 sps:$4 sm:$0xff]   ;;  %v9883_v29 = vld [vmem:[%s13609_s1 + $0x1440] ss:$16 sps:$4 sm:$0xff]  }
 0x253   :  { %6390 = vmatpush1.bf16.msra.mxu0 %v9798_v30  ;;  %7005 = vmatpush1.bf16.msra.mxu1 %v9801_v31  ;;  %v9886_v30 = vld [vmem:[%s13609_s1 + $0x1448] ss:$16 sps:$4 sm:$0xff]   ;;  %v9891_v31 = vld [vmem:[%s13609_s1 + $0x1464] ss:$16 sps:$4 sm:$0xff]  }
 0x254   :  { %6391 = vmatprep.subr.bf16.mxu0 %v9806_v33  ;;  %7006 = vmatprep.subr.bf16.mxu1 %v9809_v25  ;;  %v9894_v33 = vld [vmem:[%s13609_s1 + $0x146c] ss:$16 sps:$4 sm:$0xff]   ;;  %v9889_v25 = vld [vmem:[%s13609_s1 + $0x1460] ss:$16 sps:$4 sm:$0xff]  }
 0x257   :  { %6392 = vmatpush1.bf16.msra.mxu0 %v9804_v34  ;;  %7007 = vmatpush1.bf16.msra.mxu1 %v9807_v35  ;;  %v9892_v34 = vld [vmem:[%s13609_s1 + $0x1468] ss:$16 sps:$4 sm:$0xff]   ;;  %v9897_v35 = vld [vmem:[%s13609_s1 + $0x1484] ss:$16 sps:$4 sm:$0xff]  }
 0x258   :  { %6393 = vmatprep.subr.bf16.mxu0 %v9812_v36  ;;  %7008 = vmatprep.subr.bf16.mxu1 %v9815_v37  ;;  %v9900_v36 = vld [vmem:[%s13609_s1 + $0x148c] ss:$16 sps:$4 sm:$0xff]   ;;  %v9895_v37 = vld [vmem:[%s13609_s1 + $0x1480] ss:$16 sps:$4 sm:$0xff]  }
 0x25b   :  { %6394 = vmatpush1.bf16.msra.mxu0 %v9810_v38  ;;  %7009 = vmatpush1.bf16.msra.mxu1 %v9813_v28  ;;  %v9898_v38 = vld [vmem:[%s13609_s1 + $0x1488] ss:$16 sps:$4 sm:$0xff]   ;;  %v9903_v28 = vld [vmem:[%s13609_s1 + $0x14a4] ss:$16 sps:$4 sm:$0xff]  }
 0x25c   :  { %6395 = vmatprep.subr.bf16.mxu0 %v9818_v40  ;;  %7010 = vmatprep.subr.bf16.mxu1 %v9821_v41  ;;  %v9906_v40 = vld [vmem:[%s13609_s1 + $0x14ac] ss:$16 sps:$4 sm:$0xff]   ;;  %v9901_v41 = vld [vmem:[%s13609_s1 + $0x14a0] ss:$16 sps:$4 sm:$0xff]  }
 0x25f   :  { %6396 = vmatpush1.bf16.msra.mxu0 %v9816_v24  ;;  %7011 = vmatpush1.bf16.msra.mxu1 %v9819_v44  ;;  %v9904_v24 = vld [vmem:[%s13609_s1 + $0x14a8] ss:$16 sps:$4 sm:$0xff]   ;;  %v9909_v44 = vld [vmem:[%s13609_s1 + $0x14c4] ss:$16 sps:$4 sm:$0xff]  }
 0x260   :  { %6397 = vmatprep.subr.bf16.mxu0 %v9824_v45  ;;  %7012 = vmatprep.subr.bf16.mxu1 %v9827_v46  ;;  %v9912_v45 = vld [vmem:[%s13609_s1 + $0x14cc] ss:$16 sps:$4 sm:$0xff]   ;;  %v9907_v46 = vld [vmem:[%s13609_s1 + $0x14c0] ss:$16 sps:$4 sm:$0xff]  }
 0x263   :  { %6398 = vmatpush1.bf16.msra.mxu0 %v9822_v48  ;;  %7013 = vmatpush1.bf16.msra.mxu1 %v9825_v32  ;;  %v9910_v48 = vld [vmem:[%s13609_s1 + $0x14c8] ss:$16 sps:$4 sm:$0xff]   ;;  %v9915_v32 = vld [vmem:[%s13609_s1 + $0x14e4] ss:$16 sps:$4 sm:$0xff]  }
 0x264   :  { %6399 = vmatprep.subr.bf16.mxu0 %v9830_v50  ;;  %7014 = vmatprep.subr.bf16.mxu1 %v9833_v51  ;;  %v9918_v50 = vld [vmem:[%s13609_s1 + $0x14ec] ss:$16 sps:$4 sm:$0xff]   ;;  %v9913_v51 = vld [vmem:[%s13609_s1 + $0x14e0] ss:$16 sps:$4 sm:$0xff]  }
 0x267   :  { %6400 = vmatpush1.bf16.msra.mxu0 %v9828_v52  ;;  %7015 = vmatpush1.bf16.msra.mxu1 %v9831_v53  ;;  %v9916_v52 = vld [vmem:[%s13609_s1 + $0x14e8] ss:$16 sps:$4 sm:$0xff]   ;;  %v9921_v53 = vld [vmem:[%s13609_s1 + $0x1504] ss:$16 sps:$4 sm:$0xff]  }
 0x268   :  { %6401 = vmatprep.subr.bf16.mxu0 %v9836_v54  ;;  %7016 = vmatprep.subr.bf16.mxu1 %v9839_v42  ;;  %v9924_v54 = vld [vmem:[%s13609_s1 + $0x150c] ss:$16 sps:$4 sm:$0xff]   ;;  %v9919_v42 = vld [vmem:[%s13609_s1 + $0x1500] ss:$16 sps:$4 sm:$0xff]  }
 0x26b   :  { %6402 = vmatpush1.bf16.msra.mxu0 %v9834_v56  ;;  %7017 = vmatpush1.bf16.msra.mxu1 %v9837_v39  ;;  %v9922_v56 = vld [vmem:[%s13609_s1 + $0x1508] ss:$16 sps:$4 sm:$0xff]   ;;  %v9927_v39 = vld [vmem:[%s13609_s1 + $0x1524] ss:$16 sps:$4 sm:$0xff]  }
 0x26c   :  { %6403 = vmatprep.subr.bf16.mxu0 %v9842_v58  ;;  %7018 = vmatprep.subr.bf16.mxu1 %v9845_v59  ;;  %v9930_v58 = vld [vmem:[%s13609_s1 + $0x152c] ss:$16 sps:$4 sm:$0xff]   ;;  %v9925_v59 = vld [vmem:[%s13609_s1 + $0x1520] ss:$16 sps:$4 sm:$0xff]  }
 0x26f   :  { %6404 = vmatpush1.bf16.msra.mxu0 %v9840_v60  ;;  %7019 = vmatpush1.bf16.msra.mxu1 %v9843_v61  ;;  %v9928_v60 = vld [vmem:[%s13609_s1 + $0x1528] ss:$16 sps:$4 sm:$0xff]   ;;  %v9933_v61 = vld [vmem:[%s13609_s1 + $0x1544] ss:$16 sps:$4 sm:$0xff]  }
 0x270   :  { %6405 = vmatprep.subr.bf16.mxu0 %v9848_v63  ;;  %7020 = vmatprep.subr.bf16.mxu1 %v9851_v47  ;;  %v9936_v63 = vld [vmem:[%s13609_s1 + $0x154c] ss:$16 sps:$4 sm:$0xff]   ;;  %v9931_v47 = vld [vmem:[%s13609_s1 + $0x1540] ss:$16 sps:$4 sm:$0xff]  }
 0x273   :  { %6406 = vmatpush1.bf16.msra.mxu0 %v9846_v0  ;;  %7021 = vmatpush1.bf16.msra.mxu1 %v9849_v1  ;;  %v9934_v0 = vld [vmem:[%s13609_s1 + $0x1548] ss:$16 sps:$4 sm:$0xff]   ;;  %v9939_v1 = vld [vmem:[%s13609_s1 + $0x1564] ss:$16 sps:$4 sm:$0xff]  }
 0x274   :  { %6407 = vmatprep.subr.bf16.mxu0 %v9854_v2  ;;  %7022 = vmatprep.subr.bf16.mxu1 %v9857_v3  ;;  %v9942_v2 = vld [vmem:[%s13609_s1 + $0x156c] ss:$16 sps:$4 sm:$0xff]   ;;  %v9937_v3 = vld [vmem:[%s13609_s1 + $0x1560] ss:$16 sps:$4 sm:$0xff]  }
 0x277   :  { %6408 = vmatpush1.bf16.msra.mxu0 %v9852_v4  ;;  %7023 = vmatpush1.bf16.msra.mxu1 %v9855_v57  ;;  %v9940_v4 = vld [vmem:[%s13609_s1 + $0x1568] ss:$16 sps:$4 sm:$0xff]   ;;  %v9945_v57 = vld [vmem:[%s13609_s1 + $0x1584] ss:$16 sps:$4 sm:$0xff]  }
 0x278   :  { %6409 = vmatprep.subr.bf16.mxu0 %v9860_v6  ;;  %7024 = vmatprep.subr.bf16.mxu1 %v9863_v55  ;;  %v9948_v6 = vld [vmem:[%s13609_s1 + $0x158c] ss:$16 sps:$4 sm:$0xff]   ;;  %v9943_v55 = vld [vmem:[%s13609_s1 + $0x1580] ss:$16 sps:$4 sm:$0xff]  }
 0x27b   :  { %6410 = vmatpush1.bf16.msra.mxu0 %v9858_v8  ;;  %7025 = vmatpush1.bf16.msra.mxu1 %v9861_v10  ;;  %v9946_v8 = vld [vmem:[%s13609_s1 + $0x1588] ss:$16 sps:$4 sm:$0xff]   ;;  %v9951_v10 = vld [vmem:[%s13609_s1 + $0x15a4] ss:$16 sps:$4 sm:$0xff]  }
 0x27c   :  { %6411 = vmatprep.subr.bf16.mxu0 %v9866_v11  ;;  %7026 = vmatprep.subr.bf16.mxu1 %v9869_v12  ;;  %v9954_v11 = vld [vmem:[%s13609_s1 + $0x15ac] ss:$16 sps:$4 sm:$0xff]   ;;  %v9949_v12 = vld [vmem:[%s13609_s1 + $0x15a0] ss:$16 sps:$4 sm:$0xff]  }
 0x27f   :  { %6412 = vmatpush1.bf16.msra.mxu0 %v9864_v14  ;;  %7027 = vmatpush1.bf16.msra.mxu1 %v9867_v62  ;;  %v9952_v14 = vld [vmem:[%s13609_s1 + $0x15a8] ss:$16 sps:$4 sm:$0xff]   ;;  %v9957_v62 = vld [vmem:[%s13609_s1 + $0x15c4] ss:$16 sps:$4 sm:$0xff]  }
 0x280   :  { %6422 = vmatprep.subr.bf16.mxu0 %v9873_v15  ;;  %7037 = vmatprep.subr.bf16.mxu1 %v9876_v16  ;;  %v9960_v15 = vld [vmem:[%s13609_s1 + $0x15cc] ss:$16 sps:$4 sm:$0xff]   ;;  %v128_v16 = vcombine.high %v12443_v7, %v12443_v7 }
 0x281   :  { %v9966_v7 = vld [vmem:[%s13609_s1 + $0x15ec] ss:$16 sps:$4 sm:$0xff]  }
 0x282   :  { %6414 = vmatmul.mubr.bf16.vlgmr.msra.gmra.mrb[0].mxu0 %v218_v18  ;;  %7029 = vmatmul.mubr.bf16.vlgmr.msra.gmra.mrb[0].mxu1 %v218_v18  ;;  %v9958_v18 = vld [vmem:[%s13609_s1 + $0x15c8] ss:$16 sps:$4 sm:$0xff]  }
 0x283   :  { %6423 = vmatpush1.bf16.msra.mxu0 %v9871_v19  ;;  %7038 = vmatpush1.bf16.msra.mxu1 %v9874_v20  ;;  %v9963_v19 = vld [vmem:[%s13609_s1 + $0x15e4] ss:$16 sps:$4 sm:$0xff]   ;;  %v12660_v20 = vrot.slane %v128_v16, %v10571_v49  ;;  %v10042_v16 = vld [vmem:[%s13609_s1 + $0x1788] ss:$16 sps:$4 sm:$0xff]  }
 0x284   :  { %6424 = vmatprep.subr.bf16.mxu0 %v9879_v21  ;;  %7039 = vmatprep.subr.bf16.mxu1 %v9882_v5  ;;  %v9961_v21 = vld [vmem:[%s13609_s1 + $0x15e0] ss:$16 sps:$4 sm:$0xff]   ;;  %v9964_v5 = vld [vmem:[%s13609_s1 + $0x15e8] ss:$16 sps:$4 sm:$0xff]  }
 0x285   :  { %6454 = vmatprep.mubr.bf16.mxu0 %v221_v22  ;;  %7069 = vmatprep.mubr.bf16.mxu1 %v221_v22  ;;  %v9969_v22 = vld [vmem:[%s13609_s1 + $0x1604] ss:$16 sps:$4 sm:$0xff]  }
 0x287   :  { %6425 = vmatpush1.bf16.msra.mxu0 %v9877_v23  ;;  %7040 = vmatpush1.bf16.msra.mxu1 %v9880_v9  ;;  %v9972_v23 = vld [vmem:[%s13609_s1 + $0x160c] ss:$16 sps:$4 sm:$0xff]   ;;  %v144_v9 = vcombine.high %v12660_v20, %v12660_v20 }
 0x288   :  { %6426 = vmatprep.subr.bf16.mxu0 %v9885_v26  ;;  %7041 = vmatprep.subr.bf16.mxu1 %v9888_v27  ;;  %v220_v26 = vpack.c.bf16 %v12459_v13, %v12459_v13  ;;  %v9967_v27 = vld [vmem:[%s13609_s1 + $0x1600] ss:$16 sps:$4 sm:$0xff]   ;;  %v9978_v13 = vld [vmem:[%s13609_s1 + $0x162c] ss:$16 sps:$4 sm:$0xff]  }
 0x28b   :  { %6427 = vmatpush1.bf16.msra.mxu0 %v9883_v29  ;;  %7042 = vmatpush1.bf16.msra.mxu1 %v9886_v30  ;;  %v9970_v29 = vld [vmem:[%s13609_s1 + $0x1608] ss:$16 sps:$4 sm:$0xff]   ;;  %v9975_v30 = vld [vmem:[%s13609_s1 + $0x1624] ss:$16 sps:$4 sm:$0xff]  }
 0x28c   :  { %6428 = vmatprep.subr.bf16.mxu0 %v9891_v31  ;;  %7043 = vmatprep.subr.bf16.mxu1 %v9894_v33  ;;  %v223_v31 = vpack.c.bf16 %v144_v9, %v144_v9  ;;  %v9973_v33 = vld [vmem:[%s13609_s1 + $0x1620] ss:$16 sps:$4 sm:$0xff]   ;;  %v10054_v9 = vld [vmem:[%s13609_s1 + $0x17c8] ss:$16 sps:$4 sm:$0xff]  }
 0x28f   :  { %6429 = vmatpush1.bf16.msra.mxu0 %v9889_v25  ;;  %7044 = vmatpush1.bf16.msra.mxu1 %v9892_v34  ;;  %v9976_v25 = vld [vmem:[%s13609_s1 + $0x1628] ss:$16 sps:$4 sm:$0xff]   ;;  %v9981_v34 = vld [vmem:[%s13609_s1 + $0x1644] ss:$16 sps:$4 sm:$0xff]  }
 0x290   :  { %6430 = vmatprep.subr.bf16.mxu0 %v9897_v35  ;;  %7045 = vmatprep.subr.bf16.mxu1 %v9900_v36  ;;  %v9984_v35 = vld [vmem:[%s13609_s1 + $0x164c] ss:$16 sps:$4 sm:$0xff]   ;;  %v9979_v36 = vld [vmem:[%s13609_s1 + $0x1640] ss:$16 sps:$4 sm:$0xff]  }
 0x293   :  { %6431 = vmatpush1.bf16.msra.mxu0 %v9895_v37  ;;  %7046 = vmatpush1.bf16.msra.mxu1 %v9898_v38  ;;  %v9982_v37 = vld [vmem:[%s13609_s1 + $0x1648] ss:$16 sps:$4 sm:$0xff]   ;;  %v9987_v38 = vld [vmem:[%s13609_s1 + $0x1664] ss:$16 sps:$4 sm:$0xff]  }
 0x294   :  { %6432 = vmatprep.subr.bf16.mxu0 %v9903_v28  ;;  %7047 = vmatprep.subr.bf16.mxu1 %v9906_v40  ;;  %v9990_v28 = vld [vmem:[%s13609_s1 + $0x166c] ss:$16 sps:$4 sm:$0xff]   ;;  %v9985_v40 = vld [vmem:[%s13609_s1 + $0x1660] ss:$16 sps:$4 sm:$0xff]  }
 0x297   :  { %6433 = vmatpush1.bf16.msra.mxu0 %v9901_v41  ;;  %7048 = vmatpush1.bf16.msra.mxu1 %v9904_v24  ;;  %v9988_v41 = vld [vmem:[%s13609_s1 + $0x1668] ss:$16 sps:$4 sm:$0xff]   ;;  %v9993_v24 = vld [vmem:[%s13609_s1 + $0x1684] ss:$16 sps:$4 sm:$0xff]  }
 0x298   :  { %6434 = vmatprep.subr.bf16.mxu0 %v9909_v44  ;;  %7049 = vmatprep.subr.bf16.mxu1 %v9912_v45  ;;  %v9996_v44 = vld [vmem:[%s13609_s1 + $0x168c] ss:$16 sps:$4 sm:$0xff]   ;;  %v9991_v45 = vld [vmem:[%s13609_s1 + $0x1680] ss:$16 sps:$4 sm:$0xff]  }
 0x29b   :  { %6435 = vmatpush1.bf16.msra.mxu0 %v9907_v46  ;;  %7050 = vmatpush1.bf16.msra.mxu1 %v9910_v48  ;;  %v9994_v46 = vld [vmem:[%s13609_s1 + $0x1688] ss:$16 sps:$4 sm:$0xff]   ;;  %v9999_v48 = vld [vmem:[%s13609_s1 + $0x16a4] ss:$16 sps:$4 sm:$0xff]  }
 0x29c   :  { %6436 = vmatprep.subr.bf16.mxu0 %v9915_v32  ;;  %7051 = vmatprep.subr.bf16.mxu1 %v9918_v50  ;;  %v10002_v32 = vld [vmem:[%s13609_s1 + $0x16ac] ss:$16 sps:$4 sm:$0xff]   ;;  %v9997_v50 = vld [vmem:[%s13609_s1 + $0x16a0] ss:$16 sps:$4 sm:$0xff]  }
 0x29f   :  { %6437 = vmatpush1.bf16.msra.mxu0 %v9913_v51  ;;  %7052 = vmatpush1.bf16.msra.mxu1 %v9916_v52  ;;  %v10000_v51 = vld [vmem:[%s13609_s1 + $0x16a8] ss:$16 sps:$4 sm:$0xff]   ;;  %v10005_v52 = vld [vmem:[%s13609_s1 + $0x16c4] ss:$16 sps:$4 sm:$0xff]  }
 0x2a0   :  { %6438 = vmatprep.subr.bf16.mxu0 %v9921_v53  ;;  %7053 = vmatprep.subr.bf16.mxu1 %v9924_v54  ;;  %v10008_v53 = vld [vmem:[%s13609_s1 + $0x16cc] ss:$16 sps:$4 sm:$0xff]   ;;  %v10003_v54 = vld [vmem:[%s13609_s1 + $0x16c0] ss:$16 sps:$4 sm:$0xff]  }
 0x2a3   :  { %6439 = vmatpush1.bf16.msra.mxu0 %v9919_v42  ;;  %7054 = vmatpush1.bf16.msra.mxu1 %v9922_v56  ;;  %v10006_v42 = vld [vmem:[%s13609_s1 + $0x16c8] ss:$16 sps:$4 sm:$0xff]   ;;  %v10011_v56 = vld [vmem:[%s13609_s1 + $0x16e4] ss:$16 sps:$4 sm:$0xff]  }
 0x2a4   :  { %6440 = vmatprep.subr.bf16.mxu0 %v9927_v39  ;;  %7055 = vmatprep.subr.bf16.mxu1 %v9930_v58  ;;  %v10014_v39 = vld [vmem:[%s13609_s1 + $0x16ec] ss:$16 sps:$4 sm:$0xff]   ;;  %v10009_v58 = vld [vmem:[%s13609_s1 + $0x16e0] ss:$16 sps:$4 sm:$0xff]  }
 0x2a7   :  { %6441 = vmatpush1.bf16.msra.mxu0 %v9925_v59  ;;  %7056 = vmatpush1.bf16.msra.mxu1 %v9928_v60  ;;  %v10012_v59 = vld [vmem:[%s13609_s1 + $0x16e8] ss:$16 sps:$4 sm:$0xff]   ;;  %v10017_v60 = vld [vmem:[%s13609_s1 + $0x1704] ss:$16 sps:$4 sm:$0xff]  }
 0x2a8   :  { %6442 = vmatprep.subr.bf16.mxu0 %v9933_v61  ;;  %7057 = vmatprep.subr.bf16.mxu1 %v9936_v63  ;;  %v10020_v61 = vld [vmem:[%s13609_s1 + $0x170c] ss:$16 sps:$4 sm:$0xff]   ;;  %v10015_v63 = vld [vmem:[%s13609_s1 + $0x1700] ss:$16 sps:$4 sm:$0xff]  }
 0x2ab   :  { %6443 = vmatpush1.bf16.msra.mxu0 %v9931_v47  ;;  %7058 = vmatpush1.bf16.msra.mxu1 %v9934_v0  ;;  %v10018_v47 = vld [vmem:[%s13609_s1 + $0x1708] ss:$16 sps:$4 sm:$0xff]   ;;  %v10023_v0 = vld [vmem:[%s13609_s1 + $0x1724] ss:$16 sps:$4 sm:$0xff]  }
 0x2ac   :  { %6444 = vmatprep.subr.bf16.mxu0 %v9939_v1  ;;  %7059 = vmatprep.subr.bf16.mxu1 %v9942_v2  ;;  %v10026_v1 = vld [vmem:[%s13609_s1 + $0x172c] ss:$16 sps:$4 sm:$0xff]   ;;  %v10021_v2 = vld [vmem:[%s13609_s1 + $0x1720] ss:$16 sps:$4 sm:$0xff]  }
 0x2af   :  { %6445 = vmatpush1.bf16.msra.mxu0 %v9937_v3  ;;  %7060 = vmatpush1.bf16.msra.mxu1 %v9940_v4  ;;  %v10024_v3 = vld [vmem:[%s13609_s1 + $0x1728] ss:$16 sps:$4 sm:$0xff]   ;;  %v10029_v4 = vld [vmem:[%s13609_s1 + $0x1744] ss:$16 sps:$4 sm:$0xff]  }
 0x2b0   :  { %6446 = vmatprep.subr.bf16.mxu0 %v9945_v57  ;;  %7061 = vmatprep.subr.bf16.mxu1 %v9948_v6  ;;  %v10032_v57 = vld [vmem:[%s13609_s1 + $0x174c] ss:$16 sps:$4 sm:$0xff]   ;;  %v10027_v6 = vld [vmem:[%s13609_s1 + $0x1740] ss:$16 sps:$4 sm:$0xff]  }
 0x2b3   :  { %6447 = vmatpush1.bf16.msra.mxu0 %v9943_v55  ;;  %7062 = vmatpush1.bf16.msra.mxu1 %v9946_v8  ;;  %v10030_v55 = vld [vmem:[%s13609_s1 + $0x1748] ss:$16 sps:$4 sm:$0xff]   ;;  %v10035_v8 = vld [vmem:[%s13609_s1 + $0x1764] ss:$16 sps:$4 sm:$0xff]  }
 0x2b4   :  { %6448 = vmatprep.subr.bf16.mxu0 %v9951_v10  ;;  %7063 = vmatprep.subr.bf16.mxu1 %v9954_v11  ;;  %v10038_v10 = vld [vmem:[%s13609_s1 + $0x176c] ss:$16 sps:$4 sm:$0xff]   ;;  %v10033_v11 = vld [vmem:[%s13609_s1 + $0x1760] ss:$16 sps:$4 sm:$0xff]  }
 0x2b7   :  { %6449 = vmatpush1.bf16.msra.mxu0 %v9949_v12  ;;  %7064 = vmatpush1.bf16.msra.mxu1 %v9952_v14  ;;  %v10036_v12 = vld [vmem:[%s13609_s1 + $0x1768] ss:$16 sps:$4 sm:$0xff]   ;;  %v10041_v14 = vld [vmem:[%s13609_s1 + $0x1784] ss:$16 sps:$4 sm:$0xff]  }
 0x2b8   :  { %6450 = vmatprep.subr.bf16.mxu0 %v9957_v62  ;;  %7065 = vmatprep.subr.bf16.mxu1 %v9960_v15  ;;  %v10044_v62 = vld [vmem:[%s13609_s1 + $0x178c] ss:$16 sps:$4 sm:$0xff]   ;;  %v10039_v15 = vld [vmem:[%s13609_s1 + $0x1780] ss:$16 sps:$4 sm:$0xff]  }
 0x2bb   :  { %6451 = vmatpush1.bf16.msra.mxu0 %v9955_v17  ;;  %7066 = vmatpush1.bf16.msra.mxu1 %v9958_v18  ;;  %v10047_v17 = vld [vmem:[%s13609_s1 + $0x17a4] ss:$16 sps:$4 sm:$0xff]   ;;  %v10050_v18 = vld [vmem:[%s13609_s1 + $0x17ac] ss:$16 sps:$4 sm:$0xff]  }
 0x2bc   :  { %6452 = vmatprep.subr.bf16.mxu0 %v9963_v19  ;;  %7067 = vmatprep.subr.bf16.mxu1 %v9966_v7  ;;  %v10045_v19 = vld [vmem:[%s13609_s1 + $0x17a0] ss:$16 sps:$4 sm:$0xff]   ;;  %v10048_v7 = vld [vmem:[%s13609_s1 + $0x17a8] ss:$16 sps:$4 sm:$0xff]  }
 0x2bf   :  { %6453 = vmatpush1.bf16.msra.mxu0 %v9961_v21  ;;  %7068 = vmatpush1.bf16.msra.mxu1 %v9964_v5  ;;  %v10053_v21 = vld [vmem:[%s13609_s1 + $0x17c4] ss:$16 sps:$4 sm:$0xff]   ;;  %v10056_v5 = vld [vmem:[%s13609_s1 + $0x17cc] ss:$16 sps:$4 sm:$0xff]  }
 0x2c0   :  { %6463 = vmatprep.subr.bf16.mxu0 %v9969_v22  ;;  %7078 = vmatprep.subr.bf16.mxu1 %v9972_v23  ;;  %v12849_v22 = vld [vmem:[%s13610_s0 + $0x30] sm:$0xff] }
 0x2c1   :  { %v10051_v23 = vld [vmem:[%s13609_s1 + $0x17c0] ss:$16 sps:$4 sm:$0xff]  }
 0x2c2   :  { %6455 = vmatmul.mubr.bf16.vlgmr.msra.gmra.mrb[0].mxu0 %v220_v26  ;;  %7070 = vmatmul.mubr.bf16.vlgmr.msra.gmra.mrb[0].mxu1 %v220_v26  ;;  %v10059_v26 = vld [vmem:[%s13609_s1 + $0x17e4] ss:$16 sps:$4 sm:$0xff]  }
 0x2c3   :  { %6464 = vmatpush1.bf16.msra.mxu0 %v9967_v27  ;;  %7079 = vmatpush1.bf16.msra.mxu1 %v9970_v29  ;;  %v10062_v27 = vld [vmem:[%s13609_s1 + $0x17ec] ss:$16 sps:$4 sm:$0xff]   ;;  %v12865_v29 = vrot.slane %v12849_v22, %v10571_v49 }
 0x2c4   :  { %6465 = vmatprep.subr.bf16.mxu0 %v9975_v30  ;;  %7080 = vmatprep.subr.bf16.mxu1 %v9978_v13  ;;  %v10057_v30 = vld [vmem:[%s13609_s1 + $0x17e0] ss:$16 sps:$4 sm:$0xff]   ;;  %v10060_v13 = vld [vmem:[%s13609_s1 + $0x17e8] ss:$16 sps:$4 sm:$0xff]  }
 0x2c5   :  { %6495 = vmatprep.mubr.bf16.mxu0 %v223_v31  ;;  %7110 = vmatprep.mubr.bf16.mxu1 %v223_v31  ;;  %v10066_v31 = vld [vmem:[%s13609_s1 + $0x1804] ss:$16 sps:$4 sm:$0xff]  }
 0x2c7   :  { %6466 = vmatpush1.bf16.msra.mxu0 %v9973_v33  ;;  %7081 = vmatpush1.bf16.msra.mxu1 %v9976_v25  ;;  %v10069_v33 = vld [vmem:[%s13609_s1 + $0x180c] ss:$16 sps:$4 sm:$0xff]   ;;  %v160_v25 = vcombine.high %v12865_v29, %v12865_v29 }
 0x2c8   :  { %6467 = vmatprep.subr.bf16.mxu0 %v9981_v34  ;;  %7082 = vmatprep.subr.bf16.mxu1 %v9984_v35  ;;  %v222_v34 = vpack.c.bf16 %v12660_v20, %v12660_v20  ;;  %v10064_v35 = vld [vmem:[%s13609_s1 + $0x1800] ss:$16 sps:$4 sm:$0xff]   ;;  %v10075_v20 = vld [vmem:[%s13609_s1 + $0x182c] ss:$16 sps:$4 sm:$0xff]  }
 0x2cb   :  { %6468 = vmatpush1.bf16.msra.mxu0 %v9979_v36  ;;  %7083 = vmatpush1.bf16.msra.mxu1 %v9982_v37  ;;  %v10067_v36 = vld [vmem:[%s13609_s1 + $0x1808] ss:$16 sps:$4 sm:$0xff]   ;;  %v10072_v37 = vld [vmem:[%s13609_s1 + $0x1824] ss:$16 sps:$4 sm:$0xff]  }
 0x2cc   :  { %6469 = vmatprep.subr.bf16.mxu0 %v9987_v38  ;;  %7084 = vmatprep.subr.bf16.mxu1 %v9990_v28  ;;  %v225_v38 = vpack.c.bf16 %v160_v25, %v160_v25  ;;  %v10070_v28 = vld [vmem:[%s13609_s1 + $0x1820] ss:$16 sps:$4 sm:$0xff]  }
 0x2cd   :  { %v10148_v25 = vld [vmem:[%s13609_s1 + $0x19c0] ss:$16 sps:$4 sm:$0xff]  }
 0x2cf   :  { %6470 = vmatpush1.bf16.msra.mxu0 %v9985_v40  ;;  %7085 = vmatpush1.bf16.msra.mxu1 %v9988_v41  ;;  %v10073_v40 = vld [vmem:[%s13609_s1 + $0x1828] ss:$16 sps:$4 sm:$0xff]   ;;  %v10078_v41 = vld [vmem:[%s13609_s1 + $0x1844] ss:$16 sps:$4 sm:$0xff]  }
 0x2d0   :  { %6471 = vmatprep.subr.bf16.mxu0 %v9993_v24  ;;  %7086 = vmatprep.subr.bf16.mxu1 %v9996_v44  ;;  %v10081_v24 = vld [vmem:[%s13609_s1 + $0x184c] ss:$16 sps:$4 sm:$0xff]   ;;  %v10076_v44 = vld [vmem:[%s13609_s1 + $0x1840] ss:$16 sps:$4 sm:$0xff]  }
 0x2d3   :  { %6472 = vmatpush1.bf16.msra.mxu0 %v9991_v45  ;;  %7087 = vmatpush1.bf16.msra.mxu1 %v9994_v46  ;;  %v10079_v45 = vld [vmem:[%s13609_s1 + $0x1848] ss:$16 sps:$4 sm:$0xff]   ;;  %v10084_v46 = vld [vmem:[%s13609_s1 + $0x1864] ss:$16 sps:$4 sm:$0xff]  }
 0x2d4   :  { %6473 = vmatprep.subr.bf16.mxu0 %v9999_v48  ;;  %7088 = vmatprep.subr.bf16.mxu1 %v10002_v32  ;;  %v10087_v48 = vld [vmem:[%s13609_s1 + $0x186c] ss:$16 sps:$4 sm:$0xff]   ;;  %v10082_v32 = vld [vmem:[%s13609_s1 + $0x1860] ss:$16 sps:$4 sm:$0xff]  }
 0x2d7   :  { %6474 = vmatpush1.bf16.msra.mxu0 %v9997_v50  ;;  %7089 = vmatpush1.bf16.msra.mxu1 %v10000_v51  ;;  %v10085_v50 = vld [vmem:[%s13609_s1 + $0x1868] ss:$16 sps:$4 sm:$0xff]   ;;  %v10090_v51 = vld [vmem:[%s13609_s1 + $0x1884] ss:$16 sps:$4 sm:$0xff]  }
 0x2d8   :  { %6475 = vmatprep.subr.bf16.mxu0 %v10005_v52  ;;  %7090 = vmatprep.subr.bf16.mxu1 %v10008_v53  ;;  %v10093_v52 = vld [vmem:[%s13609_s1 + $0x188c] ss:$16 sps:$4 sm:$0xff]   ;;  %v10088_v53 = vld [vmem:[%s13609_s1 + $0x1880] ss:$16 sps:$4 sm:$0xff]  }
 0x2db   :  { %6476 = vmatpush1.bf16.msra.mxu0 %v10003_v54  ;;  %7091 = vmatpush1.bf16.msra.mxu1 %v10006_v42  ;;  %v10091_v54 = vld [vmem:[%s13609_s1 + $0x1888] ss:$16 sps:$4 sm:$0xff]   ;;  %v10096_v42 = vld [vmem:[%s13609_s1 + $0x18a4] ss:$16 sps:$4 sm:$0xff]  }
 0x2dc   :  { %6477 = vmatprep.subr.bf16.mxu0 %v10011_v56  ;;  %7092 = vmatprep.subr.bf16.mxu1 %v10014_v39  ;;  %v10099_v56 = vld [vmem:[%s13609_s1 + $0x18ac] ss:$16 sps:$4 sm:$0xff]   ;;  %v10094_v39 = vld [vmem:[%s13609_s1 + $0x18a0] ss:$16 sps:$4 sm:$0xff]  }
 0x2df   :  { %6478 = vmatpush1.bf16.msra.mxu0 %v10009_v58  ;;  %7093 = vmatpush1.bf16.msra.mxu1 %v10012_v59  ;;  %v10097_v58 = vld [vmem:[%s13609_s1 + $0x18a8] ss:$16 sps:$4 sm:$0xff]   ;;  %v10102_v59 = vld [vmem:[%s13609_s1 + $0x18c4] ss:$16 sps:$4 sm:$0xff]  }
 0x2e0   :  { %6479 = vmatprep.subr.bf16.mxu0 %v10017_v60  ;;  %7094 = vmatprep.subr.bf16.mxu1 %v10020_v61  ;;  %v10105_v60 = vld [vmem:[%s13609_s1 + $0x18cc] ss:$16 sps:$4 sm:$0xff]   ;;  %v10100_v61 = vld [vmem:[%s13609_s1 + $0x18c0] ss:$16 sps:$4 sm:$0xff]  }
 0x2e3   :  { %6480 = vmatpush1.bf16.msra.mxu0 %v10015_v63  ;;  %7095 = vmatpush1.bf16.msra.mxu1 %v10018_v47  ;;  %v10103_v63 = vld [vmem:[%s13609_s1 + $0x18c8] ss:$16 sps:$4 sm:$0xff]   ;;  %v10108_v47 = vld [vmem:[%s13609_s1 + $0x18e4] ss:$16 sps:$4 sm:$0xff]  }
 0x2e4   :  { %6481 = vmatprep.subr.bf16.mxu0 %v10023_v0  ;;  %7096 = vmatprep.subr.bf16.mxu1 %v10026_v1  ;;  %v10111_v0 = vld [vmem:[%s13609_s1 + $0x18ec] ss:$16 sps:$4 sm:$0xff]   ;;  %v10106_v1 = vld [vmem:[%s13609_s1 + $0x18e0] ss:$16 sps:$4 sm:$0xff]  }
 0x2e7   :  { %6482 = vmatpush1.bf16.msra.mxu0 %v10021_v2  ;;  %7097 = vmatpush1.bf16.msra.mxu1 %v10024_v3  ;;  %v10109_v2 = vld [vmem:[%s13609_s1 + $0x18e8] ss:$16 sps:$4 sm:$0xff]   ;;  %v10114_v3 = vld [vmem:[%s13609_s1 + $0x1904] ss:$16 sps:$4 sm:$0xff]  }
 0x2e8   :  { %6483 = vmatprep.subr.bf16.mxu0 %v10029_v4  ;;  %7098 = vmatprep.subr.bf16.mxu1 %v10032_v57  ;;  %v10117_v4 = vld [vmem:[%s13609_s1 + $0x190c] ss:$16 sps:$4 sm:$0xff]   ;;  %v10112_v57 = vld [vmem:[%s13609_s1 + $0x1900] ss:$16 sps:$4 sm:$0xff]  }
 0x2eb   :  { %6484 = vmatpush1.bf16.msra.mxu0 %v10027_v6  ;;  %7099 = vmatpush1.bf16.msra.mxu1 %v10030_v55  ;;  %v10115_v6 = vld [vmem:[%s13609_s1 + $0x1908] ss:$16 sps:$4 sm:$0xff]   ;;  %v10120_v55 = vld [vmem:[%s13609_s1 + $0x1924] ss:$16 sps:$4 sm:$0xff]  }
 0x2ec   :  { %6485 = vmatprep.subr.bf16.mxu0 %v10035_v8  ;;  %7100 = vmatprep.subr.bf16.mxu1 %v10038_v10  ;;  %v10123_v8 = vld [vmem:[%s13609_s1 + $0x192c] ss:$16 sps:$4 sm:$0xff]   ;;  %v10118_v10 = vld [vmem:[%s13609_s1 + $0x1920] ss:$16 sps:$4 sm:$0xff]  }
 0x2ef   :  { %6486 = vmatpush1.bf16.msra.mxu0 %v10033_v11  ;;  %7101 = vmatpush1.bf16.msra.mxu1 %v10036_v12  ;;  %v10121_v11 = vld [vmem:[%s13609_s1 + $0x1928] ss:$16 sps:$4 sm:$0xff]   ;;  %v10126_v12 = vld [vmem:[%s13609_s1 + $0x1944] ss:$16 sps:$4 sm:$0xff]  }
 0x2f0   :  { %6487 = vmatprep.subr.bf16.mxu0 %v10041_v14  ;;  %7102 = vmatprep.subr.bf16.mxu1 %v10044_v62  ;;  %v10129_v14 = vld [vmem:[%s13609_s1 + $0x194c] ss:$16 sps:$4 sm:$0xff]   ;;  %v10124_v62 = vld [vmem:[%s13609_s1 + $0x1940] ss:$16 sps:$4 sm:$0xff]  }
 0x2f3   :  { %6488 = vmatpush1.bf16.msra.mxu0 %v10039_v15  ;;  %7103 = vmatpush1.bf16.msra.mxu1 %v10042_v16  ;;  %v10127_v15 = vld [vmem:[%s13609_s1 + $0x1948] ss:$16 sps:$4 sm:$0xff]   ;;  %v10132_v16 = vld [vmem:[%s13609_s1 + $0x1964] ss:$16 sps:$4 sm:$0xff]  }
 0x2f4   :  { %6489 = vmatprep.subr.bf16.mxu0 %v10047_v17  ;;  %7104 = vmatprep.subr.bf16.mxu1 %v10050_v18  ;;  %v10135_v17 = vld [vmem:[%s13609_s1 + $0x196c] ss:$16 sps:$4 sm:$0xff]   ;;  %v10130_v18 = vld [vmem:[%s13609_s1 + $0x1960] ss:$16 sps:$4 sm:$0xff]  }
 0x2f7   :  { %6490 = vmatpush1.bf16.msra.mxu0 %v10045_v19  ;;  %7105 = vmatpush1.bf16.msra.mxu1 %v10048_v7  ;;  %v10133_v19 = vld [vmem:[%s13609_s1 + $0x1968] ss:$16 sps:$4 sm:$0xff]   ;;  %v10138_v7 = vld [vmem:[%s13609_s1 + $0x1984] ss:$16 sps:$4 sm:$0xff]  }
 0x2f8   :  { %6491 = vmatprep.subr.bf16.mxu0 %v10053_v21  ;;  %7106 = vmatprep.subr.bf16.mxu1 %v10056_v5  ;;  %v10141_v21 = vld [vmem:[%s13609_s1 + $0x198c] ss:$16 sps:$4 sm:$0xff]   ;;  %v10136_v5 = vld [vmem:[%s13609_s1 + $0x1980] ss:$16 sps:$4 sm:$0xff]  }
 0x2fb   :  { %6492 = vmatpush1.bf16.msra.mxu0 %v10051_v23  ;;  %7107 = vmatpush1.bf16.msra.mxu1 %v10054_v9  ;;  %v10139_v23 = vld [vmem:[%s13609_s1 + $0x1988] ss:$16 sps:$4 sm:$0xff]   ;;  %v10144_v9 = vld [vmem:[%s13609_s1 + $0x19a4] ss:$16 sps:$4 sm:$0xff]  }
 0x2fc   :  { %6493 = vmatprep.subr.bf16.mxu0 %v10059_v26  ;;  %7108 = vmatprep.subr.bf16.mxu1 %v10062_v27  ;;  %v10147_v26 = vld [vmem:[%s13609_s1 + $0x19ac] ss:$16 sps:$4 sm:$0xff]   ;;  %v10142_v27 = vld [vmem:[%s13609_s1 + $0x19a0] ss:$16 sps:$4 sm:$0xff]  }
 0x2ff   :  { %6494 = vmatpush1.bf16.msra.mxu0 %v10057_v30  ;;  %7109 = vmatpush1.bf16.msra.mxu1 %v10060_v13  ;;  %v10145_v30 = vld [vmem:[%s13609_s1 + $0x19a8] ss:$16 sps:$4 sm:$0xff]   ;;  %v10150_v13 = vld [vmem:[%s13609_s1 + $0x19c4] ss:$16 sps:$4 sm:$0xff]  }
 0x300   :  { %6504 = vmatprep.subr.bf16.mxu0 %v10066_v31  ;;  %7119 = vmatprep.subr.bf16.mxu1 %v10069_v33  ;;  %v10153_v31 = vld [vmem:[%s13609_s1 + $0x19cc] ss:$16 sps:$4 sm:$0xff]   ;;  %v145_v33 = vcombine.high %v12849_v22, %v12849_v22 }
 0x301   :  { %v10159_v22 = vld [vmem:[%s13609_s1 + $0x19ec] ss:$16 sps:$4 sm:$0xff]  }
 0x302   :  { %6496 = vmatmul.mubr.bf16.vlgmr.msra.gmra.mrb[0].mxu0 %v222_v34  ;;  %7111 = vmatmul.mubr.bf16.vlgmr.msra.gmra.mrb[0].mxu1 %v222_v34  ;;  %v10151_v34 = vld [vmem:[%s13609_s1 + $0x19c8] ss:$16 sps:$4 sm:$0xff]  }
 0x303   :  { %6505 = vmatpush1.bf16.msra.mxu0 %v10064_v35  ;;  %7120 = vmatpush1.bf16.msra.mxu1 %v10067_v36  ;;  %v10156_v35 = vld [vmem:[%s13609_s1 + $0x19e4] ss:$16 sps:$4 sm:$0xff]   ;;  %v13066_v36 = vrot.slane %v145_v33, %v10571_v49  ;;  %v10165_v49 = vld [vmem:[%s13609_s1 + $0x1a0c] ss:$16 sps:$4 sm:$0xff]  }
 0x304   :  { %6506 = vmatprep.subr.bf16.mxu0 %v10072_v37  ;;  %7121 = vmatprep.subr.bf16.mxu1 %v10075_v20  ;;  %v10154_v37 = vld [vmem:[%s13609_s1 + $0x19e0] ss:$16 sps:$4 sm:$0xff]   ;;  %v10157_v20 = vld [vmem:[%s13609_s1 + $0x19e8] ss:$16 sps:$4 sm:$0xff]   ;;  %v10240_v33 = vld [vmem:[%s13609_s1 + $0x1ba4] ss:$16 sps:$4 sm:$0xff]  }
 0x305   :  { %6536 = vmatprep.mubr.bf16.mxu0 %v225_v38  ;;  %7151 = vmatprep.mubr.bf16.mxu1 %v225_v38  ;;  %v10162_v38 = vld [vmem:[%s13609_s1 + $0x1a04] ss:$16 sps:$4 sm:$0xff]  }
 0x307   :  { %6507 = vmatpush1.bf16.msra.mxu0 %v10070_v28  ;;  %7122 = vmatpush1.bf16.msra.mxu1 %v10073_v40  ;;  %v161_v28 = vcombine.high %v13066_v36, %v13066_v36  ;;  %v224_v40 = vpack.c.bf16 %v12865_v29, %v12865_v29  ;;  %v10171_v29 = vld [vmem:[%s13609_s1 + $0x1a2c] ss:$16 sps:$4 sm:$0xff]  }
 0x308   :  { %6508 = vmatprep.subr.bf16.mxu0 %v10078_v41  ;;  %7123 = vmatprep.subr.bf16.mxu1 %v10081_v24  ;;  %v10160_v41 = vld [vmem:[%s13609_s1 + $0x1a00] ss:$16 sps:$4 sm:$0xff]   ;;  %v10163_v24 = vld [vmem:[%s13609_s1 + $0x1a08] ss:$16 sps:$4 sm:$0xff]  }
 0x30b   :  { %6509 = vmatpush1.bf16.msra.mxu0 %v10076_v44  ;;  %7124 = vmatpush1.bf16.msra.mxu1 %v10079_v45  ;;  %v10168_v44 = vld [vmem:[%s13609_s1 + $0x1a24] ss:$16 sps:$4 sm:$0xff]   ;;  %v227_v45 = vpack.c.bf16 %v161_v28, %v161_v28  ;;  %v10255_v28 = vld [vmem:[%s13609_s1 + $0x1bec] ss:$16 sps:$4 sm:$0xff]  }
 0x30c   :  { %6510 = vmatprep.subr.bf16.mxu0 %v10084_v46  ;;  %7125 = vmatprep.subr.bf16.mxu1 %v10087_v48  ;;  %v10166_v46 = vld [vmem:[%s13609_s1 + $0x1a20] ss:$16 sps:$4 sm:$0xff]   ;;  %v10169_v48 = vld [vmem:[%s13609_s1 + $0x1a28] ss:$16 sps:$4 sm:$0xff]  }
 0x30f   :  { %6511 = vmatpush1.bf16.msra.mxu0 %v10082_v32  ;;  %7126 = vmatpush1.bf16.msra.mxu1 %v10085_v50  ;;  %v10174_v32 = vld [vmem:[%s13609_s1 + $0x1a44] ss:$16 sps:$4 sm:$0xff]   ;;  %v10177_v50 = vld [vmem:[%s13609_s1 + $0x1a4c] ss:$16 sps:$4 sm:$0xff]  }
 0x310   :  { %6512 = vmatprep.subr.bf16.mxu0 %v10090_v51  ;;  %7127 = vmatprep.subr.bf16.mxu1 %v10093_v52  ;;  %v10172_v51 = vld [vmem:[%s13609_s1 + $0x1a40] ss:$16 sps:$4 sm:$0xff]   ;;  %v10175_v52 = vld [vmem:[%s13609_s1 + $0x1a48] ss:$16 sps:$4 sm:$0xff]  }
 0x313   :  { %6513 = vmatpush1.bf16.msra.mxu0 %v10088_v53  ;;  %7128 = vmatpush1.bf16.msra.mxu1 %v10091_v54  ;;  %v10180_v53 = vld [vmem:[%s13609_s1 + $0x1a64] ss:$16 sps:$4 sm:$0xff]   ;;  %v10183_v54 = vld [vmem:[%s13609_s1 + $0x1a6c] ss:$16 sps:$4 sm:$0xff]  }
 0x314   :  { %6514 = vmatprep.subr.bf16.mxu0 %v10096_v42  ;;  %7129 = vmatprep.subr.bf16.mxu1 %v10099_v56  ;;  %v10178_v42 = vld [vmem:[%s13609_s1 + $0x1a60] ss:$16 sps:$4 sm:$0xff]   ;;  %v10181_v56 = vld [vmem:[%s13609_s1 + $0x1a68] ss:$16 sps:$4 sm:$0xff]  }
 0x317   :  { %6515 = vmatpush1.bf16.msra.mxu0 %v10094_v39  ;;  %7130 = vmatpush1.bf16.msra.mxu1 %v10097_v58  ;;  %v10186_v39 = vld [vmem:[%s13609_s1 + $0x1a84] ss:$16 sps:$4 sm:$0xff]   ;;  %v10189_v58 = vld [vmem:[%s13609_s1 + $0x1a8c] ss:$16 sps:$4 sm:$0xff]  }
 0x318   :  { %6516 = vmatprep.subr.bf16.mxu0 %v10102_v59  ;;  %7131 = vmatprep.subr.bf16.mxu1 %v10105_v60  ;;  %v10184_v59 = vld [vmem:[%s13609_s1 + $0x1a80] ss:$16 sps:$4 sm:$0xff]   ;;  %v10187_v60 = vld [vmem:[%s13609_s1 + $0x1a88] ss:$16 sps:$4 sm:$0xff]  }
 0x31b   :  { %6517 = vmatpush1.bf16.msra.mxu0 %v10100_v61  ;;  %7132 = vmatpush1.bf16.msra.mxu1 %v10103_v63  ;;  %v10192_v61 = vld [vmem:[%s13609_s1 + $0x1aa4] ss:$16 sps:$4 sm:$0xff]   ;;  %v10195_v63 = vld [vmem:[%s13609_s1 + $0x1aac] ss:$16 sps:$4 sm:$0xff]  }
 0x31c   :  { %6518 = vmatprep.subr.bf16.mxu0 %v10108_v47  ;;  %7133 = vmatprep.subr.bf16.mxu1 %v10111_v0  ;;  %v10190_v47 = vld [vmem:[%s13609_s1 + $0x1aa0] ss:$16 sps:$4 sm:$0xff]   ;;  %v10193_v0 = vld [vmem:[%s13609_s1 + $0x1aa8] ss:$16 sps:$4 sm:$0xff]  }
 0x31f   :  { %6519 = vmatpush1.bf16.msra.mxu0 %v10106_v1  ;;  %7134 = vmatpush1.bf16.msra.mxu1 %v10109_v2  ;;  %v10198_v1 = vld [vmem:[%s13609_s1 + $0x1ac4] ss:$16 sps:$4 sm:$0xff]   ;;  %v10201_v2 = vld [vmem:[%s13609_s1 + $0x1acc] ss:$16 sps:$4 sm:$0xff]  }
 0x320   :  { %6520 = vmatprep.subr.bf16.mxu0 %v10114_v3  ;;  %7135 = vmatprep.subr.bf16.mxu1 %v10117_v4  ;;  %v10196_v3 = vld [vmem:[%s13609_s1 + $0x1ac0] ss:$16 sps:$4 sm:$0xff]   ;;  %v10199_v4 = vld [vmem:[%s13609_s1 + $0x1ac8] ss:$16 sps:$4 sm:$0xff]  }
 0x323   :  { %6521 = vmatpush1.bf16.msra.mxu0 %v10112_v57  ;;  %7136 = vmatpush1.bf16.msra.mxu1 %v10115_v6  ;;  %v10204_v57 = vld [vmem:[%s13609_s1 + $0x1ae4] ss:$16 sps:$4 sm:$0xff]   ;;  %v10207_v6 = vld [vmem:[%s13609_s1 + $0x1aec] ss:$16 sps:$4 sm:$0xff]  }
 0x324   :  { %6522 = vmatprep.subr.bf16.mxu0 %v10120_v55  ;;  %7137 = vmatprep.subr.bf16.mxu1 %v10123_v8  ;;  %v10202_v55 = vld [vmem:[%s13609_s1 + $0x1ae0] ss:$16 sps:$4 sm:$0xff]   ;;  %v10205_v8 = vld [vmem:[%s13609_s1 + $0x1ae8] ss:$16 sps:$4 sm:$0xff]  }
 0x327   :  { %6523 = vmatpush1.bf16.msra.mxu0 %v10118_v10  ;;  %7138 = vmatpush1.bf16.msra.mxu1 %v10121_v11  ;;  %v10210_v10 = vld [vmem:[%s13609_s1 + $0x1b04] ss:$16 sps:$4 sm:$0xff]   ;;  %v10213_v11 = vld [vmem:[%s13609_s1 + $0x1b0c] ss:$16 sps:$4 sm:$0xff]  }
 0x328   :  { %6524 = vmatprep.subr.bf16.mxu0 %v10126_v12  ;;  %7139 = vmatprep.subr.bf16.mxu1 %v10129_v14  ;;  %v10208_v12 = vld [vmem:[%s13609_s1 + $0x1b00] ss:$16 sps:$4 sm:$0xff]   ;;  %v10211_v14 = vld [vmem:[%s13609_s1 + $0x1b08] ss:$16 sps:$4 sm:$0xff]  }
 0x32b   :  { %6525 = vmatpush1.bf16.msra.mxu0 %v10124_v62  ;;  %7140 = vmatpush1.bf16.msra.mxu1 %v10127_v15  ;;  %v10216_v62 = vld [vmem:[%s13609_s1 + $0x1b24] ss:$16 sps:$4 sm:$0xff]   ;;  %v10219_v15 = vld [vmem:[%s13609_s1 + $0x1b2c] ss:$16 sps:$4 sm:$0xff]  }
 0x32c   :  { %6526 = vmatprep.subr.bf16.mxu0 %v10132_v16  ;;  %7141 = vmatprep.subr.bf16.mxu1 %v10135_v17  ;;  %v10214_v16 = vld [vmem:[%s13609_s1 + $0x1b20] ss:$16 sps:$4 sm:$0xff]   ;;  %v10217_v17 = vld [vmem:[%s13609_s1 + $0x1b28] ss:$16 sps:$4 sm:$0xff]  }
 0x32f   :  { %6527 = vmatpush1.bf16.msra.mxu0 %v10130_v18  ;;  %7142 = vmatpush1.bf16.msra.mxu1 %v10133_v19  ;;  %v10222_v18 = vld [vmem:[%s13609_s1 + $0x1b44] ss:$16 sps:$4 sm:$0xff]   ;;  %v10225_v19 = vld [vmem:[%s13609_s1 + $0x1b4c] ss:$16 sps:$4 sm:$0xff]  }
 0x330   :  { %6528 = vmatprep.subr.bf16.mxu0 %v10138_v7  ;;  %7143 = vmatprep.subr.bf16.mxu1 %v10141_v21  ;;  %v10220_v7 = vld [vmem:[%s13609_s1 + $0x1b40] ss:$16 sps:$4 sm:$0xff]   ;;  %v10223_v21 = vld [vmem:[%s13609_s1 + $0x1b48] ss:$16 sps:$4 sm:$0xff]  }
 0x333   :  { %6529 = vmatpush1.bf16.msra.mxu0 %v10136_v5  ;;  %7144 = vmatpush1.bf16.msra.mxu1 %v10139_v23  ;;  %v10228_v5 = vld [vmem:[%s13609_s1 + $0x1b64] ss:$16 sps:$4 sm:$0xff]   ;;  %v10231_v23 = vld [vmem:[%s13609_s1 + $0x1b6c] ss:$16 sps:$4 sm:$0xff]  }
 0x334   :  { %6530 = vmatprep.subr.bf16.mxu0 %v10144_v9  ;;  %7145 = vmatprep.subr.bf16.mxu1 %v10147_v26  ;;  %v10226_v9 = vld [vmem:[%s13609_s1 + $0x1b60] ss:$16 sps:$4 sm:$0xff]   ;;  %v10229_v26 = vld [vmem:[%s13609_s1 + $0x1b68] ss:$16 sps:$4 sm:$0xff]  }
 0x337   :  { %6531 = vmatpush1.bf16.msra.mxu0 %v10142_v27  ;;  %7146 = vmatpush1.bf16.msra.mxu1 %v10145_v30  ;;  %v10234_v27 = vld [vmem:[%s13609_s1 + $0x1b84] ss:$16 sps:$4 sm:$0xff]   ;;  %v10237_v30 = vld [vmem:[%s13609_s1 + $0x1b8c] ss:$16 sps:$4 sm:$0xff]  }
 0x338   :  { %6532 = vmatprep.subr.bf16.mxu0 %v10150_v13  ;;  %7147 = vmatprep.subr.bf16.mxu1 %v10153_v31  ;;  %v10232_v13 = vld [vmem:[%s13609_s1 + $0x1b80] ss:$16 sps:$4 sm:$0xff]   ;;  %v10235_v31 = vld [vmem:[%s13609_s1 + $0x1b88] ss:$16 sps:$4 sm:$0xff]  }
 0x33b   :  { %6533 = vmatpush1.bf16.msra.mxu0 %v10148_v25  ;;  %7148 = vmatpush1.bf16.msra.mxu1 %v10151_v34  ;;  %v10243_v25 = vld [vmem:[%s13609_s1 + $0x1bac] ss:$16 sps:$4 sm:$0xff]   ;;  %v10238_v34 = vld [vmem:[%s13609_s1 + $0x1ba0] ss:$16 sps:$4 sm:$0xff]  }
 0x33c   :  { %6534 = vmatprep.subr.bf16.mxu0 %v10156_v35  ;;  %7149 = vmatprep.subr.bf16.mxu1 %v10159_v22  ;;  %v10241_v35 = vld [vmem:[%s13609_s1 + $0x1ba8] ss:$16 sps:$4 sm:$0xff]   ;;  %v10246_v22 = vld [vmem:[%s13609_s1 + $0x1bc4] ss:$16 sps:$4 sm:$0xff]  }
 0x33f   :  { %6535 = vmatpush1.bf16.msra.mxu0 %v10154_v37  ;;  %7150 = vmatpush1.bf16.msra.mxu1 %v10157_v20  ;;  %v10249_v37 = vld [vmem:[%s13609_s1 + $0x1bcc] ss:$16 sps:$4 sm:$0xff]   ;;  %v10244_v20 = vld [vmem:[%s13609_s1 + $0x1bc0] ss:$16 sps:$4 sm:$0xff]  }
 0x340   :  { %6545 = vmatprep.subr.bf16.mxu0 %v10162_v38  ;;  %7160 = vmatprep.subr.bf16.mxu1 %v10165_v49  ;;  %v10247_v38 = vld [vmem:[%s13609_s1 + $0x1bc8] ss:$16 sps:$4 sm:$0xff]   ;;  %v10252_v49 = vld [vmem:[%s13609_s1 + $0x1be4] ss:$16 sps:$4 sm:$0xff]  }
 0x342   :  { %6537 = vmatmul.mubr.bf16.vlgmr.msra.gmra.mrb[0].mxu0 %v224_v40  ;;  %7152 = vmatmul.mubr.bf16.vlgmr.msra.gmra.mrb[0].mxu1 %v224_v40  ;;  %v13267_v40 = vld.sshfl [vmem:[%s13610_s0 + $0x38] sm:$0x33 pattern:$0x76325410] }
 0x343   :  { %6546 = vmatpush1.bf16.msra.mxu0 %v10160_v41  ;;  %7161 = vmatpush1.bf16.msra.mxu1 %v10163_v24  ;;  %v10250_v41 = vld [vmem:[%s13609_s1 + $0x1be0] ss:$16 sps:$4 sm:$0xff]   ;;  %v10253_v24 = vld [vmem:[%s13609_s1 + $0x1be8] ss:$16 sps:$4 sm:$0xff]  }
 0x344   :  { %6547 = vmatprep.subr.bf16.mxu0 %v10168_v44  ;;  %7162 = vmatprep.subr.bf16.mxu1 %v10171_v29  ;;  %v10259_v44 = vld [vmem:[%s13609_s1 + $0x1c04] ss:$16 sps:$4 sm:$0xff]   ;;  %v10262_v29 = vld [vmem:[%s13609_s1 + $0x1c0c] ss:$16 sps:$4 sm:$0xff]  }
 0x345   :  { %6577 = vmatprep.mubr.bf16.mxu0 %v227_v45  ;;  %7192 = vmatprep.mubr.bf16.mxu1 %v227_v45  ;;  %v169_v45 = vcombine.high %v13267_v40, %v13267_v40 }
 0x347   :  { %6548 = vmatpush1.bf16.msra.mxu0 %v10166_v46  ;;  %7163 = vmatpush1.bf16.msra.mxu1 %v10169_v48  ;;  %v226_v46 = vpack.c.bf16 %v13066_v36, %v13066_v36  ;;  %v10257_v48 = vld [vmem:[%s13609_s1 + $0x1c00] ss:$16 sps:$4 sm:$0xff]   ;;  %v10268_v36 = vld [vmem:[%s13609_s1 + $0x1c2c] ss:$16 sps:$4 sm:$0xff]  }
 0x348   :  { %6549 = vmatprep.subr.bf16.mxu0 %v10174_v32  ;;  %7164 = vmatprep.subr.bf16.mxu1 %v10177_v50  ;;  %v10260_v32 = vld [vmem:[%s13609_s1 + $0x1c08] ss:$16 sps:$4 sm:$0xff]   ;;  %v10265_v50 = vld [vmem:[%s13609_s1 + $0x1c24] ss:$16 sps:$4 sm:$0xff]  }
 0x34b   :  { %6550 = vmatpush1.bf16.msra.mxu0 %v10172_v51  ;;  %7165 = vmatpush1.bf16.msra.mxu1 %v10175_v52  ;;  %v229_v51 = vpack.c.bf16 %v169_v45, %v169_v45  ;;  %v10263_v52 = vld [vmem:[%s13609_s1 + $0x1c20] ss:$16 sps:$4 sm:$0xff]   ;;  %v10352_v45 = vld [vmem:[%s13609_s1 + $0x1dec] ss:$16 sps:$4 sm:$0xff]  }
 0x34c   :  { %6551 = vmatprep.subr.bf16.mxu0 %v10180_v53  ;;  %7166 = vmatprep.subr.bf16.mxu1 %v10183_v54  ;;  %v10266_v53 = vld [vmem:[%s13609_s1 + $0x1c28] ss:$16 sps:$4 sm:$0xff]   ;;  %v10271_v54 = vld [vmem:[%s13609_s1 + $0x1c44] ss:$16 sps:$4 sm:$0xff]  }
 0x34f   :  { %6552 = vmatpush1.bf16.msra.mxu0 %v10178_v42  ;;  %7167 = vmatpush1.bf16.msra.mxu1 %v10181_v56  ;;  %v10274_v42 = vld [vmem:[%s13609_s1 + $0x1c4c] ss:$16 sps:$4 sm:$0xff]   ;;  %v10269_v56 = vld [vmem:[%s13609_s1 + $0x1c40] ss:$16 sps:$4 sm:$0xff]  }
 0x350   :  { %6553 = vmatprep.subr.bf16.mxu0 %v10186_v39  ;;  %7168 = vmatprep.subr.bf16.mxu1 %v10189_v58  ;;  %v10272_v39 = vld [vmem:[%s13609_s1 + $0x1c48] ss:$16 sps:$4 sm:$0xff]   ;;  %v10277_v58 = vld [vmem:[%s13609_s1 + $0x1c64] ss:$16 sps:$4 sm:$0xff]  }
 0x353   :  { %6554 = vmatpush1.bf16.msra.mxu0 %v10184_v59  ;;  %7169 = vmatpush1.bf16.msra.mxu1 %v10187_v60  ;;  %v10280_v59 = vld [vmem:[%s13609_s1 + $0x1c6c] ss:$16 sps:$4 sm:$0xff]   ;;  %v10275_v60 = vld [vmem:[%s13609_s1 + $0x1c60] ss:$16 sps:$4 sm:$0xff]  }
 0x354   :  { %6555 = vmatprep.subr.bf16.mxu0 %v10192_v61  ;;  %7170 = vmatprep.subr.bf16.mxu1 %v10195_v63  ;;  %v10278_v61 = vld [vmem:[%s13609_s1 + $0x1c68] ss:$16 sps:$4 sm:$0xff]   ;;  %v10283_v63 = vld [vmem:[%s13609_s1 + $0x1c84] ss:$16 sps:$4 sm:$0xff]  }
 0x357   :  { %6556 = vmatpush1.bf16.msra.mxu0 %v10190_v47  ;;  %7171 = vmatpush1.bf16.msra.mxu1 %v10193_v0  ;;  %v10286_v47 = vld [vmem:[%s13609_s1 + $0x1c8c] ss:$16 sps:$4 sm:$0xff]   ;;  %v10281_v0 = vld [vmem:[%s13609_s1 + $0x1c80] ss:$16 sps:$4 sm:$0xff]  }
 0x358   :  { %6557 = vmatprep.subr.bf16.mxu0 %v10198_v1  ;;  %7172 = vmatprep.subr.bf16.mxu1 %v10201_v2  ;;  %v10284_v1 = vld [vmem:[%s13609_s1 + $0x1c88] ss:$16 sps:$4 sm:$0xff]   ;;  %v10289_v2 = vld [vmem:[%s13609_s1 + $0x1ca4] ss:$16 sps:$4 sm:$0xff]  }
 0x35b   :  { %6558 = vmatpush1.bf16.msra.mxu0 %v10196_v3  ;;  %7173 = vmatpush1.bf16.msra.mxu1 %v10199_v4  ;;  %v10292_v3 = vld [vmem:[%s13609_s1 + $0x1cac] ss:$16 sps:$4 sm:$0xff]   ;;  %v10287_v4 = vld [vmem:[%s13609_s1 + $0x1ca0] ss:$16 sps:$4 sm:$0xff]  }
 0x35c   :  { %6559 = vmatprep.subr.bf16.mxu0 %v10204_v57  ;;  %7174 = vmatprep.subr.bf16.mxu1 %v10207_v6  ;;  %v10290_v57 = vld [vmem:[%s13609_s1 + $0x1ca8] ss:$16 sps:$4 sm:$0xff]   ;;  %v10295_v6 = vld [vmem:[%s13609_s1 + $0x1cc4] ss:$16 sps:$4 sm:$0xff]  }
 0x35f   :  { %6560 = vmatpush1.bf16.msra.mxu0 %v10202_v55  ;;  %7175 = vmatpush1.bf16.msra.mxu1 %v10205_v8  ;;  %v10298_v55 = vld [vmem:[%s13609_s1 + $0x1ccc] ss:$16 sps:$4 sm:$0xff]   ;;  %v10293_v8 = vld [vmem:[%s13609_s1 + $0x1cc0] ss:$16 sps:$4 sm:$0xff]  }
 0x360   :  { %6561 = vmatprep.subr.bf16.mxu0 %v10210_v10  ;;  %7176 = vmatprep.subr.bf16.mxu1 %v10213_v11  ;;  %v10296_v10 = vld [vmem:[%s13609_s1 + $0x1cc8] ss:$16 sps:$4 sm:$0xff]   ;;  %v10301_v11 = vld [vmem:[%s13609_s1 + $0x1ce4] ss:$16 sps:$4 sm:$0xff]  }
 0x363   :  { %6562 = vmatpush1.bf16.msra.mxu0 %v10208_v12  ;;  %7177 = vmatpush1.bf16.msra.mxu1 %v10211_v14  ;;  %v10304_v12 = vld [vmem:[%s13609_s1 + $0x1cec] ss:$16 sps:$4 sm:$0xff]   ;;  %v10299_v14 = vld [vmem:[%s13609_s1 + $0x1ce0] ss:$16 sps:$4 sm:$0xff]  }
 0x364   :  { %6563 = vmatprep.subr.bf16.mxu0 %v10216_v62  ;;  %7178 = vmatprep.subr.bf16.mxu1 %v10219_v15  ;;  %v10302_v62 = vld [vmem:[%s13609_s1 + $0x1ce8] ss:$16 sps:$4 sm:$0xff]   ;;  %v10307_v15 = vld [vmem:[%s13609_s1 + $0x1d04] ss:$16 sps:$4 sm:$0xff]  }
 0x367   :  { %6564 = vmatpush1.bf16.msra.mxu0 %v10214_v16  ;;  %7179 = vmatpush1.bf16.msra.mxu1 %v10217_v17  ;;  %v10310_v16 = vld [vmem:[%s13609_s1 + $0x1d0c] ss:$16 sps:$4 sm:$0xff]   ;;  %v10305_v17 = vld [vmem:[%s13609_s1 + $0x1d00] ss:$16 sps:$4 sm:$0xff]  }
 0x368   :  { %6565 = vmatprep.subr.bf16.mxu0 %v10222_v18  ;;  %7180 = vmatprep.subr.bf16.mxu1 %v10225_v19  ;;  %v10308_v18 = vld [vmem:[%s13609_s1 + $0x1d08] ss:$16 sps:$4 sm:$0xff]   ;;  %v10313_v19 = vld [vmem:[%s13609_s1 + $0x1d24] ss:$16 sps:$4 sm:$0xff]  }
 0x36b   :  { %6566 = vmatpush1.bf16.msra.mxu0 %v10220_v7  ;;  %7181 = vmatpush1.bf16.msra.mxu1 %v10223_v21  ;;  %v10316_v7 = vld [vmem:[%s13609_s1 + $0x1d2c] ss:$16 sps:$4 sm:$0xff]   ;;  %v10311_v21 = vld [vmem:[%s13609_s1 + $0x1d20] ss:$16 sps:$4 sm:$0xff]  }
 0x36c   :  { %6567 = vmatprep.subr.bf16.mxu0 %v10228_v5  ;;  %7182 = vmatprep.subr.bf16.mxu1 %v10231_v23  ;;  %v10314_v5 = vld [vmem:[%s13609_s1 + $0x1d28] ss:$16 sps:$4 sm:$0xff]   ;;  %v10319_v23 = vld [vmem:[%s13609_s1 + $0x1d44] ss:$16 sps:$4 sm:$0xff]  }
 0x36f   :  { %6568 = vmatpush1.bf16.msra.mxu0 %v10226_v9  ;;  %7183 = vmatpush1.bf16.msra.mxu1 %v10229_v26  ;;  %v10322_v9 = vld [vmem:[%s13609_s1 + $0x1d4c] ss:$16 sps:$4 sm:$0xff]   ;;  %v10317_v26 = vld [vmem:[%s13609_s1 + $0x1d40] ss:$16 sps:$4 sm:$0xff]  }
 0x370   :  { %6569 = vmatprep.subr.bf16.mxu0 %v10234_v27  ;;  %7184 = vmatprep.subr.bf16.mxu1 %v10237_v30  ;;  %v10320_v27 = vld [vmem:[%s13609_s1 + $0x1d48] ss:$16 sps:$4 sm:$0xff]   ;;  %v10325_v30 = vld [vmem:[%s13609_s1 + $0x1d64] ss:$16 sps:$4 sm:$0xff]  }
 0x373   :  { %6570 = vmatpush1.bf16.msra.mxu0 %v10232_v13  ;;  %7185 = vmatpush1.bf16.msra.mxu1 %v10235_v31  ;;  %v10328_v13 = vld [vmem:[%s13609_s1 + $0x1d6c] ss:$16 sps:$4 sm:$0xff]   ;;  %v10323_v31 = vld [vmem:[%s13609_s1 + $0x1d60] ss:$16 sps:$4 sm:$0xff]  }
 0x374   :  { %6571 = vmatprep.subr.bf16.mxu0 %v10240_v33  ;;  %7186 = vmatprep.subr.bf16.mxu1 %v10243_v25  ;;  %v10326_v33 = vld [vmem:[%s13609_s1 + $0x1d68] ss:$16 sps:$4 sm:$0xff]   ;;  %v10331_v25 = vld [vmem:[%s13609_s1 + $0x1d84] ss:$16 sps:$4 sm:$0xff]  }
 0x377   :  { %6572 = vmatpush1.bf16.msra.mxu0 %v10238_v34  ;;  %7187 = vmatpush1.bf16.msra.mxu1 %v10241_v35  ;;  %v10334_v34 = vld [vmem:[%s13609_s1 + $0x1d8c] ss:$16 sps:$4 sm:$0xff]   ;;  %v10329_v35 = vld [vmem:[%s13609_s1 + $0x1d80] ss:$16 sps:$4 sm:$0xff]  }
 0x378   :  { %6573 = vmatprep.subr.bf16.mxu0 %v10246_v22  ;;  %7188 = vmatprep.subr.bf16.mxu1 %v10249_v37  ;;  %v10332_v22 = vld [vmem:[%s13609_s1 + $0x1d88] ss:$16 sps:$4 sm:$0xff]   ;;  %v10337_v37 = vld [vmem:[%s13609_s1 + $0x1da4] ss:$16 sps:$4 sm:$0xff]  }
 0x37b   :  { %6574 = vmatpush1.bf16.msra.mxu0 %v10244_v20  ;;  %7189 = vmatpush1.bf16.msra.mxu1 %v10247_v38  ;;  %v10340_v20 = vld [vmem:[%s13609_s1 + $0x1dac] ss:$16 sps:$4 sm:$0xff]   ;;  %v10335_v38 = vld [vmem:[%s13609_s1 + $0x1da0] ss:$16 sps:$4 sm:$0xff]  }
 0x37c   :  { %6575 = vmatprep.subr.bf16.mxu0 %v10252_v49  ;;  %7190 = vmatprep.subr.bf16.mxu1 %v10255_v28  ;;  %v10338_v49 = vld [vmem:[%s13609_s1 + $0x1da8] ss:$16 sps:$4 sm:$0xff]   ;;  %v10343_v28 = vld [vmem:[%s13609_s1 + $0x1dc4] ss:$16 sps:$4 sm:$0xff]  }
 0x37f   :  { %6576 = vmatpush1.bf16.msra.mxu0 %v10250_v41  ;;  %7191 = vmatpush1.bf16.msra.mxu1 %v10253_v24  ;;  %v10346_v41 = vld [vmem:[%s13609_s1 + $0x1dcc] ss:$16 sps:$4 sm:$0xff]   ;;  %v10341_v24 = vld [vmem:[%s13609_s1 + $0x1dc0] ss:$16 sps:$4 sm:$0xff]  }
 0x380   :  { %6586 = vmatprep.subr.bf16.mxu0 %v10259_v44  ;;  %7201 = vmatprep.subr.bf16.mxu1 %v10262_v29  ;;  %v10344_v44 = vld [vmem:[%s13609_s1 + $0x1dc8] ss:$16 sps:$4 sm:$0xff]   ;;  %v10349_v29 = vld [vmem:[%s13609_s1 + $0x1de4] ss:$16 sps:$4 sm:$0xff]  }
 0x382   :  { %6578 = vmatmul.mubr.bf16.vlgmr.msra.gmra.mrb[0].mxu0 %v226_v46  ;;  %7193 = vmatmul.mubr.bf16.vlgmr.msra.gmra.mrb[0].mxu1 %v226_v46  ;;  %v10347_v46 = vld [vmem:[%s13609_s1 + $0x1de0] ss:$16 sps:$4 sm:$0xff]  }
 0x383   :  { %6587 = vmatpush1.bf16.msra.mxu0 %v10257_v48  ;;  %7202 = vmatpush1.bf16.msra.mxu1 %v10260_v32  ;;  %v10350_v48 = vld [vmem:[%s13609_s1 + $0x1de8] ss:$16 sps:$4 sm:$0xff]   ;;  %v10353_v32 = vld [vmem:[%s13611_s3 + $0x40] sm:$0xff]  }
 0x384   :  { %6588 = vmatprep.subr.bf16.mxu0 %v10265_v50  ;;  %7203 = vmatprep.subr.bf16.mxu1 %v10268_v36  ;;  %v10354_v50 = vld [vmem:[%s13611_s3 + $0xc0] sm:$0xff]   ;;  %v228_v36 = vpack.c.bf16 %v13267_v40, %v13267_v40  ;;  %v10358_v40 = vld [vmem:[%s13611_s3 + $0xc8] sm:$0xff]  }
 0x385   :  { %6618 = vmatprep.mubr.bf16.mxu0 %v229_v51  ;;  %7233 = vmatprep.mubr.bf16.mxu1 %v229_v51  ;;  %v10355_v51 = vld [vmem:[%s13611_s3] sm:$0xff]  }
 0x387   :  { %6589 = vmatpush1.bf16.msra.mxu0 %v10263_v52  ;;  %7204 = vmatpush1.bf16.msra.mxu1 %v10266_v53  ;;  %v10356_v52 = vld [vmem:[%s13611_s3 + $0x80] sm:$0xff]   ;;  %v10357_v53 = vld [vmem:[%s13611_s3 + $0x48] sm:$0xff]  }
 0x388   :  { %6590 = vmatprep.subr.bf16.mxu0 %v10271_v54  ;;  %7205 = vmatprep.subr.bf16.mxu1 %v10274_v42  ;;  %v10359_v54 = vld [vmem:[%s13611_s3 + $0x8] sm:$0xff]  }
 0x389   :  { %v10360_v42 = vld [vmem:[%s13611_s3 + $0x88] sm:$0xff]  }
 0x38b   :  { %6591 = vmatpush1.bf16.msra.mxu0 %v10269_v56  ;;  %7206 = vmatpush1.bf16.msra.mxu1 %v10272_v39  ;;  %v10361_v56 = vld [vmem:[%s13611_s3 + $0x50] sm:$0xff]  }
 0x38c   :  { %6592 = vmatprep.subr.bf16.mxu0 %v10277_v58  ;;  %7207 = vmatprep.subr.bf16.mxu1 %v10280_v59  ;;  %v10362_v39 = vld [vmem:[%s13611_s3 + $0xd0] sm:$0xff]  }
 0x38d   :  { %v10363_v58 = vld [vmem:[%s13611_s3 + $0x10] sm:$0xff]  }
 0x38e   :  { %v10364_v59 = vld [vmem:[%s13611_s3 + $0x90] sm:$0xff]  }
 0x38f   :  { %6593 = vmatpush1.bf16.msra.mxu0 %v10275_v60  ;;  %7208 = vmatpush1.bf16.msra.mxu1 %v10278_v61  ;;  %v10365_v60 = vld [vmem:[%s13611_s3 + $0x58] sm:$0xff]  }
 0x390   :  { %6594 = vmatprep.subr.bf16.mxu0 %v10283_v63  ;;  %7209 = vmatprep.subr.bf16.mxu1 %v10286_v47  ;;  %v10366_v61 = vld [vmem:[%s13611_s3 + $0xd8] sm:$0xff]  }
 0x391   :  { %v10367_v63 = vld [vmem:[%s13611_s3 + $0x18] sm:$0xff]  }
 0x392   :  { %v10368_v47 = vld [vmem:[%s13611_s3 + $0x98] sm:$0xff]  }
 0x393   :  { %6595 = vmatpush1.bf16.msra.mxu0 %v10281_v0  ;;  %7210 = vmatpush1.bf16.msra.mxu1 %v10284_v1  ;;  %v10369_v0 = vld [vmem:[%s13611_s3 + $0x60] sm:$0xff]  }
 0x394   :  { %6596 = vmatprep.subr.bf16.mxu0 %v10289_v2  ;;  %7211 = vmatprep.subr.bf16.mxu1 %v10292_v3  ;;  %v10370_v1 = vld [vmem:[%s13611_s3 + $0xe0] sm:$0xff]  }
 0x395   :  { %v10371_v2 = vld [vmem:[%s13611_s3 + $0x20] sm:$0xff]  }
 0x396   :  { %v10372_v3 = vld [vmem:[%s13611_s3 + $0xa0] sm:$0xff]  }
 0x397   :  { %6597 = vmatpush1.bf16.msra.mxu0 %v10287_v4  ;;  %7212 = vmatpush1.bf16.msra.mxu1 %v10290_v57  ;;  %v10373_v4 = vld [vmem:[%s13611_s3 + $0x68] sm:$0xff]  }
 0x398   :  { %6598 = vmatprep.subr.bf16.mxu0 %v10295_v6  ;;  %7213 = vmatprep.subr.bf16.mxu1 %v10298_v55  ;;  %v10374_v57 = vld [vmem:[%s13611_s3 + $0xe8] sm:$0xff]  }
 0x399   :  { %v10375_v6 = vld [vmem:[%s13611_s3 + $0x28] sm:$0xff]  }
 0x39a   :  { %v10376_v55 = vld [vmem:[%s13611_s3 + $0xa8] sm:$0xff]  }
 0x39b   :  { %6599 = vmatpush1.bf16.msra.mxu0 %v10293_v8  ;;  %7214 = vmatpush1.bf16.msra.mxu1 %v10296_v10  ;;  %v10377_v8 = vld [vmem:[%s13611_s3 + $0x70] sm:$0xff]  }
 0x39c   :  { %6600 = vmatprep.subr.bf16.mxu0 %v10301_v11  ;;  %7215 = vmatprep.subr.bf16.mxu1 %v10304_v12  ;;  %v10378_v10 = vld [vmem:[%s13611_s3 + $0xf0] sm:$0xff]  }
 0x39d   :  { %v10379_v11 = vld [vmem:[%s13611_s3 + $0x30] sm:$0xff]  }
 0x39e   :  { %v10380_v12 = vld [vmem:[%s13611_s3 + $0xb0] sm:$0xff]  }
 0x39f   :  { %6601 = vmatpush1.bf16.msra.mxu0 %v10299_v14  ;;  %7216 = vmatpush1.bf16.msra.mxu1 %v10302_v62  ;;  %v10381_v14 = vld [vmem:[%s13611_s3 + $0x78] sm:$0xff]  }
 0x3a0   :  { %6602 = vmatprep.subr.bf16.mxu0 %v10307_v15  ;;  %7217 = vmatprep.subr.bf16.mxu1 %v10310_v16  ;;  %v10382_v62 = vld [vmem:[%s13611_s3 + $0xf8] sm:$0xff]  }
 0x3a1   :  { %v10383_v15 = vld [vmem:[%s13611_s3 + $0x38] sm:$0xff]  }
 0x3a2   :  { %v10384_v16 = vld [vmem:[%s13611_s3 + $0xb8] sm:$0xff]  }
 0x3a3   :  { %6603 = vmatpush1.bf16.msra.mxu0 %v10305_v17  ;;  %7218 = vmatpush1.bf16.msra.mxu1 %v10308_v18  ;;  %v10394_v17 = vmov 0.0   ;;  %v1194_v18 = vsub.s32 0, %v10553_v43 }
 0x3a4   :  { %6604 = vmatprep.subr.bf16.mxu0 %v10313_v19  ;;  %7219 = vmatprep.subr.bf16.mxu1 %v10316_v7  ;;  %v1202_v19 = vsub.s32 2, %v10553_v43  ;;  %v1190_v7 = vld [vmem:[%s13613_s2] sm:$0xf] }
 0x3a7   :  { %6605 = vmatpush1.bf16.msra.mxu0 %v10311_v21  ;;  %7220 = vmatpush1.bf16.msra.mxu1 %v10314_v5  ;;  %v1198_v21 = vsub.s32 1, %v10553_v43  ;;  %v1206_v5 = vsub.s32 3, %v10553_v43 }
 0x3a8   :  { %6606 = vmatprep.subr.bf16.mxu0 %v10319_v23  ;;  %7221 = vmatprep.subr.bf16.mxu1 %v10322_v9  ;;  %v1195_v23 = vrot.slane %v1190_v7, %v1194_v18  ;;  %v1203_v9 = vrot.slane %v1190_v7, %v1202_v19 }
 0x3ab   :  { %6607 = vmatpush1.bf16.msra.mxu0 %v10317_v26  ;;  %7222 = vmatpush1.bf16.msra.mxu1 %v10320_v27  ;;  %v1199_v26 = vrot.slane %v1190_v7, %v1198_v21  ;;  %v1207_v27 = vrot.slane %v1190_v7, %v1206_v5 }
 0x3ac   :  { %6608 = vmatprep.subr.bf16.mxu0 %v10325_v30  ;;  %7223 = vmatprep.subr.bf16.mxu1 %v10328_v13 }
 0x3af   :  { %6609 = vmatpush1.bf16.msra.mxu0 %v10323_v31  ;;  %7224 = vmatpush1.bf16.msra.mxu1 %v10326_v33 }
 0x3b0   :  { %6610 = vmatprep.subr.bf16.mxu0 %v10331_v25  ;;  %7225 = vmatprep.subr.bf16.mxu1 %v10334_v34 }
 0x3b3   :  { %6611 = vmatpush1.bf16.msra.mxu0 %v10329_v35  ;;  %7226 = vmatpush1.bf16.msra.mxu1 %v10332_v22 }
 0x3b4   :  { %6612 = vmatprep.subr.bf16.mxu0 %v10337_v37  ;;  %7227 = vmatprep.subr.bf16.mxu1 %v10340_v20 }
 0x3b7   :  { %6613 = vmatpush1.bf16.msra.mxu0 %v10335_v38  ;;  %7228 = vmatpush1.bf16.msra.mxu1 %v10338_v49 }
 0x3b8   :  { %6614 = vmatprep.subr.bf16.mxu0 %v10343_v28  ;;  %7229 = vmatprep.subr.bf16.mxu1 %v10346_v41 }
 0x3bb   :  { %6615 = vmatpush1.bf16.msra.mxu0 %v10341_v24  ;;  %7230 = vmatpush1.bf16.msra.mxu1 %v10344_v44 }
 0x3bc   :  { %6616 = vmatprep.subr.bf16.mxu0 %v10349_v29  ;;  %7231 = vmatprep.subr.bf16.mxu1 %v10352_v45  ;;  %v10385_v45 = vld [vmem:[%s13612_s5] sm:$0xff]  }
 0x3bf   :  { %6617 = vmatpush1.bf16.msra.mxu0 %v10347_v46  ;;  %7232 = vmatpush1.bf16.msra.mxu1 %v10350_v48 }
 0x3c0   :  { %8714 = vmatprep.subr.bf16.mxu0 %v10353_v32  ;;  %8736 = vmatprep.subr.bf16.mxu1 %v10354_v50  ;;  %v10386_v32 = vld [vmem:[%s13612_s5 + $0x8] sm:$0xff]   ;;  %v10387_v50 = vld [vmem:[%s13612_s5 + $0x10] sm:$0xff]  }
 0x3c2   :  { %6619 = vmatmul.mubr.bf16.vlgmr.msra.gmra.mrb[0].mxu0 %v228_v36  ;;  %7234 = vmatmul.mubr.bf16.vlgmr.msra.gmra.mrb[0].mxu1 %v228_v36  ;;  %v10388_v36 = vld [vmem:[%s13612_s5 + $0x18] sm:$0xff]  }
 0x3c3   :  { %8715 = vmatpush3.bf16.msra.mxu0 %v10355_v51  ;;  %8737 = vmatpush3.bf16.msra.mxu1 %v10356_v52  ;;  %v10389_v51 = vld [vmem:[%s13612_s5 + $0x20] sm:$0xff]   ;;  %v10390_v52 = vld [vmem:[%s13612_s5 + $0x28] sm:$0xff]  }
 0x3c4   :  { %8716 = vmatprep.subr.bf16.mxu0 %v10357_v53  ;;  %8738 = vmatprep.subr.bf16.mxu1 %v10358_v40  ;;  %v10391_v53 = vld [vmem:[%s13612_s5 + $0x30] sm:$0xff]   ;;  %v10392_v40 = vld [vmem:[%s13612_s5 + $0x38] sm:$0xff]  }
 0x3c7   :  { %8717 = vmatpush3.bf16.msra.mxu0 %v10359_v54  ;;  %8739 = vmatpush3.bf16.msra.mxu1 %v10360_v42 }
 0x3c8   :  { %8718 = vmatprep.subr.bf16.mxu0 %v10361_v56  ;;  %8740 = vmatprep.subr.bf16.mxu1 %v10362_v39  ;;  %v8672_v56 = vld [vmem:[%s13614_s4] ss:$0 sm:$0xff] }
 0x3cb   :  { %8719 = vmatpush3.bf16.msra.mxu0 %v10363_v58  ;;  %8741 = vmatpush3.bf16.msra.mxu1 %v10364_v59 }
 0x3cc   :  { %8720 = vmatprep.subr.bf16.mxu0 %v10365_v60  ;;  %8742 = vmatprep.subr.bf16.mxu1 %v10366_v61 }
 0x3cf   :  { %8721 = vmatpush3.bf16.msra.mxu0 %v10367_v63  ;;  %8743 = vmatpush3.bf16.msra.mxu1 %v10368_v47 }
 0x3d0   :  { %8722 = vmatprep.subr.bf16.mxu0 %v10369_v0  ;;  %8744 = vmatprep.subr.bf16.mxu1 %v10370_v1 }
 0x3d3   :  { %8723 = vmatpush3.bf16.msra.mxu0 %v10371_v2  ;;  %8745 = vmatpush3.bf16.msra.mxu1 %v10372_v3 }
 0x3d4   :  { %8724 = vmatprep.subr.bf16.mxu0 %v10373_v4  ;;  %8746 = vmatprep.subr.bf16.mxu1 %v10374_v57  ;;  %v8705_v57 = vld [vmem:[%s13615_s6] ss:$0 sm:$0xff] }
 0x3d7   :  { %8725 = vmatpush3.bf16.msra.mxu0 %v10375_v6  ;;  %8747 = vmatpush3.bf16.msra.mxu1 %v10376_v55 }
 0x3d8   :  { %8726 = vmatprep.subr.bf16.mxu0 %v10377_v8  ;;  %8748 = vmatprep.subr.bf16.mxu1 %v10378_v10 }
 0x3db   :  { %8727 = vmatpush3.bf16.msra.mxu0 %v10379_v11  ;;  %8749 = vmatpush3.bf16.msra.mxu1 %v10380_v12 }
 0x3dc   :  { %8728 = vmatprep.subr.bf16.mxu0 %v10381_v14  ;;  %8750 = vmatprep.subr.bf16.mxu1 %v10382_v62 }
 0x3df   :  { %8729 = vmatpush3.bf16.msra.mxu0 %v10383_v15  ;;  %8751 = vmatpush3.bf16.msra.mxu1 %v10384_v16 }
 0x3e0   :  { %8767 = vmatprep.subr.bf16.mxu0 %v10394_v17 }
 0x495   :  { %v6620_v30 = vpop.f32.mrb[0].mxu0  ;;  %v7235_v13 = vpop.f32.mrb[0].mxu1 }
 0x496   :  { %v8787_v31 = vadd.f32 %v6620_v30, %v1195_v23  ;;  %v8789_v33 = vadd.f32 %v7235_v13, %v1203_v9  ;;  %v6622_v25 = vpop.f32.mrb[1].mxu0  ;;  %v7237_v34 = vpop.f32.mrb[1].mxu1 }
 0x497   :  { %v8788_v35 = vadd.f32 %v6622_v25, %v1199_v26  ;;  %v8790_v22 = vadd.f32 %v7237_v34, %v1207_v27  ;;  %v6624_v37 = vpop.f32.mrb[2].mxu0  ;;  %v7239_v20 = vpop.f32.mrb[2].mxu1 }
 0x498   :  { %v7242_v38 = vmax.f32 %v8787_v31, 0.0  ;;  %v7244_v49 = vmax.f32 %v8789_v33, 0.0  ;;  %v6625_v28 = vpop.f32.mrb[3].mxu0  ;;  %v7240_v41 = vpop.f32.mrb[3].mxu1 }
 0x499   :  { %v7243_v24 = vmax.f32 %v8788_v35, 0.0  ;;  %v7245_v43 = vmax.f32 %v8790_v22, 0.0 }
 0x49a   :  { %v7246_v46 = vpack.c.bf16 %v7242_v38, %v7242_v38  ;;  %v7248_v48 = vpack.c.bf16 %v7244_v49, %v7244_v49 }
 0x49b   :  { %v7247_v44 = vpack.c.bf16 %v7243_v24, %v7243_v24  ;;  %v7249_v29 = vpack.c.bf16 %v7245_v43, %v7245_v43 }
 0x49d   :  { %7545 = vmatprep.mubr.bf16.mxu0 %v7247_v44  ;;  %7585 = vmatprep.mubr.bf16.mxu1 %v7249_v29 }
 0x49e   :  { %7546 = vmatmul.mubr.bf16.vlgmr.msra.gmra.mrb[4].mxu0 %v7246_v46  ;;  %7586 = vmatmul.mubr.bf16.vlgmr.msra.gmra.mrb[4].mxu1 %v7248_v48 }
 0x49f   :  { %8768 = vmatpush3.bf16.msra.mxu0 %v10385_v45  ;;  %8783 = vmatprep.mubr.msk.bf16.mxu0 %vm10395_vm0, %v10394_v17 }
 0x4a0   :  { %8769 = vmatprep.subr.bf16.mxu0 %v10394_v17 }
 0x4a3   :  { %8770 = vmatpush3.bf16.msra.mxu0 %v10386_v32 }
 0x4a4   :  { %8771 = vmatprep.subr.bf16.mxu0 %v10394_v17 }
 0x4a7   :  { %8772 = vmatpush3.bf16.msra.mxu0 %v10387_v50 }
 0x4a8   :  { %8773 = vmatprep.subr.bf16.mxu0 %v10394_v17 }
 0x4ab   :  { %8774 = vmatpush3.bf16.msra.mxu0 %v10388_v36 }
 0x4ac   :  { %8775 = vmatprep.subr.bf16.mxu0 %v10394_v17 }
 0x4af   :  { %8776 = vmatpush3.bf16.msra.mxu0 %v10389_v51 }
 0x4b0   :  { %8777 = vmatprep.subr.bf16.mxu0 %v10394_v17 }
 0x4b3   :  { %8778 = vmatpush3.bf16.msra.mxu0 %v10390_v52 }
 0x4b4   :  { %8779 = vmatprep.subr.bf16.mxu0 %v10394_v17 }
 0x4b7   :  { %8780 = vmatpush3.bf16.msra.mxu0 %v10391_v53 }
 0x4b8   :  { %8781 = vmatprep.subr.bf16.mxu0 %v10394_v17 }
 0x4bb   :  { %8782 = vmatpush3.bf16.msra.mxu0 %v10392_v40 }
 0x571   :  { %v8730_v54 = vpop.f32.mrb[4].mxu0  ;;  %v8752_v42 = vpop.f32.mrb[4].mxu1 }
 0x572   :  { %v8731_v39 = vpop.f32.mrb[5].mxu0  ;;  %v8753_v58 = vpop.f32.mrb[5].mxu1 }
 0x573   :  { %v8732_v59 = vadd.f32 %v8731_v39, %v8730_v54  ;;  %v8754_v60 = vadd.f32 %v8753_v58, %v8752_v42  ;;  %v8733_v61 = vpop.f32.mrb[6].mxu0  ;;  %v8755_v63 = vpop.f32.mrb[6].mxu1 }
 0x574   :  { %v8734_v47 = vpop.f32.mrb[7].mxu0  ;;  %v8756_v0 = vpop.f32.mrb[7].mxu1 }
 0x575   :  { %v7548_v1 = vadd.f32 %v8732_v59, %v8672_v56 }
 0x577   :  { %v7588_v2 = vadd.f32 %v8754_v60, %v7548_v1 }
 0x579   :  { %v7593_v3 = vmax.f32 %v7588_v2, 0.0 }
 0x57b   :  { %v7594_v4 = vpack.c.bf16 %v7593_v3, %v7593_v3 }
 0x57d   :  { %8784 = vmatmul.mubr.bf16.vlgmr.msra.gmra.mrb[8].mxu0 %v7594_v4 }
 0x650   :  { %v7700_v6 = vpop.f32.mrb[8].mxu0 }
 0x651   :  { %v7701_v55 = vadd.f32 %v8705_v57, %v7700_v6  ;;  %v8785_v8 = vpop.f32.mrb[9].mxu0 }
 0x652   :  { %v7703_v10 = vpop.f32.mrb[10].mxu0 }
 0x653   :  { %7706 = vst [vmem:[%s13616_s7] sm:$0x3] %v7701_v55  ;;  %v8786_v11 = vpop.f32.mrb[11].mxu0 }

</bundles_post_ra>
